<compile_context>
chip_gen: v5e
topology: v5e:2x2
jax: 0.10.0
libtpu: 0.0.40
codegen_flags: <defaults>
</compile_context>

<pallas_src>
import math
from functools import partial

import jax
import jax.numpy as jnp
from jax import lax
from jax.experimental import pallas as pl
from jax.experimental.pallas import tpu as pltpu

NEG = -1e9
LN_EPS = 1e-5
LANE = 128
VMEM_LIMIT = 32 * 1024 * 1024


def _round_up(n, m):
    return ((n + m - 1) // m) * m


# --------------------------- in-kernel helpers ------------------------------
def _layernorm(x, g, beta, d_real):
    # Padding-aware LayerNorm: padded feature lanes of `x` are exactly zero,
    # so raw sums equal sums over the real features; normalize by d_real.
    inv_n = 1.0 / float(d_real)
    mu = jnp.sum(x, axis=-1, keepdims=True) * inv_n
    ex2 = jnp.sum(x * x, axis=-1, keepdims=True) * inv_n
    var = ex2 - mu * mu
    return (x - mu) * lax.rsqrt(var + LN_EPS) * g + beta


def _attn_ln(o_scr, xq, xkv, bias, wq, bq, wk, bk, wv, bv, wo, bo, g, beta,
             *, H, Dh, d_real, scale):
    """LN(xq + MHA(xq, xkv)). Weights already bf16; scores/LN math in f32."""
    xqb = xq.astype(jnp.bfloat16)
    xkb = xkv.astype(jnp.bfloat16)
    # Fold the 1/sqrt(Dh) score scale into q once (not per-head on [Sq,Sk]).
    q = (jnp.dot(xqb, wq, preferred_element_type=jnp.float32) + bq) * scale
    k = jnp.dot(xkb, wk, preferred_element_type=jnp.float32) + bk
    v = jnp.dot(xkb, wv, preferred_element_type=jnp.float32) + bv
    qb = q.astype(jnp.bfloat16)
    kb = k.astype(jnp.bfloat16)
    vb = v.astype(jnp.bfloat16)

    # Head outputs land in a VMEM scratch lane-slab; padded lanes stay zero so
    # one full [Sq,Dp]@[Dp,Dp] projection after the loop is exact.
    o_scr[...] = jnp.zeros_like(o_scr)

    # TODO(synk): convert to lax.fori_loop(unroll=True) / flash-style KV tiling
    # once H or the sequence length grows (bounds vreg live ranges).
    for h in range(H):
        sl = slice(h * Dh, (h + 1) * Dh)
        # q_h @ k_h^T without materializing a transposed copy.
        s = lax.dot_general(qb[:, sl], kb[:, sl], (((1,), (1,)), ((), ())),
                            preferred_element_type=jnp.float32)   # [Sq,Sk] f32
        s = s + bias                                   # hoisted combined bias
        s = s - jnp.max(s, axis=-1, keepdims=True)
        e = jnp.exp(s)
        p = e * pl.reciprocal(jnp.sum(e, axis=-1, keepdims=True), approx=True)
        o_scr[:, sl] = jnp.dot(p.astype(jnp.bfloat16), vb[:, sl],
                               preferred_element_type=jnp.float32)

    h_attn = jnp.dot(o_scr[...].astype(jnp.bfloat16), wo,
                     preferred_element_type=jnp.float32) + bo + xq
    return _layernorm(h_attn, g, beta, d_real)


def _ffn_ln(x, w1, b1, w2, b2, g, beta, *, d_real):
    a = jnp.dot(x.astype(jnp.bfloat16), w1,
                preferred_element_type=jnp.float32) + b1
    a = jnp.maximum(a, 0.0)
    f = jnp.dot(a.astype(jnp.bfloat16), w2,
                preferred_element_type=jnp.float32) + b2
    return _layernorm(f + x, g, beta, d_real)


# --------------------------- fused layer kernels -----------------------------
def _encoder_layer_kernel(x_ref, kmask_ref,
                          wq, bq, wk, bk, wv, bv, wo, bo, g1, be1,
                          w1, b1, w2, b2, g2, be2,
                          o_ref, attn_scr, *, H, Dh, d_real, scale):
    x = x_ref[0]                                           # [S, Dp] f32
    bias = (1.0 - kmask_ref[0]) * NEG                      # [1, S] key-pad bias
    h1 = _attn_ln(attn_scr, x, x, bias,
                  wq[...], bq[...], wk[...], bk[...], wv[...], bv[...],
                  wo[...], bo[...], g1[...], be1[...],
                  H=H, Dh=Dh, d_real=d_real, scale=scale)
    o_ref[0] = _ffn_ln(h1, w1[...], b1[...], w2[...], b2[...],
                       g2[...], be2[...], d_real=d_real)


def _decoder_layer_kernel(x_ref, tmask_ref, enc_ref, imask_ref,
                          swq, sbq, swk, sbk, swv, sbv, swo, sbo, sg, sbe,
                          cwq, cbq, cwk, cbk, cwv, cbv, cwo, cbo, cg, cbe,
                          w1, b1, w2, b2, g2, be2,
                          o_ref, attn_scr, *, H, Dh, d_real, scale):
    x = x_ref[0]                                           # [Sd, Dp]
    enc = enc_ref[0]                                       # [Se, Dp]
    Sd = x.shape[0]

    # Combined causal + target-padding bias, built once (keep scores in f32).
    row = lax.broadcasted_iota(jnp.int32, (Sd, Sd), 0)
    col = lax.broadcasted_iota(jnp.int32, (Sd, Sd), 1)
    self_bias = ((1.0 - tmask_ref[0]) * NEG
                 + jnp.where(col <= row, 0.0, NEG))        # [Sd, Sd]
    cross_bias = (1.0 - imask_ref[0]) * NEG                # [1, Se]

    h1 = _attn_ln(attn_scr, x, x, self_bias,
                  swq[...], sbq[...], swk[...], sbk[...], swv[...], sbv[...],
                  swo[...], sbo[...], sg[...], sbe[...],
                  H=H, Dh=Dh, d_real=d_real, scale=scale)
    h2 = _attn_ln(attn_scr, h1, enc, cross_bias,
                  cwq[...], cbq[...], cwk[...], cbk[...], cwv[...], cbv[...],
                  cwo[...], cbo[...], cg[...], cbe[...],
                  H=H, Dh=Dh, d_real=d_real, scale=scale)
    o_ref[0] = _ffn_ln(h2, w1[...], b1[...], w2[...], b2[...],
                       g2[...], be2[...], d_real=d_real)


def _linear_kernel(x_ref, w_ref, b_ref, o_ref):
    o_ref[...] = jnp.dot(x_ref[...].astype(jnp.bfloat16), w_ref[...],
                         preferred_element_type=jnp.float32) + b_ref[...]


# --------------------------- pallas_call wrappers ----------------------------
def _rep(shape):
    n = len(shape)
    return pl.BlockSpec(shape, lambda i, _n=n: (0,) * _n)


def _attn_specs(Dp):
    w, v = _rep((Dp, Dp)), _rep((1, Dp))
    return [w, v, w, v, w, v, w, v, v, v]    # wq bq wk bk wv bv wo bo g beta


def _ffn_specs(Dp, Fp):
    return [_rep((Dp, Fp)), _rep((1, Fp)), _rep((Fp, Dp)), _rep((1, Dp)),
            _rep((1, Dp)), _rep((1, Dp))]


def _attn_args(a):
    return [a["wq"], a["bq"], a["wk"], a["bk"], a["wv"], a["bv"],
            a["wo"], a["bo"], a["ln_g"], a["ln_b"]]


def _ffn_args(f):
    return [f["w1"], f["b1"], f["w2"], f["b2"], f["ln_g"], f["ln_b"]]


def encoder_layer(x, imask3, p, *, H, Dh, d_real, scale):
    B, S, Dp = x.shape
    Fp = p["ffn"]["w1"].shape[1]
    return pl.pallas_call(
        partial(_encoder_layer_kernel, H=H, Dh=Dh, d_real=d_real, scale=scale),
        out_shape=jax.ShapeDtypeStruct((B, S, Dp), jnp.float32),
        grid=(B,),
        in_specs=[pl.BlockSpec((1, S, Dp), lambda b: (b, 0, 0)),
                  pl.BlockSpec((1, 1, S), lambda b: (b, 0, 0))]
                 + _attn_specs(Dp) + _ffn_specs(Dp, Fp),
        out_specs=pl.BlockSpec((1, S, Dp), lambda b: (b, 0, 0)),
        scratch_shapes=[pltpu.VMEM((S, Dp), jnp.float32)],
        compiler_params=pltpu.CompilerParams(
            dimension_semantics=("parallel",),
            vmem_limit_bytes=VMEM_LIMIT),
    )(x, imask3, *_attn_args(p["attn"]), *_ffn_args(p["ffn"]))


def decoder_layer(x, tmask3, enc, imask3, p, *, H, Dh, d_real, scale):
    B, Sd, Dp = x.shape
    Se = enc.shape[1]
    Fp = p["ffn"]["w1"].shape[1]
    return pl.pallas_call(
        partial(_decoder_layer_kernel, H=H, Dh=Dh, d_real=d_real, scale=scale),
        out_shape=jax.ShapeDtypeStruct((B, Sd, Dp), jnp.float32),
        grid=(B,),
        in_specs=[pl.BlockSpec((1, Sd, Dp), lambda b: (b, 0, 0)),
                  pl.BlockSpec((1, 1, Sd), lambda b: (b, 0, 0)),
                  pl.BlockSpec((1, Se, Dp), lambda b: (b, 0, 0)),
                  pl.BlockSpec((1, 1, Se), lambda b: (b, 0, 0))]
                 + _attn_specs(Dp) + _attn_specs(Dp) + _ffn_specs(Dp, Fp),
        out_specs=pl.BlockSpec((1, Sd, Dp), lambda b: (b, 0, 0)),
        scratch_shapes=[pltpu.VMEM((Sd, Dp), jnp.float32)],
        compiler_params=pltpu.CompilerParams(
            dimension_semantics=("parallel",),
            vmem_limit_bytes=VMEM_LIMIT),
    )(x, tmask3, enc, imask3,
      *_attn_args(p["self_attn"]), *_attn_args(p["cross_attn"]),
      *_ffn_args(p["ffn"]))


def linear_rows(x2d, w, b):
    M, K = x2d.shape
    N = w.shape[1]
    tm = M // 2 if M % 16 == 0 else M          # >=2 row blocks -> both v7x TCs
    return pl.pallas_call(
        _linear_kernel,
        out_shape=jax.ShapeDtypeStruct((M, N), jnp.float32),
        grid=(M // tm,),
        in_specs=[pl.BlockSpec((tm, K), lambda i: (i, 0)),
                  _rep((K, N)), _rep((1, N))],
        out_specs=pl.BlockSpec((tm, N), lambda i: (i, 0)),
        compiler_params=pltpu.CompilerParams(
            dimension_semantics=("parallel",),
            vmem_limit_bytes=VMEM_LIMIT),
    )(x2d, w, b)


# --------------------------------- model ------------------------------------
def transformer_forward(params, input_x, input_mask, target_x, target_mask,
                        *, H, d_real, out_dim):
    Dp = params["w_out"].shape[0]
    B, Se, D = input_x.shape
    Sd = target_x.shape[1]
    Dh = d_real // H
    scale = 1.0 / math.sqrt(Dh)
    pad = Dp - D

    enc = jnp.pad(input_x, ((0, 0), (0, 0), (0, pad)))      # lane-dense slabs
    dec = jnp.pad(target_x, ((0, 0), (0, 0), (0, pad)))
    imask3 = input_mask.reshape(B, 1, Se).astype(jnp.float32)
    tmask3 = target_mask.reshape(B, 1, Sd).astype(jnp.float32)

    for p in params["encoder"]:
        enc = encoder_layer(enc, imask3, p, H=H, Dh=Dh, d_real=d_real,
                            scale=scale)
    x = dec
    for p in params["decoder"]:
        x = decoder_layer(x, tmask3, enc, imask3, p, H=H, Dh=Dh,
                          d_real=d_real, scale=scale)

    out = linear_rows(x.reshape(B * Sd, Dp), params["w_out"], params["b_out"])
    return out.reshape(B, Sd, -1)[:, :, :out_dim]


# --------------------------- deterministic params ---------------------------
def _dense_padded(key, din, dout, din_p, dout_p):
    w = jax.random.normal(key, (din, dout), jnp.float32) * (1.0 / math.sqrt(din))
    wp = jnp.zeros((din_p, dout_p), jnp.float32).at[:din, :dout].set(w)
    return wp.astype(jnp.bfloat16), jnp.zeros((1, dout_p), jnp.float32)


def _ln_padded(d, dp):
    g = jnp.zeros((1, dp), jnp.float32).at[:, :d].set(1.0)
    return g, jnp.zeros((1, dp), jnp.float32)


def init_params(key, D, F, out_dim, n_enc, n_dec):
    Dp, Fp, Op = _round_up(D, LANE), _round_up(F, LANE), _round_up(out_dim, LANE)
    keys = iter(jax.random.split(key, 1024))

    def attn_params():
        p = {}
        for name in ("q", "k", "v", "o"):
            p["w" + name], p["b" + name] = _dense_padded(next(keys), D, D, Dp, Dp)
        p["ln_g"], p["ln_b"] = _ln_padded(D, Dp)
        return p

    def ffn_params():
        d = {}
        d["w1"], d["b1"] = _dense_padded(next(keys), D, F, Dp, Fp)
        d["w2"], d["b2"] = _dense_padded(next(keys), F, D, Fp, Dp)
        d["ln_g"], d["ln_b"] = _ln_padded(D, Dp)
        return d

    enc_layers = [{"attn": attn_params(), "ffn": ffn_params()}
                  for _ in range(n_enc)]
    dec_layers = [{"self_attn": attn_params(), "cross_attn": attn_params(),
                   "ffn": ffn_params()} for _ in range(n_dec)]
    w_out, b_out = _dense_padded(next(keys), D, out_dim, Dp, Op)
    return {"encoder": enc_layers, "decoder": dec_layers,
            "w_out": w_out, "b_out": b_out}


# ---------------------------------- main ------------------------------------
if __name__ == "__main__":
    B, S_ENC, S_DEC = 2, 8, 8
    HIDDEN, HEADS, FF, OUT_DIM = 32, 4, 64, 16
    N_ENC_LAYERS, N_DEC_LAYERS = 2, 2

    key = jax.random.PRNGKey(0)
    k_p, k_x, k_t = jax.random.split(key, 3)

    params = init_params(k_p, HIDDEN, FF, OUT_DIM, N_ENC_LAYERS, N_DEC_LAYERS)
    input_x = jax.random.normal(k_x, (B, S_ENC, HIDDEN), jnp.float32)
    target_x = jax.random.normal(k_t, (B, S_DEC, HIDDEN), jnp.float32)
    input_mask = jnp.ones((B, S_ENC), jnp.float32)
    target_mask = jnp.ones((B, S_DEC), jnp.float32)

    fwd = jax.jit(partial(transformer_forward, H=HEADS, d_real=HIDDEN,
                          out_dim=OUT_DIM))
    out = fwd(params, input_x, input_mask, target_x, target_mask)
    out = jax.block_until_ready(out)

    assert out.shape == (B, S_DEC, OUT_DIM)
    assert bool(jnp.all(jnp.isfinite(out)))
    print("KERNEL_OK")
</pallas_src>

<mosaic_0001>
module attributes {stable_mosaic.version = 11 : i64} {
  func.func @_encoder_layer_kernel(%arg0: i32, %arg1: memref<1x8x128xf32, #tpu.memory_space<vmem>>, %arg2: memref<1x1x8xf32, #tpu.memory_space<vmem>>, %arg3: memref<128x128xbf16, #tpu.memory_space<vmem>>, %arg4: memref<1x128xf32, #tpu.memory_space<vmem>>, %arg5: memref<128x128xbf16, #tpu.memory_space<vmem>>, %arg6: memref<1x128xf32, #tpu.memory_space<vmem>>, %arg7: memref<128x128xbf16, #tpu.memory_space<vmem>>, %arg8: memref<1x128xf32, #tpu.memory_space<vmem>>, %arg9: memref<128x128xbf16, #tpu.memory_space<vmem>>, %arg10: memref<1x128xf32, #tpu.memory_space<vmem>>, %arg11: memref<1x128xf32, #tpu.memory_space<vmem>>, %arg12: memref<1x128xf32, #tpu.memory_space<vmem>>, %arg13: memref<128x128xbf16, #tpu.memory_space<vmem>>, %arg14: memref<1x128xf32, #tpu.memory_space<vmem>>, %arg15: memref<128x128xbf16, #tpu.memory_space<vmem>>, %arg16: memref<1x128xf32, #tpu.memory_space<vmem>>, %arg17: memref<1x128xf32, #tpu.memory_space<vmem>>, %arg18: memref<1x128xf32, #tpu.memory_space<vmem>>, %arg19: memref<1x8x128xf32, #tpu.memory_space<vmem>>, %arg20: memref<8x128xf32, #tpu.memory_space<vmem>>) attributes {dimension_semantics = [#tpu.dimension_semantics<parallel>], iteration_bounds = array<i64: 2>, scalar_prefetch = 0 : i64, scratch_operands = 1 : i64, tpu.core_type = #tpu.core_type<tc>, window_params = [{transform_indices = @transform_0, window_bounds = array<i64: 1, 8, 128>}, {transform_indices = @transform_1, window_bounds = array<i64: 1, 1, 8>}, {pipeline_mode = #tpu.pipeline_mode<synchronous>, transform_indices = @transform_2, window_bounds = array<i64: 128, 128>}, {pipeline_mode = #tpu.pipeline_mode<synchronous>, transform_indices = @transform_3, window_bounds = array<i64: 1, 128>}, {pipeline_mode = #tpu.pipeline_mode<synchronous>, transform_indices = @transform_4, window_bounds = array<i64: 128, 128>}, {pipeline_mode = #tpu.pipeline_mode<synchronous>, transform_indices = @transform_5, window_bounds = array<i64: 1, 128>}, {pipeline_mode = #tpu.pipeline_mode<synchronous>, transform_indices = @transform_6, window_bounds = array<i64: 128, 128>}, {pipeline_mode = #tpu.pipeline_mode<synchronous>, transform_indices = @transform_7, window_bounds = array<i64: 1, 128>}, {pipeline_mode = #tpu.pipeline_mode<synchronous>, transform_indices = @transform_8, window_bounds = array<i64: 128, 128>}, {pipeline_mode = #tpu.pipeline_mode<synchronous>, transform_indices = @transform_9, window_bounds = array<i64: 1, 128>}, {pipeline_mode = #tpu.pipeline_mode<synchronous>, transform_indices = @transform_10, window_bounds = array<i64: 1, 128>}, {pipeline_mode = #tpu.pipeline_mode<synchronous>, transform_indices = @transform_11, window_bounds = array<i64: 1, 128>}, {pipeline_mode = #tpu.pipeline_mode<synchronous>, transform_indices = @transform_12, window_bounds = array<i64: 128, 128>}, {pipeline_mode = #tpu.pipeline_mode<synchronous>, transform_indices = @transform_13, window_bounds = array<i64: 1, 128>}, {pipeline_mode = #tpu.pipeline_mode<synchronous>, transform_indices = @transform_14, window_bounds = array<i64: 128, 128>}, {pipeline_mode = #tpu.pipeline_mode<synchronous>, transform_indices = @transform_15, window_bounds = array<i64: 1, 128>}, {pipeline_mode = #tpu.pipeline_mode<synchronous>, transform_indices = @transform_16, window_bounds = array<i64: 1, 128>}, {pipeline_mode = #tpu.pipeline_mode<synchronous>, transform_indices = @transform_17, window_bounds = array<i64: 1, 128>}, {transform_indices = @transform_18, window_bounds = array<i64: 1, 8, 128>}]} {
    %c0 = arith.constant 0 : index
    %c0_0 = arith.constant 0 : index
    %c0_1 = arith.constant 0 : index
    %0 = vector.load %arg1[%c0, %c0_0, %c0_1] : memref<1x8x128xf32, #tpu.memory_space<vmem>>, vector<1x8x128xf32>
    %1 = vector.shape_cast %0 : vector<1x8x128xf32> to vector<8x128xf32>
    %c0_2 = arith.constant 0 : index
    %c0_3 = arith.constant 0 : index
    %c0_4 = arith.constant 0 : index
    %2 = vector.load %arg2[%c0_2, %c0_3, %c0_4] : memref<1x1x8xf32, #tpu.memory_space<vmem>>, vector<1x1x8xf32>
    %3 = vector.shape_cast %2 : vector<1x1x8xf32> to vector<1x8xf32>
    %cst = arith.constant 1.000000e+00 : f32
    %4 = vector.broadcast %cst : f32 to vector<1x8xf32>
    %5 = arith.subf %4, %3 : vector<1x8xf32>
    %cst_5 = arith.constant -1.000000e+09 : f32
    %6 = vector.broadcast %cst_5 : f32 to vector<1x8xf32>
    %7 = arith.mulf %5, %6 : vector<1x8xf32>
    %c0_6 = arith.constant 0 : index
    %c0_7 = arith.constant 0 : index
    %8 = vector.load %arg3[%c0_6, %c0_7] : memref<128x128xbf16, #tpu.memory_space<vmem>>, vector<128x128xbf16>
    %c0_8 = arith.constant 0 : index
    %c0_9 = arith.constant 0 : index
    %9 = vector.load %arg4[%c0_8, %c0_9] : memref<1x128xf32, #tpu.memory_space<vmem>>, vector<1x128xf32>
    %c0_10 = arith.constant 0 : index
    %c0_11 = arith.constant 0 : index
    %10 = vector.load %arg5[%c0_10, %c0_11] : memref<128x128xbf16, #tpu.memory_space<vmem>>, vector<128x128xbf16>
    %c0_12 = arith.constant 0 : index
    %c0_13 = arith.constant 0 : index
    %11 = vector.load %arg6[%c0_12, %c0_13] : memref<1x128xf32, #tpu.memory_space<vmem>>, vector<1x128xf32>
    %c0_14 = arith.constant 0 : index
    %c0_15 = arith.constant 0 : index
    %12 = vector.load %arg7[%c0_14, %c0_15] : memref<128x128xbf16, #tpu.memory_space<vmem>>, vector<128x128xbf16>
    %c0_16 = arith.constant 0 : index
    %c0_17 = arith.constant 0 : index
    %13 = vector.load %arg8[%c0_16, %c0_17] : memref<1x128xf32, #tpu.memory_space<vmem>>, vector<1x128xf32>
    %c0_18 = arith.constant 0 : index
    %c0_19 = arith.constant 0 : index
    %14 = vector.load %arg9[%c0_18, %c0_19] : memref<128x128xbf16, #tpu.memory_space<vmem>>, vector<128x128xbf16>
    %c0_20 = arith.constant 0 : index
    %c0_21 = arith.constant 0 : index
    %15 = vector.load %arg10[%c0_20, %c0_21] : memref<1x128xf32, #tpu.memory_space<vmem>>, vector<1x128xf32>
    %c0_22 = arith.constant 0 : index
    %c0_23 = arith.constant 0 : index
    %16 = vector.load %arg11[%c0_22, %c0_23] : memref<1x128xf32, #tpu.memory_space<vmem>>, vector<1x128xf32>
    %c0_24 = arith.constant 0 : index
    %c0_25 = arith.constant 0 : index
    %17 = vector.load %arg12[%c0_24, %c0_25] : memref<1x128xf32, #tpu.memory_space<vmem>>, vector<1x128xf32>
    %18 = arith.truncf %1 : vector<8x128xf32> to vector<8x128xbf16>
    %19 = arith.truncf %1 : vector<8x128xf32> to vector<8x128xbf16>
    %cst_26 = arith.constant dense<0.000000e+00> : vector<8x128xf32>
    %20 = tpu.matmul %18, %8, %cst_26 {dimension_numbers = #tpu.dot_dimension_numbers<[1], [0], [0], [1], [0, 0, 1, 1], [], []>} : vector<8x128xbf16>, vector<128x128xbf16>, vector<8x128xf32> -> vector<8x128xf32>
    %21 = vector.broadcast %9 : vector<1x128xf32> to vector<8x128xf32>
    %22 = arith.addf %20, %21 : vector<8x128xf32>
    %cst_27 = arith.constant 0.353553385 : f32
    %23 = vector.broadcast %cst_27 : f32 to vector<8x128xf32>
    %24 = arith.mulf %22, %23 : vector<8x128xf32>
    %cst_28 = arith.constant dense<0.000000e+00> : vector<8x128xf32>
    %25 = tpu.matmul %19, %10, %cst_28 {dimension_numbers = #tpu.dot_dimension_numbers<[1], [0], [0], [1], [0, 0, 1, 1], [], []>} : vector<8x128xbf16>, vector<128x128xbf16>, vector<8x128xf32> -> vector<8x128xf32>
    %26 = vector.broadcast %11 : vector<1x128xf32> to vector<8x128xf32>
    %27 = arith.addf %25, %26 : vector<8x128xf32>
    %cst_29 = arith.constant dense<0.000000e+00> : vector<8x128xf32>
    %28 = tpu.matmul %19, %12, %cst_29 {dimension_numbers = #tpu.dot_dimension_numbers<[1], [0], [0], [1], [0, 0, 1, 1], [], []>} : vector<8x128xbf16>, vector<128x128xbf16>, vector<8x128xf32> -> vector<8x128xf32>
    %29 = vector.broadcast %13 : vector<1x128xf32> to vector<8x128xf32>
    %30 = arith.addf %28, %29 : vector<8x128xf32>
    %31 = arith.truncf %24 : vector<8x128xf32> to vector<8x128xbf16>
    %32 = arith.truncf %27 : vector<8x128xf32> to vector<8x128xbf16>
    %33 = arith.truncf %30 : vector<8x128xf32> to vector<8x128xbf16>
    %cst_30 = arith.constant 0.000000e+00 : f32
    %34 = vector.broadcast %cst_30 : f32 to vector<8x128xf32>
    %c0_31 = arith.constant 0 : index
    %c0_32 = arith.constant 0 : index
    %35 = vector.load %arg20[%c0_31, %c0_32] : memref<8x128xf32, #tpu.memory_space<vmem>>, vector<8x128xf32>
    tpu.vector_store %arg20[%c0_31, %c0_32], %34 {strides = array<i32>} : memref<8x128xf32, #tpu.memory_space<vmem>>, vector<8x128xf32>,
    %36 = vector.extract_strided_slice %31 {offsets = [0, 0], sizes = [8, 8], strides = [1, 1]} : vector<8x128xbf16> to vector<8x8xbf16>
    %37 = vector.extract_strided_slice %32 {offsets = [0, 0], sizes = [8, 8], strides = [1, 1]} : vector<8x128xbf16> to vector<8x8xbf16>
    %cst_33 = arith.constant dense<0.000000e+00> : vector<8x8xf32>
    %38 = tpu.matmul %36, %37, %cst_33 {dimension_numbers = #tpu.dot_dimension_numbers<[1], [1], [0], [0], [0, 0, 1, 0], [], []>} : vector<8x8xbf16>, vector<8x8xbf16>, vector<8x8xf32> -> vector<8x8xf32>
    %39 = vector.broadcast %7 : vector<1x8xf32> to vector<8x8xf32>
    %40 = arith.addf %38, %39 : vector<8x8xf32>
    %cst_34 = arith.constant dense<0xFF800000> : vector<8xf32>
    %41 = vector.multi_reduction <maximumf>, %40, %cst_34 [1] : vector<8x8xf32> to vector<8xf32>
    %42 = vector.shape_cast %41 : vector<8xf32> to vector<8x1xf32>
    %43 = vector.broadcast %42 : vector<8x1xf32> to vector<8x8xf32>
    %44 = arith.subf %40, %43 : vector<8x8xf32>
    %45 = math.exp %44 : vector<8x8xf32>
    %cst_35 = arith.constant dense<0.000000e+00> : vector<8xf32>
    %46 = vector.multi_reduction <add>, %45, %cst_35 [1] : vector<8x8xf32> to vector<8xf32>
    %47 = vector.shape_cast %46 : vector<8xf32> to vector<8x1xf32>
    %48 = tpu.reciprocal %47 {approx = true} : vector<8x1xf32> -> vector<8x1xf32>
    %49 = vector.broadcast %48 : vector<8x1xf32> to vector<8x8xf32>
    %50 = arith.mulf %45, %49 : vector<8x8xf32>
    %51 = arith.truncf %50 : vector<8x8xf32> to vector<8x8xbf16>
    %52 = vector.extract_strided_slice %33 {offsets = [0, 0], sizes = [8, 8], strides = [1, 1]} : vector<8x128xbf16> to vector<8x8xbf16>
    %cst_36 = arith.constant dense<0.000000e+00> : vector<8x8xf32>
    %53 = tpu.matmul %51, %52, %cst_36 {dimension_numbers = #tpu.dot_dimension_numbers<[1], [0], [0], [1], [0, 0, 1, 1], [], []>} : vector<8x8xbf16>, vector<8x8xbf16>, vector<8x8xf32> -> vector<8x8xf32>
    %c0_37 = arith.constant 0 : index
    %c0_38 = arith.constant 0 : index
    %54 = vector.load %arg20[%c0_37, %c0_38] : memref<8x128xf32, #tpu.memory_space<vmem>>, vector<8x8xf32>
    tpu.vector_store %arg20[%c0_37, %c0_38], %53 {strides = array<i32>} : memref<8x128xf32, #tpu.memory_space<vmem>>, vector<8x8xf32>,
    %55 = vector.extract_strided_slice %31 {offsets = [0, 8], sizes = [8, 8], strides = [1, 1]} : vector<8x128xbf16> to vector<8x8xbf16>
    %56 = vector.extract_strided_slice %32 {offsets = [0, 8], sizes = [8, 8], strides = [1, 1]} : vector<8x128xbf16> to vector<8x8xbf16>
    %cst_39 = arith.constant dense<0.000000e+00> : vector<8x8xf32>
    %57 = tpu.matmul %55, %56, %cst_39 {dimension_numbers = #tpu.dot_dimension_numbers<[1], [1], [0], [0], [0, 0, 1, 0], [], []>} : vector<8x8xbf16>, vector<8x8xbf16>, vector<8x8xf32> -> vector<8x8xf32>
    %58 = vector.broadcast %7 : vector<1x8xf32> to vector<8x8xf32>
    %59 = arith.addf %57, %58 : vector<8x8xf32>
    %cst_40 = arith.constant dense<0xFF800000> : vector<8xf32>
    %60 = vector.multi_reduction <maximumf>, %59, %cst_40 [1] : vector<8x8xf32> to vector<8xf32>
    %61 = vector.shape_cast %60 : vector<8xf32> to vector<8x1xf32>
    %62 = vector.broadcast %61 : vector<8x1xf32> to vector<8x8xf32>
    %63 = arith.subf %59, %62 : vector<8x8xf32>
    %64 = math.exp %63 : vector<8x8xf32>
    %cst_41 = arith.constant dense<0.000000e+00> : vector<8xf32>
    %65 = vector.multi_reduction <add>, %64, %cst_41 [1] : vector<8x8xf32> to vector<8xf32>
    %66 = vector.shape_cast %65 : vector<8xf32> to vector<8x1xf32>
    %67 = tpu.reciprocal %66 {approx = true} : vector<8x1xf32> -> vector<8x1xf32>
    %68 = vector.broadcast %67 : vector<8x1xf32> to vector<8x8xf32>
    %69 = arith.mulf %64, %68 : vector<8x8xf32>
    %70 = arith.truncf %69 : vector<8x8xf32> to vector<8x8xbf16>
    %71 = vector.extract_strided_slice %33 {offsets = [0, 8], sizes = [8, 8], strides = [1, 1]} : vector<8x128xbf16> to vector<8x8xbf16>
    %cst_42 = arith.constant dense<0.000000e+00> : vector<8x8xf32>
    %72 = tpu.matmul %70, %71, %cst_42 {dimension_numbers = #tpu.dot_dimension_numbers<[1], [0], [0], [1], [0, 0, 1, 1], [], []>} : vector<8x8xbf16>, vector<8x8xbf16>, vector<8x8xf32> -> vector<8x8xf32>
    %c0_43 = arith.constant 0 : index
    %c8 = arith.constant 8 : index
    %73 = vector.load %arg20[%c0_43, %c8] : memref<8x128xf32, #tpu.memory_space<vmem>>, vector<8x8xf32>
    tpu.vector_store %arg20[%c0_43, %c8], %72 {strides = array<i32>} : memref<8x128xf32, #tpu.memory_space<vmem>>, vector<8x8xf32>,
    %74 = vector.extract_strided_slice %31 {offsets = [0, 16], sizes = [8, 8], strides = [1, 1]} : vector<8x128xbf16> to vector<8x8xbf16>
    %75 = vector.extract_strided_slice %32 {offsets = [0, 16], sizes = [8, 8], strides = [1, 1]} : vector<8x128xbf16> to vector<8x8xbf16>
    %cst_44 = arith.constant dense<0.000000e+00> : vector<8x8xf32>
    %76 = tpu.matmul %74, %75, %cst_44 {dimension_numbers = #tpu.dot_dimension_numbers<[1], [1], [0], [0], [0, 0, 1, 0], [], []>} : vector<8x8xbf16>, vector<8x8xbf16>, vector<8x8xf32> -> vector<8x8xf32>
    %77 = vector.broadcast %7 : vector<1x8xf32> to vector<8x8xf32>
    %78 = arith.addf %76, %77 : vector<8x8xf32>
    %cst_45 = arith.constant dense<0xFF800000> : vector<8xf32>
    %79 = vector.multi_reduction <maximumf>, %78, %cst_45 [1] : vector<8x8xf32> to vector<8xf32>
    %80 = vector.shape_cast %79 : vector<8xf32> to vector<8x1xf32>
    %81 = vector.broadcast %80 : vector<8x1xf32> to vector<8x8xf32>
    %82 = arith.subf %78, %81 : vector<8x8xf32>
    %83 = math.exp %82 : vector<8x8xf32>
    %cst_46 = arith.constant dense<0.000000e+00> : vector<8xf32>
    %84 = vector.multi_reduction <add>, %83, %cst_46 [1] : vector<8x8xf32> to vector<8xf32>
    %85 = vector.shape_cast %84 : vector<8xf32> to vector<8x1xf32>
    %86 = tpu.reciprocal %85 {approx = true} : vector<8x1xf32> -> vector<8x1xf32>
    %87 = vector.broadcast %86 : vector<8x1xf32> to vector<8x8xf32>
    %88 = arith.mulf %83, %87 : vector<8x8xf32>
    %89 = arith.truncf %88 : vector<8x8xf32> to vector<8x8xbf16>
    %90 = vector.extract_strided_slice %33 {offsets = [0, 16], sizes = [8, 8], strides = [1, 1]} : vector<8x128xbf16> to vector<8x8xbf16>
    %cst_47 = arith.constant dense<0.000000e+00> : vector<8x8xf32>
    %91 = tpu.matmul %89, %90, %cst_47 {dimension_numbers = #tpu.dot_dimension_numbers<[1], [0], [0], [1], [0, 0, 1, 1], [], []>} : vector<8x8xbf16>, vector<8x8xbf16>, vector<8x8xf32> -> vector<8x8xf32>
    %c0_48 = arith.constant 0 : index
    %c16 = arith.constant 16 : index
    %92 = vector.load %arg20[%c0_48, %c16] : memref<8x128xf32, #tpu.memory_space<vmem>>, vector<8x8xf32>
    tpu.vector_store %arg20[%c0_48, %c16], %91 {strides = array<i32>} : memref<8x128xf32, #tpu.memory_space<vmem>>, vector<8x8xf32>,
    %93 = vector.extract_strided_slice %31 {offsets = [0, 24], sizes = [8, 8], strides = [1, 1]} : vector<8x128xbf16> to vector<8x8xbf16>
    %94 = vector.extract_strided_slice %32 {offsets = [0, 24], sizes = [8, 8], strides = [1, 1]} : vector<8x128xbf16> to vector<8x8xbf16>
    %cst_49 = arith.constant dense<0.000000e+00> : vector<8x8xf32>
    %95 = tpu.matmul %93, %94, %cst_49 {dimension_numbers = #tpu.dot_dimension_numbers<[1], [1], [0], [0], [0, 0, 1, 0], [], []>} : vector<8x8xbf16>, vector<8x8xbf16>, vector<8x8xf32> -> vector<8x8xf32>
    %96 = vector.broadcast %7 : vector<1x8xf32> to vector<8x8xf32>
    %97 = arith.addf %95, %96 : vector<8x8xf32>
    %cst_50 = arith.constant dense<0xFF800000> : vector<8xf32>
    %98 = vector.multi_reduction <maximumf>, %97, %cst_50 [1] : vector<8x8xf32> to vector<8xf32>
    %99 = vector.shape_cast %98 : vector<8xf32> to vector<8x1xf32>
    %100 = vector.broadcast %99 : vector<8x1xf32> to vector<8x8xf32>
    %101 = arith.subf %97, %100 : vector<8x8xf32>
    %102 = math.exp %101 : vector<8x8xf32>
    %cst_51 = arith.constant dense<0.000000e+00> : vector<8xf32>
    %103 = vector.multi_reduction <add>, %102, %cst_51 [1] : vector<8x8xf32> to vector<8xf32>
    %104 = vector.shape_cast %103 : vector<8xf32> to vector<8x1xf32>
    %105 = tpu.reciprocal %104 {approx = true} : vector<8x1xf32> -> vector<8x1xf32>
    %106 = vector.broadcast %105 : vector<8x1xf32> to vector<8x8xf32>
    %107 = arith.mulf %102, %106 : vector<8x8xf32>
    %108 = arith.truncf %107 : vector<8x8xf32> to vector<8x8xbf16>
    %109 = vector.extract_strided_slice %33 {offsets = [0, 24], sizes = [8, 8], strides = [1, 1]} : vector<8x128xbf16> to vector<8x8xbf16>
    %cst_52 = arith.constant dense<0.000000e+00> : vector<8x8xf32>
    %110 = tpu.matmul %108, %109, %cst_52 {dimension_numbers = #tpu.dot_dimension_numbers<[1], [0], [0], [1], [0, 0, 1, 1], [], []>} : vector<8x8xbf16>, vector<8x8xbf16>, vector<8x8xf32> -> vector<8x8xf32>
    %c0_53 = arith.constant 0 : index
    %c24 = arith.constant 24 : index
    %111 = vector.load %arg20[%c0_53, %c24] : memref<8x128xf32, #tpu.memory_space<vmem>>, vector<8x8xf32>
    tpu.vector_store %arg20[%c0_53, %c24], %110 {strides = array<i32>} : memref<8x128xf32, #tpu.memory_space<vmem>>, vector<8x8xf32>,
    %c0_54 = arith.constant 0 : index
    %c0_55 = arith.constant 0 : index
    %112 = vector.load %arg20[%c0_54, %c0_55] : memref<8x128xf32, #tpu.memory_space<vmem>>, vector<8x128xf32>
    %113 = arith.truncf %112 : vector<8x128xf32> to vector<8x128xbf16>
    %cst_56 = arith.constant dense<0.000000e+00> : vector<8x128xf32>
    %114 = tpu.matmul %113, %14, %cst_56 {dimension_numbers = #tpu.dot_dimension_numbers<[1], [0], [0], [1], [0, 0, 1, 1], [], []>} : vector<8x128xbf16>, vector<128x128xbf16>, vector<8x128xf32> -> vector<8x128xf32>
    %115 = vector.broadcast %15 : vector<1x128xf32> to vector<8x128xf32>
    %116 = arith.addf %114, %115 : vector<8x128xf32>
    %117 = arith.addf %116, %1 : vector<8x128xf32>
    %cst_57 = arith.constant dense<0.000000e+00> : vector<8xf32>
    %118 = vector.multi_reduction <add>, %117, %cst_57 [1] : vector<8x128xf32> to vector<8xf32>
    %119 = vector.shape_cast %118 : vector<8xf32> to vector<8x1xf32>
    %cst_58 = arith.constant 3.125000e-02 : f32
    %120 = vector.broadcast %cst_58 : f32 to vector<8x1xf32>
    %121 = arith.mulf %119, %120 : vector<8x1xf32>
    %122 = arith.mulf %117, %117 : vector<8x128xf32>
    %cst_59 = arith.constant dense<0.000000e+00> : vector<8xf32>
    %123 = vector.multi_reduction <add>, %122, %cst_59 [1] : vector<8x128xf32> to vector<8xf32>
    %124 = vector.shape_cast %123 : vector<8xf32> to vector<8x1xf32>
    %cst_60 = arith.constant 3.125000e-02 : f32
    %125 = vector.broadcast %cst_60 : f32 to vector<8x1xf32>
    %126 = arith.mulf %124, %125 : vector<8x1xf32>
    %127 = arith.mulf %121, %121 : vector<8x1xf32>
    %128 = arith.subf %126, %127 : vector<8x1xf32>
    %129 = vector.broadcast %121 : vector<8x1xf32> to vector<8x128xf32>
    %130 = arith.subf %117, %129 : vector<8x128xf32>
    %cst_61 = arith.constant 9.99999974E-6 : f32
    %131 = vector.broadcast %cst_61 : f32 to vector<8x1xf32>
    %132 = arith.addf %128, %131 : vector<8x1xf32>
    %133 = math.rsqrt %132 : vector<8x1xf32>
    %134 = vector.broadcast %133 : vector<8x1xf32> to vector<8x128xf32>
    %135 = arith.mulf %130, %134 : vector<8x128xf32>
    %136 = vector.broadcast %16 : vector<1x128xf32> to vector<8x128xf32>
    %137 = arith.mulf %135, %136 : vector<8x128xf32>
    %138 = vector.broadcast %17 : vector<1x128xf32> to vector<8x128xf32>
    %139 = arith.addf %137, %138 : vector<8x128xf32>
    %c0_62 = arith.constant 0 : index
    %c0_63 = arith.constant 0 : index
    %140 = vector.load %arg13[%c0_62, %c0_63] : memref<128x128xbf16, #tpu.memory_space<vmem>>, vector<128x128xbf16>
    %c0_64 = arith.constant 0 : index
    %c0_65 = arith.constant 0 : index
    %141 = vector.load %arg14[%c0_64, %c0_65] : memref<1x128xf32, #tpu.memory_space<vmem>>, vector<1x128xf32>
    %c0_66 = arith.constant 0 : index
    %c0_67 = arith.constant 0 : index
    %142 = vector.load %arg15[%c0_66, %c0_67] : memref<128x128xbf16, #tpu.memory_space<vmem>>, vector<128x128xbf16>
    %c0_68 = arith.constant 0 : index
    %c0_69 = arith.constant 0 : index
    %143 = vector.load %arg16[%c0_68, %c0_69] : memref<1x128xf32, #tpu.memory_space<vmem>>, vector<1x128xf32>
    %c0_70 = arith.constant 0 : index
    %c0_71 = arith.constant 0 : index
    %144 = vector.load %arg17[%c0_70, %c0_71] : memref<1x128xf32, #tpu.memory_space<vmem>>, vector<1x128xf32>
    %c0_72 = arith.constant 0 : index
    %c0_73 = arith.constant 0 : index
    %145 = vector.load %arg18[%c0_72, %c0_73] : memref<1x128xf32, #tpu.memory_space<vmem>>, vector<1x128xf32>
    %146 = arith.truncf %139 : vector<8x128xf32> to vector<8x128xbf16>
    %cst_74 = arith.constant dense<0.000000e+00> : vector<8x128xf32>
    %147 = tpu.matmul %146, %140, %cst_74 {dimension_numbers = #tpu.dot_dimension_numbers<[1], [0], [0], [1], [0, 0, 1, 1], [], []>} : vector<8x128xbf16>, vector<128x128xbf16>, vector<8x128xf32> -> vector<8x128xf32>
    %148 = vector.broadcast %141 : vector<1x128xf32> to vector<8x128xf32>
    %149 = arith.addf %147, %148 : vector<8x128xf32>
    %cst_75 = arith.constant 0.000000e+00 : f32
    %150 = vector.broadcast %cst_75 : f32 to vector<8x128xf32>
    %151 = arith.maximumf %149, %150 : vector<8x128xf32>
    %152 = arith.truncf %151 : vector<8x128xf32> to vector<8x128xbf16>
    %cst_76 = arith.constant dense<0.000000e+00> : vector<8x128xf32>
    %153 = tpu.matmul %152, %142, %cst_76 {dimension_numbers = #tpu.dot_dimension_numbers<[1], [0], [0], [1], [0, 0, 1, 1], [], []>} : vector<8x128xbf16>, vector<128x128xbf16>, vector<8x128xf32> -> vector<8x128xf32>
    %154 = vector.broadcast %143 : vector<1x128xf32> to vector<8x128xf32>
    %155 = arith.addf %153, %154 : vector<8x128xf32>
    %156 = arith.addf %155, %139 : vector<8x128xf32>
    %cst_77 = arith.constant dense<0.000000e+00> : vector<8xf32>
    %157 = vector.multi_reduction <add>, %156, %cst_77 [1] : vector<8x128xf32> to vector<8xf32>
    %158 = vector.shape_cast %157 : vector<8xf32> to vector<8x1xf32>
    %cst_78 = arith.constant 3.125000e-02 : f32
    %159 = vector.broadcast %cst_78 : f32 to vector<8x1xf32>
    %160 = arith.mulf %158, %159 : vector<8x1xf32>
    %161 = arith.mulf %156, %156 : vector<8x128xf32>
    %cst_79 = arith.constant dense<0.000000e+00> : vector<8xf32>
    %162 = vector.multi_reduction <add>, %161, %cst_79 [1] : vector<8x128xf32> to vector<8xf32>
    %163 = vector.shape_cast %162 : vector<8xf32> to vector<8x1xf32>
    %cst_80 = arith.constant 3.125000e-02 : f32
    %164 = vector.broadcast %cst_80 : f32 to vector<8x1xf32>
    %165 = arith.mulf %163, %164 : vector<8x1xf32>
    %166 = arith.mulf %160, %160 : vector<8x1xf32>
    %167 = arith.subf %165, %166 : vector<8x1xf32>
    %168 = vector.broadcast %160 : vector<8x1xf32> to vector<8x128xf32>
    %169 = arith.subf %156, %168 : vector<8x128xf32>
    %cst_81 = arith.constant 9.99999974E-6 : f32
    %170 = vector.broadcast %cst_81 : f32 to vector<8x1xf32>
    %171 = arith.addf %167, %170 : vector<8x1xf32>
    %172 = math.rsqrt %171 : vector<8x1xf32>
    %173 = vector.broadcast %172 : vector<8x1xf32> to vector<8x128xf32>
    %174 = arith.mulf %169, %173 : vector<8x128xf32>
    %175 = vector.broadcast %144 : vector<1x128xf32> to vector<8x128xf32>
    %176 = arith.mulf %174, %175 : vector<8x128xf32>
    %177 = vector.broadcast %145 : vector<1x128xf32> to vector<8x128xf32>
    %178 = arith.addf %176, %177 : vector<8x128xf32>
    %c0_82 = arith.constant 0 : index
    %c0_83 = arith.constant 0 : index
    %c0_84 = arith.constant 0 : index
    %179 = vector.load %arg19[%c0_82, %c0_83, %c0_84] : memref<1x8x128xf32, #tpu.memory_space<vmem>>, vector<1x8x128xf32>
    %180 = vector.shape_cast %179 : vector<1x8x128xf32> to vector<8x128xf32>
    %181 = vector.shape_cast %178 : vector<8x128xf32> to vector<1x8x128xf32>
    tpu.vector_store %arg19[%c0_82, %c0_83, %c0_84], %181 {strides = array<i32>} : memref<1x8x128xf32, #tpu.memory_space<vmem>>, vector<1x8x128xf32>,
    return
  }
  func.func @transform_0(%arg0: i32) -> (i32, i32, i32) {
    %c0_i32 = arith.constant 0 : i32
    %c0_i32_0 = arith.constant 0 : i32
    %c0_i32_1 = arith.constant 0 : i32
    return %arg0, %c0_i32, %c0_i32_0 : i32, i32, i32
  }
  func.func @transform_1(%arg0: i32) -> (i32, i32, i32) {
    %c0_i32 = arith.constant 0 : i32
    %c0_i32_0 = arith.constant 0 : i32
    %c0_i32_1 = arith.constant 0 : i32
    return %arg0, %c0_i32, %c0_i32_0 : i32, i32, i32
  }
  func.func @transform_2(%arg0: i32) -> (i32, i32) {
    %c0_i32 = arith.constant 0 : i32
    %c0_i32_0 = arith.constant 0 : i32
    %c0_i32_1 = arith.constant 0 : i32
    return %c0_i32, %c0_i32_0 : i32, i32
  }
  func.func @transform_3(%arg0: i32) -> (i32, i32) {
    %c0_i32 = arith.constant 0 : i32
    %c0_i32_0 = arith.constant 0 : i32
    %c0_i32_1 = arith.constant 0 : i32
    return %c0_i32, %c0_i32_0 : i32, i32
  }
  func.func @transform_4(%arg0: i32) -> (i32, i32) {
    %c0_i32 = arith.constant 0 : i32
    %c0_i32_0 = arith.constant 0 : i32
    %c0_i32_1 = arith.constant 0 : i32
    return %c0_i32, %c0_i32_0 : i32, i32
  }
  func.func @transform_5(%arg0: i32) -> (i32, i32) {
    %c0_i32 = arith.constant 0 : i32
    %c0_i32_0 = arith.constant 0 : i32
    %c0_i32_1 = arith.constant 0 : i32
    return %c0_i32, %c0_i32_0 : i32, i32
  }
  func.func @transform_6(%arg0: i32) -> (i32, i32) {
    %c0_i32 = arith.constant 0 : i32
    %c0_i32_0 = arith.constant 0 : i32
    %c0_i32_1 = arith.constant 0 : i32
    return %c0_i32, %c0_i32_0 : i32, i32
  }
  func.func @transform_7(%arg0: i32) -> (i32, i32) {
    %c0_i32 = arith.constant 0 : i32
    %c0_i32_0 = arith.constant 0 : i32
    %c0_i32_1 = arith.constant 0 : i32
    return %c0_i32, %c0_i32_0 : i32, i32
  }
  func.func @transform_8(%arg0: i32) -> (i32, i32) {
    %c0_i32 = arith.constant 0 : i32
    %c0_i32_0 = arith.constant 0 : i32
    %c0_i32_1 = arith.constant 0 : i32
    return %c0_i32, %c0_i32_0 : i32, i32
  }
  func.func @transform_9(%arg0: i32) -> (i32, i32) {
    %c0_i32 = arith.constant 0 : i32
    %c0_i32_0 = arith.constant 0 : i32
    %c0_i32_1 = arith.constant 0 : i32
    return %c0_i32, %c0_i32_0 : i32, i32
  }
  func.func @transform_10(%arg0: i32) -> (i32, i32) {
    %c0_i32 = arith.constant 0 : i32
    %c0_i32_0 = arith.constant 0 : i32
    %c0_i32_1 = arith.constant 0 : i32
    return %c0_i32, %c0_i32_0 : i32, i32
  }
  func.func @transform_11(%arg0: i32) -> (i32, i32) {
    %c0_i32 = arith.constant 0 : i32
    %c0_i32_0 = arith.constant 0 : i32
    %c0_i32_1 = arith.constant 0 : i32
    return %c0_i32, %c0_i32_0 : i32, i32
  }
  func.func @transform_12(%arg0: i32) -> (i32, i32) {
    %c0_i32 = arith.constant 0 : i32
    %c0_i32_0 = arith.constant 0 : i32
    %c0_i32_1 = arith.constant 0 : i32
    return %c0_i32, %c0_i32_0 : i32, i32
  }
  func.func @transform_13(%arg0: i32) -> (i32, i32) {
    %c0_i32 = arith.constant 0 : i32
    %c0_i32_0 = arith.constant 0 : i32
    %c0_i32_1 = arith.constant 0 : i32
    return %c0_i32, %c0_i32_0 : i32, i32
  }
  func.func @transform_14(%arg0: i32) -> (i32, i32) {
    %c0_i32 = arith.constant 0 : i32
    %c0_i32_0 = arith.constant 0 : i32
    %c0_i32_1 = arith.constant 0 : i32
    return %c0_i32, %c0_i32_0 : i32, i32
  }
  func.func @transform_15(%arg0: i32) -> (i32, i32) {
    %c0_i32 = arith.constant 0 : i32
    %c0_i32_0 = arith.constant 0 : i32
    %c0_i32_1 = arith.constant 0 : i32
    return %c0_i32, %c0_i32_0 : i32, i32
  }
  func.func @transform_16(%arg0: i32) -> (i32, i32) {
    %c0_i32 = arith.constant 0 : i32
    %c0_i32_0 = arith.constant 0 : i32
    %c0_i32_1 = arith.constant 0 : i32
    return %c0_i32, %c0_i32_0 : i32, i32
  }
  func.func @transform_17(%arg0: i32) -> (i32, i32) {
    %c0_i32 = arith.constant 0 : i32
    %c0_i32_0 = arith.constant 0 : i32
    %c0_i32_1 = arith.constant 0 : i32
    return %c0_i32, %c0_i32_0 : i32, i32
  }
  func.func @transform_18(%arg0: i32) -> (i32, i32, i32) {
    %c0_i32 = arith.constant 0 : i32
    %c0_i32_0 = arith.constant 0 : i32
    %c0_i32_1 = arith.constant 0 : i32
    return %arg0, %c0_i32, %c0_i32_0 : i32, i32, i32
  }
}

module attributes {stable_mosaic.version = 11 : i64} {
  func.func @_decoder_layer_kernel(%arg0: i32, %arg1: memref<1x8x128xf32, #tpu.memory_space<vmem>>, %arg2: memref<1x1x8xf32, #tpu.memory_space<vmem>>, %arg3: memref<1x8x128xf32, #tpu.memory_space<vmem>>, %arg4: memref<1x1x8xf32, #tpu.memory_space<vmem>>, %arg5: memref<128x128xbf16, #tpu.memory_space<vmem>>, %arg6: memref<1x128xf32, #tpu.memory_space<vmem>>, %arg7: memref<128x128xbf16, #tpu.memory_space<vmem>>, %arg8: memref<1x128xf32, #tpu.memory_space<vmem>>, %arg9: memref<128x128xbf16, #tpu.memory_space<vmem>>, %arg10: memref<1x128xf32, #tpu.memory_space<vmem>>, %arg11: memref<128x128xbf16, #tpu.memory_space<vmem>>, %arg12: memref<1x128xf32, #tpu.memory_space<vmem>>, %arg13: memref<1x128xf32, #tpu.memory_space<vmem>>, %arg14: memref<1x128xf32, #tpu.memory_space<vmem>>, %arg15: memref<128x128xbf16, #tpu.memory_space<vmem>>, %arg16: memref<1x128xf32, #tpu.memory_space<vmem>>, %arg17: memref<128x128xbf16, #tpu.memory_space<vmem>>, %arg18: memref<1x128xf32, #tpu.memory_space<vmem>>, %arg19: memref<128x128xbf16, #tpu.memory_space<vmem>>, %arg20: memref<1x128xf32, #tpu.memory_space<vmem>>, %arg21: memref<128x128xbf16, #tpu.memory_space<vmem>>, %arg22: memref<1x128xf32, #tpu.memory_space<vmem>>, %arg23: memref<1x128xf32, #tpu.memory_space<vmem>>, %arg24: memref<1x128xf32, #tpu.memory_space<vmem>>, %arg25: memref<128x128xbf16, #tpu.memory_space<vmem>>, %arg26: memref<1x128xf32, #tpu.memory_space<vmem>>, %arg27: memref<128x128xbf16, #tpu.memory_space<vmem>>, %arg28: memref<1x128xf32, #tpu.memory_space<vmem>>, %arg29: memref<1x128xf32, #tpu.memory_space<vmem>>, %arg30: memref<1x128xf32, #tpu.memory_space<vmem>>, %arg31: memref<1x8x128xf32, #tpu.memory_space<vmem>>, %arg32: memref<8x128xf32, #tpu.memory_space<vmem>>) attributes {dimension_semantics = [#tpu.dimension_semantics<parallel>], iteration_bounds = array<i64: 2>, scalar_prefetch = 0 : i64, scratch_operands = 1 : i64, tpu.core_type = #tpu.core_type<tc>, window_params = [{transform_indices = @transform_0, window_bounds = array<i64: 1, 8, 128>}, {transform_indices = @transform_1, window_bounds = array<i64: 1, 1, 8>}, {transform_indices = @transform_2, window_bounds = array<i64: 1, 8, 128>}, {transform_indices = @transform_3, window_bounds = array<i64: 1, 1, 8>}, {pipeline_mode = #tpu.pipeline_mode<synchronous>, transform_indices = @transform_4, window_bounds = array<i64: 128, 128>}, {pipeline_mode = #tpu.pipeline_mode<synchronous>, transform_indices = @transform_5, window_bounds = array<i64: 1, 128>}, {pipeline_mode = #tpu.pipeline_mode<synchronous>, transform_indices = @transform_6, window_bounds = array<i64: 128, 128>}, {pipeline_mode = #tpu.pipeline_mode<synchronous>, transform_indices = @transform_7, window_bounds = array<i64: 1, 128>}, {pipeline_mode = #tpu.pipeline_mode<synchronous>, transform_indices = @transform_8, window_bounds = array<i64: 128, 128>}, {pipeline_mode = #tpu.pipeline_mode<synchronous>, transform_indices = @transform_9, window_bounds = array<i64: 1, 128>}, {pipeline_mode = #tpu.pipeline_mode<synchronous>, transform_indices = @transform_10, window_bounds = array<i64: 128, 128>}, {pipeline_mode = #tpu.pipeline_mode<synchronous>, transform_indices = @transform_11, window_bounds = array<i64: 1, 128>}, {pipeline_mode = #tpu.pipeline_mode<synchronous>, transform_indices = @transform_12, window_bounds = array<i64: 1, 128>}, {pipeline_mode = #tpu.pipeline_mode<synchronous>, transform_indices = @transform_13, window_bounds = array<i64: 1, 128>}, {pipeline_mode = #tpu.pipeline_mode<synchronous>, transform_indices = @transform_14, window_bounds = array<i64: 128, 128>}, {pipeline_mode = #tpu.pipeline_mode<synchronous>, transform_indices = @transform_15, window_bounds = array<i64: 1, 128>}, {pipeline_mode = #tpu.pipeline_mode<synchronous>, transform_indices = @transform_16, window_bounds = array<i64: 128, 128>}, {pipeline_mode = #tpu.pipeline_mode<synchronous>, transform_indices = @transform_17, window_bounds = array<i64: 1, 128>}, {pipeline_mode = #tpu.pipeline_mode<synchronous>, transform_indices = @transform_18, window_bounds = array<i64: 128, 128>}, {pipeline_mode = #tpu.pipeline_mode<synchronous>, transform_indices = @transform_19, window_bounds = array<i64: 1, 128>}, {pipeline_mode = #tpu.pipeline_mode<synchronous>, transform_indices = @transform_20, window_bounds = array<i64: 128, 128>}, {pipeline_mode = #tpu.pipeline_mode<synchronous>, transform_indices = @transform_21, window_bounds = array<i64: 1, 128>}, {pipeline_mode = #tpu.pipeline_mode<synchronous>, transform_indices = @transform_22, window_bounds = array<i64: 1, 128>}, {pipeline_mode = #tpu.pipeline_mode<synchronous>, transform_indices = @transform_23, window_bounds = array<i64: 1, 128>}, {pipeline_mode = #tpu.pipeline_mode<synchronous>, transform_indices = @transform_24, window_bounds = array<i64: 128, 128>}, {pipeline_mode = #tpu.pipeline_mode<synchronous>, transform_indices = @transform_25, window_bounds = array<i64: 1, 128>}, {pipeline_mode = #tpu.pipeline_mode<synchronous>, transform_indices = @transform_26, window_bounds = array<i64: 128, 128>}, {pipeline_mode = #tpu.pipeline_mode<synchronous>, transform_indices = @transform_27, window_bounds = array<i64: 1, 128>}, {pipeline_mode = #tpu.pipeline_mode<synchronous>, transform_indices = @transform_28, window_bounds = array<i64: 1, 128>}, {pipeline_mode = #tpu.pipeline_mode<synchronous>, transform_indices = @transform_29, window_bounds = array<i64: 1, 128>}, {transform_indices = @transform_30, window_bounds = array<i64: 1, 8, 128>}]} {
    %c0 = arith.constant 0 : index
    %c0_0 = arith.constant 0 : index
    %c0_1 = arith.constant 0 : index
    %0 = vector.load %arg1[%c0, %c0_0, %c0_1] : memref<1x8x128xf32, #tpu.memory_space<vmem>>, vector<1x8x128xf32>
    %1 = vector.shape_cast %0 : vector<1x8x128xf32> to vector<8x128xf32>
    %c0_2 = arith.constant 0 : index
    %c0_3 = arith.constant 0 : index
    %c0_4 = arith.constant 0 : index
    %2 = vector.load %arg3[%c0_2, %c0_3, %c0_4] : memref<1x8x128xf32, #tpu.memory_space<vmem>>, vector<1x8x128xf32>
    %3 = vector.shape_cast %2 : vector<1x8x128xf32> to vector<8x128xf32>
    %4 = tpu.iota {dimensions = array<i32: 0>} : vector<8x8xi32>
    %5 = tpu.iota {dimensions = array<i32: 1>} : vector<8x8xi32>
    %c0_5 = arith.constant 0 : index
    %c0_6 = arith.constant 0 : index
    %c0_7 = arith.constant 0 : index
    %6 = vector.load %arg2[%c0_5, %c0_6, %c0_7] : memref<1x1x8xf32, #tpu.memory_space<vmem>>, vector<1x1x8xf32>
    %7 = vector.shape_cast %6 : vector<1x1x8xf32> to vector<1x8xf32>
    %cst = arith.constant 1.000000e+00 : f32
    %8 = vector.broadcast %cst : f32 to vector<1x8xf32>
    %9 = arith.subf %8, %7 : vector<1x8xf32>
    %cst_8 = arith.constant -1.000000e+09 : f32
    %10 = vector.broadcast %cst_8 : f32 to vector<1x8xf32>
    %11 = arith.mulf %9, %10 : vector<1x8xf32>
    %12 = arith.cmpi sle, %5, %4 : vector<8x8xi32>
    %cst_9 = arith.constant 0.000000e+00 : f32
    %cst_10 = arith.constant -1.000000e+09 : f32
    %13 = vector.broadcast %cst_9 : f32 to vector<8x8xf32>
    %14 = vector.broadcast %cst_10 : f32 to vector<8x8xf32>
    %15 = arith.select %12, %13, %14 : vector<8x8xi1>, vector<8x8xf32>
    %16 = vector.broadcast %11 : vector<1x8xf32> to vector<8x8xf32>
    %17 = arith.addf %16, %15 : vector<8x8xf32>
    %c0_11 = arith.constant 0 : index
    %c0_12 = arith.constant 0 : index
    %c0_13 = arith.constant 0 : index
    %18 = vector.load %arg4[%c0_11, %c0_12, %c0_13] : memref<1x1x8xf32, #tpu.memory_space<vmem>>, vector<1x1x8xf32>
    %19 = vector.shape_cast %18 : vector<1x1x8xf32> to vector<1x8xf32>
    %cst_14 = arith.constant 1.000000e+00 : f32
    %20 = vector.broadcast %cst_14 : f32 to vector<1x8xf32>
    %21 = arith.subf %20, %19 : vector<1x8xf32>
    %cst_15 = arith.constant -1.000000e+09 : f32
    %22 = vector.broadcast %cst_15 : f32 to vector<1x8xf32>
    %23 = arith.mulf %21, %22 : vector<1x8xf32>
    %c0_16 = arith.constant 0 : index
    %c0_17 = arith.constant 0 : index
    %24 = vector.load %arg5[%c0_16, %c0_17] : memref<128x128xbf16, #tpu.memory_space<vmem>>, vector<128x128xbf16>
    %c0_18 = arith.constant 0 : index
    %c0_19 = arith.constant 0 : index
    %25 = vector.load %arg6[%c0_18, %c0_19] : memref<1x128xf32, #tpu.memory_space<vmem>>, vector<1x128xf32>
    %c0_20 = arith.constant 0 : index
    %c0_21 = arith.constant 0 : index
    %26 = vector.load %arg7[%c0_20, %c0_21] : memref<128x128xbf16, #tpu.memory_space<vmem>>, vector<128x128xbf16>
    %c0_22 = arith.constant 0 : index
    %c0_23 = arith.constant 0 : index
    %27 = vector.load %arg8[%c0_22, %c0_23] : memref<1x128xf32, #tpu.memory_space<vmem>>, vector<1x128xf32>
    %c0_24 = arith.constant 0 : index
    %c0_25 = arith.constant 0 : index
    %28 = vector.load %arg9[%c0_24, %c0_25] : memref<128x128xbf16, #tpu.memory_space<vmem>>, vector<128x128xbf16>
    %c0_26 = arith.constant 0 : index
    %c0_27 = arith.constant 0 : index
    %29 = vector.load %arg10[%c0_26, %c0_27] : memref<1x128xf32, #tpu.memory_space<vmem>>, vector<1x128xf32>
    %c0_28 = arith.constant 0 : index
    %c0_29 = arith.constant 0 : index
    %30 = vector.load %arg11[%c0_28, %c0_29] : memref<128x128xbf16, #tpu.memory_space<vmem>>, vector<128x128xbf16>
    %c0_30 = arith.constant 0 : index
    %c0_31 = arith.constant 0 : index
    %31 = vector.load %arg12[%c0_30, %c0_31] : memref<1x128xf32, #tpu.memory_space<vmem>>, vector<1x128xf32>
    %c0_32 = arith.constant 0 : index
    %c0_33 = arith.constant 0 : index
    %32 = vector.load %arg13[%c0_32, %c0_33] : memref<1x128xf32, #tpu.memory_space<vmem>>, vector<1x128xf32>
    %c0_34 = arith.constant 0 : index
    %c0_35 = arith.constant 0 : index
    %33 = vector.load %arg14[%c0_34, %c0_35] : memref<1x128xf32, #tpu.memory_space<vmem>>, vector<1x128xf32>
    %34 = arith.truncf %1 : vector<8x128xf32> to vector<8x128xbf16>
    %35 = arith.truncf %1 : vector<8x128xf32> to vector<8x128xbf16>
    %cst_36 = arith.constant dense<0.000000e+00> : vector<8x128xf32>
    %36 = tpu.matmul %34, %24, %cst_36 {dimension_numbers = #tpu.dot_dimension_numbers<[1], [0], [0], [1], [0, 0, 1, 1], [], []>} : vector<8x128xbf16>, vector<128x128xbf16>, vector<8x128xf32> -> vector<8x128xf32>
    %37 = vector.broadcast %25 : vector<1x128xf32> to vector<8x128xf32>
    %38 = arith.addf %36, %37 : vector<8x128xf32>
    %cst_37 = arith.constant 0.353553385 : f32
    %39 = vector.broadcast %cst_37 : f32 to vector<8x128xf32>
    %40 = arith.mulf %38, %39 : vector<8x128xf32>
    %cst_38 = arith.constant dense<0.000000e+00> : vector<8x128xf32>
    %41 = tpu.matmul %35, %26, %cst_38 {dimension_numbers = #tpu.dot_dimension_numbers<[1], [0], [0], [1], [0, 0, 1, 1], [], []>} : vector<8x128xbf16>, vector<128x128xbf16>, vector<8x128xf32> -> vector<8x128xf32>
    %42 = vector.broadcast %27 : vector<1x128xf32> to vector<8x128xf32>
    %43 = arith.addf %41, %42 : vector<8x128xf32>
    %cst_39 = arith.constant dense<0.000000e+00> : vector<8x128xf32>
    %44 = tpu.matmul %35, %28, %cst_39 {dimension_numbers = #tpu.dot_dimension_numbers<[1], [0], [0], [1], [0, 0, 1, 1], [], []>} : vector<8x128xbf16>, vector<128x128xbf16>, vector<8x128xf32> -> vector<8x128xf32>
    %45 = vector.broadcast %29 : vector<1x128xf32> to vector<8x128xf32>
    %46 = arith.addf %44, %45 : vector<8x128xf32>
    %47 = arith.truncf %40 : vector<8x128xf32> to vector<8x128xbf16>
    %48 = arith.truncf %43 : vector<8x128xf32> to vector<8x128xbf16>
    %49 = arith.truncf %46 : vector<8x128xf32> to vector<8x128xbf16>
    %cst_40 = arith.constant 0.000000e+00 : f32
    %50 = vector.broadcast %cst_40 : f32 to vector<8x128xf32>
    %c0_41 = arith.constant 0 : index
    %c0_42 = arith.constant 0 : index
    %51 = vector.load %arg32[%c0_41, %c0_42] : memref<8x128xf32, #tpu.memory_space<vmem>>, vector<8x128xf32>
    tpu.vector_store %arg32[%c0_41, %c0_42], %50 {strides = array<i32>} : memref<8x128xf32, #tpu.memory_space<vmem>>, vector<8x128xf32>,
    %52 = vector.extract_strided_slice %47 {offsets = [0, 0], sizes = [8, 8], strides = [1, 1]} : vector<8x128xbf16> to vector<8x8xbf16>
    %53 = vector.extract_strided_slice %48 {offsets = [0, 0], sizes = [8, 8], strides = [1, 1]} : vector<8x128xbf16> to vector<8x8xbf16>
    %cst_43 = arith.constant dense<0.000000e+00> : vector<8x8xf32>
    %54 = tpu.matmul %52, %53, %cst_43 {dimension_numbers = #tpu.dot_dimension_numbers<[1], [1], [0], [0], [0, 0, 1, 0], [], []>} : vector<8x8xbf16>, vector<8x8xbf16>, vector<8x8xf32> -> vector<8x8xf32>
    %55 = arith.addf %54, %17 : vector<8x8xf32>
    %cst_44 = arith.constant dense<0xFF800000> : vector<8xf32>
    %56 = vector.multi_reduction <maximumf>, %55, %cst_44 [1] : vector<8x8xf32> to vector<8xf32>
    %57 = vector.shape_cast %56 : vector<8xf32> to vector<8x1xf32>
    %58 = vector.broadcast %57 : vector<8x1xf32> to vector<8x8xf32>
    %59 = arith.subf %55, %58 : vector<8x8xf32>
    %60 = math.exp %59 : vector<8x8xf32>
    %cst_45 = arith.constant dense<0.000000e+00> : vector<8xf32>
    %61 = vector.multi_reduction <add>, %60, %cst_45 [1] : vector<8x8xf32> to vector<8xf32>
    %62 = vector.shape_cast %61 : vector<8xf32> to vector<8x1xf32>
    %63 = tpu.reciprocal %62 {approx = true} : vector<8x1xf32> -> vector<8x1xf32>
    %64 = vector.broadcast %63 : vector<8x1xf32> to vector<8x8xf32>
    %65 = arith.mulf %60, %64 : vector<8x8xf32>
    %66 = arith.truncf %65 : vector<8x8xf32> to vector<8x8xbf16>
    %67 = vector.extract_strided_slice %49 {offsets = [0, 0], sizes = [8, 8], strides = [1, 1]} : vector<8x128xbf16> to vector<8x8xbf16>
    %cst_46 = arith.constant dense<0.000000e+00> : vector<8x8xf32>
    %68 = tpu.matmul %66, %67, %cst_46 {dimension_numbers = #tpu.dot_dimension_numbers<[1], [0], [0], [1], [0, 0, 1, 1], [], []>} : vector<8x8xbf16>, vector<8x8xbf16>, vector<8x8xf32> -> vector<8x8xf32>
    %c0_47 = arith.constant 0 : index
    %c0_48 = arith.constant 0 : index
    %69 = vector.load %arg32[%c0_47, %c0_48] : memref<8x128xf32, #tpu.memory_space<vmem>>, vector<8x8xf32>
    tpu.vector_store %arg32[%c0_47, %c0_48], %68 {strides = array<i32>} : memref<8x128xf32, #tpu.memory_space<vmem>>, vector<8x8xf32>,
    %70 = vector.extract_strided_slice %47 {offsets = [0, 8], sizes = [8, 8], strides = [1, 1]} : vector<8x128xbf16> to vector<8x8xbf16>
    %71 = vector.extract_strided_slice %48 {offsets = [0, 8], sizes = [8, 8], strides = [1, 1]} : vector<8x128xbf16> to vector<8x8xbf16>
    %cst_49 = arith.constant dense<0.000000e+00> : vector<8x8xf32>
    %72 = tpu.matmul %70, %71, %cst_49 {dimension_numbers = #tpu.dot_dimension_numbers<[1], [1], [0], [0], [0, 0, 1, 0], [], []>} : vector<8x8xbf16>, vector<8x8xbf16>, vector<8x8xf32> -> vector<8x8xf32>
    %73 = arith.addf %72, %17 : vector<8x8xf32>
    %cst_50 = arith.constant dense<0xFF800000> : vector<8xf32>
    %74 = vector.multi_reduction <maximumf>, %73, %cst_50 [1] : vector<8x8xf32> to vector<8xf32>
    %75 = vector.shape_cast %74 : vector<8xf32> to vector<8x1xf32>
    %76 = vector.broadcast %75 : vector<8x1xf32> to vector<8x8xf32>
    %77 = arith.subf %73, %76 : vector<8x8xf32>
    %78 = math.exp %77 : vector<8x8xf32>
    %cst_51 = arith.constant dense<0.000000e+00> : vector<8xf32>
    %79 = vector.multi_reduction <add>, %78, %cst_51 [1] : vector<8x8xf32> to vector<8xf32>
    %80 = vector.shape_cast %79 : vector<8xf32> to vector<8x1xf32>
    %81 = tpu.reciprocal %80 {approx = true} : vector<8x1xf32> -> vector<8x1xf32>
    %82 = vector.broadcast %81 : vector<8x1xf32> to vector<8x8xf32>
    %83 = arith.mulf %78, %82 : vector<8x8xf32>
    %84 = arith.truncf %83 : vector<8x8xf32> to vector<8x8xbf16>
    %85 = vector.extract_strided_slice %49 {offsets = [0, 8], sizes = [8, 8], strides = [1, 1]} : vector<8x128xbf16> to vector<8x8xbf16>
    %cst_52 = arith.constant dense<0.000000e+00> : vector<8x8xf32>
    %86 = tpu.matmul %84, %85, %cst_52 {dimension_numbers = #tpu.dot_dimension_numbers<[1], [0], [0], [1], [0, 0, 1, 1], [], []>} : vector<8x8xbf16>, vector<8x8xbf16>, vector<8x8xf32> -> vector<8x8xf32>
    %c0_53 = arith.constant 0 : index
    %c8 = arith.constant 8 : index
    %87 = vector.load %arg32[%c0_53, %c8] : memref<8x128xf32, #tpu.memory_space<vmem>>, vector<8x8xf32>
    tpu.vector_store %arg32[%c0_53, %c8], %86 {strides = array<i32>} : memref<8x128xf32, #tpu.memory_space<vmem>>, vector<8x8xf32>,
    %88 = vector.extract_strided_slice %47 {offsets = [0, 16], sizes = [8, 8], strides = [1, 1]} : vector<8x128xbf16> to vector<8x8xbf16>
    %89 = vector.extract_strided_slice %48 {offsets = [0, 16], sizes = [8, 8], strides = [1, 1]} : vector<8x128xbf16> to vector<8x8xbf16>
    %cst_54 = arith.constant dense<0.000000e+00> : vector<8x8xf32>
    %90 = tpu.matmul %88, %89, %cst_54 {dimension_numbers = #tpu.dot_dimension_numbers<[1], [1], [0], [0], [0, 0, 1, 0], [], []>} : vector<8x8xbf16>, vector<8x8xbf16>, vector<8x8xf32> -> vector<8x8xf32>
    %91 = arith.addf %90, %17 : vector<8x8xf32>
    %cst_55 = arith.constant dense<0xFF800000> : vector<8xf32>
    %92 = vector.multi_reduction <maximumf>, %91, %cst_55 [1] : vector<8x8xf32> to vector<8xf32>
    %93 = vector.shape_cast %92 : vector<8xf32> to vector<8x1xf32>
    %94 = vector.broadcast %93 : vector<8x1xf32> to vector<8x8xf32>
    %95 = arith.subf %91, %94 : vector<8x8xf32>
    %96 = math.exp %95 : vector<8x8xf32>
    %cst_56 = arith.constant dense<0.000000e+00> : vector<8xf32>
    %97 = vector.multi_reduction <add>, %96, %cst_56 [1] : vector<8x8xf32> to vector<8xf32>
    %98 = vector.shape_cast %97 : vector<8xf32> to vector<8x1xf32>
    %99 = tpu.reciprocal %98 {approx = true} : vector<8x1xf32> -> vector<8x1xf32>
    %100 = vector.broadcast %99 : vector<8x1xf32> to vector<8x8xf32>
    %101 = arith.mulf %96, %100 : vector<8x8xf32>
    %102 = arith.truncf %101 : vector<8x8xf32> to vector<8x8xbf16>
    %103 = vector.extract_strided_slice %49 {offsets = [0, 16], sizes = [8, 8], strides = [1, 1]} : vector<8x128xbf16> to vector<8x8xbf16>
    %cst_57 = arith.constant dense<0.000000e+00> : vector<8x8xf32>
    %104 = tpu.matmul %102, %103, %cst_57 {dimension_numbers = #tpu.dot_dimension_numbers<[1], [0], [0], [1], [0, 0, 1, 1], [], []>} : vector<8x8xbf16>, vector<8x8xbf16>, vector<8x8xf32> -> vector<8x8xf32>
    %c0_58 = arith.constant 0 : index
    %c16 = arith.constant 16 : index
    %105 = vector.load %arg32[%c0_58, %c16] : memref<8x128xf32, #tpu.memory_space<vmem>>, vector<8x8xf32>
    tpu.vector_store %arg32[%c0_58, %c16], %104 {strides = array<i32>} : memref<8x128xf32, #tpu.memory_space<vmem>>, vector<8x8xf32>,
    %106 = vector.extract_strided_slice %47 {offsets = [0, 24], sizes = [8, 8], strides = [1, 1]} : vector<8x128xbf16> to vector<8x8xbf16>
    %107 = vector.extract_strided_slice %48 {offsets = [0, 24], sizes = [8, 8], strides = [1, 1]} : vector<8x128xbf16> to vector<8x8xbf16>
    %cst_59 = arith.constant dense<0.000000e+00> : vector<8x8xf32>
    %108 = tpu.matmul %106, %107, %cst_59 {dimension_numbers = #tpu.dot_dimension_numbers<[1], [1], [0], [0], [0, 0, 1, 0], [], []>} : vector<8x8xbf16>, vector<8x8xbf16>, vector<8x8xf32> -> vector<8x8xf32>
    %109 = arith.addf %108, %17 : vector<8x8xf32>
    %cst_60 = arith.constant dense<0xFF800000> : vector<8xf32>
    %110 = vector.multi_reduction <maximumf>, %109, %cst_60 [1] : vector<8x8xf32> to vector<8xf32>
    %111 = vector.shape_cast %110 : vector<8xf32> to vector<8x1xf32>
    %112 = vector.broadcast %111 : vector<8x1xf32> to vector<8x8xf32>
    %113 = arith.subf %109, %112 : vector<8x8xf32>
    %114 = math.exp %113 : vector<8x8xf32>
    %cst_61 = arith.constant dense<0.000000e+00> : vector<8xf32>
    %115 = vector.multi_reduction <add>, %114, %cst_61 [1] : vector<8x8xf32> to vector<8xf32>
    %116 = vector.shape_cast %115 : vector<8xf32> to vector<8x1xf32>
    %117 = tpu.reciprocal %116 {approx = true} : vector<8x1xf32> -> vector<8x1xf32>
    %118 = vector.broadcast %117 : vector<8x1xf32> to vector<8x8xf32>
    %119 = arith.mulf %114, %118 : vector<8x8xf32>
    %120 = arith.truncf %119 : vector<8x8xf32> to vector<8x8xbf16>
    %121 = vector.extract_strided_slice %49 {offsets = [0, 24], sizes = [8, 8], strides = [1, 1]} : vector<8x128xbf16> to vector<8x8xbf16>
    %cst_62 = arith.constant dense<0.000000e+00> : vector<8x8xf32>
    %122 = tpu.matmul %120, %121, %cst_62 {dimension_numbers = #tpu.dot_dimension_numbers<[1], [0], [0], [1], [0, 0, 1, 1], [], []>} : vector<8x8xbf16>, vector<8x8xbf16>, vector<8x8xf32> -> vector<8x8xf32>
    %c0_63 = arith.constant 0 : index
    %c24 = arith.constant 24 : index
    %123 = vector.load %arg32[%c0_63, %c24] : memref<8x128xf32, #tpu.memory_space<vmem>>, vector<8x8xf32>
    tpu.vector_store %arg32[%c0_63, %c24], %122 {strides = array<i32>} : memref<8x128xf32, #tpu.memory_space<vmem>>, vector<8x8xf32>,
    %c0_64 = arith.constant 0 : index
    %c0_65 = arith.constant 0 : index
    %124 = vector.load %arg32[%c0_64, %c0_65] : memref<8x128xf32, #tpu.memory_space<vmem>>, vector<8x128xf32>
    %125 = arith.truncf %124 : vector<8x128xf32> to vector<8x128xbf16>
    %cst_66 = arith.constant dense<0.000000e+00> : vector<8x128xf32>
    %126 = tpu.matmul %125, %30, %cst_66 {dimension_numbers = #tpu.dot_dimension_numbers<[1], [0], [0], [1], [0, 0, 1, 1], [], []>} : vector<8x128xbf16>, vector<128x128xbf16>, vector<8x128xf32> -> vector<8x128xf32>
    %127 = vector.broadcast %31 : vector<1x128xf32> to vector<8x128xf32>
    %128 = arith.addf %126, %127 : vector<8x128xf32>
    %129 = arith.addf %128, %1 : vector<8x128xf32>
    %cst_67 = arith.constant dense<0.000000e+00> : vector<8xf32>
    %130 = vector.multi_reduction <add>, %129, %cst_67 [1] : vector<8x128xf32> to vector<8xf32>
    %131 = vector.shape_cast %130 : vector<8xf32> to vector<8x1xf32>
    %cst_68 = arith.constant 3.125000e-02 : f32
    %132 = vector.broadcast %cst_68 : f32 to vector<8x1xf32>
    %133 = arith.mulf %131, %132 : vector<8x1xf32>
    %134 = arith.mulf %129, %129 : vector<8x128xf32>
    %cst_69 = arith.constant dense<0.000000e+00> : vector<8xf32>
    %135 = vector.multi_reduction <add>, %134, %cst_69 [1] : vector<8x128xf32> to vector<8xf32>
    %136 = vector.shape_cast %135 : vector<8xf32> to vector<8x1xf32>
    %cst_70 = arith.constant 3.125000e-02 : f32
    %137 = vector.broadcast %cst_70 : f32 to vector<8x1xf32>
    %138 = arith.mulf %136, %137 : vector<8x1xf32>
    %139 = arith.mulf %133, %133 : vector<8x1xf32>
    %140 = arith.subf %138, %139 : vector<8x1xf32>
    %141 = vector.broadcast %133 : vector<8x1xf32> to vector<8x128xf32>
    %142 = arith.subf %129, %141 : vector<8x128xf32>
    %cst_71 = arith.constant 9.99999974E-6 : f32
    %143 = vector.broadcast %cst_71 : f32 to vector<8x1xf32>
    %144 = arith.addf %140, %143 : vector<8x1xf32>
    %145 = math.rsqrt %144 : vector<8x1xf32>
    %146 = vector.broadcast %145 : vector<8x1xf32> to vector<8x128xf32>
    %147 = arith.mulf %142, %146 : vector<8x128xf32>
    %148 = vector.broadcast %32 : vector<1x128xf32> to vector<8x128xf32>
    %149 = arith.mulf %147, %148 : vector<8x128xf32>
    %150 = vector.broadcast %33 : vector<1x128xf32> to vector<8x128xf32>
    %151 = arith.addf %149, %150 : vector<8x128xf32>
    %c0_72 = arith.constant 0 : index
    %c0_73 = arith.constant 0 : index
    %152 = vector.load %arg15[%c0_72, %c0_73] : memref<128x128xbf16, #tpu.memory_space<vmem>>, vector<128x128xbf16>
    %c0_74 = arith.constant 0 : index
    %c0_75 = arith.constant 0 : index
    %153 = vector.load %arg16[%c0_74, %c0_75] : memref<1x128xf32, #tpu.memory_space<vmem>>, vector<1x128xf32>
    %c0_76 = arith.constant 0 : index
    %c0_77 = arith.constant 0 : index
    %154 = vector.load %arg17[%c0_76, %c0_77] : memref<128x128xbf16, #tpu.memory_space<vmem>>, vector<128x128xbf16>
    %c0_78 = arith.constant 0 : index
    %c0_79 = arith.constant 0 : index
    %155 = vector.load %arg18[%c0_78, %c0_79] : memref<1x128xf32, #tpu.memory_space<vmem>>, vector<1x128xf32>
    %c0_80 = arith.constant 0 : index
    %c0_81 = arith.constant 0 : index
    %156 = vector.load %arg19[%c0_80, %c0_81] : memref<128x128xbf16, #tpu.memory_space<vmem>>, vector<128x128xbf16>
    %c0_82 = arith.constant 0 : index
    %c0_83 = arith.constant 0 : index
    %157 = vector.load %arg20[%c0_82, %c0_83] : memref<1x128xf32, #tpu.memory_space<vmem>>, vector<1x128xf32>
    %c0_84 = arith.constant 0 : index
    %c0_85 = arith.constant 0 : index
    %158 = vector.load %arg21[%c0_84, %c0_85] : memref<128x128xbf16, #tpu.memory_space<vmem>>, vector<128x128xbf16>
    %c0_86 = arith.constant 0 : index
    %c0_87 = arith.constant 0 : index
    %159 = vector.load %arg22[%c0_86, %c0_87] : memref<1x128xf32, #tpu.memory_space<vmem>>, vector<1x128xf32>
    %c0_88 = arith.constant 0 : index
    %c0_89 = arith.constant 0 : index
    %160 = vector.load %arg23[%c0_88, %c0_89] : memref<1x128xf32, #tpu.memory_space<vmem>>, vector<1x128xf32>
    %c0_90 = arith.constant 0 : index
    %c0_91 = arith.constant 0 : index
    %161 = vector.load %arg24[%c0_90, %c0_91] : memref<1x128xf32, #tpu.memory_space<vmem>>, vector<1x128xf32>
    %162 = arith.truncf %151 : vector<8x128xf32> to vector<8x128xbf16>
    %163 = arith.truncf %3 : vector<8x128xf32> to vector<8x128xbf16>
    %cst_92 = arith.constant dense<0.000000e+00> : vector<8x128xf32>
    %164 = tpu.matmul %162, %152, %cst_92 {dimension_numbers = #tpu.dot_dimension_numbers<[1], [0], [0], [1], [0, 0, 1, 1], [], []>} : vector<8x128xbf16>, vector<128x128xbf16>, vector<8x128xf32> -> vector<8x128xf32>
    %165 = vector.broadcast %153 : vector<1x128xf32> to vector<8x128xf32>
    %166 = arith.addf %164, %165 : vector<8x128xf32>
    %cst_93 = arith.constant 0.353553385 : f32
    %167 = vector.broadcast %cst_93 : f32 to vector<8x128xf32>
    %168 = arith.mulf %166, %167 : vector<8x128xf32>
    %cst_94 = arith.constant dense<0.000000e+00> : vector<8x128xf32>
    %169 = tpu.matmul %163, %154, %cst_94 {dimension_numbers = #tpu.dot_dimension_numbers<[1], [0], [0], [1], [0, 0, 1, 1], [], []>} : vector<8x128xbf16>, vector<128x128xbf16>, vector<8x128xf32> -> vector<8x128xf32>
    %170 = vector.broadcast %155 : vector<1x128xf32> to vector<8x128xf32>
    %171 = arith.addf %169, %170 : vector<8x128xf32>
    %cst_95 = arith.constant dense<0.000000e+00> : vector<8x128xf32>
    %172 = tpu.matmul %163, %156, %cst_95 {dimension_numbers = #tpu.dot_dimension_numbers<[1], [0], [0], [1], [0, 0, 1, 1], [], []>} : vector<8x128xbf16>, vector<128x128xbf16>, vector<8x128xf32> -> vector<8x128xf32>
    %173 = vector.broadcast %157 : vector<1x128xf32> to vector<8x128xf32>
    %174 = arith.addf %172, %173 : vector<8x128xf32>
    %175 = arith.truncf %168 : vector<8x128xf32> to vector<8x128xbf16>
    %176 = arith.truncf %171 : vector<8x128xf32> to vector<8x128xbf16>
    %177 = arith.truncf %174 : vector<8x128xf32> to vector<8x128xbf16>
    %cst_96 = arith.constant 0.000000e+00 : f32
    %178 = vector.broadcast %cst_96 : f32 to vector<8x128xf32>
    %c0_97 = arith.constant 0 : index
    %c0_98 = arith.constant 0 : index
    %179 = vector.load %arg32[%c0_97, %c0_98] : memref<8x128xf32, #tpu.memory_space<vmem>>, vector<8x128xf32>
    tpu.vector_store %arg32[%c0_97, %c0_98], %178 {strides = array<i32>} : memref<8x128xf32, #tpu.memory_space<vmem>>, vector<8x128xf32>,
    %180 = vector.extract_strided_slice %175 {offsets = [0, 0], sizes = [8, 8], strides = [1, 1]} : vector<8x128xbf16> to vector<8x8xbf16>
    %181 = vector.extract_strided_slice %176 {offsets = [0, 0], sizes = [8, 8], strides = [1, 1]} : vector<8x128xbf16> to vector<8x8xbf16>
    %cst_99 = arith.constant dense<0.000000e+00> : vector<8x8xf32>
    %182 = tpu.matmul %180, %181, %cst_99 {dimension_numbers = #tpu.dot_dimension_numbers<[1], [1], [0], [0], [0, 0, 1, 0], [], []>} : vector<8x8xbf16>, vector<8x8xbf16>, vector<8x8xf32> -> vector<8x8xf32>
    %183 = vector.broadcast %23 : vector<1x8xf32> to vector<8x8xf32>
    %184 = arith.addf %182, %183 : vector<8x8xf32>
    %cst_100 = arith.constant dense<0xFF800000> : vector<8xf32>
    %185 = vector.multi_reduction <maximumf>, %184, %cst_100 [1] : vector<8x8xf32> to vector<8xf32>
    %186 = vector.shape_cast %185 : vector<8xf32> to vector<8x1xf32>
    %187 = vector.broadcast %186 : vector<8x1xf32> to vector<8x8xf32>
    %188 = arith.subf %184, %187 : vector<8x8xf32>
    %189 = math.exp %188 : vector<8x8xf32>
    %cst_101 = arith.constant dense<0.000000e+00> : vector<8xf32>
    %190 = vector.multi_reduction <add>, %189, %cst_101 [1] : vector<8x8xf32> to vector<8xf32>
    %191 = vector.shape_cast %190 : vector<8xf32> to vector<8x1xf32>
    %192 = tpu.reciprocal %191 {approx = true} : vector<8x1xf32> -> vector<8x1xf32>
    %193 = vector.broadcast %192 : vector<8x1xf32> to vector<8x8xf32>
    %194 = arith.mulf %189, %193 : vector<8x8xf32>
    %195 = arith.truncf %194 : vector<8x8xf32> to vector<8x8xbf16>
    %196 = vector.extract_strided_slice %177 {offsets = [0, 0], sizes = [8, 8], strides = [1, 1]} : vector<8x128xbf16> to vector<8x8xbf16>
    %cst_102 = arith.constant dense<0.000000e+00> : vector<8x8xf32>
    %197 = tpu.matmul %195, %196, %cst_102 {dimension_numbers = #tpu.dot_dimension_numbers<[1], [0], [0], [1], [0, 0, 1, 1], [], []>} : vector<8x8xbf16>, vector<8x8xbf16>, vector<8x8xf32> -> vector<8x8xf32>
    %c0_103 = arith.constant 0 : index
    %c0_104 = arith.constant 0 : index
    %198 = vector.load %arg32[%c0_103, %c0_104] : memref<8x128xf32, #tpu.memory_space<vmem>>, vector<8x8xf32>
    tpu.vector_store %arg32[%c0_103, %c0_104], %197 {strides = array<i32>} : memref<8x128xf32, #tpu.memory_space<vmem>>, vector<8x8xf32>,
    %199 = vector.extract_strided_slice %175 {offsets = [0, 8], sizes = [8, 8], strides = [1, 1]} : vector<8x128xbf16> to vector<8x8xbf16>
    %200 = vector.extract_strided_slice %176 {offsets = [0, 8], sizes = [8, 8], strides = [1, 1]} : vector<8x128xbf16> to vector<8x8xbf16>
    %cst_105 = arith.constant dense<0.000000e+00> : vector<8x8xf32>
    %201 = tpu.matmul %199, %200, %cst_105 {dimension_numbers = #tpu.dot_dimension_numbers<[1], [1], [0], [0], [0, 0, 1, 0], [], []>} : vector<8x8xbf16>, vector<8x8xbf16>, vector<8x8xf32> -> vector<8x8xf32>
    %202 = vector.broadcast %23 : vector<1x8xf32> to vector<8x8xf32>
    %203 = arith.addf %201, %202 : vector<8x8xf32>
    %cst_106 = arith.constant dense<0xFF800000> : vector<8xf32>
    %204 = vector.multi_reduction <maximumf>, %203, %cst_106 [1] : vector<8x8xf32> to vector<8xf32>
    %205 = vector.shape_cast %204 : vector<8xf32> to vector<8x1xf32>
    %206 = vector.broadcast %205 : vector<8x1xf32> to vector<8x8xf32>
    %207 = arith.subf %203, %206 : vector<8x8xf32>
    %208 = math.exp %207 : vector<8x8xf32>
    %cst_107 = arith.constant dense<0.000000e+00> : vector<8xf32>
    %209 = vector.multi_reduction <add>, %208, %cst_107 [1] : vector<8x8xf32> to vector<8xf32>
    %210 = vector.shape_cast %209 : vector<8xf32> to vector<8x1xf32>
    %211 = tpu.reciprocal %210 {approx = true} : vector<8x1xf32> -> vector<8x1xf32>
    %212 = vector.broadcast %211 : vector<8x1xf32> to vector<8x8xf32>
    %213 = arith.mulf %208, %212 : vector<8x8xf32>
    %214 = arith.truncf %213 : vector<8x8xf32> to vector<8x8xbf16>
    %215 = vector.extract_strided_slice %177 {offsets = [0, 8], sizes = [8, 8], strides = [1, 1]} : vector<8x128xbf16> to vector<8x8xbf16>
    %cst_108 = arith.constant dense<0.000000e+00> : vector<8x8xf32>
    %216 = tpu.matmul %214, %215, %cst_108 {dimension_numbers = #tpu.dot_dimension_numbers<[1], [0], [0], [1], [0, 0, 1, 1], [], []>} : vector<8x8xbf16>, vector<8x8xbf16>, vector<8x8xf32> -> vector<8x8xf32>
    %c0_109 = arith.constant 0 : index
    %c8_110 = arith.constant 8 : index
    %217 = vector.load %arg32[%c0_109, %c8_110] : memref<8x128xf32, #tpu.memory_space<vmem>>, vector<8x8xf32>
    tpu.vector_store %arg32[%c0_109, %c8_110], %216 {strides = array<i32>} : memref<8x128xf32, #tpu.memory_space<vmem>>, vector<8x8xf32>,
    %218 = vector.extract_strided_slice %175 {offsets = [0, 16], sizes = [8, 8], strides = [1, 1]} : vector<8x128xbf16> to vector<8x8xbf16>
    %219 = vector.extract_strided_slice %176 {offsets = [0, 16], sizes = [8, 8], strides = [1, 1]} : vector<8x128xbf16> to vector<8x8xbf16>
    %cst_111 = arith.constant dense<0.000000e+00> : vector<8x8xf32>
    %220 = tpu.matmul %218, %219, %cst_111 {dimension_numbers = #tpu.dot_dimension_numbers<[1], [1], [0], [0], [0, 0, 1, 0], [], []>} : vector<8x8xbf16>, vector<8x8xbf16>, vector<8x8xf32> -> vector<8x8xf32>
    %221 = vector.broadcast %23 : vector<1x8xf32> to vector<8x8xf32>
    %222 = arith.addf %220, %221 : vector<8x8xf32>
    %cst_112 = arith.constant dense<0xFF800000> : vector<8xf32>
    %223 = vector.multi_reduction <maximumf>, %222, %cst_112 [1] : vector<8x8xf32> to vector<8xf32>
    %224 = vector.shape_cast %223 : vector<8xf32> to vector<8x1xf32>
    %225 = vector.broadcast %224 : vector<8x1xf32> to vector<8x8xf32>
    %226 = arith.subf %222, %225 : vector<8x8xf32>
    %227 = math.exp %226 : vector<8x8xf32>
    %cst_113 = arith.constant dense<0.000000e+00> : vector<8xf32>
    %228 = vector.multi_reduction <add>, %227, %cst_113 [1] : vector<8x8xf32> to vector<8xf32>
    %229 = vector.shape_cast %228 : vector<8xf32> to vector<8x1xf32>
    %230 = tpu.reciprocal %229 {approx = true} : vector<8x1xf32> -> vector<8x1xf32>
    %231 = vector.broadcast %230 : vector<8x1xf32> to vector<8x8xf32>
    %232 = arith.mulf %227, %231 : vector<8x8xf32>
    %233 = arith.truncf %232 : vector<8x8xf32> to vector<8x8xbf16>
    %234 = vector.extract_strided_slice %177 {offsets = [0, 16], sizes = [8, 8], strides = [1, 1]} : vector<8x128xbf16> to vector<8x8xbf16>
    %cst_114 = arith.constant dense<0.000000e+00> : vector<8x8xf32>
    %235 = tpu.matmul %233, %234, %cst_114 {dimension_numbers = #tpu.dot_dimension_numbers<[1], [0], [0], [1], [0, 0, 1, 1], [], []>} : vector<8x8xbf16>, vector<8x8xbf16>, vector<8x8xf32> -> vector<8x8xf32>
    %c0_115 = arith.constant 0 : index
    %c16_116 = arith.constant 16 : index
    %236 = vector.load %arg32[%c0_115, %c16_116] : memref<8x128xf32, #tpu.memory_space<vmem>>, vector<8x8xf32>
    tpu.vector_store %arg32[%c0_115, %c16_116], %235 {strides = array<i32>} : memref<8x128xf32, #tpu.memory_space<vmem>>, vector<8x8xf32>,
    %237 = vector.extract_strided_slice %175 {offsets = [0, 24], sizes = [8, 8], strides = [1, 1]} : vector<8x128xbf16> to vector<8x8xbf16>
    %238 = vector.extract_strided_slice %176 {offsets = [0, 24], sizes = [8, 8], strides = [1, 1]} : vector<8x128xbf16> to vector<8x8xbf16>
    %cst_117 = arith.constant dense<0.000000e+00> : vector<8x8xf32>
    %239 = tpu.matmul %237, %238, %cst_117 {dimension_numbers = #tpu.dot_dimension_numbers<[1], [1], [0], [0], [0, 0, 1, 0], [], []>} : vector<8x8xbf16>, vector<8x8xbf16>, vector<8x8xf32> -> vector<8x8xf32>
    %240 = vector.broadcast %23 : vector<1x8xf32> to vector<8x8xf32>
    %241 = arith.addf %239, %240 : vector<8x8xf32>
    %cst_118 = arith.constant dense<0xFF800000> : vector<8xf32>
    %242 = vector.multi_reduction <maximumf>, %241, %cst_118 [1] : vector<8x8xf32> to vector<8xf32>
    %243 = vector.shape_cast %242 : vector<8xf32> to vector<8x1xf32>
    %244 = vector.broadcast %243 : vector<8x1xf32> to vector<8x8xf32>
    %245 = arith.subf %241, %244 : vector<8x8xf32>
    %246 = math.exp %245 : vector<8x8xf32>
    %cst_119 = arith.constant dense<0.000000e+00> : vector<8xf32>
    %247 = vector.multi_reduction <add>, %246, %cst_119 [1] : vector<8x8xf32> to vector<8xf32>
    %248 = vector.shape_cast %247 : vector<8xf32> to vector<8x1xf32>
    %249 = tpu.reciprocal %248 {approx = true} : vector<8x1xf32> -> vector<8x1xf32>
    %250 = vector.broadcast %249 : vector<8x1xf32> to vector<8x8xf32>
    %251 = arith.mulf %246, %250 : vector<8x8xf32>
    %252 = arith.truncf %251 : vector<8x8xf32> to vector<8x8xbf16>
    %253 = vector.extract_strided_slice %177 {offsets = [0, 24], sizes = [8, 8], strides = [1, 1]} : vector<8x128xbf16> to vector<8x8xbf16>
    %cst_120 = arith.constant dense<0.000000e+00> : vector<8x8xf32>
    %254 = tpu.matmul %252, %253, %cst_120 {dimension_numbers = #tpu.dot_dimension_numbers<[1], [0], [0], [1], [0, 0, 1, 1], [], []>} : vector<8x8xbf16>, vector<8x8xbf16>, vector<8x8xf32> -> vector<8x8xf32>
    %c0_121 = arith.constant 0 : index
    %c24_122 = arith.constant 24 : index
    %255 = vector.load %arg32[%c0_121, %c24_122] : memref<8x128xf32, #tpu.memory_space<vmem>>, vector<8x8xf32>
    tpu.vector_store %arg32[%c0_121, %c24_122], %254 {strides = array<i32>} : memref<8x128xf32, #tpu.memory_space<vmem>>, vector<8x8xf32>,
    %c0_123 = arith.constant 0 : index
    %c0_124 = arith.constant 0 : index
    %256 = vector.load %arg32[%c0_123, %c0_124] : memref<8x128xf32, #tpu.memory_space<vmem>>, vector<8x128xf32>
    %257 = arith.truncf %256 : vector<8x128xf32> to vector<8x128xbf16>
    %cst_125 = arith.constant dense<0.000000e+00> : vector<8x128xf32>
    %258 = tpu.matmul %257, %158, %cst_125 {dimension_numbers = #tpu.dot_dimension_numbers<[1], [0], [0], [1], [0, 0, 1, 1], [], []>} : vector<8x128xbf16>, vector<128x128xbf16>, vector<8x128xf32> -> vector<8x128xf32>
    %259 = vector.broadcast %159 : vector<1x128xf32> to vector<8x128xf32>
    %260 = arith.addf %258, %259 : vector<8x128xf32>
    %261 = arith.addf %260, %151 : vector<8x128xf32>
    %cst_126 = arith.constant dense<0.000000e+00> : vector<8xf32>
    %262 = vector.multi_reduction <add>, %261, %cst_126 [1] : vector<8x128xf32> to vector<8xf32>
    %263 = vector.shape_cast %262 : vector<8xf32> to vector<8x1xf32>
    %cst_127 = arith.constant 3.125000e-02 : f32
    %264 = vector.broadcast %cst_127 : f32 to vector<8x1xf32>
    %265 = arith.mulf %263, %264 : vector<8x1xf32>
    %266 = arith.mulf %261, %261 : vector<8x128xf32>
    %cst_128 = arith.constant dense<0.000000e+00> : vector<8xf32>
    %267 = vector.multi_reduction <add>, %266, %cst_128 [1] : vector<8x128xf32> to vector<8xf32>
    %268 = vector.shape_cast %267 : vector<8xf32> to vector<8x1xf32>
    %cst_129 = arith.constant 3.125000e-02 : f32
    %269 = vector.broadcast %cst_129 : f32 to vector<8x1xf32>
    %270 = arith.mulf %268, %269 : vector<8x1xf32>
    %271 = arith.mulf %265, %265 : vector<8x1xf32>
    %272 = arith.subf %270, %271 : vector<8x1xf32>
    %273 = vector.broadcast %265 : vector<8x1xf32> to vector<8x128xf32>
    %274 = arith.subf %261, %273 : vector<8x128xf32>
    %cst_130 = arith.constant 9.99999974E-6 : f32
    %275 = vector.broadcast %cst_130 : f32 to vector<8x1xf32>
    %276 = arith.addf %272, %275 : vector<8x1xf32>
    %277 = math.rsqrt %276 : vector<8x1xf32>
    %278 = vector.broadcast %277 : vector<8x1xf32> to vector<8x128xf32>
    %279 = arith.mulf %274, %278 : vector<8x128xf32>
    %280 = vector.broadcast %160 : vector<1x128xf32> to vector<8x128xf32>
    %281 = arith.mulf %279, %280 : vector<8x128xf32>
    %282 = vector.broadcast %161 : vector<1x128xf32> to vector<8x128xf32>
    %283 = arith.addf %281, %282 : vector<8x128xf32>
    %c0_131 = arith.constant 0 : index
    %c0_132 = arith.constant 0 : index
    %284 = vector.load %arg25[%c0_131, %c0_132] : memref<128x128xbf16, #tpu.memory_space<vmem>>, vector<128x128xbf16>
    %c0_133 = arith.constant 0 : index
    %c0_134 = arith.constant 0 : index
    %285 = vector.load %arg26[%c0_133, %c0_134] : memref<1x128xf32, #tpu.memory_space<vmem>>, vector<1x128xf32>
    %c0_135 = arith.constant 0 : index
    %c0_136 = arith.constant 0 : index
    %286 = vector.load %arg27[%c0_135, %c0_136] : memref<128x128xbf16, #tpu.memory_space<vmem>>, vector<128x128xbf16>
    %c0_137 = arith.constant 0 : index
    %c0_138 = arith.constant 0 : index
    %287 = vector.load %arg28[%c0_137, %c0_138] : memref<1x128xf32, #tpu.memory_space<vmem>>, vector<1x128xf32>
    %c0_139 = arith.constant 0 : index
    %c0_140 = arith.constant 0 : index
    %288 = vector.load %arg29[%c0_139, %c0_140] : memref<1x128xf32, #tpu.memory_space<vmem>>, vector<1x128xf32>
    %c0_141 = arith.constant 0 : index
    %c0_142 = arith.constant 0 : index
    %289 = vector.load %arg30[%c0_141, %c0_142] : memref<1x128xf32, #tpu.memory_space<vmem>>, vector<1x128xf32>
    %290 = arith.truncf %283 : vector<8x128xf32> to vector<8x128xbf16>
    %cst_143 = arith.constant dense<0.000000e+00> : vector<8x128xf32>
    %291 = tpu.matmul %290, %284, %cst_143 {dimension_numbers = #tpu.dot_dimension_numbers<[1], [0], [0], [1], [0, 0, 1, 1], [], []>} : vector<8x128xbf16>, vector<128x128xbf16>, vector<8x128xf32> -> vector<8x128xf32>
    %292 = vector.broadcast %285 : vector<1x128xf32> to vector<8x128xf32>
    %293 = arith.addf %291, %292 : vector<8x128xf32>
    %cst_144 = arith.constant 0.000000e+00 : f32
    %294 = vector.broadcast %cst_144 : f32 to vector<8x128xf32>
    %295 = arith.maximumf %293, %294 : vector<8x128xf32>
    %296 = arith.truncf %295 : vector<8x128xf32> to vector<8x128xbf16>
    %cst_145 = arith.constant dense<0.000000e+00> : vector<8x128xf32>
    %297 = tpu.matmul %296, %286, %cst_145 {dimension_numbers = #tpu.dot_dimension_numbers<[1], [0], [0], [1], [0, 0, 1, 1], [], []>} : vector<8x128xbf16>, vector<128x128xbf16>, vector<8x128xf32> -> vector<8x128xf32>
    %298 = vector.broadcast %287 : vector<1x128xf32> to vector<8x128xf32>
    %299 = arith.addf %297, %298 : vector<8x128xf32>
    %300 = arith.addf %299, %283 : vector<8x128xf32>
    %cst_146 = arith.constant dense<0.000000e+00> : vector<8xf32>
    %301 = vector.multi_reduction <add>, %300, %cst_146 [1] : vector<8x128xf32> to vector<8xf32>
    %302 = vector.shape_cast %301 : vector<8xf32> to vector<8x1xf32>
    %cst_147 = arith.constant 3.125000e-02 : f32
    %303 = vector.broadcast %cst_147 : f32 to vector<8x1xf32>
    %304 = arith.mulf %302, %303 : vector<8x1xf32>
    %305 = arith.mulf %300, %300 : vector<8x128xf32>
    %cst_148 = arith.constant dense<0.000000e+00> : vector<8xf32>
    %306 = vector.multi_reduction <add>, %305, %cst_148 [1] : vector<8x128xf32> to vector<8xf32>
    %307 = vector.shape_cast %306 : vector<8xf32> to vector<8x1xf32>
    %cst_149 = arith.constant 3.125000e-02 : f32
    %308 = vector.broadcast %cst_149 : f32 to vector<8x1xf32>
    %309 = arith.mulf %307, %308 : vector<8x1xf32>
    %310 = arith.mulf %304, %304 : vector<8x1xf32>
    %311 = arith.subf %309, %310 : vector<8x1xf32>
    %312 = vector.broadcast %304 : vector<8x1xf32> to vector<8x128xf32>
    %313 = arith.subf %300, %312 : vector<8x128xf32>
    %cst_150 = arith.constant 9.99999974E-6 : f32
    %314 = vector.broadcast %cst_150 : f32 to vector<8x1xf32>
    %315 = arith.addf %311, %314 : vector<8x1xf32>
    %316 = math.rsqrt %315 : vector<8x1xf32>
    %317 = vector.broadcast %316 : vector<8x1xf32> to vector<8x128xf32>
    %318 = arith.mulf %313, %317 : vector<8x128xf32>
    %319 = vector.broadcast %288 : vector<1x128xf32> to vector<8x128xf32>
    %320 = arith.mulf %318, %319 : vector<8x128xf32>
    %321 = vector.broadcast %289 : vector<1x128xf32> to vector<8x128xf32>
    %322 = arith.addf %320, %321 : vector<8x128xf32>
    %c0_151 = arith.constant 0 : index
    %c0_152 = arith.constant 0 : index
    %c0_153 = arith.constant 0 : index
    %323 = vector.load %arg31[%c0_151, %c0_152, %c0_153] : memref<1x8x128xf32, #tpu.memory_space<vmem>>, vector<1x8x128xf32>
    %324 = vector.shape_cast %323 : vector<1x8x128xf32> to vector<8x128xf32>
    %325 = vector.shape_cast %322 : vector<8x128xf32> to vector<1x8x128xf32>
    tpu.vector_store %arg31[%c0_151, %c0_152, %c0_153], %325 {strides = array<i32>} : memref<1x8x128xf32, #tpu.memory_space<vmem>>, vector<1x8x128xf32>,
    return
  }
  func.func @transform_0(%arg0: i32) -> (i32, i32, i32) {
    %c0_i32 = arith.constant 0 : i32
    %c0_i32_0 = arith.constant 0 : i32
    %c0_i32_1 = arith.constant 0 : i32
    return %arg0, %c0_i32, %c0_i32_0 : i32, i32, i32
  }
  func.func @transform_1(%arg0: i32) -> (i32, i32, i32) {
    %c0_i32 = arith.constant 0 : i32
    %c0_i32_0 = arith.constant 0 : i32
    %c0_i32_1 = arith.constant 0 : i32
    return %arg0, %c0_i32, %c0_i32_0 : i32, i32, i32
  }
  func.func @transform_2(%arg0: i32) -> (i32, i32, i32) {
    %c0_i32 = arith.constant 0 : i32
    %c0_i32_0 = arith.constant 0 : i32
    %c0_i32_1 = arith.constant 0 : i32
    return %arg0, %c0_i32, %c0_i32_0 : i32, i32, i32
  }
  func.func @transform_3(%arg0: i32) -> (i32, i32, i32) {
    %c0_i32 = arith.constant 0 : i32
    %c0_i32_0 = arith.constant 0 : i32
    %c0_i32_1 = arith.constant 0 : i32
    return %arg0, %c0_i32, %c0_i32_0 : i32, i32, i32
  }
  func.func @transform_4(%arg0: i32) -> (i32, i32) {
    %c0_i32 = arith.constant 0 : i32
    %c0_i32_0 = arith.constant 0 : i32
    %c0_i32_1 = arith.constant 0 : i32
    return %c0_i32, %c0_i32_0 : i32, i32
  }
  func.func @transform_5(%arg0: i32) -> (i32, i32) {
    %c0_i32 = arith.constant 0 : i32
    %c0_i32_0 = arith.constant 0 : i32
    %c0_i32_1 = arith.constant 0 : i32
    return %c0_i32, %c0_i32_0 : i32, i32
  }
  func.func @transform_6(%arg0: i32) -> (i32, i32) {
    %c0_i32 = arith.constant 0 : i32
    %c0_i32_0 = arith.constant 0 : i32
    %c0_i32_1 = arith.constant 0 : i32
    return %c0_i32, %c0_i32_0 : i32, i32
  }
  func.func @transform_7(%arg0: i32) -> (i32, i32) {
    %c0_i32 = arith.constant 0 : i32
    %c0_i32_0 = arith.constant 0 : i32
    %c0_i32_1 = arith.constant 0 : i32
    return %c0_i32, %c0_i32_0 : i32, i32
  }
  func.func @transform_8(%arg0: i32) -> (i32, i32) {
    %c0_i32 = arith.constant 0 : i32
    %c0_i32_0 = arith.constant 0 : i32
    %c0_i32_1 = arith.constant 0 : i32
    return %c0_i32, %c0_i32_0 : i32, i32
  }
  func.func @transform_9(%arg0: i32) -> (i32, i32) {
    %c0_i32 = arith.constant 0 : i32
    %c0_i32_0 = arith.constant 0 : i32
    %c0_i32_1 = arith.constant 0 : i32
    return %c0_i32, %c0_i32_0 : i32, i32
  }
  func.func @transform_10(%arg0: i32) -> (i32, i32) {
    %c0_i32 = arith.constant 0 : i32
    %c0_i32_0 = arith.constant 0 : i32
    %c0_i32_1 = arith.constant 0 : i32
    return %c0_i32, %c0_i32_0 : i32, i32
  }
  func.func @transform_11(%arg0: i32) -> (i32, i32) {
    %c0_i32 = arith.constant 0 : i32
    %c0_i32_0 = arith.constant 0 : i32
    %c0_i32_1 = arith.constant 0 : i32
    return %c0_i32, %c0_i32_0 : i32, i32
  }
  func.func @transform_12(%arg0: i32) -> (i32, i32) {
    %c0_i32 = arith.constant 0 : i32
    %c0_i32_0 = arith.constant 0 : i32
    %c0_i32_1 = arith.constant 0 : i32
    return %c0_i32, %c0_i32_0 : i32, i32
  }
  func.func @transform_13(%arg0: i32) -> (i32, i32) {
    %c0_i32 = arith.constant 0 : i32
    %c0_i32_0 = arith.constant 0 : i32
    %c0_i32_1 = arith.constant 0 : i32
    return %c0_i32, %c0_i32_0 : i32, i32
  }
  func.func @transform_14(%arg0: i32) -> (i32, i32) {
    %c0_i32 = arith.constant 0 : i32
    %c0_i32_0 = arith.constant 0 : i32
    %c0_i32_1 = arith.constant 0 : i32
    return %c0_i32, %c0_i32_0 : i32, i32
  }
  func.func @transform_15(%arg0: i32) -> (i32, i32) {
    %c0_i32 = arith.constant 0 : i32
    %c0_i32_0 = arith.constant 0 : i32
    %c0_i32_1 = arith.constant 0 : i32
    return %c0_i32, %c0_i32_0 : i32, i32
  }
  func.func @transform_16(%arg0: i32) -> (i32, i32) {
    %c0_i32 = arith.constant 0 : i32
    %c0_i32_0 = arith.constant 0 : i32
    %c0_i32_1 = arith.constant 0 : i32
    return %c0_i32, %c0_i32_0 : i32, i32
  }
  func.func @transform_17(%arg0: i32) -> (i32, i32) {
    %c0_i32 = arith.constant 0 : i32
    %c0_i32_0 = arith.constant 0 : i32
    %c0_i32_1 = arith.constant 0 : i32
    return %c0_i32, %c0_i32_0 : i32, i32
  }
  func.func @transform_18(%arg0: i32) -> (i32, i32) {
    %c0_i32 = arith.constant 0 : i32
    %c0_i32_0 = arith.constant 0 : i32
    %c0_i32_1 = arith.constant 0 : i32
    return %c0_i32, %c0_i32_0 : i32, i32
  }
  func.func @transform_19(%arg0: i32) -> (i32, i32) {
    %c0_i32 = arith.constant 0 : i32
    %c0_i32_0 = arith.constant 0 : i32
    %c0_i32_1 = arith.constant 0 : i32
    return %c0_i32, %c0_i32_0 : i32, i32
  }
  func.func @transform_20(%arg0: i32) -> (i32, i32) {
    %c0_i32 = arith.constant 0 : i32
    %c0_i32_0 = arith.constant 0 : i32
    %c0_i32_1 = arith.constant 0 : i32
    return %c0_i32, %c0_i32_0 : i32, i32
  }
  func.func @transform_21(%arg0: i32) -> (i32, i32) {
    %c0_i32 = arith.constant 0 : i32
    %c0_i32_0 = arith.constant 0 : i32
    %c0_i32_1 = arith.constant 0 : i32
    return %c0_i32, %c0_i32_0 : i32, i32
  }
  func.func @transform_22(%arg0: i32) -> (i32, i32) {
    %c0_i32 = arith.constant 0 : i32
    %c0_i32_0 = arith.constant 0 : i32
    %c0_i32_1 = arith.constant 0 : i32
    return %c0_i32, %c0_i32_0 : i32, i32
  }
  func.func @transform_23(%arg0: i32) -> (i32, i32) {
    %c0_i32 = arith.constant 0 : i32
    %c0_i32_0 = arith.constant 0 : i32
    %c0_i32_1 = arith.constant 0 : i32
    return %c0_i32, %c0_i32_0 : i32, i32
  }
  func.func @transform_24(%arg0: i32) -> (i32, i32) {
    %c0_i32 = arith.constant 0 : i32
    %c0_i32_0 = arith.constant 0 : i32
    %c0_i32_1 = arith.constant 0 : i32
    return %c0_i32, %c0_i32_0 : i32, i32
  }
  func.func @transform_25(%arg0: i32) -> (i32, i32) {
    %c0_i32 = arith.constant 0 : i32
    %c0_i32_0 = arith.constant 0 : i32
    %c0_i32_1 = arith.constant 0 : i32
    return %c0_i32, %c0_i32_0 : i32, i32
  }
  func.func @transform_26(%arg0: i32) -> (i32, i32) {
    %c0_i32 = arith.constant 0 : i32
    %c0_i32_0 = arith.constant 0 : i32
    %c0_i32_1 = arith.constant 0 : i32
    return %c0_i32, %c0_i32_0 : i32, i32
  }
  func.func @transform_27(%arg0: i32) -> (i32, i32) {
    %c0_i32 = arith.constant 0 : i32
    %c0_i32_0 = arith.constant 0 : i32
    %c0_i32_1 = arith.constant 0 : i32
    return %c0_i32, %c0_i32_0 : i32, i32
  }
  func.func @transform_28(%arg0: i32) -> (i32, i32) {
    %c0_i32 = arith.constant 0 : i32
    %c0_i32_0 = arith.constant 0 : i32
    %c0_i32_1 = arith.constant 0 : i32
    return %c0_i32, %c0_i32_0 : i32, i32
  }
  func.func @transform_29(%arg0: i32) -> (i32, i32) {
    %c0_i32 = arith.constant 0 : i32
    %c0_i32_0 = arith.constant 0 : i32
    %c0_i32_1 = arith.constant 0 : i32
    return %c0_i32, %c0_i32_0 : i32, i32
  }
  func.func @transform_30(%arg0: i32) -> (i32, i32, i32) {
    %c0_i32 = arith.constant 0 : i32
    %c0_i32_0 = arith.constant 0 : i32
    %c0_i32_1 = arith.constant 0 : i32
    return %arg0, %c0_i32, %c0_i32_0 : i32, i32, i32
  }
}

module attributes {stable_mosaic.version = 11 : i64} {
  func.func @_encoder_layer_kernel(%arg0: i32, %arg1: memref<1x8x128xf32, #tpu.memory_space<vmem>>, %arg2: memref<1x1x8xf32, #tpu.memory_space<vmem>>, %arg3: memref<128x128xbf16, #tpu.memory_space<vmem>>, %arg4: memref<1x128xf32, #tpu.memory_space<vmem>>, %arg5: memref<128x128xbf16, #tpu.memory_space<vmem>>, %arg6: memref<1x128xf32, #tpu.memory_space<vmem>>, %arg7: memref<128x128xbf16, #tpu.memory_space<vmem>>, %arg8: memref<1x128xf32, #tpu.memory_space<vmem>>, %arg9: memref<128x128xbf16, #tpu.memory_space<vmem>>, %arg10: memref<1x128xf32, #tpu.memory_space<vmem>>, %arg11: memref<1x128xf32, #tpu.memory_space<vmem>>, %arg12: memref<1x128xf32, #tpu.memory_space<vmem>>, %arg13: memref<128x128xbf16, #tpu.memory_space<vmem>>, %arg14: memref<1x128xf32, #tpu.memory_space<vmem>>, %arg15: memref<128x128xbf16, #tpu.memory_space<vmem>>, %arg16: memref<1x128xf32, #tpu.memory_space<vmem>>, %arg17: memref<1x128xf32, #tpu.memory_space<vmem>>, %arg18: memref<1x128xf32, #tpu.memory_space<vmem>>, %arg19: memref<1x8x128xf32, #tpu.memory_space<vmem>>, %arg20: memref<8x128xf32, #tpu.memory_space<vmem>>) attributes {dimension_semantics = [#tpu.dimension_semantics<parallel>], iteration_bounds = array<i64: 2>, scalar_prefetch = 0 : i64, scratch_operands = 1 : i64, tpu.core_type = #tpu.core_type<tc>, window_params = [{transform_indices = @transform_0, window_bounds = array<i64: 1, 8, 128>}, {transform_indices = @transform_1, window_bounds = array<i64: 1, 1, 8>}, {pipeline_mode = #tpu.pipeline_mode<synchronous>, transform_indices = @transform_2, window_bounds = array<i64: 128, 128>}, {pipeline_mode = #tpu.pipeline_mode<synchronous>, transform_indices = @transform_3, window_bounds = array<i64: 1, 128>}, {pipeline_mode = #tpu.pipeline_mode<synchronous>, transform_indices = @transform_4, window_bounds = array<i64: 128, 128>}, {pipeline_mode = #tpu.pipeline_mode<synchronous>, transform_indices = @transform_5, window_bounds = array<i64: 1, 128>}, {pipeline_mode = #tpu.pipeline_mode<synchronous>, transform_indices = @transform_6, window_bounds = array<i64: 128, 128>}, {pipeline_mode = #tpu.pipeline_mode<synchronous>, transform_indices = @transform_7, window_bounds = array<i64: 1, 128>}, {pipeline_mode = #tpu.pipeline_mode<synchronous>, transform_indices = @transform_8, window_bounds = array<i64: 128, 128>}, {pipeline_mode = #tpu.pipeline_mode<synchronous>, transform_indices = @transform_9, window_bounds = array<i64: 1, 128>}, {pipeline_mode = #tpu.pipeline_mode<synchronous>, transform_indices = @transform_10, window_bounds = array<i64: 1, 128>}, {pipeline_mode = #tpu.pipeline_mode<synchronous>, transform_indices = @transform_11, window_bounds = array<i64: 1, 128>}, {pipeline_mode = #tpu.pipeline_mode<synchronous>, transform_indices = @transform_12, window_bounds = array<i64: 128, 128>}, {pipeline_mode = #tpu.pipeline_mode<synchronous>, transform_indices = @transform_13, window_bounds = array<i64: 1, 128>}, {pipeline_mode = #tpu.pipeline_mode<synchronous>, transform_indices = @transform_14, window_bounds = array<i64: 128, 128>}, {pipeline_mode = #tpu.pipeline_mode<synchronous>, transform_indices = @transform_15, window_bounds = array<i64: 1, 128>}, {pipeline_mode = #tpu.pipeline_mode<synchronous>, transform_indices = @transform_16, window_bounds = array<i64: 1, 128>}, {pipeline_mode = #tpu.pipeline_mode<synchronous>, transform_indices = @transform_17, window_bounds = array<i64: 1, 128>}, {transform_indices = @transform_18, window_bounds = array<i64: 1, 8, 128>}]} {
    %c0 = arith.constant 0 : index
    %c0_0 = arith.constant 0 : index
    %c0_1 = arith.constant 0 : index
    %0 = vector.load %arg1[%c0, %c0_0, %c0_1] : memref<1x8x128xf32, #tpu.memory_space<vmem>>, vector<1x8x128xf32>
    %1 = vector.shape_cast %0 : vector<1x8x128xf32> to vector<8x128xf32>
    %c0_2 = arith.constant 0 : index
    %c0_3 = arith.constant 0 : index
    %c0_4 = arith.constant 0 : index
    %2 = vector.load %arg2[%c0_2, %c0_3, %c0_4] : memref<1x1x8xf32, #tpu.memory_space<vmem>>, vector<1x1x8xf32>
    %3 = vector.shape_cast %2 : vector<1x1x8xf32> to vector<1x8xf32>
    %cst = arith.constant 1.000000e+00 : f32
    %4 = vector.broadcast %cst : f32 to vector<1x8xf32>
    %5 = arith.subf %4, %3 : vector<1x8xf32>
    %cst_5 = arith.constant -1.000000e+09 : f32
    %6 = vector.broadcast %cst_5 : f32 to vector<1x8xf32>
    %7 = arith.mulf %5, %6 : vector<1x8xf32>
    %c0_6 = arith.constant 0 : index
    %c0_7 = arith.constant 0 : index
    %8 = vector.load %arg3[%c0_6, %c0_7] : memref<128x128xbf16, #tpu.memory_space<vmem>>, vector<128x128xbf16>
    %c0_8 = arith.constant 0 : index
    %c0_9 = arith.constant 0 : index
    %9 = vector.load %arg4[%c0_8, %c0_9] : memref<1x128xf32, #tpu.memory_space<vmem>>, vector<1x128xf32>
    %c0_10 = arith.constant 0 : index
    %c0_11 = arith.constant 0 : index
    %10 = vector.load %arg5[%c0_10, %c0_11] : memref<128x128xbf16, #tpu.memory_space<vmem>>, vector<128x128xbf16>
    %c0_12 = arith.constant 0 : index
    %c0_13 = arith.constant 0 : index
    %11 = vector.load %arg6[%c0_12, %c0_13] : memref<1x128xf32, #tpu.memory_space<vmem>>, vector<1x128xf32>
    %c0_14 = arith.constant 0 : index
    %c0_15 = arith.constant 0 : index
    %12 = vector.load %arg7[%c0_14, %c0_15] : memref<128x128xbf16, #tpu.memory_space<vmem>>, vector<128x128xbf16>
    %c0_16 = arith.constant 0 : index
    %c0_17 = arith.constant 0 : index
    %13 = vector.load %arg8[%c0_16, %c0_17] : memref<1x128xf32, #tpu.memory_space<vmem>>, vector<1x128xf32>
    %c0_18 = arith.constant 0 : index
    %c0_19 = arith.constant 0 : index
    %14 = vector.load %arg9[%c0_18, %c0_19] : memref<128x128xbf16, #tpu.memory_space<vmem>>, vector<128x128xbf16>
    %c0_20 = arith.constant 0 : index
    %c0_21 = arith.constant 0 : index
    %15 = vector.load %arg10[%c0_20, %c0_21] : memref<1x128xf32, #tpu.memory_space<vmem>>, vector<1x128xf32>
    %c0_22 = arith.constant 0 : index
    %c0_23 = arith.constant 0 : index
    %16 = vector.load %arg11[%c0_22, %c0_23] : memref<1x128xf32, #tpu.memory_space<vmem>>, vector<1x128xf32>
    %c0_24 = arith.constant 0 : index
    %c0_25 = arith.constant 0 : index
    %17 = vector.load %arg12[%c0_24, %c0_25] : memref<1x128xf32, #tpu.memory_space<vmem>>, vector<1x128xf32>
    %18 = arith.truncf %1 : vector<8x128xf32> to vector<8x128xbf16>
    %19 = arith.truncf %1 : vector<8x128xf32> to vector<8x128xbf16>
    %cst_26 = arith.constant dense<0.000000e+00> : vector<8x128xf32>
    %20 = tpu.matmul %18, %8, %cst_26 {dimension_numbers = #tpu.dot_dimension_numbers<[1], [0], [0], [1], [0, 0, 1, 1], [], []>} : vector<8x128xbf16>, vector<128x128xbf16>, vector<8x128xf32> -> vector<8x128xf32>
    %21 = vector.broadcast %9 : vector<1x128xf32> to vector<8x128xf32>
    %22 = arith.addf %20, %21 : vector<8x128xf32>
    %cst_27 = arith.constant 0.353553385 : f32
    %23 = vector.broadcast %cst_27 : f32 to vector<8x128xf32>
    %24 = arith.mulf %22, %23 : vector<8x128xf32>
    %cst_28 = arith.constant dense<0.000000e+00> : vector<8x128xf32>
    %25 = tpu.matmul %19, %10, %cst_28 {dimension_numbers = #tpu.dot_dimension_numbers<[1], [0], [0], [1], [0, 0, 1, 1], [], []>} : vector<8x128xbf16>, vector<128x128xbf16>, vector<8x128xf32> -> vector<8x128xf32>
    %26 = vector.broadcast %11 : vector<1x128xf32> to vector<8x128xf32>
    %27 = arith.addf %25, %26 : vector<8x128xf32>
    %cst_29 = arith.constant dense<0.000000e+00> : vector<8x128xf32>
    %28 = tpu.matmul %19, %12, %cst_29 {dimension_numbers = #tpu.dot_dimension_numbers<[1], [0], [0], [1], [0, 0, 1, 1], [], []>} : vector<8x128xbf16>, vector<128x128xbf16>, vector<8x128xf32> -> vector<8x128xf32>
    %29 = vector.broadcast %13 : vector<1x128xf32> to vector<8x128xf32>
    %30 = arith.addf %28, %29 : vector<8x128xf32>
    %31 = arith.truncf %24 : vector<8x128xf32> to vector<8x128xbf16>
    %32 = arith.truncf %27 : vector<8x128xf32> to vector<8x128xbf16>
    %33 = arith.truncf %30 : vector<8x128xf32> to vector<8x128xbf16>
    %cst_30 = arith.constant 0.000000e+00 : f32
    %34 = vector.broadcast %cst_30 : f32 to vector<8x128xf32>
    %c0_31 = arith.constant 0 : index
    %c0_32 = arith.constant 0 : index
    %35 = vector.load %arg20[%c0_31, %c0_32] : memref<8x128xf32, #tpu.memory_space<vmem>>, vector<8x128xf32>
    tpu.vector_store %arg20[%c0_31, %c0_32], %34 {strides = array<i32>} : memref<8x128xf32, #tpu.memory_space<vmem>>, vector<8x128xf32>,
    %36 = vector.extract_strided_slice %31 {offsets = [0, 0], sizes = [8, 8], strides = [1, 1]} : vector<8x128xbf16> to vector<8x8xbf16>
    %37 = vector.extract_strided_slice %32 {offsets = [0, 0], sizes = [8, 8], strides = [1, 1]} : vector<8x128xbf16> to vector<8x8xbf16>
    %cst_33 = arith.constant dense<0.000000e+00> : vector<8x8xf32>
    %38 = tpu.matmul %36, %37, %cst_33 {dimension_numbers = #tpu.dot_dimension_numbers<[1], [1], [0], [0], [0, 0, 1, 0], [], []>} : vector<8x8xbf16>, vector<8x8xbf16>, vector<8x8xf32> -> vector<8x8xf32>
    %39 = vector.broadcast %7 : vector<1x8xf32> to vector<8x8xf32>
    %40 = arith.addf %38, %39 : vector<8x8xf32>
    %cst_34 = arith.constant dense<0xFF800000> : vector<8xf32>
    %41 = vector.multi_reduction <maximumf>, %40, %cst_34 [1] : vector<8x8xf32> to vector<8xf32>
    %42 = vector.shape_cast %41 : vector<8xf32> to vector<8x1xf32>
    %43 = vector.broadcast %42 : vector<8x1xf32> to vector<8x8xf32>
    %44 = arith.subf %40, %43 : vector<8x8xf32>
    %45 = math.exp %44 : vector<8x8xf32>
    %cst_35 = arith.constant dense<0.000000e+00> : vector<8xf32>
    %46 = vector.multi_reduction <add>, %45, %cst_35 [1] : vector<8x8xf32> to vector<8xf32>
    %47 = vector.shape_cast %46 : vector<8xf32> to vector<8x1xf32>
    %48 = tpu.reciprocal %47 {approx = true} : vector<8x1xf32> -> vector<8x1xf32>
    %49 = vector.broadcast %48 : vector<8x1xf32> to vector<8x8xf32>
    %50 = arith.mulf %45, %49 : vector<8x8xf32>
    %51 = arith.truncf %50 : vector<8x8xf32> to vector<8x8xbf16>
    %52 = vector.extract_strided_slice %33 {offsets = [0, 0], sizes = [8, 8], strides = [1, 1]} : vector<8x128xbf16> to vector<8x8xbf16>
    %cst_36 = arith.constant dense<0.000000e+00> : vector<8x8xf32>
    %53 = tpu.matmul %51, %52, %cst_36 {dimension_numbers = #tpu.dot_dimension_numbers<[1], [0], [0], [1], [0, 0, 1, 1], [], []>} : vector<8x8xbf16>, vector<8x8xbf16>, vector<8x8xf32> -> vector<8x8xf32>
    %c0_37 = arith.constant 0 : index
    %c0_38 = arith.constant 0 : index
    %54 = vector.load %arg20[%c0_37, %c0_38] : memref<8x128xf32, #tpu.memory_space<vmem>>, vector<8x8xf32>
    tpu.vector_store %arg20[%c0_37, %c0_38], %53 {strides = array<i32>} : memref<8x128xf32, #tpu.memory_space<vmem>>, vector<8x8xf32>,
    %55 = vector.extract_strided_slice %31 {offsets = [0, 8], sizes = [8, 8], strides = [1, 1]} : vector<8x128xbf16> to vector<8x8xbf16>
    %56 = vector.extract_strided_slice %32 {offsets = [0, 8], sizes = [8, 8], strides = [1, 1]} : vector<8x128xbf16> to vector<8x8xbf16>
    %cst_39 = arith.constant dense<0.000000e+00> : vector<8x8xf32>
    %57 = tpu.matmul %55, %56, %cst_39 {dimension_numbers = #tpu.dot_dimension_numbers<[1], [1], [0], [0], [0, 0, 1, 0], [], []>} : vector<8x8xbf16>, vector<8x8xbf16>, vector<8x8xf32> -> vector<8x8xf32>
    %58 = vector.broadcast %7 : vector<1x8xf32> to vector<8x8xf32>
    %59 = arith.addf %57, %58 : vector<8x8xf32>
    %cst_40 = arith.constant dense<0xFF800000> : vector<8xf32>
    %60 = vector.multi_reduction <maximumf>, %59, %cst_40 [1] : vector<8x8xf32> to vector<8xf32>
    %61 = vector.shape_cast %60 : vector<8xf32> to vector<8x1xf32>
    %62 = vector.broadcast %61 : vector<8x1xf32> to vector<8x8xf32>
    %63 = arith.subf %59, %62 : vector<8x8xf32>
    %64 = math.exp %63 : vector<8x8xf32>
    %cst_41 = arith.constant dense<0.000000e+00> : vector<8xf32>
    %65 = vector.multi_reduction <add>, %64, %cst_41 [1] : vector<8x8xf32> to vector<8xf32>
    %66 = vector.shape_cast %65 : vector<8xf32> to vector<8x1xf32>
    %67 = tpu.reciprocal %66 {approx = true} : vector<8x1xf32> -> vector<8x1xf32>
    %68 = vector.broadcast %67 : vector<8x1xf32> to vector<8x8xf32>
    %69 = arith.mulf %64, %68 : vector<8x8xf32>
    %70 = arith.truncf %69 : vector<8x8xf32> to vector<8x8xbf16>
    %71 = vector.extract_strided_slice %33 {offsets = [0, 8], sizes = [8, 8], strides = [1, 1]} : vector<8x128xbf16> to vector<8x8xbf16>
    %cst_42 = arith.constant dense<0.000000e+00> : vector<8x8xf32>
    %72 = tpu.matmul %70, %71, %cst_42 {dimension_numbers = #tpu.dot_dimension_numbers<[1], [0], [0], [1], [0, 0, 1, 1], [], []>} : vector<8x8xbf16>, vector<8x8xbf16>, vector<8x8xf32> -> vector<8x8xf32>
    %c0_43 = arith.constant 0 : index
    %c8 = arith.constant 8 : index
    %73 = vector.load %arg20[%c0_43, %c8] : memref<8x128xf32, #tpu.memory_space<vmem>>, vector<8x8xf32>
    tpu.vector_store %arg20[%c0_43, %c8], %72 {strides = array<i32>} : memref<8x128xf32, #tpu.memory_space<vmem>>, vector<8x8xf32>,
    %74 = vector.extract_strided_slice %31 {offsets = [0, 16], sizes = [8, 8], strides = [1, 1]} : vector<8x128xbf16> to vector<8x8xbf16>
    %75 = vector.extract_strided_slice %32 {offsets = [0, 16], sizes = [8, 8], strides = [1, 1]} : vector<8x128xbf16> to vector<8x8xbf16>
    %cst_44 = arith.constant dense<0.000000e+00> : vector<8x8xf32>
    %76 = tpu.matmul %74, %75, %cst_44 {dimension_numbers = #tpu.dot_dimension_numbers<[1], [1], [0], [0], [0, 0, 1, 0], [], []>} : vector<8x8xbf16>, vector<8x8xbf16>, vector<8x8xf32> -> vector<8x8xf32>
    %77 = vector.broadcast %7 : vector<1x8xf32> to vector<8x8xf32>
    %78 = arith.addf %76, %77 : vector<8x8xf32>
    %cst_45 = arith.constant dense<0xFF800000> : vector<8xf32>
    %79 = vector.multi_reduction <maximumf>, %78, %cst_45 [1] : vector<8x8xf32> to vector<8xf32>
    %80 = vector.shape_cast %79 : vector<8xf32> to vector<8x1xf32>
    %81 = vector.broadcast %80 : vector<8x1xf32> to vector<8x8xf32>
    %82 = arith.subf %78, %81 : vector<8x8xf32>
    %83 = math.exp %82 : vector<8x8xf32>
    %cst_46 = arith.constant dense<0.000000e+00> : vector<8xf32>
    %84 = vector.multi_reduction <add>, %83, %cst_46 [1] : vector<8x8xf32> to vector<8xf32>
    %85 = vector.shape_cast %84 : vector<8xf32> to vector<8x1xf32>
    %86 = tpu.reciprocal %85 {approx = true} : vector<8x1xf32> -> vector<8x1xf32>
    %87 = vector.broadcast %86 : vector<8x1xf32> to vector<8x8xf32>
    %88 = arith.mulf %83, %87 : vector<8x8xf32>
    %89 = arith.truncf %88 : vector<8x8xf32> to vector<8x8xbf16>
    %90 = vector.extract_strided_slice %33 {offsets = [0, 16], sizes = [8, 8], strides = [1, 1]} : vector<8x128xbf16> to vector<8x8xbf16>
    %cst_47 = arith.constant dense<0.000000e+00> : vector<8x8xf32>
    %91 = tpu.matmul %89, %90, %cst_47 {dimension_numbers = #tpu.dot_dimension_numbers<[1], [0], [0], [1], [0, 0, 1, 1], [], []>} : vector<8x8xbf16>, vector<8x8xbf16>, vector<8x8xf32> -> vector<8x8xf32>
    %c0_48 = arith.constant 0 : index
    %c16 = arith.constant 16 : index
    %92 = vector.load %arg20[%c0_48, %c16] : memref<8x128xf32, #tpu.memory_space<vmem>>, vector<8x8xf32>
    tpu.vector_store %arg20[%c0_48, %c16], %91 {strides = array<i32>} : memref<8x128xf32, #tpu.memory_space<vmem>>, vector<8x8xf32>,
    %93 = vector.extract_strided_slice %31 {offsets = [0, 24], sizes = [8, 8], strides = [1, 1]} : vector<8x128xbf16> to vector<8x8xbf16>
    %94 = vector.extract_strided_slice %32 {offsets = [0, 24], sizes = [8, 8], strides = [1, 1]} : vector<8x128xbf16> to vector<8x8xbf16>
    %cst_49 = arith.constant dense<0.000000e+00> : vector<8x8xf32>
    %95 = tpu.matmul %93, %94, %cst_49 {dimension_numbers = #tpu.dot_dimension_numbers<[1], [1], [0], [0], [0, 0, 1, 0], [], []>} : vector<8x8xbf16>, vector<8x8xbf16>, vector<8x8xf32> -> vector<8x8xf32>
    %96 = vector.broadcast %7 : vector<1x8xf32> to vector<8x8xf32>
    %97 = arith.addf %95, %96 : vector<8x8xf32>
    %cst_50 = arith.constant dense<0xFF800000> : vector<8xf32>
    %98 = vector.multi_reduction <maximumf>, %97, %cst_50 [1] : vector<8x8xf32> to vector<8xf32>
    %99 = vector.shape_cast %98 : vector<8xf32> to vector<8x1xf32>
    %100 = vector.broadcast %99 : vector<8x1xf32> to vector<8x8xf32>
    %101 = arith.subf %97, %100 : vector<8x8xf32>
    %102 = math.exp %101 : vector<8x8xf32>
    %cst_51 = arith.constant dense<0.000000e+00> : vector<8xf32>
    %103 = vector.multi_reduction <add>, %102, %cst_51 [1] : vector<8x8xf32> to vector<8xf32>
    %104 = vector.shape_cast %103 : vector<8xf32> to vector<8x1xf32>
    %105 = tpu.reciprocal %104 {approx = true} : vector<8x1xf32> -> vector<8x1xf32>
    %106 = vector.broadcast %105 : vector<8x1xf32> to vector<8x8xf32>
    %107 = arith.mulf %102, %106 : vector<8x8xf32>
    %108 = arith.truncf %107 : vector<8x8xf32> to vector<8x8xbf16>
    %109 = vector.extract_strided_slice %33 {offsets = [0, 24], sizes = [8, 8], strides = [1, 1]} : vector<8x128xbf16> to vector<8x8xbf16>
    %cst_52 = arith.constant dense<0.000000e+00> : vector<8x8xf32>
    %110 = tpu.matmul %108, %109, %cst_52 {dimension_numbers = #tpu.dot_dimension_numbers<[1], [0], [0], [1], [0, 0, 1, 1], [], []>} : vector<8x8xbf16>, vector<8x8xbf16>, vector<8x8xf32> -> vector<8x8xf32>
    %c0_53 = arith.constant 0 : index
    %c24 = arith.constant 24 : index
    %111 = vector.load %arg20[%c0_53, %c24] : memref<8x128xf32, #tpu.memory_space<vmem>>, vector<8x8xf32>
    tpu.vector_store %arg20[%c0_53, %c24], %110 {strides = array<i32>} : memref<8x128xf32, #tpu.memory_space<vmem>>, vector<8x8xf32>,
    %c0_54 = arith.constant 0 : index
    %c0_55 = arith.constant 0 : index
    %112 = vector.load %arg20[%c0_54, %c0_55] : memref<8x128xf32, #tpu.memory_space<vmem>>, vector<8x128xf32>
    %113 = arith.truncf %112 : vector<8x128xf32> to vector<8x128xbf16>
    %cst_56 = arith.constant dense<0.000000e+00> : vector<8x128xf32>
    %114 = tpu.matmul %113, %14, %cst_56 {dimension_numbers = #tpu.dot_dimension_numbers<[1], [0], [0], [1], [0, 0, 1, 1], [], []>} : vector<8x128xbf16>, vector<128x128xbf16>, vector<8x128xf32> -> vector<8x128xf32>
    %115 = vector.broadcast %15 : vector<1x128xf32> to vector<8x128xf32>
    %116 = arith.addf %114, %115 : vector<8x128xf32>
    %117 = arith.addf %116, %1 : vector<8x128xf32>
    %cst_57 = arith.constant dense<0.000000e+00> : vector<8xf32>
    %118 = vector.multi_reduction <add>, %117, %cst_57 [1] : vector<8x128xf32> to vector<8xf32>
    %119 = vector.shape_cast %118 : vector<8xf32> to vector<8x1xf32>
    %cst_58 = arith.constant 3.125000e-02 : f32
    %120 = vector.broadcast %cst_58 : f32 to vector<8x1xf32>
    %121 = arith.mulf %119, %120 : vector<8x1xf32>
    %122 = arith.mulf %117, %117 : vector<8x128xf32>
    %cst_59 = arith.constant dense<0.000000e+00> : vector<8xf32>
    %123 = vector.multi_reduction <add>, %122, %cst_59 [1] : vector<8x128xf32> to vector<8xf32>
    %124 = vector.shape_cast %123 : vector<8xf32> to vector<8x1xf32>
    %cst_60 = arith.constant 3.125000e-02 : f32
    %125 = vector.broadcast %cst_60 : f32 to vector<8x1xf32>
    %126 = arith.mulf %124, %125 : vector<8x1xf32>
    %127 = arith.mulf %121, %121 : vector<8x1xf32>
    %128 = arith.subf %126, %127 : vector<8x1xf32>
    %129 = vector.broadcast %121 : vector<8x1xf32> to vector<8x128xf32>
    %130 = arith.subf %117, %129 : vector<8x128xf32>
    %cst_61 = arith.constant 9.99999974E-6 : f32
    %131 = vector.broadcast %cst_61 : f32 to vector<8x1xf32>
    %132 = arith.addf %128, %131 : vector<8x1xf32>
    %133 = math.rsqrt %132 : vector<8x1xf32>
    %134 = vector.broadcast %133 : vector<8x1xf32> to vector<8x128xf32>
    %135 = arith.mulf %130, %134 : vector<8x128xf32>
    %136 = vector.broadcast %16 : vector<1x128xf32> to vector<8x128xf32>
    %137 = arith.mulf %135, %136 : vector<8x128xf32>
    %138 = vector.broadcast %17 : vector<1x128xf32> to vector<8x128xf32>
    %139 = arith.addf %137, %138 : vector<8x128xf32>
    %c0_62 = arith.constant 0 : index
    %c0_63 = arith.constant 0 : index
    %140 = vector.load %arg13[%c0_62, %c0_63] : memref<128x128xbf16, #tpu.memory_space<vmem>>, vector<128x128xbf16>
    %c0_64 = arith.constant 0 : index
    %c0_65 = arith.constant 0 : index
    %141 = vector.load %arg14[%c0_64, %c0_65] : memref<1x128xf32, #tpu.memory_space<vmem>>, vector<1x128xf32>
    %c0_66 = arith.constant 0 : index
    %c0_67 = arith.constant 0 : index
    %142 = vector.load %arg15[%c0_66, %c0_67] : memref<128x128xbf16, #tpu.memory_space<vmem>>, vector<128x128xbf16>
    %c0_68 = arith.constant 0 : index
    %c0_69 = arith.constant 0 : index
    %143 = vector.load %arg16[%c0_68, %c0_69] : memref<1x128xf32, #tpu.memory_space<vmem>>, vector<1x128xf32>
    %c0_70 = arith.constant 0 : index
    %c0_71 = arith.constant 0 : index
    %144 = vector.load %arg17[%c0_70, %c0_71] : memref<1x128xf32, #tpu.memory_space<vmem>>, vector<1x128xf32>
    %c0_72 = arith.constant 0 : index
    %c0_73 = arith.constant 0 : index
    %145 = vector.load %arg18[%c0_72, %c0_73] : memref<1x128xf32, #tpu.memory_space<vmem>>, vector<1x128xf32>
    %146 = arith.truncf %139 : vector<8x128xf32> to vector<8x128xbf16>
    %cst_74 = arith.constant dense<0.000000e+00> : vector<8x128xf32>
    %147 = tpu.matmul %146, %140, %cst_74 {dimension_numbers = #tpu.dot_dimension_numbers<[1], [0], [0], [1], [0, 0, 1, 1], [], []>} : vector<8x128xbf16>, vector<128x128xbf16>, vector<8x128xf32> -> vector<8x128xf32>
    %148 = vector.broadcast %141 : vector<1x128xf32> to vector<8x128xf32>
    %149 = arith.addf %147, %148 : vector<8x128xf32>
    %cst_75 = arith.constant 0.000000e+00 : f32
    %150 = vector.broadcast %cst_75 : f32 to vector<8x128xf32>
    %151 = arith.maximumf %149, %150 : vector<8x128xf32>
    %152 = arith.truncf %151 : vector<8x128xf32> to vector<8x128xbf16>
    %cst_76 = arith.constant dense<0.000000e+00> : vector<8x128xf32>
    %153 = tpu.matmul %152, %142, %cst_76 {dimension_numbers = #tpu.dot_dimension_numbers<[1], [0], [0], [1], [0, 0, 1, 1], [], []>} : vector<8x128xbf16>, vector<128x128xbf16>, vector<8x128xf32> -> vector<8x128xf32>
    %154 = vector.broadcast %143 : vector<1x128xf32> to vector<8x128xf32>
    %155 = arith.addf %153, %154 : vector<8x128xf32>
    %156 = arith.addf %155, %139 : vector<8x128xf32>
    %cst_77 = arith.constant dense<0.000000e+00> : vector<8xf32>
    %157 = vector.multi_reduction <add>, %156, %cst_77 [1] : vector<8x128xf32> to vector<8xf32>
    %158 = vector.shape_cast %157 : vector<8xf32> to vector<8x1xf32>
    %cst_78 = arith.constant 3.125000e-02 : f32
    %159 = vector.broadcast %cst_78 : f32 to vector<8x1xf32>
    %160 = arith.mulf %158, %159 : vector<8x1xf32>
    %161 = arith.mulf %156, %156 : vector<8x128xf32>
    %cst_79 = arith.constant dense<0.000000e+00> : vector<8xf32>
    %162 = vector.multi_reduction <add>, %161, %cst_79 [1] : vector<8x128xf32> to vector<8xf32>
    %163 = vector.shape_cast %162 : vector<8xf32> to vector<8x1xf32>
    %cst_80 = arith.constant 3.125000e-02 : f32
    %164 = vector.broadcast %cst_80 : f32 to vector<8x1xf32>
    %165 = arith.mulf %163, %164 : vector<8x1xf32>
    %166 = arith.mulf %160, %160 : vector<8x1xf32>
    %167 = arith.subf %165, %166 : vector<8x1xf32>
    %168 = vector.broadcast %160 : vector<8x1xf32> to vector<8x128xf32>
    %169 = arith.subf %156, %168 : vector<8x128xf32>
    %cst_81 = arith.constant 9.99999974E-6 : f32
    %170 = vector.broadcast %cst_81 : f32 to vector<8x1xf32>
    %171 = arith.addf %167, %170 : vector<8x1xf32>
    %172 = math.rsqrt %171 : vector<8x1xf32>
    %173 = vector.broadcast %172 : vector<8x1xf32> to vector<8x128xf32>
    %174 = arith.mulf %169, %173 : vector<8x128xf32>
    %175 = vector.broadcast %144 : vector<1x128xf32> to vector<8x128xf32>
    %176 = arith.mulf %174, %175 : vector<8x128xf32>
    %177 = vector.broadcast %145 : vector<1x128xf32> to vector<8x128xf32>
    %178 = arith.addf %176, %177 : vector<8x128xf32>
    %c0_82 = arith.constant 0 : index
    %c0_83 = arith.constant 0 : index
    %c0_84 = arith.constant 0 : index
    %179 = vector.load %arg19[%c0_82, %c0_83, %c0_84] : memref<1x8x128xf32, #tpu.memory_space<vmem>>, vector<1x8x128xf32>
    %180 = vector.shape_cast %179 : vector<1x8x128xf32> to vector<8x128xf32>
    %181 = vector.shape_cast %178 : vector<8x128xf32> to vector<1x8x128xf32>
    tpu.vector_store %arg19[%c0_82, %c0_83, %c0_84], %181 {strides = array<i32>} : memref<1x8x128xf32, #tpu.memory_space<vmem>>, vector<1x8x128xf32>,
    return
  }
  func.func @transform_0(%arg0: i32) -> (i32, i32, i32) {
    %c0_i32 = arith.constant 0 : i32
    %c0_i32_0 = arith.constant 0 : i32
    %c0_i32_1 = arith.constant 0 : i32
    return %arg0, %c0_i32, %c0_i32_0 : i32, i32, i32
  }
  func.func @transform_1(%arg0: i32) -> (i32, i32, i32) {
    %c0_i32 = arith.constant 0 : i32
    %c0_i32_0 = arith.constant 0 : i32
    %c0_i32_1 = arith.constant 0 : i32
    return %arg0, %c0_i32, %c0_i32_0 : i32, i32, i32
  }
  func.func @transform_2(%arg0: i32) -> (i32, i32) {
    %c0_i32 = arith.constant 0 : i32
    %c0_i32_0 = arith.constant 0 : i32
    %c0_i32_1 = arith.constant 0 : i32
    return %c0_i32, %c0_i32_0 : i32, i32
  }
  func.func @transform_3(%arg0: i32) -> (i32, i32) {
    %c0_i32 = arith.constant 0 : i32
    %c0_i32_0 = arith.constant 0 : i32
    %c0_i32_1 = arith.constant 0 : i32
    return %c0_i32, %c0_i32_0 : i32, i32
  }
  func.func @transform_4(%arg0: i32) -> (i32, i32) {
    %c0_i32 = arith.constant 0 : i32
    %c0_i32_0 = arith.constant 0 : i32
    %c0_i32_1 = arith.constant 0 : i32
    return %c0_i32, %c0_i32_0 : i32, i32
  }
  func.func @transform_5(%arg0: i32) -> (i32, i32) {
    %c0_i32 = arith.constant 0 : i32
    %c0_i32_0 = arith.constant 0 : i32
    %c0_i32_1 = arith.constant 0 : i32
    return %c0_i32, %c0_i32_0 : i32, i32
  }
  func.func @transform_6(%arg0: i32) -> (i32, i32) {
    %c0_i32 = arith.constant 0 : i32
    %c0_i32_0 = arith.constant 0 : i32
    %c0_i32_1 = arith.constant 0 : i32
    return %c0_i32, %c0_i32_0 : i32, i32
  }
  func.func @transform_7(%arg0: i32) -> (i32, i32) {
    %c0_i32 = arith.constant 0 : i32
    %c0_i32_0 = arith.constant 0 : i32
    %c0_i32_1 = arith.constant 0 : i32
    return %c0_i32, %c0_i32_0 : i32, i32
  }
  func.func @transform_8(%arg0: i32) -> (i32, i32) {
    %c0_i32 = arith.constant 0 : i32
    %c0_i32_0 = arith.constant 0 : i32
    %c0_i32_1 = arith.constant 0 : i32
    return %c0_i32, %c0_i32_0 : i32, i32
  }
  func.func @transform_9(%arg0: i32) -> (i32, i32) {
    %c0_i32 = arith.constant 0 : i32
    %c0_i32_0 = arith.constant 0 : i32
    %c0_i32_1 = arith.constant 0 : i32
    return %c0_i32, %c0_i32_0 : i32, i32
  }
  func.func @transform_10(%arg0: i32) -> (i32, i32) {
    %c0_i32 = arith.constant 0 : i32
    %c0_i32_0 = arith.constant 0 : i32
    %c0_i32_1 = arith.constant 0 : i32
    return %c0_i32, %c0_i32_0 : i32, i32
  }
  func.func @transform_11(%arg0: i32) -> (i32, i32) {
    %c0_i32 = arith.constant 0 : i32
    %c0_i32_0 = arith.constant 0 : i32
    %c0_i32_1 = arith.constant 0 : i32
    return %c0_i32, %c0_i32_0 : i32, i32
  }
  func.func @transform_12(%arg0: i32) -> (i32, i32) {
    %c0_i32 = arith.constant 0 : i32
    %c0_i32_0 = arith.constant 0 : i32
    %c0_i32_1 = arith.constant 0 : i32
    return %c0_i32, %c0_i32_0 : i32, i32
  }
  func.func @transform_13(%arg0: i32) -> (i32, i32) {
    %c0_i32 = arith.constant 0 : i32
    %c0_i32_0 = arith.constant 0 : i32
    %c0_i32_1 = arith.constant 0 : i32
    return %c0_i32, %c0_i32_0 : i32, i32
  }
  func.func @transform_14(%arg0: i32) -> (i32, i32) {
    %c0_i32 = arith.constant 0 : i32
    %c0_i32_0 = arith.constant 0 : i32
    %c0_i32_1 = arith.constant 0 : i32
    return %c0_i32, %c0_i32_0 : i32, i32
  }
  func.func @transform_15(%arg0: i32) -> (i32, i32) {
    %c0_i32 = arith.constant 0 : i32
    %c0_i32_0 = arith.constant 0 : i32
    %c0_i32_1 = arith.constant 0 : i32
    return %c0_i32, %c0_i32_0 : i32, i32
  }
  func.func @transform_16(%arg0: i32) -> (i32, i32) {
    %c0_i32 = arith.constant 0 : i32
    %c0_i32_0 = arith.constant 0 : i32
    %c0_i32_1 = arith.constant 0 : i32
    return %c0_i32, %c0_i32_0 : i32, i32
  }
  func.func @transform_17(%arg0: i32) -> (i32, i32) {
    %c0_i32 = arith.constant 0 : i32
    %c0_i32_0 = arith.constant 0 : i32
    %c0_i32_1 = arith.constant 0 : i32
    return %c0_i32, %c0_i32_0 : i32, i32
  }
  func.func @transform_18(%arg0: i32) -> (i32, i32, i32) {
    %c0_i32 = arith.constant 0 : i32
    %c0_i32_0 = arith.constant 0 : i32
    %c0_i32_1 = arith.constant 0 : i32
    return %arg0, %c0_i32, %c0_i32_0 : i32, i32, i32
  }
}

module attributes {stable_mosaic.version = 11 : i64} {
  func.func @_decoder_layer_kernel(%arg0: i32, %arg1: memref<1x8x128xf32, #tpu.memory_space<vmem>>, %arg2: memref<1x1x8xf32, #tpu.memory_space<vmem>>, %arg3: memref<1x8x128xf32, #tpu.memory_space<vmem>>, %arg4: memref<1x1x8xf32, #tpu.memory_space<vmem>>, %arg5: memref<128x128xbf16, #tpu.memory_space<vmem>>, %arg6: memref<1x128xf32, #tpu.memory_space<vmem>>, %arg7: memref<128x128xbf16, #tpu.memory_space<vmem>>, %arg8: memref<1x128xf32, #tpu.memory_space<vmem>>, %arg9: memref<128x128xbf16, #tpu.memory_space<vmem>>, %arg10: memref<1x128xf32, #tpu.memory_space<vmem>>, %arg11: memref<128x128xbf16, #tpu.memory_space<vmem>>, %arg12: memref<1x128xf32, #tpu.memory_space<vmem>>, %arg13: memref<1x128xf32, #tpu.memory_space<vmem>>, %arg14: memref<1x128xf32, #tpu.memory_space<vmem>>, %arg15: memref<128x128xbf16, #tpu.memory_space<vmem>>, %arg16: memref<1x128xf32, #tpu.memory_space<vmem>>, %arg17: memref<128x128xbf16, #tpu.memory_space<vmem>>, %arg18: memref<1x128xf32, #tpu.memory_space<vmem>>, %arg19: memref<128x128xbf16, #tpu.memory_space<vmem>>, %arg20: memref<1x128xf32, #tpu.memory_space<vmem>>, %arg21: memref<128x128xbf16, #tpu.memory_space<vmem>>, %arg22: memref<1x128xf32, #tpu.memory_space<vmem>>, %arg23: memref<1x128xf32, #tpu.memory_space<vmem>>, %arg24: memref<1x128xf32, #tpu.memory_space<vmem>>, %arg25: memref<128x128xbf16, #tpu.memory_space<vmem>>, %arg26: memref<1x128xf32, #tpu.memory_space<vmem>>, %arg27: memref<128x128xbf16, #tpu.memory_space<vmem>>, %arg28: memref<1x128xf32, #tpu.memory_space<vmem>>, %arg29: memref<1x128xf32, #tpu.memory_space<vmem>>, %arg30: memref<1x128xf32, #tpu.memory_space<vmem>>, %arg31: memref<1x8x128xf32, #tpu.memory_space<vmem>>, %arg32: memref<8x128xf32, #tpu.memory_space<vmem>>) attributes {dimension_semantics = [#tpu.dimension_semantics<parallel>], iteration_bounds = array<i64: 2>, scalar_prefetch = 0 : i64, scratch_operands = 1 : i64, tpu.core_type = #tpu.core_type<tc>, window_params = [{transform_indices = @transform_0, window_bounds = array<i64: 1, 8, 128>}, {transform_indices = @transform_1, window_bounds = array<i64: 1, 1, 8>}, {transform_indices = @transform_2, window_bounds = array<i64: 1, 8, 128>}, {transform_indices = @transform_3, window_bounds = array<i64: 1, 1, 8>}, {pipeline_mode = #tpu.pipeline_mode<synchronous>, transform_indices = @transform_4, window_bounds = array<i64: 128, 128>}, {pipeline_mode = #tpu.pipeline_mode<synchronous>, transform_indices = @transform_5, window_bounds = array<i64: 1, 128>}, {pipeline_mode = #tpu.pipeline_mode<synchronous>, transform_indices = @transform_6, window_bounds = array<i64: 128, 128>}, {pipeline_mode = #tpu.pipeline_mode<synchronous>, transform_indices = @transform_7, window_bounds = array<i64: 1, 128>}, {pipeline_mode = #tpu.pipeline_mode<synchronous>, transform_indices = @transform_8, window_bounds = array<i64: 128, 128>}, {pipeline_mode = #tpu.pipeline_mode<synchronous>, transform_indices = @transform_9, window_bounds = array<i64: 1, 128>}, {pipeline_mode = #tpu.pipeline_mode<synchronous>, transform_indices = @transform_10, window_bounds = array<i64: 128, 128>}, {pipeline_mode = #tpu.pipeline_mode<synchronous>, transform_indices = @transform_11, window_bounds = array<i64: 1, 128>}, {pipeline_mode = #tpu.pipeline_mode<synchronous>, transform_indices = @transform_12, window_bounds = array<i64: 1, 128>}, {pipeline_mode = #tpu.pipeline_mode<synchronous>, transform_indices = @transform_13, window_bounds = array<i64: 1, 128>}, {pipeline_mode = #tpu.pipeline_mode<synchronous>, transform_indices = @transform_14, window_bounds = array<i64: 128, 128>}, {pipeline_mode = #tpu.pipeline_mode<synchronous>, transform_indices = @transform_15, window_bounds = array<i64: 1, 128>}, {pipeline_mode = #tpu.pipeline_mode<synchronous>, transform_indices = @transform_16, window_bounds = array<i64: 128, 128>}, {pipeline_mode = #tpu.pipeline_mode<synchronous>, transform_indices = @transform_17, window_bounds = array<i64: 1, 128>}, {pipeline_mode = #tpu.pipeline_mode<synchronous>, transform_indices = @transform_18, window_bounds = array<i64: 128, 128>}, {pipeline_mode = #tpu.pipeline_mode<synchronous>, transform_indices = @transform_19, window_bounds = array<i64: 1, 128>}, {pipeline_mode = #tpu.pipeline_mode<synchronous>, transform_indices = @transform_20, window_bounds = array<i64: 128, 128>}, {pipeline_mode = #tpu.pipeline_mode<synchronous>, transform_indices = @transform_21, window_bounds = array<i64: 1, 128>}, {pipeline_mode = #tpu.pipeline_mode<synchronous>, transform_indices = @transform_22, window_bounds = array<i64: 1, 128>}, {pipeline_mode = #tpu.pipeline_mode<synchronous>, transform_indices = @transform_23, window_bounds = array<i64: 1, 128>}, {pipeline_mode = #tpu.pipeline_mode<synchronous>, transform_indices = @transform_24, window_bounds = array<i64: 128, 128>}, {pipeline_mode = #tpu.pipeline_mode<synchronous>, transform_indices = @transform_25, window_bounds = array<i64: 1, 128>}, {pipeline_mode = #tpu.pipeline_mode<synchronous>, transform_indices = @transform_26, window_bounds = array<i64: 128, 128>}, {pipeline_mode = #tpu.pipeline_mode<synchronous>, transform_indices = @transform_27, window_bounds = array<i64: 1, 128>}, {pipeline_mode = #tpu.pipeline_mode<synchronous>, transform_indices = @transform_28, window_bounds = array<i64: 1, 128>}, {pipeline_mode = #tpu.pipeline_mode<synchronous>, transform_indices = @transform_29, window_bounds = array<i64: 1, 128>}, {transform_indices = @transform_30, window_bounds = array<i64: 1, 8, 128>}]} {
    %c0 = arith.constant 0 : index
    %c0_0 = arith.constant 0 : index
    %c0_1 = arith.constant 0 : index
    %0 = vector.load %arg1[%c0, %c0_0, %c0_1] : memref<1x8x128xf32, #tpu.memory_space<vmem>>, vector<1x8x128xf32>
    %1 = vector.shape_cast %0 : vector<1x8x128xf32> to vector<8x128xf32>
    %c0_2 = arith.constant 0 : index
    %c0_3 = arith.constant 0 : index
    %c0_4 = arith.constant 0 : index
    %2 = vector.load %arg3[%c0_2, %c0_3, %c0_4] : memref<1x8x128xf32, #tpu.memory_space<vmem>>, vector<1x8x128xf32>
    %3 = vector.shape_cast %2 : vector<1x8x128xf32> to vector<8x128xf32>
    %4 = tpu.iota {dimensions = array<i32: 0>} : vector<8x8xi32>
    %5 = tpu.iota {dimensions = array<i32: 1>} : vector<8x8xi32>
    %c0_5 = arith.constant 0 : index
    %c0_6 = arith.constant 0 : index
    %c0_7 = arith.constant 0 : index
    %6 = vector.load %arg2[%c0_5, %c0_6, %c0_7] : memref<1x1x8xf32, #tpu.memory_space<vmem>>, vector<1x1x8xf32>
    %7 = vector.shape_cast %6 : vector<1x1x8xf32> to vector<1x8xf32>
    %cst = arith.constant 1.000000e+00 : f32
    %8 = vector.broadcast %cst : f32 to vector<1x8xf32>
    %9 = arith.subf %8, %7 : vector<1x8xf32>
    %cst_8 = arith.constant -1.000000e+09 : f32
    %10 = vector.broadcast %cst_8 : f32 to vector<1x8xf32>
    %11 = arith.mulf %9, %10 : vector<1x8xf32>
    %12 = arith.cmpi sle, %5, %4 : vector<8x8xi32>
    %cst_9 = arith.constant 0.000000e+00 : f32
    %cst_10 = arith.constant -1.000000e+09 : f32
    %13 = vector.broadcast %cst_9 : f32 to vector<8x8xf32>
    %14 = vector.broadcast %cst_10 : f32 to vector<8x8xf32>
    %15 = arith.select %12, %13, %14 : vector<8x8xi1>, vector<8x8xf32>
    %16 = vector.broadcast %11 : vector<1x8xf32> to vector<8x8xf32>
    %17 = arith.addf %16, %15 : vector<8x8xf32>
    %c0_11 = arith.constant 0 : index
    %c0_12 = arith.constant 0 : index
    %c0_13 = arith.constant 0 : index
    %18 = vector.load %arg4[%c0_11, %c0_12, %c0_13] : memref<1x1x8xf32, #tpu.memory_space<vmem>>, vector<1x1x8xf32>
    %19 = vector.shape_cast %18 : vector<1x1x8xf32> to vector<1x8xf32>
    %cst_14 = arith.constant 1.000000e+00 : f32
    %20 = vector.broadcast %cst_14 : f32 to vector<1x8xf32>
    %21 = arith.subf %20, %19 : vector<1x8xf32>
    %cst_15 = arith.constant -1.000000e+09 : f32
    %22 = vector.broadcast %cst_15 : f32 to vector<1x8xf32>
    %23 = arith.mulf %21, %22 : vector<1x8xf32>
    %c0_16 = arith.constant 0 : index
    %c0_17 = arith.constant 0 : index
    %24 = vector.load %arg5[%c0_16, %c0_17] : memref<128x128xbf16, #tpu.memory_space<vmem>>, vector<128x128xbf16>
    %c0_18 = arith.constant 0 : index
    %c0_19 = arith.constant 0 : index
    %25 = vector.load %arg6[%c0_18, %c0_19] : memref<1x128xf32, #tpu.memory_space<vmem>>, vector<1x128xf32>
    %c0_20 = arith.constant 0 : index
    %c0_21 = arith.constant 0 : index
    %26 = vector.load %arg7[%c0_20, %c0_21] : memref<128x128xbf16, #tpu.memory_space<vmem>>, vector<128x128xbf16>
    %c0_22 = arith.constant 0 : index
    %c0_23 = arith.constant 0 : index
    %27 = vector.load %arg8[%c0_22, %c0_23] : memref<1x128xf32, #tpu.memory_space<vmem>>, vector<1x128xf32>
    %c0_24 = arith.constant 0 : index
    %c0_25 = arith.constant 0 : index
    %28 = vector.load %arg9[%c0_24, %c0_25] : memref<128x128xbf16, #tpu.memory_space<vmem>>, vector<128x128xbf16>
    %c0_26 = arith.constant 0 : index
    %c0_27 = arith.constant 0 : index
    %29 = vector.load %arg10[%c0_26, %c0_27] : memref<1x128xf32, #tpu.memory_space<vmem>>, vector<1x128xf32>
    %c0_28 = arith.constant 0 : index
    %c0_29 = arith.constant 0 : index
    %30 = vector.load %arg11[%c0_28, %c0_29] : memref<128x128xbf16, #tpu.memory_space<vmem>>, vector<128x128xbf16>
    %c0_30 = arith.constant 0 : index
    %c0_31 = arith.constant 0 : index
    %31 = vector.load %arg12[%c0_30, %c0_31] : memref<1x128xf32, #tpu.memory_space<vmem>>, vector<1x128xf32>
    %c0_32 = arith.constant 0 : index
    %c0_33 = arith.constant 0 : index
    %32 = vector.load %arg13[%c0_32, %c0_33] : memref<1x128xf32, #tpu.memory_space<vmem>>, vector<1x128xf32>
    %c0_34 = arith.constant 0 : index
    %c0_35 = arith.constant 0 : index
    %33 = vector.load %arg14[%c0_34, %c0_35] : memref<1x128xf32, #tpu.memory_space<vmem>>, vector<1x128xf32>
    %34 = arith.truncf %1 : vector<8x128xf32> to vector<8x128xbf16>
    %35 = arith.truncf %1 : vector<8x128xf32> to vector<8x128xbf16>
    %cst_36 = arith.constant dense<0.000000e+00> : vector<8x128xf32>
    %36 = tpu.matmul %34, %24, %cst_36 {dimension_numbers = #tpu.dot_dimension_numbers<[1], [0], [0], [1], [0, 0, 1, 1], [], []>} : vector<8x128xbf16>, vector<128x128xbf16>, vector<8x128xf32> -> vector<8x128xf32>
    %37 = vector.broadcast %25 : vector<1x128xf32> to vector<8x128xf32>
    %38 = arith.addf %36, %37 : vector<8x128xf32>
    %cst_37 = arith.constant 0.353553385 : f32
    %39 = vector.broadcast %cst_37 : f32 to vector<8x128xf32>
    %40 = arith.mulf %38, %39 : vector<8x128xf32>
    %cst_38 = arith.constant dense<0.000000e+00> : vector<8x128xf32>
    %41 = tpu.matmul %35, %26, %cst_38 {dimension_numbers = #tpu.dot_dimension_numbers<[1], [0], [0], [1], [0, 0, 1, 1], [], []>} : vector<8x128xbf16>, vector<128x128xbf16>, vector<8x128xf32> -> vector<8x128xf32>
    %42 = vector.broadcast %27 : vector<1x128xf32> to vector<8x128xf32>
    %43 = arith.addf %41, %42 : vector<8x128xf32>
    %cst_39 = arith.constant dense<0.000000e+00> : vector<8x128xf32>
    %44 = tpu.matmul %35, %28, %cst_39 {dimension_numbers = #tpu.dot_dimension_numbers<[1], [0], [0], [1], [0, 0, 1, 1], [], []>} : vector<8x128xbf16>, vector<128x128xbf16>, vector<8x128xf32> -> vector<8x128xf32>
    %45 = vector.broadcast %29 : vector<1x128xf32> to vector<8x128xf32>
    %46 = arith.addf %44, %45 : vector<8x128xf32>
    %47 = arith.truncf %40 : vector<8x128xf32> to vector<8x128xbf16>
    %48 = arith.truncf %43 : vector<8x128xf32> to vector<8x128xbf16>
    %49 = arith.truncf %46 : vector<8x128xf32> to vector<8x128xbf16>
    %cst_40 = arith.constant 0.000000e+00 : f32
    %50 = vector.broadcast %cst_40 : f32 to vector<8x128xf32>
    %c0_41 = arith.constant 0 : index
    %c0_42 = arith.constant 0 : index
    %51 = vector.load %arg32[%c0_41, %c0_42] : memref<8x128xf32, #tpu.memory_space<vmem>>, vector<8x128xf32>
    tpu.vector_store %arg32[%c0_41, %c0_42], %50 {strides = array<i32>} : memref<8x128xf32, #tpu.memory_space<vmem>>, vector<8x128xf32>,
    %52 = vector.extract_strided_slice %47 {offsets = [0, 0], sizes = [8, 8], strides = [1, 1]} : vector<8x128xbf16> to vector<8x8xbf16>
    %53 = vector.extract_strided_slice %48 {offsets = [0, 0], sizes = [8, 8], strides = [1, 1]} : vector<8x128xbf16> to vector<8x8xbf16>
    %cst_43 = arith.constant dense<0.000000e+00> : vector<8x8xf32>
    %54 = tpu.matmul %52, %53, %cst_43 {dimension_numbers = #tpu.dot_dimension_numbers<[1], [1], [0], [0], [0, 0, 1, 0], [], []>} : vector<8x8xbf16>, vector<8x8xbf16>, vector<8x8xf32> -> vector<8x8xf32>
    %55 = arith.addf %54, %17 : vector<8x8xf32>
    %cst_44 = arith.constant dense<0xFF800000> : vector<8xf32>
    %56 = vector.multi_reduction <maximumf>, %55, %cst_44 [1] : vector<8x8xf32> to vector<8xf32>
    %57 = vector.shape_cast %56 : vector<8xf32> to vector<8x1xf32>
    %58 = vector.broadcast %57 : vector<8x1xf32> to vector<8x8xf32>
    %59 = arith.subf %55, %58 : vector<8x8xf32>
    %60 = math.exp %59 : vector<8x8xf32>
    %cst_45 = arith.constant dense<0.000000e+00> : vector<8xf32>
    %61 = vector.multi_reduction <add>, %60, %cst_45 [1] : vector<8x8xf32> to vector<8xf32>
    %62 = vector.shape_cast %61 : vector<8xf32> to vector<8x1xf32>
    %63 = tpu.reciprocal %62 {approx = true} : vector<8x1xf32> -> vector<8x1xf32>
    %64 = vector.broadcast %63 : vector<8x1xf32> to vector<8x8xf32>
    %65 = arith.mulf %60, %64 : vector<8x8xf32>
    %66 = arith.truncf %65 : vector<8x8xf32> to vector<8x8xbf16>
    %67 = vector.extract_strided_slice %49 {offsets = [0, 0], sizes = [8, 8], strides = [1, 1]} : vector<8x128xbf16> to vector<8x8xbf16>
    %cst_46 = arith.constant dense<0.000000e+00> : vector<8x8xf32>
    %68 = tpu.matmul %66, %67, %cst_46 {dimension_numbers = #tpu.dot_dimension_numbers<[1], [0], [0], [1], [0, 0, 1, 1], [], []>} : vector<8x8xbf16>, vector<8x8xbf16>, vector<8x8xf32> -> vector<8x8xf32>
    %c0_47 = arith.constant 0 : index
    %c0_48 = arith.constant 0 : index
    %69 = vector.load %arg32[%c0_47, %c0_48] : memref<8x128xf32, #tpu.memory_space<vmem>>, vector<8x8xf32>
    tpu.vector_store %arg32[%c0_47, %c0_48], %68 {strides = array<i32>} : memref<8x128xf32, #tpu.memory_space<vmem>>, vector<8x8xf32>,
    %70 = vector.extract_strided_slice %47 {offsets = [0, 8], sizes = [8, 8], strides = [1, 1]} : vector<8x128xbf16> to vector<8x8xbf16>
    %71 = vector.extract_strided_slice %48 {offsets = [0, 8], sizes = [8, 8], strides = [1, 1]} : vector<8x128xbf16> to vector<8x8xbf16>
    %cst_49 = arith.constant dense<0.000000e+00> : vector<8x8xf32>
    %72 = tpu.matmul %70, %71, %cst_49 {dimension_numbers = #tpu.dot_dimension_numbers<[1], [1], [0], [0], [0, 0, 1, 0], [], []>} : vector<8x8xbf16>, vector<8x8xbf16>, vector<8x8xf32> -> vector<8x8xf32>
    %73 = arith.addf %72, %17 : vector<8x8xf32>
    %cst_50 = arith.constant dense<0xFF800000> : vector<8xf32>
    %74 = vector.multi_reduction <maximumf>, %73, %cst_50 [1] : vector<8x8xf32> to vector<8xf32>
    %75 = vector.shape_cast %74 : vector<8xf32> to vector<8x1xf32>
    %76 = vector.broadcast %75 : vector<8x1xf32> to vector<8x8xf32>
    %77 = arith.subf %73, %76 : vector<8x8xf32>
    %78 = math.exp %77 : vector<8x8xf32>
    %cst_51 = arith.constant dense<0.000000e+00> : vector<8xf32>
    %79 = vector.multi_reduction <add>, %78, %cst_51 [1] : vector<8x8xf32> to vector<8xf32>
    %80 = vector.shape_cast %79 : vector<8xf32> to vector<8x1xf32>
    %81 = tpu.reciprocal %80 {approx = true} : vector<8x1xf32> -> vector<8x1xf32>
    %82 = vector.broadcast %81 : vector<8x1xf32> to vector<8x8xf32>
    %83 = arith.mulf %78, %82 : vector<8x8xf32>
    %84 = arith.truncf %83 : vector<8x8xf32> to vector<8x8xbf16>
    %85 = vector.extract_strided_slice %49 {offsets = [0, 8], sizes = [8, 8], strides = [1, 1]} : vector<8x128xbf16> to vector<8x8xbf16>
    %cst_52 = arith.constant dense<0.000000e+00> : vector<8x8xf32>
    %86 = tpu.matmul %84, %85, %cst_52 {dimension_numbers = #tpu.dot_dimension_numbers<[1], [0], [0], [1], [0, 0, 1, 1], [], []>} : vector<8x8xbf16>, vector<8x8xbf16>, vector<8x8xf32> -> vector<8x8xf32>
    %c0_53 = arith.constant 0 : index
    %c8 = arith.constant 8 : index
    %87 = vector.load %arg32[%c0_53, %c8] : memref<8x128xf32, #tpu.memory_space<vmem>>, vector<8x8xf32>
    tpu.vector_store %arg32[%c0_53, %c8], %86 {strides = array<i32>} : memref<8x128xf32, #tpu.memory_space<vmem>>, vector<8x8xf32>,
    %88 = vector.extract_strided_slice %47 {offsets = [0, 16], sizes = [8, 8], strides = [1, 1]} : vector<8x128xbf16> to vector<8x8xbf16>
    %89 = vector.extract_strided_slice %48 {offsets = [0, 16], sizes = [8, 8], strides = [1, 1]} : vector<8x128xbf16> to vector<8x8xbf16>
    %cst_54 = arith.constant dense<0.000000e+00> : vector<8x8xf32>
    %90 = tpu.matmul %88, %89, %cst_54 {dimension_numbers = #tpu.dot_dimension_numbers<[1], [1], [0], [0], [0, 0, 1, 0], [], []>} : vector<8x8xbf16>, vector<8x8xbf16>, vector<8x8xf32> -> vector<8x8xf32>
    %91 = arith.addf %90, %17 : vector<8x8xf32>
    %cst_55 = arith.constant dense<0xFF800000> : vector<8xf32>
    %92 = vector.multi_reduction <maximumf>, %91, %cst_55 [1] : vector<8x8xf32> to vector<8xf32>
    %93 = vector.shape_cast %92 : vector<8xf32> to vector<8x1xf32>
    %94 = vector.broadcast %93 : vector<8x1xf32> to vector<8x8xf32>
    %95 = arith.subf %91, %94 : vector<8x8xf32>
    %96 = math.exp %95 : vector<8x8xf32>
    %cst_56 = arith.constant dense<0.000000e+00> : vector<8xf32>
    %97 = vector.multi_reduction <add>, %96, %cst_56 [1] : vector<8x8xf32> to vector<8xf32>
    %98 = vector.shape_cast %97 : vector<8xf32> to vector<8x1xf32>
    %99 = tpu.reciprocal %98 {approx = true} : vector<8x1xf32> -> vector<8x1xf32>
    %100 = vector.broadcast %99 : vector<8x1xf32> to vector<8x8xf32>
    %101 = arith.mulf %96, %100 : vector<8x8xf32>
    %102 = arith.truncf %101 : vector<8x8xf32> to vector<8x8xbf16>
    %103 = vector.extract_strided_slice %49 {offsets = [0, 16], sizes = [8, 8], strides = [1, 1]} : vector<8x128xbf16> to vector<8x8xbf16>
    %cst_57 = arith.constant dense<0.000000e+00> : vector<8x8xf32>
    %104 = tpu.matmul %102, %103, %cst_57 {dimension_numbers = #tpu.dot_dimension_numbers<[1], [0], [0], [1], [0, 0, 1, 1], [], []>} : vector<8x8xbf16>, vector<8x8xbf16>, vector<8x8xf32> -> vector<8x8xf32>
    %c0_58 = arith.constant 0 : index
    %c16 = arith.constant 16 : index
    %105 = vector.load %arg32[%c0_58, %c16] : memref<8x128xf32, #tpu.memory_space<vmem>>, vector<8x8xf32>
    tpu.vector_store %arg32[%c0_58, %c16], %104 {strides = array<i32>} : memref<8x128xf32, #tpu.memory_space<vmem>>, vector<8x8xf32>,
    %106 = vector.extract_strided_slice %47 {offsets = [0, 24], sizes = [8, 8], strides = [1, 1]} : vector<8x128xbf16> to vector<8x8xbf16>
    %107 = vector.extract_strided_slice %48 {offsets = [0, 24], sizes = [8, 8], strides = [1, 1]} : vector<8x128xbf16> to vector<8x8xbf16>
    %cst_59 = arith.constant dense<0.000000e+00> : vector<8x8xf32>
    %108 = tpu.matmul %106, %107, %cst_59 {dimension_numbers = #tpu.dot_dimension_numbers<[1], [1], [0], [0], [0, 0, 1, 0], [], []>} : vector<8x8xbf16>, vector<8x8xbf16>, vector<8x8xf32> -> vector<8x8xf32>
    %109 = arith.addf %108, %17 : vector<8x8xf32>
    %cst_60 = arith.constant dense<0xFF800000> : vector<8xf32>
    %110 = vector.multi_reduction <maximumf>, %109, %cst_60 [1] : vector<8x8xf32> to vector<8xf32>
    %111 = vector.shape_cast %110 : vector<8xf32> to vector<8x1xf32>
    %112 = vector.broadcast %111 : vector<8x1xf32> to vector<8x8xf32>
    %113 = arith.subf %109, %112 : vector<8x8xf32>
    %114 = math.exp %113 : vector<8x8xf32>
    %cst_61 = arith.constant dense<0.000000e+00> : vector<8xf32>
    %115 = vector.multi_reduction <add>, %114, %cst_61 [1] : vector<8x8xf32> to vector<8xf32>
    %116 = vector.shape_cast %115 : vector<8xf32> to vector<8x1xf32>
    %117 = tpu.reciprocal %116 {approx = true} : vector<8x1xf32> -> vector<8x1xf32>
    %118 = vector.broadcast %117 : vector<8x1xf32> to vector<8x8xf32>
    %119 = arith.mulf %114, %118 : vector<8x8xf32>
    %120 = arith.truncf %119 : vector<8x8xf32> to vector<8x8xbf16>
    %121 = vector.extract_strided_slice %49 {offsets = [0, 24], sizes = [8, 8], strides = [1, 1]} : vector<8x128xbf16> to vector<8x8xbf16>
    %cst_62 = arith.constant dense<0.000000e+00> : vector<8x8xf32>
    %122 = tpu.matmul %120, %121, %cst_62 {dimension_numbers = #tpu.dot_dimension_numbers<[1], [0], [0], [1], [0, 0, 1, 1], [], []>} : vector<8x8xbf16>, vector<8x8xbf16>, vector<8x8xf32> -> vector<8x8xf32>
    %c0_63 = arith.constant 0 : index
    %c24 = arith.constant 24 : index
    %123 = vector.load %arg32[%c0_63, %c24] : memref<8x128xf32, #tpu.memory_space<vmem>>, vector<8x8xf32>
    tpu.vector_store %arg32[%c0_63, %c24], %122 {strides = array<i32>} : memref<8x128xf32, #tpu.memory_space<vmem>>, vector<8x8xf32>,
    %c0_64 = arith.constant 0 : index
    %c0_65 = arith.constant 0 : index
    %124 = vector.load %arg32[%c0_64, %c0_65] : memref<8x128xf32, #tpu.memory_space<vmem>>, vector<8x128xf32>
    %125 = arith.truncf %124 : vector<8x128xf32> to vector<8x128xbf16>
    %cst_66 = arith.constant dense<0.000000e+00> : vector<8x128xf32>
    %126 = tpu.matmul %125, %30, %cst_66 {dimension_numbers = #tpu.dot_dimension_numbers<[1], [0], [0], [1], [0, 0, 1, 1], [], []>} : vector<8x128xbf16>, vector<128x128xbf16>, vector<8x128xf32> -> vector<8x128xf32>
    %127 = vector.broadcast %31 : vector<1x128xf32> to vector<8x128xf32>
    %128 = arith.addf %126, %127 : vector<8x128xf32>
    %129 = arith.addf %128, %1 : vector<8x128xf32>
    %cst_67 = arith.constant dense<0.000000e+00> : vector<8xf32>
    %130 = vector.multi_reduction <add>, %129, %cst_67 [1] : vector<8x128xf32> to vector<8xf32>
    %131 = vector.shape_cast %130 : vector<8xf32> to vector<8x1xf32>
    %cst_68 = arith.constant 3.125000e-02 : f32
    %132 = vector.broadcast %cst_68 : f32 to vector<8x1xf32>
    %133 = arith.mulf %131, %132 : vector<8x1xf32>
    %134 = arith.mulf %129, %129 : vector<8x128xf32>
    %cst_69 = arith.constant dense<0.000000e+00> : vector<8xf32>
    %135 = vector.multi_reduction <add>, %134, %cst_69 [1] : vector<8x128xf32> to vector<8xf32>
    %136 = vector.shape_cast %135 : vector<8xf32> to vector<8x1xf32>
    %cst_70 = arith.constant 3.125000e-02 : f32
    %137 = vector.broadcast %cst_70 : f32 to vector<8x1xf32>
    %138 = arith.mulf %136, %137 : vector<8x1xf32>
    %139 = arith.mulf %133, %133 : vector<8x1xf32>
    %140 = arith.subf %138, %139 : vector<8x1xf32>
    %141 = vector.broadcast %133 : vector<8x1xf32> to vector<8x128xf32>
    %142 = arith.subf %129, %141 : vector<8x128xf32>
    %cst_71 = arith.constant 9.99999974E-6 : f32
    %143 = vector.broadcast %cst_71 : f32 to vector<8x1xf32>
    %144 = arith.addf %140, %143 : vector<8x1xf32>
    %145 = math.rsqrt %144 : vector<8x1xf32>
    %146 = vector.broadcast %145 : vector<8x1xf32> to vector<8x128xf32>
    %147 = arith.mulf %142, %146 : vector<8x128xf32>
    %148 = vector.broadcast %32 : vector<1x128xf32> to vector<8x128xf32>
    %149 = arith.mulf %147, %148 : vector<8x128xf32>
    %150 = vector.broadcast %33 : vector<1x128xf32> to vector<8x128xf32>
    %151 = arith.addf %149, %150 : vector<8x128xf32>
    %c0_72 = arith.constant 0 : index
    %c0_73 = arith.constant 0 : index
    %152 = vector.load %arg15[%c0_72, %c0_73] : memref<128x128xbf16, #tpu.memory_space<vmem>>, vector<128x128xbf16>
    %c0_74 = arith.constant 0 : index
    %c0_75 = arith.constant 0 : index
    %153 = vector.load %arg16[%c0_74, %c0_75] : memref<1x128xf32, #tpu.memory_space<vmem>>, vector<1x128xf32>
    %c0_76 = arith.constant 0 : index
    %c0_77 = arith.constant 0 : index
    %154 = vector.load %arg17[%c0_76, %c0_77] : memref<128x128xbf16, #tpu.memory_space<vmem>>, vector<128x128xbf16>
    %c0_78 = arith.constant 0 : index
    %c0_79 = arith.constant 0 : index
    %155 = vector.load %arg18[%c0_78, %c0_79] : memref<1x128xf32, #tpu.memory_space<vmem>>, vector<1x128xf32>
    %c0_80 = arith.constant 0 : index
    %c0_81 = arith.constant 0 : index
    %156 = vector.load %arg19[%c0_80, %c0_81] : memref<128x128xbf16, #tpu.memory_space<vmem>>, vector<128x128xbf16>
    %c0_82 = arith.constant 0 : index
    %c0_83 = arith.constant 0 : index
    %157 = vector.load %arg20[%c0_82, %c0_83] : memref<1x128xf32, #tpu.memory_space<vmem>>, vector<1x128xf32>
    %c0_84 = arith.constant 0 : index
    %c0_85 = arith.constant 0 : index
    %158 = vector.load %arg21[%c0_84, %c0_85] : memref<128x128xbf16, #tpu.memory_space<vmem>>, vector<128x128xbf16>
    %c0_86 = arith.constant 0 : index
    %c0_87 = arith.constant 0 : index
    %159 = vector.load %arg22[%c0_86, %c0_87] : memref<1x128xf32, #tpu.memory_space<vmem>>, vector<1x128xf32>
    %c0_88 = arith.constant 0 : index
    %c0_89 = arith.constant 0 : index
    %160 = vector.load %arg23[%c0_88, %c0_89] : memref<1x128xf32, #tpu.memory_space<vmem>>, vector<1x128xf32>
    %c0_90 = arith.constant 0 : index
    %c0_91 = arith.constant 0 : index
    %161 = vector.load %arg24[%c0_90, %c0_91] : memref<1x128xf32, #tpu.memory_space<vmem>>, vector<1x128xf32>
    %162 = arith.truncf %151 : vector<8x128xf32> to vector<8x128xbf16>
    %163 = arith.truncf %3 : vector<8x128xf32> to vector<8x128xbf16>
    %cst_92 = arith.constant dense<0.000000e+00> : vector<8x128xf32>
    %164 = tpu.matmul %162, %152, %cst_92 {dimension_numbers = #tpu.dot_dimension_numbers<[1], [0], [0], [1], [0, 0, 1, 1], [], []>} : vector<8x128xbf16>, vector<128x128xbf16>, vector<8x128xf32> -> vector<8x128xf32>
    %165 = vector.broadcast %153 : vector<1x128xf32> to vector<8x128xf32>
    %166 = arith.addf %164, %165 : vector<8x128xf32>
    %cst_93 = arith.constant 0.353553385 : f32
    %167 = vector.broadcast %cst_93 : f32 to vector<8x128xf32>
    %168 = arith.mulf %166, %167 : vector<8x128xf32>
    %cst_94 = arith.constant dense<0.000000e+00> : vector<8x128xf32>
    %169 = tpu.matmul %163, %154, %cst_94 {dimension_numbers = #tpu.dot_dimension_numbers<[1], [0], [0], [1], [0, 0, 1, 1], [], []>} : vector<8x128xbf16>, vector<128x128xbf16>, vector<8x128xf32> -> vector<8x128xf32>
    %170 = vector.broadcast %155 : vector<1x128xf32> to vector<8x128xf32>
    %171 = arith.addf %169, %170 : vector<8x128xf32>
    %cst_95 = arith.constant dense<0.000000e+00> : vector<8x128xf32>
    %172 = tpu.matmul %163, %156, %cst_95 {dimension_numbers = #tpu.dot_dimension_numbers<[1], [0], [0], [1], [0, 0, 1, 1], [], []>} : vector<8x128xbf16>, vector<128x128xbf16>, vector<8x128xf32> -> vector<8x128xf32>
    %173 = vector.broadcast %157 : vector<1x128xf32> to vector<8x128xf32>
    %174 = arith.addf %172, %173 : vector<8x128xf32>
    %175 = arith.truncf %168 : vector<8x128xf32> to vector<8x128xbf16>
    %176 = arith.truncf %171 : vector<8x128xf32> to vector<8x128xbf16>
    %177 = arith.truncf %174 : vector<8x128xf32> to vector<8x128xbf16>
    %cst_96 = arith.constant 0.000000e+00 : f32
    %178 = vector.broadcast %cst_96 : f32 to vector<8x128xf32>
    %c0_97 = arith.constant 0 : index
    %c0_98 = arith.constant 0 : index
    %179 = vector.load %arg32[%c0_97, %c0_98] : memref<8x128xf32, #tpu.memory_space<vmem>>, vector<8x128xf32>
    tpu.vector_store %arg32[%c0_97, %c0_98], %178 {strides = array<i32>} : memref<8x128xf32, #tpu.memory_space<vmem>>, vector<8x128xf32>,
    %180 = vector.extract_strided_slice %175 {offsets = [0, 0], sizes = [8, 8], strides = [1, 1]} : vector<8x128xbf16> to vector<8x8xbf16>
    %181 = vector.extract_strided_slice %176 {offsets = [0, 0], sizes = [8, 8], strides = [1, 1]} : vector<8x128xbf16> to vector<8x8xbf16>
    %cst_99 = arith.constant dense<0.000000e+00> : vector<8x8xf32>
    %182 = tpu.matmul %180, %181, %cst_99 {dimension_numbers = #tpu.dot_dimension_numbers<[1], [1], [0], [0], [0, 0, 1, 0], [], []>} : vector<8x8xbf16>, vector<8x8xbf16>, vector<8x8xf32> -> vector<8x8xf32>
    %183 = vector.broadcast %23 : vector<1x8xf32> to vector<8x8xf32>
    %184 = arith.addf %182, %183 : vector<8x8xf32>
    %cst_100 = arith.constant dense<0xFF800000> : vector<8xf32>
    %185 = vector.multi_reduction <maximumf>, %184, %cst_100 [1] : vector<8x8xf32> to vector<8xf32>
    %186 = vector.shape_cast %185 : vector<8xf32> to vector<8x1xf32>
    %187 = vector.broadcast %186 : vector<8x1xf32> to vector<8x8xf32>
    %188 = arith.subf %184, %187 : vector<8x8xf32>
    %189 = math.exp %188 : vector<8x8xf32>
    %cst_101 = arith.constant dense<0.000000e+00> : vector<8xf32>
    %190 = vector.multi_reduction <add>, %189, %cst_101 [1] : vector<8x8xf32> to vector<8xf32>
    %191 = vector.shape_cast %190 : vector<8xf32> to vector<8x1xf32>
    %192 = tpu.reciprocal %191 {approx = true} : vector<8x1xf32> -> vector<8x1xf32>
    %193 = vector.broadcast %192 : vector<8x1xf32> to vector<8x8xf32>
    %194 = arith.mulf %189, %193 : vector<8x8xf32>
    %195 = arith.truncf %194 : vector<8x8xf32> to vector<8x8xbf16>
    %196 = vector.extract_strided_slice %177 {offsets = [0, 0], sizes = [8, 8], strides = [1, 1]} : vector<8x128xbf16> to vector<8x8xbf16>
    %cst_102 = arith.constant dense<0.000000e+00> : vector<8x8xf32>
    %197 = tpu.matmul %195, %196, %cst_102 {dimension_numbers = #tpu.dot_dimension_numbers<[1], [0], [0], [1], [0, 0, 1, 1], [], []>} : vector<8x8xbf16>, vector<8x8xbf16>, vector<8x8xf32> -> vector<8x8xf32>
    %c0_103 = arith.constant 0 : index
    %c0_104 = arith.constant 0 : index
    %198 = vector.load %arg32[%c0_103, %c0_104] : memref<8x128xf32, #tpu.memory_space<vmem>>, vector<8x8xf32>
    tpu.vector_store %arg32[%c0_103, %c0_104], %197 {strides = array<i32>} : memref<8x128xf32, #tpu.memory_space<vmem>>, vector<8x8xf32>,
    %199 = vector.extract_strided_slice %175 {offsets = [0, 8], sizes = [8, 8], strides = [1, 1]} : vector<8x128xbf16> to vector<8x8xbf16>
    %200 = vector.extract_strided_slice %176 {offsets = [0, 8], sizes = [8, 8], strides = [1, 1]} : vector<8x128xbf16> to vector<8x8xbf16>
    %cst_105 = arith.constant dense<0.000000e+00> : vector<8x8xf32>
    %201 = tpu.matmul %199, %200, %cst_105 {dimension_numbers = #tpu.dot_dimension_numbers<[1], [1], [0], [0], [0, 0, 1, 0], [], []>} : vector<8x8xbf16>, vector<8x8xbf16>, vector<8x8xf32> -> vector<8x8xf32>
    %202 = vector.broadcast %23 : vector<1x8xf32> to vector<8x8xf32>
    %203 = arith.addf %201, %202 : vector<8x8xf32>
    %cst_106 = arith.constant dense<0xFF800000> : vector<8xf32>
    %204 = vector.multi_reduction <maximumf>, %203, %cst_106 [1] : vector<8x8xf32> to vector<8xf32>
    %205 = vector.shape_cast %204 : vector<8xf32> to vector<8x1xf32>
    %206 = vector.broadcast %205 : vector<8x1xf32> to vector<8x8xf32>
    %207 = arith.subf %203, %206 : vector<8x8xf32>
    %208 = math.exp %207 : vector<8x8xf32>
    %cst_107 = arith.constant dense<0.000000e+00> : vector<8xf32>
    %209 = vector.multi_reduction <add>, %208, %cst_107 [1] : vector<8x8xf32> to vector<8xf32>
    %210 = vector.shape_cast %209 : vector<8xf32> to vector<8x1xf32>
    %211 = tpu.reciprocal %210 {approx = true} : vector<8x1xf32> -> vector<8x1xf32>
    %212 = vector.broadcast %211 : vector<8x1xf32> to vector<8x8xf32>
    %213 = arith.mulf %208, %212 : vector<8x8xf32>
    %214 = arith.truncf %213 : vector<8x8xf32> to vector<8x8xbf16>
    %215 = vector.extract_strided_slice %177 {offsets = [0, 8], sizes = [8, 8], strides = [1, 1]} : vector<8x128xbf16> to vector<8x8xbf16>
    %cst_108 = arith.constant dense<0.000000e+00> : vector<8x8xf32>
    %216 = tpu.matmul %214, %215, %cst_108 {dimension_numbers = #tpu.dot_dimension_numbers<[1], [0], [0], [1], [0, 0, 1, 1], [], []>} : vector<8x8xbf16>, vector<8x8xbf16>, vector<8x8xf32> -> vector<8x8xf32>
    %c0_109 = arith.constant 0 : index
    %c8_110 = arith.constant 8 : index
    %217 = vector.load %arg32[%c0_109, %c8_110] : memref<8x128xf32, #tpu.memory_space<vmem>>, vector<8x8xf32>
    tpu.vector_store %arg32[%c0_109, %c8_110], %216 {strides = array<i32>} : memref<8x128xf32, #tpu.memory_space<vmem>>, vector<8x8xf32>,
    %218 = vector.extract_strided_slice %175 {offsets = [0, 16], sizes = [8, 8], strides = [1, 1]} : vector<8x128xbf16> to vector<8x8xbf16>
    %219 = vector.extract_strided_slice %176 {offsets = [0, 16], sizes = [8, 8], strides = [1, 1]} : vector<8x128xbf16> to vector<8x8xbf16>
    %cst_111 = arith.constant dense<0.000000e+00> : vector<8x8xf32>
    %220 = tpu.matmul %218, %219, %cst_111 {dimension_numbers = #tpu.dot_dimension_numbers<[1], [1], [0], [0], [0, 0, 1, 0], [], []>} : vector<8x8xbf16>, vector<8x8xbf16>, vector<8x8xf32> -> vector<8x8xf32>
    %221 = vector.broadcast %23 : vector<1x8xf32> to vector<8x8xf32>
    %222 = arith.addf %220, %221 : vector<8x8xf32>
    %cst_112 = arith.constant dense<0xFF800000> : vector<8xf32>
    %223 = vector.multi_reduction <maximumf>, %222, %cst_112 [1] : vector<8x8xf32> to vector<8xf32>
    %224 = vector.shape_cast %223 : vector<8xf32> to vector<8x1xf32>
    %225 = vector.broadcast %224 : vector<8x1xf32> to vector<8x8xf32>
    %226 = arith.subf %222, %225 : vector<8x8xf32>
    %227 = math.exp %226 : vector<8x8xf32>
    %cst_113 = arith.constant dense<0.000000e+00> : vector<8xf32>
    %228 = vector.multi_reduction <add>, %227, %cst_113 [1] : vector<8x8xf32> to vector<8xf32>
    %229 = vector.shape_cast %228 : vector<8xf32> to vector<8x1xf32>
    %230 = tpu.reciprocal %229 {approx = true} : vector<8x1xf32> -> vector<8x1xf32>
    %231 = vector.broadcast %230 : vector<8x1xf32> to vector<8x8xf32>
    %232 = arith.mulf %227, %231 : vector<8x8xf32>
    %233 = arith.truncf %232 : vector<8x8xf32> to vector<8x8xbf16>
    %234 = vector.extract_strided_slice %177 {offsets = [0, 16], sizes = [8, 8], strides = [1, 1]} : vector<8x128xbf16> to vector<8x8xbf16>
    %cst_114 = arith.constant dense<0.000000e+00> : vector<8x8xf32>
    %235 = tpu.matmul %233, %234, %cst_114 {dimension_numbers = #tpu.dot_dimension_numbers<[1], [0], [0], [1], [0, 0, 1, 1], [], []>} : vector<8x8xbf16>, vector<8x8xbf16>, vector<8x8xf32> -> vector<8x8xf32>
    %c0_115 = arith.constant 0 : index
    %c16_116 = arith.constant 16 : index
    %236 = vector.load %arg32[%c0_115, %c16_116] : memref<8x128xf32, #tpu.memory_space<vmem>>, vector<8x8xf32>
    tpu.vector_store %arg32[%c0_115, %c16_116], %235 {strides = array<i32>} : memref<8x128xf32, #tpu.memory_space<vmem>>, vector<8x8xf32>,
    %237 = vector.extract_strided_slice %175 {offsets = [0, 24], sizes = [8, 8], strides = [1, 1]} : vector<8x128xbf16> to vector<8x8xbf16>
    %238 = vector.extract_strided_slice %176 {offsets = [0, 24], sizes = [8, 8], strides = [1, 1]} : vector<8x128xbf16> to vector<8x8xbf16>
    %cst_117 = arith.constant dense<0.000000e+00> : vector<8x8xf32>
    %239 = tpu.matmul %237, %238, %cst_117 {dimension_numbers = #tpu.dot_dimension_numbers<[1], [1], [0], [0], [0, 0, 1, 0], [], []>} : vector<8x8xbf16>, vector<8x8xbf16>, vector<8x8xf32> -> vector<8x8xf32>
    %240 = vector.broadcast %23 : vector<1x8xf32> to vector<8x8xf32>
    %241 = arith.addf %239, %240 : vector<8x8xf32>
    %cst_118 = arith.constant dense<0xFF800000> : vector<8xf32>
    %242 = vector.multi_reduction <maximumf>, %241, %cst_118 [1] : vector<8x8xf32> to vector<8xf32>
    %243 = vector.shape_cast %242 : vector<8xf32> to vector<8x1xf32>
    %244 = vector.broadcast %243 : vector<8x1xf32> to vector<8x8xf32>
    %245 = arith.subf %241, %244 : vector<8x8xf32>
    %246 = math.exp %245 : vector<8x8xf32>
    %cst_119 = arith.constant dense<0.000000e+00> : vector<8xf32>
    %247 = vector.multi_reduction <add>, %246, %cst_119 [1] : vector<8x8xf32> to vector<8xf32>
    %248 = vector.shape_cast %247 : vector<8xf32> to vector<8x1xf32>
    %249 = tpu.reciprocal %248 {approx = true} : vector<8x1xf32> -> vector<8x1xf32>
    %250 = vector.broadcast %249 : vector<8x1xf32> to vector<8x8xf32>
    %251 = arith.mulf %246, %250 : vector<8x8xf32>
    %252 = arith.truncf %251 : vector<8x8xf32> to vector<8x8xbf16>
    %253 = vector.extract_strided_slice %177 {offsets = [0, 24], sizes = [8, 8], strides = [1, 1]} : vector<8x128xbf16> to vector<8x8xbf16>
    %cst_120 = arith.constant dense<0.000000e+00> : vector<8x8xf32>
    %254 = tpu.matmul %252, %253, %cst_120 {dimension_numbers = #tpu.dot_dimension_numbers<[1], [0], [0], [1], [0, 0, 1, 1], [], []>} : vector<8x8xbf16>, vector<8x8xbf16>, vector<8x8xf32> -> vector<8x8xf32>
    %c0_121 = arith.constant 0 : index
    %c24_122 = arith.constant 24 : index
    %255 = vector.load %arg32[%c0_121, %c24_122] : memref<8x128xf32, #tpu.memory_space<vmem>>, vector<8x8xf32>
    tpu.vector_store %arg32[%c0_121, %c24_122], %254 {strides = array<i32>} : memref<8x128xf32, #tpu.memory_space<vmem>>, vector<8x8xf32>,
    %c0_123 = arith.constant 0 : index
    %c0_124 = arith.constant 0 : index
    %256 = vector.load %arg32[%c0_123, %c0_124] : memref<8x128xf32, #tpu.memory_space<vmem>>, vector<8x128xf32>
    %257 = arith.truncf %256 : vector<8x128xf32> to vector<8x128xbf16>
    %cst_125 = arith.constant dense<0.000000e+00> : vector<8x128xf32>
    %258 = tpu.matmul %257, %158, %cst_125 {dimension_numbers = #tpu.dot_dimension_numbers<[1], [0], [0], [1], [0, 0, 1, 1], [], []>} : vector<8x128xbf16>, vector<128x128xbf16>, vector<8x128xf32> -> vector<8x128xf32>
    %259 = vector.broadcast %159 : vector<1x128xf32> to vector<8x128xf32>
    %260 = arith.addf %258, %259 : vector<8x128xf32>
    %261 = arith.addf %260, %151 : vector<8x128xf32>
    %cst_126 = arith.constant dense<0.000000e+00> : vector<8xf32>
    %262 = vector.multi_reduction <add>, %261, %cst_126 [1] : vector<8x128xf32> to vector<8xf32>
    %263 = vector.shape_cast %262 : vector<8xf32> to vector<8x1xf32>
    %cst_127 = arith.constant 3.125000e-02 : f32
    %264 = vector.broadcast %cst_127 : f32 to vector<8x1xf32>
    %265 = arith.mulf %263, %264 : vector<8x1xf32>
    %266 = arith.mulf %261, %261 : vector<8x128xf32>
    %cst_128 = arith.constant dense<0.000000e+00> : vector<8xf32>
    %267 = vector.multi_reduction <add>, %266, %cst_128 [1] : vector<8x128xf32> to vector<8xf32>
    %268 = vector.shape_cast %267 : vector<8xf32> to vector<8x1xf32>
    %cst_129 = arith.constant 3.125000e-02 : f32
    %269 = vector.broadcast %cst_129 : f32 to vector<8x1xf32>
    %270 = arith.mulf %268, %269 : vector<8x1xf32>
    %271 = arith.mulf %265, %265 : vector<8x1xf32>
    %272 = arith.subf %270, %271 : vector<8x1xf32>
    %273 = vector.broadcast %265 : vector<8x1xf32> to vector<8x128xf32>
    %274 = arith.subf %261, %273 : vector<8x128xf32>
    %cst_130 = arith.constant 9.99999974E-6 : f32
    %275 = vector.broadcast %cst_130 : f32 to vector<8x1xf32>
    %276 = arith.addf %272, %275 : vector<8x1xf32>
    %277 = math.rsqrt %276 : vector<8x1xf32>
    %278 = vector.broadcast %277 : vector<8x1xf32> to vector<8x128xf32>
    %279 = arith.mulf %274, %278 : vector<8x128xf32>
    %280 = vector.broadcast %160 : vector<1x128xf32> to vector<8x128xf32>
    %281 = arith.mulf %279, %280 : vector<8x128xf32>
    %282 = vector.broadcast %161 : vector<1x128xf32> to vector<8x128xf32>
    %283 = arith.addf %281, %282 : vector<8x128xf32>
    %c0_131 = arith.constant 0 : index
    %c0_132 = arith.constant 0 : index
    %284 = vector.load %arg25[%c0_131, %c0_132] : memref<128x128xbf16, #tpu.memory_space<vmem>>, vector<128x128xbf16>
    %c0_133 = arith.constant 0 : index
    %c0_134 = arith.constant 0 : index
    %285 = vector.load %arg26[%c0_133, %c0_134] : memref<1x128xf32, #tpu.memory_space<vmem>>, vector<1x128xf32>
    %c0_135 = arith.constant 0 : index
    %c0_136 = arith.constant 0 : index
    %286 = vector.load %arg27[%c0_135, %c0_136] : memref<128x128xbf16, #tpu.memory_space<vmem>>, vector<128x128xbf16>
    %c0_137 = arith.constant 0 : index
    %c0_138 = arith.constant 0 : index
    %287 = vector.load %arg28[%c0_137, %c0_138] : memref<1x128xf32, #tpu.memory_space<vmem>>, vector<1x128xf32>
    %c0_139 = arith.constant 0 : index
    %c0_140 = arith.constant 0 : index
    %288 = vector.load %arg29[%c0_139, %c0_140] : memref<1x128xf32, #tpu.memory_space<vmem>>, vector<1x128xf32>
    %c0_141 = arith.constant 0 : index
    %c0_142 = arith.constant 0 : index
    %289 = vector.load %arg30[%c0_141, %c0_142] : memref<1x128xf32, #tpu.memory_space<vmem>>, vector<1x128xf32>
    %290 = arith.truncf %283 : vector<8x128xf32> to vector<8x128xbf16>
    %cst_143 = arith.constant dense<0.000000e+00> : vector<8x128xf32>
    %291 = tpu.matmul %290, %284, %cst_143 {dimension_numbers = #tpu.dot_dimension_numbers<[1], [0], [0], [1], [0, 0, 1, 1], [], []>} : vector<8x128xbf16>, vector<128x128xbf16>, vector<8x128xf32> -> vector<8x128xf32>
    %292 = vector.broadcast %285 : vector<1x128xf32> to vector<8x128xf32>
    %293 = arith.addf %291, %292 : vector<8x128xf32>
    %cst_144 = arith.constant 0.000000e+00 : f32
    %294 = vector.broadcast %cst_144 : f32 to vector<8x128xf32>
    %295 = arith.maximumf %293, %294 : vector<8x128xf32>
    %296 = arith.truncf %295 : vector<8x128xf32> to vector<8x128xbf16>
    %cst_145 = arith.constant dense<0.000000e+00> : vector<8x128xf32>
    %297 = tpu.matmul %296, %286, %cst_145 {dimension_numbers = #tpu.dot_dimension_numbers<[1], [0], [0], [1], [0, 0, 1, 1], [], []>} : vector<8x128xbf16>, vector<128x128xbf16>, vector<8x128xf32> -> vector<8x128xf32>
    %298 = vector.broadcast %287 : vector<1x128xf32> to vector<8x128xf32>
    %299 = arith.addf %297, %298 : vector<8x128xf32>
    %300 = arith.addf %299, %283 : vector<8x128xf32>
    %cst_146 = arith.constant dense<0.000000e+00> : vector<8xf32>
    %301 = vector.multi_reduction <add>, %300, %cst_146 [1] : vector<8x128xf32> to vector<8xf32>
    %302 = vector.shape_cast %301 : vector<8xf32> to vector<8x1xf32>
    %cst_147 = arith.constant 3.125000e-02 : f32
    %303 = vector.broadcast %cst_147 : f32 to vector<8x1xf32>
    %304 = arith.mulf %302, %303 : vector<8x1xf32>
    %305 = arith.mulf %300, %300 : vector<8x128xf32>
    %cst_148 = arith.constant dense<0.000000e+00> : vector<8xf32>
    %306 = vector.multi_reduction <add>, %305, %cst_148 [1] : vector<8x128xf32> to vector<8xf32>
    %307 = vector.shape_cast %306 : vector<8xf32> to vector<8x1xf32>
    %cst_149 = arith.constant 3.125000e-02 : f32
    %308 = vector.broadcast %cst_149 : f32 to vector<8x1xf32>
    %309 = arith.mulf %307, %308 : vector<8x1xf32>
    %310 = arith.mulf %304, %304 : vector<8x1xf32>
    %311 = arith.subf %309, %310 : vector<8x1xf32>
    %312 = vector.broadcast %304 : vector<8x1xf32> to vector<8x128xf32>
    %313 = arith.subf %300, %312 : vector<8x128xf32>
    %cst_150 = arith.constant 9.99999974E-6 : f32
    %314 = vector.broadcast %cst_150 : f32 to vector<8x1xf32>
    %315 = arith.addf %311, %314 : vector<8x1xf32>
    %316 = math.rsqrt %315 : vector<8x1xf32>
    %317 = vector.broadcast %316 : vector<8x1xf32> to vector<8x128xf32>
    %318 = arith.mulf %313, %317 : vector<8x128xf32>
    %319 = vector.broadcast %288 : vector<1x128xf32> to vector<8x128xf32>
    %320 = arith.mulf %318, %319 : vector<8x128xf32>
    %321 = vector.broadcast %289 : vector<1x128xf32> to vector<8x128xf32>
    %322 = arith.addf %320, %321 : vector<8x128xf32>
    %c0_151 = arith.constant 0 : index
    %c0_152 = arith.constant 0 : index
    %c0_153 = arith.constant 0 : index
    %323 = vector.load %arg31[%c0_151, %c0_152, %c0_153] : memref<1x8x128xf32, #tpu.memory_space<vmem>>, vector<1x8x128xf32>
    %324 = vector.shape_cast %323 : vector<1x8x128xf32> to vector<8x128xf32>
    %325 = vector.shape_cast %322 : vector<8x128xf32> to vector<1x8x128xf32>
    tpu.vector_store %arg31[%c0_151, %c0_152, %c0_153], %325 {strides = array<i32>} : memref<1x8x128xf32, #tpu.memory_space<vmem>>, vector<1x8x128xf32>,
    return
  }
  func.func @transform_0(%arg0: i32) -> (i32, i32, i32) {
    %c0_i32 = arith.constant 0 : i32
    %c0_i32_0 = arith.constant 0 : i32
    %c0_i32_1 = arith.constant 0 : i32
    return %arg0, %c0_i32, %c0_i32_0 : i32, i32, i32
  }
  func.func @transform_1(%arg0: i32) -> (i32, i32, i32) {
    %c0_i32 = arith.constant 0 : i32
    %c0_i32_0 = arith.constant 0 : i32
    %c0_i32_1 = arith.constant 0 : i32
    return %arg0, %c0_i32, %c0_i32_0 : i32, i32, i32
  }
  func.func @transform_2(%arg0: i32) -> (i32, i32, i32) {
    %c0_i32 = arith.constant 0 : i32
    %c0_i32_0 = arith.constant 0 : i32
    %c0_i32_1 = arith.constant 0 : i32
    return %arg0, %c0_i32, %c0_i32_0 : i32, i32, i32
  }
  func.func @transform_3(%arg0: i32) -> (i32, i32, i32) {
    %c0_i32 = arith.constant 0 : i32
    %c0_i32_0 = arith.constant 0 : i32
    %c0_i32_1 = arith.constant 0 : i32
    return %arg0, %c0_i32, %c0_i32_0 : i32, i32, i32
  }
  func.func @transform_4(%arg0: i32) -> (i32, i32) {
    %c0_i32 = arith.constant 0 : i32
    %c0_i32_0 = arith.constant 0 : i32
    %c0_i32_1 = arith.constant 0 : i32
    return %c0_i32, %c0_i32_0 : i32, i32
  }
  func.func @transform_5(%arg0: i32) -> (i32, i32) {
    %c0_i32 = arith.constant 0 : i32
    %c0_i32_0 = arith.constant 0 : i32
    %c0_i32_1 = arith.constant 0 : i32
    return %c0_i32, %c0_i32_0 : i32, i32
  }
  func.func @transform_6(%arg0: i32) -> (i32, i32) {
    %c0_i32 = arith.constant 0 : i32
    %c0_i32_0 = arith.constant 0 : i32
    %c0_i32_1 = arith.constant 0 : i32
    return %c0_i32, %c0_i32_0 : i32, i32
  }
  func.func @transform_7(%arg0: i32) -> (i32, i32) {
    %c0_i32 = arith.constant 0 : i32
    %c0_i32_0 = arith.constant 0 : i32
    %c0_i32_1 = arith.constant 0 : i32
    return %c0_i32, %c0_i32_0 : i32, i32
  }
  func.func @transform_8(%arg0: i32) -> (i32, i32) {
    %c0_i32 = arith.constant 0 : i32
    %c0_i32_0 = arith.constant 0 : i32
    %c0_i32_1 = arith.constant 0 : i32
    return %c0_i32, %c0_i32_0 : i32, i32
  }
  func.func @transform_9(%arg0: i32) -> (i32, i32) {
    %c0_i32 = arith.constant 0 : i32
    %c0_i32_0 = arith.constant 0 : i32
    %c0_i32_1 = arith.constant 0 : i32
    return %c0_i32, %c0_i32_0 : i32, i32
  }
  func.func @transform_10(%arg0: i32) -> (i32, i32) {
    %c0_i32 = arith.constant 0 : i32
    %c0_i32_0 = arith.constant 0 : i32
    %c0_i32_1 = arith.constant 0 : i32
    return %c0_i32, %c0_i32_0 : i32, i32
  }
  func.func @transform_11(%arg0: i32) -> (i32, i32) {
    %c0_i32 = arith.constant 0 : i32
    %c0_i32_0 = arith.constant 0 : i32
    %c0_i32_1 = arith.constant 0 : i32
    return %c0_i32, %c0_i32_0 : i32, i32
  }
  func.func @transform_12(%arg0: i32) -> (i32, i32) {
    %c0_i32 = arith.constant 0 : i32
    %c0_i32_0 = arith.constant 0 : i32
    %c0_i32_1 = arith.constant 0 : i32
    return %c0_i32, %c0_i32_0 : i32, i32
  }
  func.func @transform_13(%arg0: i32) -> (i32, i32) {
    %c0_i32 = arith.constant 0 : i32
    %c0_i32_0 = arith.constant 0 : i32
    %c0_i32_1 = arith.constant 0 : i32
    return %c0_i32, %c0_i32_0 : i32, i32
  }
  func.func @transform_14(%arg0: i32) -> (i32, i32) {
    %c0_i32 = arith.constant 0 : i32
    %c0_i32_0 = arith.constant 0 : i32
    %c0_i32_1 = arith.constant 0 : i32
    return %c0_i32, %c0_i32_0 : i32, i32
  }
  func.func @transform_15(%arg0: i32) -> (i32, i32) {
    %c0_i32 = arith.constant 0 : i32
    %c0_i32_0 = arith.constant 0 : i32
    %c0_i32_1 = arith.constant 0 : i32
    return %c0_i32, %c0_i32_0 : i32, i32
  }
  func.func @transform_16(%arg0: i32) -> (i32, i32) {
    %c0_i32 = arith.constant 0 : i32
    %c0_i32_0 = arith.constant 0 : i32
    %c0_i32_1 = arith.constant 0 : i32
    return %c0_i32, %c0_i32_0 : i32, i32
  }
  func.func @transform_17(%arg0: i32) -> (i32, i32) {
    %c0_i32 = arith.constant 0 : i32
    %c0_i32_0 = arith.constant 0 : i32
    %c0_i32_1 = arith.constant 0 : i32
    return %c0_i32, %c0_i32_0 : i32, i32
  }
  func.func @transform_18(%arg0: i32) -> (i32, i32) {
    %c0_i32 = arith.constant 0 : i32
    %c0_i32_0 = arith.constant 0 : i32
    %c0_i32_1 = arith.constant 0 : i32
    return %c0_i32, %c0_i32_0 : i32, i32
  }
  func.func @transform_19(%arg0: i32) -> (i32, i32) {
    %c0_i32 = arith.constant 0 : i32
    %c0_i32_0 = arith.constant 0 : i32
    %c0_i32_1 = arith.constant 0 : i32
    return %c0_i32, %c0_i32_0 : i32, i32
  }
  func.func @transform_20(%arg0: i32) -> (i32, i32) {
    %c0_i32 = arith.constant 0 : i32
    %c0_i32_0 = arith.constant 0 : i32
    %c0_i32_1 = arith.constant 0 : i32
    return %c0_i32, %c0_i32_0 : i32, i32
  }
  func.func @transform_21(%arg0: i32) -> (i32, i32) {
    %c0_i32 = arith.constant 0 : i32
    %c0_i32_0 = arith.constant 0 : i32
    %c0_i32_1 = arith.constant 0 : i32
    return %c0_i32, %c0_i32_0 : i32, i32
  }
  func.func @transform_22(%arg0: i32) -> (i32, i32) {
    %c0_i32 = arith.constant 0 : i32
    %c0_i32_0 = arith.constant 0 : i32
    %c0_i32_1 = arith.constant 0 : i32
    return %c0_i32, %c0_i32_0 : i32, i32
  }
  func.func @transform_23(%arg0: i32) -> (i32, i32) {
    %c0_i32 = arith.constant 0 : i32
    %c0_i32_0 = arith.constant 0 : i32
    %c0_i32_1 = arith.constant 0 : i32
    return %c0_i32, %c0_i32_0 : i32, i32
  }
  func.func @transform_24(%arg0: i32) -> (i32, i32) {
    %c0_i32 = arith.constant 0 : i32
    %c0_i32_0 = arith.constant 0 : i32
    %c0_i32_1 = arith.constant 0 : i32
    return %c0_i32, %c0_i32_0 : i32, i32
  }
  func.func @transform_25(%arg0: i32) -> (i32, i32) {
    %c0_i32 = arith.constant 0 : i32
    %c0_i32_0 = arith.constant 0 : i32
    %c0_i32_1 = arith.constant 0 : i32
    return %c0_i32, %c0_i32_0 : i32, i32
  }
  func.func @transform_26(%arg0: i32) -> (i32, i32) {
    %c0_i32 = arith.constant 0 : i32
    %c0_i32_0 = arith.constant 0 : i32
    %c0_i32_1 = arith.constant 0 : i32
    return %c0_i32, %c0_i32_0 : i32, i32
  }
  func.func @transform_27(%arg0: i32) -> (i32, i32) {
    %c0_i32 = arith.constant 0 : i32
    %c0_i32_0 = arith.constant 0 : i32
    %c0_i32_1 = arith.constant 0 : i32
    return %c0_i32, %c0_i32_0 : i32, i32
  }
  func.func @transform_28(%arg0: i32) -> (i32, i32) {
    %c0_i32 = arith.constant 0 : i32
    %c0_i32_0 = arith.constant 0 : i32
    %c0_i32_1 = arith.constant 0 : i32
    return %c0_i32, %c0_i32_0 : i32, i32
  }
  func.func @transform_29(%arg0: i32) -> (i32, i32) {
    %c0_i32 = arith.constant 0 : i32
    %c0_i32_0 = arith.constant 0 : i32
    %c0_i32_1 = arith.constant 0 : i32
    return %c0_i32, %c0_i32_0 : i32, i32
  }
  func.func @transform_30(%arg0: i32) -> (i32, i32, i32) {
    %c0_i32 = arith.constant 0 : i32
    %c0_i32_0 = arith.constant 0 : i32
    %c0_i32_1 = arith.constant 0 : i32
    return %arg0, %c0_i32, %c0_i32_0 : i32, i32, i32
  }
}

module attributes {stable_mosaic.version = 11 : i64} {
  func.func @_linear_kernel(%arg0: i32, %arg1: memref<8x128xf32, #tpu.memory_space<vmem>>, %arg2: memref<128x128xbf16, #tpu.memory_space<vmem>>, %arg3: memref<1x128xf32, #tpu.memory_space<vmem>>, %arg4: memref<8x128xf32, #tpu.memory_space<vmem>>) attributes {dimension_semantics = [#tpu.dimension_semantics<parallel>], iteration_bounds = array<i64: 2>, scalar_prefetch = 0 : i64, scratch_operands = 0 : i64, tpu.core_type = #tpu.core_type<tc>, window_params = [{transform_indices = @transform_0, window_bounds = array<i64: 8, 128>}, {pipeline_mode = #tpu.pipeline_mode<synchronous>, transform_indices = @transform_1, window_bounds = array<i64: 128, 128>}, {pipeline_mode = #tpu.pipeline_mode<synchronous>, transform_indices = @transform_2, window_bounds = array<i64: 1, 128>}, {transform_indices = @transform_3, window_bounds = array<i64: 8, 128>}]} {
    %c0 = arith.constant 0 : index
    %c0_0 = arith.constant 0 : index
    %0 = vector.load %arg1[%c0, %c0_0] : memref<8x128xf32, #tpu.memory_space<vmem>>, vector<8x128xf32>
    %1 = arith.truncf %0 : vector<8x128xf32> to vector<8x128xbf16>
    %c0_1 = arith.constant 0 : index
    %c0_2 = arith.constant 0 : index
    %2 = vector.load %arg2[%c0_1, %c0_2] : memref<128x128xbf16, #tpu.memory_space<vmem>>, vector<128x128xbf16>
    %cst = arith.constant dense<0.000000e+00> : vector<8x128xf32>
    %3 = tpu.matmul %1, %2, %cst {dimension_numbers = #tpu.dot_dimension_numbers<[1], [0], [0], [1], [0, 0, 1, 1], [], []>} : vector<8x128xbf16>, vector<128x128xbf16>, vector<8x128xf32> -> vector<8x128xf32>
    %c0_3 = arith.constant 0 : index
    %c0_4 = arith.constant 0 : index
    %4 = vector.load %arg3[%c0_3, %c0_4] : memref<1x128xf32, #tpu.memory_space<vmem>>, vector<1x128xf32>
    %5 = vector.broadcast %4 : vector<1x128xf32> to vector<8x128xf32>
    %6 = arith.addf %3, %5 : vector<8x128xf32>
    %c0_5 = arith.constant 0 : index
    %c0_6 = arith.constant 0 : index
    %7 = vector.load %arg4[%c0_5, %c0_6] : memref<8x128xf32, #tpu.memory_space<vmem>>, vector<8x128xf32>
    tpu.vector_store %arg4[%c0_5, %c0_6], %6 {strides = array<i32>} : memref<8x128xf32, #tpu.memory_space<vmem>>, vector<8x128xf32>,
    return
  }
  func.func @transform_0(%arg0: i32) -> (i32, i32) {
    %c0_i32 = arith.constant 0 : i32
    %c0_i32_0 = arith.constant 0 : i32
    return %arg0, %c0_i32 : i32, i32
  }
  func.func @transform_1(%arg0: i32) -> (i32, i32) {
    %c0_i32 = arith.constant 0 : i32
    %c0_i32_0 = arith.constant 0 : i32
    %c0_i32_1 = arith.constant 0 : i32
    return %c0_i32, %c0_i32_0 : i32, i32
  }
  func.func @transform_2(%arg0: i32) -> (i32, i32) {
    %c0_i32 = arith.constant 0 : i32
    %c0_i32_0 = arith.constant 0 : i32
    %c0_i32_1 = arith.constant 0 : i32
    return %c0_i32, %c0_i32_0 : i32, i32
  }
  func.func @transform_3(%arg0: i32) -> (i32, i32) {
    %c0_i32 = arith.constant 0 : i32
    %c0_i32_0 = arith.constant 0 : i32
    return %arg0, %c0_i32 : i32, i32
  }
}

</mosaic_0001>

<bundles_post_ra>
// kernel: transformer_forward.6
= control target key start
LH: loop header
LB: loop body
LE: loop exit
PB: predicated region body
PF: predicated region fallthrough
CT: control target
= control target key end

     0   :  { %s2664_s0 = inlined_call_operand.vmem [shape: f32[2,8,128], index: 0, kind: input, shape index: {}]   ;;  %s2665_s1 = inlined_call_operand.vmem [shape: f32[2,1,8], index: 1, kind: input, shape index: {}]   ;;  %s2666_s2 = inlined_call_operand.hbm [shape: bf16[128,128], index: 2, kind: input, shape index: {}]   ;;  %s2667_s3 = inlined_call_operand.vmem [shape: f32[1,128], index: 3, kind: input, shape index: {}]   ;;  %s2668_s4 = inlined_call_operand.hbm [shape: bf16[128,128], index: 4, kind: input, shape index: {}]   ;;  %s2669_s5 = inlined_call_operand.vmem [shape: f32[1,128], index: 5, kind: input, shape index: {}]   ;;  %s2670_s6 = inlined_call_operand.hbm [shape: bf16[128,128], index: 6, kind: input, shape index: {}]   ;;  %s2671_s7 = inlined_call_operand.vmem [shape: f32[1,128], index: 7, kind: input, shape index: {}]   ;;  %s2672_s8 = inlined_call_operand.hbm [shape: bf16[128,128], index: 8, kind: input, shape index: {}]   ;;  %s2673_s9 = inlined_call_operand.vmem [shape: f32[1,128], index: 9, kind: input, shape index: {}]   ;;  %s2674_s10 = inlined_call_operand.vmem [shape: f32[1,128], index: 10, kind: input, shape index: {}]   ;;  %s2675_s11 = inlined_call_operand.vmem [shape: f32[1,128], index: 11, kind: input, shape index: {}]   ;;  %s2676_s12 = inlined_call_operand.vmem [shape: bf16[128,128], index: 12, kind: input, shape index: {}]   ;;  %s2677_s13 = inlined_call_operand.vmem [shape: f32[1,128], index: 13, kind: input, shape index: {}]   ;;  %s2678_s14 = inlined_call_operand.hbm [shape: bf16[128,128], index: 14, kind: input, shape index: {}]   ;;  %s2679_s15 = inlined_call_operand.hbm [shape: f32[1,128], index: 15, kind: input, shape index: {}]   ;;  %s2680_s16 = inlined_call_operand.hbm [shape: f32[1,128], index: 16, kind: input, shape index: {}]   ;;  %s2681_s17 = inlined_call_operand.hbm [shape: f32[1,128], index: 17, kind: input, shape index: {}]   ;;  %s2682_s18 = inlined_call_operand.vmem [shape: f32[2,8,128], index: 18, kind: output, shape index: {}]  }
   0x1   :  { %2684 = sst [smem:[#allocation22_spill]] %s2664_s0 }
   0x2   :  { %2685 = sst [smem:[#allocation23_spill]] %s2665_s1 }
   0x3   :  { %2686 = sst [smem:[#allocation24_spill]] %s2666_s2 }
   0x4   :  { %2687 = sst [smem:[#allocation25_spill]] %s2668_s4 }
   0x5   :  { %2688 = sst [smem:[#allocation26_spill]] %s2672_s8 }
   0x6   :  { %2689 = sst [smem:[#allocation27_spill]] %s2679_s15 }
   0x7   :  { %2690 = sst [smem:[#allocation28_spill]] %s2682_s18 }
   0x8   :  { %23 = vsyncpa [#allocation4], 0 }
   0x9   :  { %24 = vsyncpa [#allocation6], 0 }
   0xa   :  { %25 = vsyncpa [#allocation9], 0 }
   0xb   :  { %26 = vsyncpa [#allocation12], 0 }
   0xc   :  { %27 = vsyncpa [#allocation15], 0  ;;  %s2454_s27 = smov 0  }
   0xd LB: > { %2691 = sst [smem:[#allocation21_spill]] %s2340_s27  ;;  %s2460_s28 = sadd.s32 4294967295, %s2340_s27   ;;  %s2340_s27 = sphi %s2454_s27, %s33_s27  }
   0xe   : > { %p1675_p0 = scmp.ge.s32.totalorder %s2340_s27, 1  ;;  %p452_p1 = scmp.lt.s32.totalorder %s2340_s27, 3 }
   0xf   : > { %p2003_p2 = scmp.eq.s32.totalorder %s2460_s28, 0  ;;  %s2692_s4 = sld [smem:[#allocation25_spill]] }
  0x10   : > { %p2468_p3 = pnand %p1675_p0, %p452_p1  ;;  %s2694_s8 = sld [smem:[#allocation26_spill]] }
  0x11   : > { %s2342_s22 = smov [#allocation5]   ;;  %s2343_s24 = smov [#allocation8]  }
  0x12   : > { %p1978_p4 = pneg %p2468_p3  ;;  %s482_s2 = sshll.u32 %s2342_s22, 4  ;;  %s483_s2 = int_to_ptr.vmem [resolvable:$true] %s482_s2 }
  0x13   : > { %s516_s25 = sshll.u32 %s2343_s24, 4  ;;  %s2696_s15 = sld [smem:[#allocation27_spill]]  ;;  %s517_s25 = int_to_ptr.vmem [resolvable:$true] %s516_s25 }
  0x14   : > { %p2479_p5 = pnand %p2003_p2, %p1978_p4  ;;  %s2344_s1 = smov 64  }
  0x15   : > { %s480_s0 = sshll.u32 %s2692_s4, 4  ;;  %s2345_s20 = smov 4   ;;  %s481_s0 = int_to_ptr.hbm [resolvable:$true] %s480_s0 }
  0x16   : > { %s514_s21 = sshll.u32 %s2694_s8, 4  ;;  %s2346_s22 = smov [#allocation11]   ;;  %s515_s21 = int_to_ptr.hbm [resolvable:$true] %s514_s21 }
  0x17   : > { %1984 = dma.hbm_to_vmem [thread:$0]  (!%p2479_p5), %s481_s0, 1024, %s483_s2, [#allocation6], %s2344_s1, %s2344_s1, %s2345_s20  }
  0x18   : > { %1990 = dma.hbm_to_vmem [thread:$0]  (!%p2479_p5), %s515_s21, 1024, %s517_s25, [#allocation9], %s2344_s1, %s2344_s1, %s2345_s20  }
  0x19   : > { %s558_s30 = sshll.u32 %s2696_s15, 4  ;;  %s560_s24 = sshll.u32 %s2346_s22, 4  ;;  %s559_s30 = int_to_ptr.hbm [resolvable:$true] %s558_s30  ;;  %s561_s24 = int_to_ptr.vmem [resolvable:$true] %s560_s24 }
  0x1a   : > { %s2697_s29 = sld [smem:[#allocation24_spill]]  ;;  %s497_s0 = sshll.u32 %s2670_s6, 4  ;;  %s498_s0 = int_to_ptr.hbm [resolvable:$true] %s497_s0 }
  0x1b   : > { %1996 = dma.hbm_to_vmem [thread:$0]  (!%p2479_p5), %s559_s30, 16, %s561_s24, [#allocation12]  }
  0x1c   : > { %s2347_s2 = smov [#allocation3]   ;;  %s2348_s4 = smov [#allocation7]  }
  0x1d   : > { %s465_s18 = sshll.u32 %s2347_s2, 4  ;;  %s499_s21 = sshll.u32 %s2348_s4, 4  ;;  %s466_s18 = int_to_ptr.vmem [resolvable:$true] %s465_s18  ;;  %s500_s21 = int_to_ptr.vmem [resolvable:$true] %s499_s21 }
  0x1e   : > { %s543_s30 = sshll.u32 %s2678_s14, 4  ;;  %s570_s24 = sshll.u32 %s2680_s16, 4  ;;  %s544_s30 = int_to_ptr.hbm [resolvable:$true] %s543_s30  ;;  %s571_s24 = int_to_ptr.hbm [resolvable:$true] %s570_s24 }
  0x1f   : > { %1987 = dma.hbm_to_vmem [thread:$0]  (!%p2479_p5), %s498_s0, 1024, %s500_s21, [#allocation6], %s2344_s1, %s2344_s1, %s2345_s20  }
  0x20   : > { %s463_s8 = sshll.u32 %s2697_s29, 4  ;;  %s2350_s26 = smov [#allocation13]   ;;  %s464_s8 = int_to_ptr.hbm [resolvable:$true] %s463_s8 }
  0x21   : > { %1981 = dma.hbm_to_vmem [thread:$0]  (!%p2479_p5), %s464_s8, 1024, %s466_s18, [#allocation4], %s2344_s1, %s2344_s1, %s2345_s20  }
  0x22   : > { %s2349_s8 = smov [#allocation10]   ;;  %s572_s29 = sshll.u32 %s2350_s26, 4  ;;  %s573_s29 = int_to_ptr.vmem [resolvable:$true] %s572_s29 }
  0x23   : > { %s545_s18 = sshll.u32 %s2349_s8, 4  ;;  %s582_s0 = sshll.u32 %s2681_s17, 4  ;;  %s546_s18 = int_to_ptr.vmem [resolvable:$true] %s545_s18  ;;  %s583_s0 = int_to_ptr.hbm [resolvable:$true] %s582_s0 }
  0x24   : > { %1993 = dma.hbm_to_vmem [thread:$0]  (!%p2479_p5), %s544_s30, 1024, %s546_s18, [#allocation9], %s2344_s1, %s2344_s1, %s2345_s20  }
  0x25   : > { %1999 = dma.hbm_to_vmem [thread:$0]  (!%p2479_p5), %s571_s24, 16, %s573_s29, [#allocation12]  }
  0x26   : > { %s2351_s21 = smov [#allocation14]   ;;  %610 = sbr.rel (%p2468_p3) target bundleno = 2000 (0x7d0), region = 92 }
  0x27   : > { %s584_s25 = sshll.u32 %s2351_s21, 4  ;;  %s585_s25 = int_to_ptr.vmem [resolvable:$true] %s584_s25 }
  0x28   : > { %2002 = dma.hbm_to_vmem [thread:$0]  (!%p2479_p5), %s583_s0, 16, %s585_s25, [#allocation15]  }
  0x2b   : > { %2319 = dma.done.wait (%p2003_p2), [#allocation4], 1024  }
  0x2c   : > { %2321 = vsyncadd (%p2003_p2), [#allocation4], 4294966272 }
  0x2d   : > { %2323 = dma.done.wait (%p2003_p2), [#allocation6], 2048  }
  0x2e   : > { %2325 = vsyncadd (%p2003_p2), [#allocation6], 4294965248 }
  0x2f   : > { %2327 = dma.done.wait (%p2003_p2), [#allocation9], 2048  }
  0x30   : > { %2329 = vsyncadd (%p2003_p2), [#allocation9], 4294965248 }
  0x31   : > { %2331 = dma.done.wait (%p2003_p2), [#allocation12], 32  }
  0x32   : > { %2333 = vsyncadd (%p2003_p2), [#allocation12], 4294967264 }
  0x33   : > { %2335 = dma.done.wait (%p2003_p2), [#allocation15], 16  }
  0x34   : > { %2337 = vsyncadd (%p2003_p2), [#allocation15], 4294967280  ;;  %v1905_v0 = vld [vmem:[#allocation3 + $0x38] sm:$0xff]  ;;  %v1904_v2 = vld [vmem:[#allocation3 + $0x30] sm:$0xff]  ;;  %p701_p6 = scmp.lt.s32.totalorder %s2460_s28, 1  ;;  %s2698_s20 = sld [smem:[#allocation22_spill]] }
  0x35   : > { %v1913_v1 = vld [vmem:[#allocation5 + $0x38] sm:$0xff]  ;;  %839 = vmatpush.bf16.msra.mxu0 %v1905_v0  ;;  %v1912_v3 = vld [vmem:[#allocation5 + $0x30] sm:$0xff]  ;;  %v1903_v5 = vld [vmem:[#allocation3 + $0x28] sm:$0xff]  ;;  %vm988_vm0 = vcmask 64512   ;;  %s2352_s8 = smov 112   ;;  %s2353_s18 = smov 120  }
  0x36   : > { %904 = vmatpush.bf16.msra.mxu1 %v1913_v1  ;;  %v1921_v4 = vld [vmem:[#allocation7 + $0x38] sm:$0xff]  ;;  %v1911_v6 = vld [vmem:[#allocation5 + $0x28] sm:$0xff]  ;;  %v1920_v7 = vld [vmem:[#allocation7 + $0x30] sm:$0xff]  ;;  %s2703_s28 = smov (!%p701_p6, %s2460_s28), 1  ;;  %s2354_s26 = smov 104   ;;  %vm1023_vm1 = vcmask 1043456  }
  0x37   : > { %968 = vmatpush.bf16.msra.mxu2 %v1921_v4  ;;  %v1902_v8 = vld [vmem:[#allocation3 + $0x20] sm:$0xff]  ;;  %v1919_v10 = vld [vmem:[#allocation7 + $0x28] sm:$0xff]  ;;  %v1901_v11 = vld [vmem:[#allocation3 + $0x18] sm:$0xff]  ;;  %s1694_s19 = sshll.u32 %s2703_s28, 3  ;;  %s2699_s21 = sld [smem:[#allocation23_spill]]  ;;  %vm1110_vm2 = vcmask 130112  }
  0x38   : > { %v1910_v9 = vld [vmem:[#allocation5 + $0x20] sm:$0xff]  ;;  %v1909_v12 = vld [vmem:[#allocation5 + $0x18] sm:$0xff]  ;;  %v1900_v14 = vld [vmem:[#allocation3 + $0x10] sm:$0xff]  ;;  %s2356_s23 = smov 8   ;;  %s2357_s1 = smov 16   ;;  %vm1172_vm3 = vcmask 195712  }
  0x39   : > { %840 = vmatpush.bf16.msra.mxu0 %v1904_v2  ;;  %v1918_v13 = vld [vmem:[#allocation7 + $0x20] sm:$0xff]  ;;  %v1908_v15 = vld [vmem:[#allocation5 + $0x10] sm:$0xff]  ;;  %v1917_v16 = vld [vmem:[#allocation7 + $0x18] sm:$0xff]  ;;  %vm1234_vm4 = vcmask 261312   ;;  %s2700_s2 = sld [smem:[#allocation28_spill]] }
  0x3a   : > { %905 = vmatpush.bf16.msra.mxu1 %v1912_v3  ;;  %v1899_v17 = vld [vmem:[#allocation3 + $0x8] sm:$0xff]  ;;  %s704_s22 = scalar_lea.vmem %s2698_s20, %s1694_s19  ;;  %v1916_v19 = vld [vmem:[#allocation7 + $0x10] sm:$0xff]  ;;  %v1898_v20 = vld [vmem:[#allocation3] sm:$0xff]  ;;  %s2358_s20 = smov 24  }
  0x3b   : > { %969 = vmatpush.bf16.msra.mxu2 %v1920_v7  ;;  %v1907_v18 = vld [vmem:[#allocation5 + $0x8] sm:$0xff]  ;;  %v1906_v21 = vld [vmem:[#allocation5] sm:$0xff]  ;;  %v2564_v22 = vld [vmem:[%s704_s22] sm:$0xff]  ;;  %v2355_v7 = vmov 0.0  }
  0x3c   : > { %v1915_v23 = vld [vmem:[#allocation7 + $0x8] sm:$0xff]  ;;  %v787_v24 = vpack.c.bf16 %v2564_v22, %v2564_v22  ;;  %v1914_v25 = vld [vmem:[#allocation7] sm:$0xff]  ;;  %v2044_v26 = vld [vmem:[%s2667_s3] ss:$0 sm:$0xff]  ;;  %984 = vst [vmem:[#allocation2] sm:$0xff] %v2355_v7 }
  0x3d   : > { %841 = vmatpush.bf16.msra.mxu0 %v1903_v5  ;;  %v2045_v27 = vld [vmem:[%s2669_s5] ss:$0 sm:$0xff]  ;;  %s707_s25 = scalar_lea.vmem %s2699_s21, %s2703_s28 }
  0x3e   : > { %906 = vmatpush.bf16.msra.mxu1 %v1911_v6  ;;  %v2046_v43 = vld [vmem:[%s2671_s7] ss:$0 sm:$0xff] }
  0x3f   : > { %970 = vmatpush.bf16.msra.mxu2 %v1919_v10  ;;  %v714_v52 = vld [vmem:[%s707_s25] sm:$0x1]  ;;  %s711_s4 = scalar_lea.vmem %s2700_s2, %s1694_s19 }
  0x40   : > { %v715_v53 = vsub.f32 1.0, %v714_v52  ;;  %v1925_v7 = vld [vmem:[#allocation8 + $0x18] sm:$0xff] }
  0x41   : > { %842 = vmatpush.bf16.msra.mxu0 %v1902_v8 }
  0x42   : > { %907 = vmatpush.bf16.msra.mxu1 %v1910_v9  ;;  %v716_v54 = vmul.f32 -1e+09, %v715_v53 }
  0x43   : > { %971 = vmatpush.bf16.msra.mxu2 %v1918_v13 }
  0x44   : > { %v986_v55 = vperm.slane %v716_v54, 0 }
  0x45   : > { %843 = vmatpush.bf16.msra.mxu0 %v1901_v11 }
  0x46   : > { %908 = vmatpush.bf16.msra.mxu1 %v1909_v12 }
  0x47   : > { %972 = vmatpush.bf16.msra.mxu2 %v1917_v16 }
  0x49   : > { %844 = vmatpush.bf16.msra.mxu0 %v1900_v14 }
  0x4a   : > { %909 = vmatpush.bf16.msra.mxu1 %v1908_v15 }
  0x4b   : > { %973 = vmatpush.bf16.msra.mxu2 %v1916_v19 }
  0x4d   : > { %845 = vmatpush.bf16.msra.mxu0 %v1899_v17 }
  0x4e   : > { %910 = vmatpush.bf16.msra.mxu1 %v1907_v18 }
  0x4f   : > { %974 = vmatpush.bf16.msra.mxu2 %v1915_v23 }
  0x51   : > { %846 = vmatpush.bf16.msra.mxu0 %v1898_v20 }
  0x52   : > { %911 = vmatpush.bf16.msra.mxu1 %v1906_v21 }
  0x53   : > { %975 = vmatpush.bf16.msra.mxu2 %v1914_v25 }
  0x54   : > { %847 = vmatmul.bf16.vlgmr.msra.gmra.mxu0 %v787_v24 }
  0x55   : > { %912 = vmatmul.bf16.vlgmr.msra.gmra.mxu1 %v787_v24 }
  0x56   : > { %976 = vmatmul.bf16.vlgmr.msra.gmra.mxu2 %v787_v24 }
  0xd1   : > { %v848_v28 = vpop.f32.mrf.mxu0 }
  0xd2   : > { %v913_v29 = vpop.f32.mrf.mxu1  ;;  %v849_v30 = vadd.f32 %v2044_v26, %v848_v28 }
  0xd3   : > { %v914_v31 = vadd.f32 %v2045_v27, %v913_v29 }
  0xd4   : > { %v852_v32 = vmul.f32 0.35355338, %v849_v30 }
  0xd5   : > { %v982_v33 = vpack.c.bf16 %v914_v31, %v914_v31 }
  0xd6   : > { %v981_v34 = vpack.c.bf16 %v852_v32, %v852_v32 }
  0xd7   : > { %v1047_v35 = vunpack.c.l.b16 %v982_v33  ;;  %v993_v36 = vsel %vm988_vm0, %v982_v33, 0 }
  0xd8   : > { %1002 = vmatpush.bf16.xpose.msrb.mxu0 %v993_v36  ;;  %v1042_v40 = vunpack.c.l.b16 %v981_v34 }
  0xd9   : > { %v1048_v37 = vpack.c.b16 %v1047_v35, %v1047_v35  ;;  %v850_v38 = vpop.f32.mrf.mxu0  ;;  %v977_v42 = vpop.f32.mrf.mxu2 }
  0xda   : > { %v915_v39 = vpop.f32.mrf.mxu1  ;;  %v1043_v41 = vpack.c.b16 %v1042_v40, %v1042_v40  ;;  %v978_v44 = vadd.f32 %v2046_v43, %v977_v42 }
  0xdb   : > { %1114 = vrot.lane.b32.xlu2 %v1048_v37, %s2352_s8  ;;  %1049 = vrot.lane.b32.xlu1 %v1048_v37, %s2353_s18 }
  0xdc   : > { %v2584_v46 = vpack.c.bf16 %v978_v44, %v978_v44 }
  0xde   : > { %v1025_v47 = vsel %vm1023_vm1, %v2584_v46, 0  ;;  %v1083_v26 = vunpack.c.l.b16 %v2584_v46 }
  0xdf   : > { %1792 = vmatmul.msk.bf16.vlgmr.msrb.gmra.mxu0 %vm988_vm0, %v981_v34  ;;  %1034 = vmatpush.bf16.msra.mxu3 %v1025_v47 }
  0xe0   : > { %v1084_v27 = vpack.c.b16 %v1083_v26, %v1083_v26  ;;  %v1933_v26 = vld [vmem:[%s2676_s12 + $0x18] sm:$0xff] }
  0xe1   : > { %v979_v45 = vpop.f32.mrf.mxu2 }
  0xe3   : > { %1176 = vrot.lane.b32.xlu2 %v1048_v37, %s2354_s26  ;;  %1044 = vrot.lane.b32.xlu1 %v1043_v41, %s2353_s18 }
  0xeb   : > { %1174 = vrot.lane.b32.xlu1 %v1043_v41, %s2354_s26 }
 0x135   : > { %v1115_v48 = vpop.permute.xlu2 %1114 }
 0x136   : > { %v1120_v49 = vsel %vm988_vm0, %v1115_v48, 0 }
 0x137   : > { %1129 = vmatpush.bf16.xpose.msrb.mxu1 %v1120_v49 }
 0x13d   : > { %v1177_v4 = vpop.permute.xlu2 %1176 }
 0x13e   : > { %v1182_v6 = vsel %vm988_vm0, %v1177_v4, 0  ;;  %v1928_v4 = vld [vmem:[#allocation8 + $0x30] sm:$0xff] }
 0x14d   : > { %v1050_v50 = vpop.permute.xlu1 %1049 }
 0x14e   : > { %v1055_v51 = vsel %vm988_vm0, %v1050_v50, 0 }
 0x14f   : > { %1064 = vmatpush.bf16.xpose.msrb.mxu3 %v1055_v51 }
 0x155   : > { %v1045_v9 = vpop.permute.xlu1 %1044 }
 0x15c   : > { %v1004_v56 = vpop.f32.mrf.mxu0 }
 0x15d   : > { %v1005_v57 = vadd.f32 %v1004_v56, %v986_v55  ;;  %v1175_v10 = vpop.permute.xlu1 %1174 }
 0x15f   : > { %v1008_v58 = vsel %vm988_vm0, %v1005_v57, -inf }
 0x160   : > { %1009 = vmax.xlane.f32.xlu0 %v1008_v58 }
 0x164   : > { %v1006_v59 = vpop.f32.mrf.mxu0 }
 0x1d3   : > { %v1010_v60 = vpop.xlane.xlu0 %1009 }
 0x1d4   : > { %v1011_v61 = vsub.f32 %v1005_v57, %v1010_v60 }
 0x1d6   : > { %v1012_v62 = vmul.f32 1.442695, %v1011_v61 }
 0x1d8   : > { %2054 = vpow2.f32 %v1012_v62 }
 0x1de   : > { %v2055_v63 = vpop.eup %2054 }
 0x1df   : > { %v1014_v0 = vsel %vm988_vm0, %v2055_v63, 0.0 }
 0x1e0   : > { %1015 = vadd.xlane.f32.xlu0 %v1014_v0 }
 0x1f4   : > { %1112 = vrot.lane.b32.xlu0 %v1043_v41, %s2352_s8 }
 0x253   : > { %v1016_v1 = vpop.xlane.xlu0 %1015 }
 0x254   : > { %2056 = vrcp.f32 %v1016_v1 }
 0x25a   : > { %v2057_v2 = vpop.eup %2056 }
 0x25b   : > { %v1018_v3 = vmul.f32 %v2057_v2, %v2055_v63 }
 0x25d   : > { %v1019_v5 = vpack.c.bf16 %v1018_v3, %v1018_v3  ;;  %v1929_v3 = vld [vmem:[#allocation8 + $0x38] sm:$0xff] }
 0x25e   : > { %1289 = vmatpush.bf16.msra.mxu1 %v1929_v3 }
 0x25f   : > { %1793 = vmatmul.msk.bf16.vlgmr.msra.gmra.mxu3 %vm988_vm0, %v1019_v5  ;;  %v1927_v5 = vld [vmem:[#allocation8 + $0x28] sm:$0xff] }
 0x260   : > { %1191 = vmatpush.bf16.xpose.msra.mxu3 %v1182_v6  ;;  %v1926_v6 = vld [vmem:[#allocation8 + $0x20] sm:$0xff] }
 0x262   : > { %1290 = vmatpush.bf16.msra.mxu1 %v1928_v4 }
 0x266   : > { %v1113_v8 = vpop.permute.xlu0 %1112  ;;  %1291 = vmatpush.bf16.msra.mxu1 %v1927_v5 }
 0x267   : > { %1796 = vmatmul.msk.bf16.vlgmr.msrb.gmra.mxu1 %vm988_vm0, %v1113_v8  ;;  %v1924_v8 = vld [vmem:[#allocation8 + $0x10] sm:$0xff] }
 0x26a   : > { %1292 = vmatpush.bf16.msra.mxu1 %v1926_v6 }
 0x26e   : > { %1293 = vmatpush.bf16.msra.mxu1 %v1925_v7 }
 0x26f   : > { %1794 = vmatmul.msk.bf16.vlgmr.msrb.gmra.mxu3 %vm988_vm0, %v1045_v9 }
 0x272   : > { %1294 = vmatpush.bf16.msra.mxu1 %v1924_v8 }
 0x27f   : > { %1798 = vmatmul.msk.bf16.vlgmr.msra.gmra.mxu3 %vm988_vm0, %v1175_v10 }
 0x2e2   : > { %v1036_v11 = vpop.f32.mrf.mxu3 }
 0x2e3   : > { %1040 = vst.msk [vmem:[#allocation2] sm:$0xff] %vm988_vm0, %v1036_v11  ;;  %v1923_v11 = vld [vmem:[#allocation8 + $0x8] sm:$0xff] }
 0x2e4   : > { %v1131_v12 = vpop.f32.mrf.mxu1  ;;  %1295 = vmatpush.bf16.msra.mxu1 %v1923_v11 }
 0x2e5   : > { %v1132_v13 = vadd.f32 %v1131_v12, %v986_v55  ;;  %v1922_v12 = vld [vmem:[#allocation8] sm:$0xff] }
 0x2e7   : > { %v1135_v14 = vsel %vm988_vm0, %v1132_v13, -inf }
 0x2e8   : > { %1136 = vmax.xlane.f32.xlu1 %v1135_v14  ;;  %1296 = vmatpush.bf16.msra.mxu1 %v1922_v12 }
 0x2ea   : > { %v1038_v15 = vpop.f32.mrf.mxu3 }
 0x2ec   : > { %v1133_v16 = vpop.f32.mrf.mxu1 }
 0x2ed   : > { %v2047_v16 = vld [vmem:[%s2673_s9] ss:$0 sm:$0xff] }
 0x2f2   : > { %v1066_v17 = vpop.f32.mrf.mxu3 }
 0x2f3   : > { %v1067_v18 = vadd.f32 %v1066_v17, %v986_v55 }
 0x2f5   : > { %v1070_v19 = vsel %vm988_vm0, %v1067_v18, -inf }
 0x2f6   : > { %1071 = vmax.xlane.f32.xlu2 %v1070_v19 }
 0x2fa   : > { %v1068_v20 = vpop.f32.mrf.mxu3 }
 0x302   : > { %v1193_v21 = vpop.f32.mrf.mxu3 }
 0x303   : > { %v1194_v23 = vadd.f32 %v1193_v21, %v986_v55 }
 0x305   : > { %v1197_v24 = vsel %vm988_vm0, %v1194_v23, -inf }
 0x306   : > { %1198 = vmax.xlane.f32.xlu0 %v1197_v24  ;;  %v1936_v24 = vld [vmem:[%s2676_s12 + $0x30] sm:$0xff] }
 0x30a   : > { %v1195_v25 = vpop.f32.mrf.mxu3 }
 0x30b   : > { %v1935_v25 = vld [vmem:[%s2676_s12 + $0x28] sm:$0xff] }
 0x31a   : > { %1147 = vrot.lane.b32.xlu0 %v1084_v27, %s2352_s8 }
 0x35b   : > { %v1137_v28 = vpop.xlane.xlu1 %1136 }
 0x35c   : > { %v1138_v29 = vsub.f32 %v1132_v13, %v1137_v28  ;;  %v1931_v28 = vld [vmem:[%s2676_s12 + $0x8] sm:$0xff] }
 0x35e   : > { %v1139_v30 = vmul.f32 1.442695, %v1138_v29  ;;  %v1930_v29 = vld [vmem:[%s2676_s12] sm:$0xff] }
 0x360   : > { %2058 = vpow2.f32 %v1139_v30 }
 0x366   : > { %v2059_v31 = vpop.eup %2058 }
 0x367   : > { %v1141_v32 = vsel %vm988_vm0, %v2059_v31, 0.0 }
 0x368   : > { %1142 = vadd.xlane.f32.xlu1 %v1141_v32 }
 0x369   : > { %v1072_v33 = vpop.xlane.xlu2 %1071 }
 0x36a   : > { %v1073_v34 = vsub.f32 %v1067_v18, %v1072_v33 }
 0x36c   : > { %v1074_v35 = vmul.f32 1.442695, %v1073_v34 }
 0x36e   : > { %2060 = vpow2.f32 %v1074_v35  ;;  %v1945_v35 = vld [vmem:[#allocation10 + $0x38] sm:$0xff] }
 0x36f   : > { %1487 = vmatpush.bf16.msrb.mxu3 %v1945_v35 }
 0x374   : > { %v2061_v36 = vpop.eup %2060 }
 0x375   : > { %v1076_v37 = vsel %vm988_vm0, %v2061_v36, 0.0 }
 0x376   : > { %1077 = vadd.xlane.f32.xlu2 %v1076_v37  ;;  %v1944_v37 = vld [vmem:[#allocation10 + $0x30] sm:$0xff] }
 0x377   : > { %1488 = vmatpush.bf16.msrb.mxu3 %v1944_v37 }
 0x379   : > { %v1199_v38 = vpop.xlane.xlu0 %1198 }
 0x37a   : > { %v1200_v39 = vsub.f32 %v1194_v23, %v1199_v38  ;;  %v1937_v23 = vld [vmem:[%s2676_s12 + $0x38] sm:$0xff] }
 0x37c   : > { %v1201_v40 = vmul.f32 1.442695, %v1200_v39  ;;  %v1943_v39 = vld [vmem:[#allocation10 + $0x28] sm:$0xff] }
 0x37d   : > { %1489 = vmatpush.bf16.msrb.mxu3 %v1943_v39 }
 0x37e   : > { %2062 = vpow2.f32 %v1201_v40  ;;  %v1942_v40 = vld [vmem:[#allocation10 + $0x20] sm:$0xff] }
 0x381   : > { %1490 = vmatpush.bf16.msrb.mxu3 %v1942_v40 }
 0x384   : > { %v2063_v41 = vpop.eup %2062 }
 0x385   : > { %v1203_v42 = vsel %vm988_vm0, %v2063_v41, 0.0 }
 0x386   : > { %1204 = vadd.xlane.f32.xlu1 %v1203_v42 }
 0x38c   : > { %v1148_v43 = vpop.permute.xlu0 %1147 }
 0x38d   : > { %v1153_v44 = vsel %vm1023_vm1, %v1148_v43, 0  ;;  %v1941_v43 = vld [vmem:[#allocation10 + $0x18] sm:$0xff] }
 0x38e   : > { %1085 = vrot.lane.b32.xlu2 %v1084_v27, %s2353_s18  ;;  %1162 = vmatpush.bf16.msrb.mxu2 %v1153_v44 }
 0x38f   : > { %1491 = vmatpush.bf16.msrb.mxu3 %v1941_v43 }
 0x392   : > { %1421 = vmatpush.bf16.msra.mxu2 %v1937_v23 }
 0x396   : > { %1422 = vmatpush.bf16.msra.mxu2 %v1936_v24  ;;  %v2053_v24 = vld [vmem:[#allocation14] ss:$0 sm:$0xff] }
 0x39a   : > { %1423 = vmatpush.bf16.msra.mxu2 %v1935_v25 }
 0x39f   : > { %1209 = vrot.lane.b32.xlu1 %v1084_v27, %s2354_s26  ;;  %v1932_v27 = vld [vmem:[%s2676_s12 + $0x10] sm:$0xff] }
 0x3db   : > { %v1143_v45 = vpop.xlane.xlu1 %1142 }
 0x3dc   : > { %2064 = vrcp.f32 %v1143_v45 }
 0x3e2   : > { %v2065_v46 = vpop.eup %2064 }
 0x3e3   : > { %v1145_v47 = vmul.f32 %v2065_v46, %v2059_v31  ;;  %v1940_v46 = vld [vmem:[#allocation10 + $0x10] sm:$0xff] }
 0x3e4   : > { %1492 = vmatpush.bf16.msrb.mxu3 %v1940_v46 }
 0x3e5   : > { %v1146_v48 = vpack.c.bf16 %v1145_v47, %v1145_v47 }
 0x3e7   : > { %1797 = vmatmul.msk.bf16.vlgmr.msrb.gmra.mxu2 %vm988_vm0, %v1146_v48 }
 0x3e9   : > { %v1078_v49 = vpop.xlane.xlu2 %1077 }
 0x3ea   : > { %2066 = vrcp.f32 %v1078_v49 }
 0x3f0   : > { %v2067_v50 = vpop.eup %2066 }
 0x3f1   : > { %v1080_v51 = vmul.f32 %v2067_v50, %v2061_v36  ;;  %v1086_v52 = vpop.permute.xlu2 %1085  ;;  %v2048_v50 = vld [vmem:[%s2674_s10] ss:$0 sm:$0xff] }
 0x3f2   : > { %v1091_v53 = vsel %vm1023_vm1, %v1086_v52, 0 }
 0x3f3   : > { %v1081_v54 = vpack.c.bf16 %v1080_v51, %v1080_v51  ;;  %1100 = vmatpush.bf16.msra.mxu0 %v1091_v53  ;;  %v2049_v53 = vld [vmem:[%s2675_s11] ss:$0 sm:$0xff] }
 0x3f6   : > { %1795 = vmatmul.msk.bf16.vlgmr.msra.gmra.mxu0 %vm988_vm0, %v1081_v54 }
 0x3f9   : > { %v1205_v55 = vpop.xlane.xlu1 %1204 }
 0x3fa   : > { %2068 = vrcp.f32 %v1205_v55 }
 0x400   : > { %v2069_v56 = vpop.eup %2068 }
 0x401   : > { %v1207_v57 = vmul.f32 %v2069_v56, %v2063_v41 }
 0x403   : > { %v1208_v60 = vpack.c.bf16 %v1207_v57, %v1207_v57  ;;  %v1939_v57 = vld [vmem:[#allocation10 + $0x8] sm:$0xff] }
 0x404   : > { %1493 = vmatpush.bf16.msrb.mxu3 %v1939_v57 }
 0x411   : > { %v1210_v58 = vpop.permute.xlu1 %1209 }
 0x412   : > { %v1215_v59 = vsel %vm1023_vm1, %v1210_v58, 0  ;;  %v1938_v58 = vld [vmem:[#allocation10] sm:$0xff] }
 0x413   : > { %1224 = vmatpush.bf16.msrb.mxu0 %v1215_v59  ;;  %1494 = vmatpush.bf16.msrb.mxu3 %v1938_v58  ;;  %v2050_v59 = vld [vmem:[%s2677_s13] ss:$0 sm:$0xff] }
 0x416   : > { %1799 = vmatmul.msk.bf16.vlgmr.msrb.gmra.mxu0 %vm988_vm0, %v1208_v60 }
 0x46a   : > { %v1164_v61 = vpop.f32.mrf.mxu2 }
 0x472   : > { %v1166_v62 = vpop.f32.mrf.mxu2 }
 0x473   : > { %v1102_v63 = vpop.f32.mrf.mxu0 }
 0x474   : > { %1107 = vrot.lane.b32.xlu2 %v1102_v63, %s2356_s23 }
 0x47b   : > { %v1104_v0 = vpop.f32.mrf.mxu0 }
 0x47c   : > { %1169 = vrot.lane.b32.xlu2 %v1164_v61, %s2357_s1 }
 0x493   : > { %v1226_v1 = vpop.f32.mrf.mxu0 }
 0x494   : > { %1231 = vrot.lane.b32.xlu0 %v1226_v1, %s2358_s20  ;;  %v2051_v1 = vld [vmem:[#allocation11] ss:$0 sm:$0xff] }
 0x49b   : > { %v1228_v2 = vpop.f32.mrf.mxu0 }
 0x4ce   : > { %v1108_v9 = vpop.permute.xlu2 %1107 }
 0x4cf   : > { %1111 = vst.msk [vmem:[#allocation2] sm:$0xff] %vm1110_vm2, %v1108_v9 }
 0x4d6   : > { %v1170_v10 = vpop.permute.xlu2 %1169 }
 0x4d7   : > { %1173 = vst.msk [vmem:[#allocation2] sm:$0xff] %vm1172_vm3, %v1170_v10 }
 0x506   : > { %v1232_v13 = vpop.permute.xlu0 %1231 }
 0x507   : > { %1235 = vst.msk [vmem:[#allocation2] sm:$0xff] %vm1234_vm4, %v1232_v13 }
 0x50e   : > { %v1236_v14 = vld [vmem:[#allocation2] sm:$0xff] }
 0x50f   : > { %v1237_v15 = vpack.c.bf16 %v1236_v14, %v1236_v14 }
 0x511   : > { %1297 = vmatmul.bf16.vlgmr.msra.gmra.mxu1 %v1237_v15 }
 0x58e   : > { %v1298_v17 = vpop.f32.mrf.mxu1 }
 0x58f   : > { %v1299_v18 = vadd.f32 %v2047_v16, %v1298_v17 }
 0x591   : > { %v1302_v19 = vadd.f32 %v1299_v18, %v2564_v22  ;;  %v1934_v22 = vld [vmem:[%s2676_s12 + $0x20] sm:$0xff] }
 0x592   : > { %1424 = vmatpush.bf16.msra.mxu2 %v1934_v22 }
 0x593   : > { %1303 = vadd.xlane.f32.xlu2 %v1302_v19  ;;  %v1306_v20 = vmul.f32 %v1302_v19, %v1302_v19 }
 0x595   : > { %1307 = vadd.xlane.f32.xlu0 %v1306_v20 }
 0x596   : > { %v1300_v21 = vpop.f32.mrf.mxu1  ;;  %1425 = vmatpush.bf16.msra.mxu2 %v1933_v26 }
 0x597   : > { %v2052_v21 = vld [vmem:[#allocation13] ss:$0 sm:$0xff] }
 0x59a   : > { %1426 = vmatpush.bf16.msra.mxu2 %v1932_v27 }
 0x59e   : > { %1427 = vmatpush.bf16.msra.mxu2 %v1931_v28 }
 0x5a2   : > { %1428 = vmatpush.bf16.msra.mxu2 %v1930_v29 }
 0x606   : > { %v1304_v30 = vpop.xlane.xlu2 %1303 }
 0x607   : > { %v1305_v31 = vmul.f32 0.03125, %v1304_v30 }
 0x608   : > { %v1308_v32 = vpop.xlane.xlu0 %1307 }
 0x609   : > { %v1310_v33 = vmul.f32 %v1305_v31, %v1305_v31  ;;  %v1309_v34 = vmul.f32 0.03125, %v1308_v32  ;;  %v1312_v49 = vsub.f32 %v1302_v19, %v1305_v31 }
 0x60b   : > { %v1311_v36 = vsub.f32 %v1309_v34, %v1310_v33 }
 0x60d   : > { %v1313_v38 = vadd.f32 1e-05, %v1311_v36 }
 0x60f   : > { %2070 = vrsqrt.f32 %v1313_v38  ;;  %vm1320_vm6 = vweird.f32 %v1313_v38 }
 0x615   : > { %v2071_v41 = vpop.eup %2070 }
 0x616   : > { %v1315_v42 = vmul.f32 %v2071_v41, %v1313_v38  ;;  %vm1321_vm5 = vweird.f32 %v2071_v41 }
 0x617   : > { %vm1322_vm7 = vmor %vm1320_vm6, %vm1321_vm5 }
 0x618   : > { %v1316_v44 = vmul.f32 %v2071_v41, %v1315_v42 }
 0x61a   : > { %v1317_v45 = vmul.f32 0.5, %v1316_v44 }
 0x61c   : > { %v1318_v47 = vsub.f32 1.5, %v1317_v45 }
 0x61e   : > { %v1319_v48 = vmul.f32 %v2071_v41, %v1318_v47 }
 0x620   : > { %v1323_v51 = vsel %vm1322_vm7, %v2071_v41, %v1319_v48 }
 0x621   : > { %v1324_v52 = vmul.f32 %v1323_v51, %v1312_v49 }
 0x623   : > { %v1328_v54 = vmul.f32 %v2048_v50, %v1324_v52 }
 0x625   : > { %v1332_v55 = vadd.f32 %v2049_v53, %v1328_v54 }
 0x627   : > { %v1369_v56 = vpack.c.bf16 %v1332_v55, %v1332_v55 }
 0x629   : > { %1429 = vmatmul.bf16.vlgmr.msra.gmra.mxu2 %v1369_v56 }
 0x6ac   : > { %v1430_v60 = vpop.f32.mrf.mxu2 }
 0x6ad   : > { %v1431_v61 = vadd.f32 %v2050_v59, %v1430_v60 }
 0x6af   : > { %v1434_v62 = vmax.f32 %v1431_v61, 0.0 }
 0x6b1   : > { %v1435_v63 = vpack.c.bf16 %v1434_v62, %v1434_v62 }
 0x6b3   : > { %1495 = vmatmul.bf16.vlgmr.msrb.gmra.mxu3 %v1435_v63 }
 0x6b4   : > { %v1432_v0 = vpop.f32.mrf.mxu2 }
 0x736   : > { %v1496_v2 = vpop.f32.mrf.mxu3 }
 0x737   : > { %v1497_v3 = vadd.f32 %v2051_v1, %v1496_v2 }
 0x739   : > { %v1500_v4 = vadd.f32 %v1497_v3, %v1332_v55 }
 0x73b   : > { %1501 = vadd.xlane.f32.xlu1 %v1500_v4  ;;  %v1504_v5 = vmul.f32 %v1500_v4, %v1500_v4 }
 0x73d   : > { %1505 = vadd.xlane.f32.xlu2 %v1504_v5 }
 0x73e   : > { %v1498_v6 = vpop.f32.mrf.mxu3 }
 0x7ae   : > { %v1502_v7 = vpop.xlane.xlu1 %1501 }
 0x7af   : > { %v1503_v8 = vmul.f32 0.03125, %v1502_v7 }
 0x7b0   : > { %v1506_v9 = vpop.xlane.xlu2 %1505 }
 0x7b1   : > { %v1508_v10 = vmul.f32 %v1503_v8, %v1503_v8  ;;  %v1507_v11 = vmul.f32 0.03125, %v1506_v9  ;;  %v1510_v20 = vsub.f32 %v1500_v4, %v1503_v8 }
 0x7b3   : > { %v1509_v12 = vsub.f32 %v1507_v11, %v1508_v10 }
 0x7b5   : > { %v1511_v13 = vadd.f32 1e-05, %v1509_v12 }
 0x7b7   : > { %2072 = vrsqrt.f32 %v1511_v13  ;;  %vm1518_vm9 = vweird.f32 %v1511_v13 }
 0x7bd   : > { %v2073_v14 = vpop.eup %2072 }
 0x7be   : > { %v1513_v15 = vmul.f32 %v2073_v14, %v1511_v13  ;;  %vm1519_vm8 = vweird.f32 %v2073_v14 }
 0x7bf   : > { %vm1520_vm10 = vmor %vm1518_vm9, %vm1519_vm8 }
 0x7c0   : > { %v1514_v16 = vmul.f32 %v2073_v14, %v1513_v15 }
 0x7c2   : > { %v1515_v17 = vmul.f32 0.5, %v1514_v16 }
 0x7c4   : > { %v1516_v18 = vsub.f32 1.5, %v1515_v17 }
 0x7c6   : > { %v1517_v19 = vmul.f32 %v2073_v14, %v1516_v18 }
 0x7c8   : > { %v1521_v23 = vsel %vm1520_vm10, %v2073_v14, %v1517_v19 }
 0x7c9   : > { %v1522_v25 = vmul.f32 %v1521_v23, %v1510_v20 }
 0x7cb   : > { %v1526_v22 = vmul.f32 %v2052_v21, %v1522_v25 }
 0x7cd   : > { %v1530_v26 = vadd.f32 %v2053_v24, %v1526_v22 }
 0x7cf   : > { %1531 = vst [vmem:[%s711_s4] sm:$0xff] %v1530_v26 }
 0x7d0 PF: > { %s2701_s0 = sld [smem:[#allocation21_spill]] }
 0x7d6   : > { %s33_s27 = sadd.s32 1, %s2701_s0  }
 0x7d7   : > { %p30_p7 = scmp.ge.s32.totalorder %s33_s27, 4  }
 0x7d9   :  { %32 = sbr.rel (!%p30_p7) target bundleno = 13 (0xd), region = 158 }
 0x7de   :  { %1551 = vsyncpa [#allocation4], 1 }
 0x7df   :  { %1553 = vsyncpa [#allocation4 + $0x1], 1 }
 0x7e0   :  { %1554 = vsyncpa [#allocation6], 1 }
 0x7e1   :  { %1555 = vsyncpa [#allocation9], 1 }
 0x7e2   :  { %1556 = vsyncpa [#allocation12], 1 }
 0x7e3   :  { %1557 = vsyncpa [#allocation15], 1 }

// kernel: transformer_forward.5
= control target key start
LH: loop header
LB: loop body
LE: loop exit
PB: predicated region body
PF: predicated region fallthrough
CT: control target
= control target key end

     0   :  { %s2484_s0 = inlined_call_operand.vmem [shape: f32[2,8,128], index: 0, kind: input, shape index: {}]   ;;  %s2485_s1 = inlined_call_operand.vmem [shape: f32[2,1,8], index: 1, kind: input, shape index: {}]   ;;  %s2486_s2 = inlined_call_operand.hbm [shape: bf16[128,128], index: 2, kind: input, shape index: {}]   ;;  %s2487_s3 = inlined_call_operand.vmem [shape: f32[1,128], index: 3, kind: input, shape index: {}]   ;;  %s2488_s4 = inlined_call_operand.hbm [shape: bf16[128,128], index: 4, kind: input, shape index: {}]   ;;  %s2489_s5 = inlined_call_operand.vmem [shape: f32[1,128], index: 5, kind: input, shape index: {}]   ;;  %s2490_s6 = inlined_call_operand.hbm [shape: bf16[128,128], index: 6, kind: input, shape index: {}]   ;;  %s2491_s7 = inlined_call_operand.vmem [shape: f32[1,128], index: 7, kind: input, shape index: {}]   ;;  %s2492_s8 = inlined_call_operand.hbm [shape: bf16[128,128], index: 8, kind: input, shape index: {}]   ;;  %s2493_s9 = inlined_call_operand.vmem [shape: f32[1,128], index: 9, kind: input, shape index: {}]   ;;  %s2494_s10 = inlined_call_operand.vmem [shape: f32[1,128], index: 10, kind: input, shape index: {}]   ;;  %s2495_s11 = inlined_call_operand.vmem [shape: f32[1,128], index: 11, kind: input, shape index: {}]   ;;  %s2496_s12 = inlined_call_operand.hbm [shape: bf16[128,128], index: 12, kind: input, shape index: {}]   ;;  %s2497_s13 = inlined_call_operand.vmem [shape: f32[1,128], index: 13, kind: input, shape index: {}]   ;;  %s2498_s14 = inlined_call_operand.hbm [shape: bf16[128,128], index: 14, kind: input, shape index: {}]   ;;  %s2499_s15 = inlined_call_operand.vmem [shape: f32[1,128], index: 15, kind: input, shape index: {}]   ;;  %s2500_s16 = inlined_call_operand.vmem [shape: f32[1,128], index: 16, kind: input, shape index: {}]   ;;  %s2501_s17 = inlined_call_operand.vmem [shape: f32[1,128], index: 17, kind: input, shape index: {}]   ;;  %s2502_s18 = inlined_call_operand.vmem [shape: f32[2,8,128], index: 18, kind: output, shape index: {}]  }
   0x1   :  { %2504 = sst [smem:[#allocation18_spill]] %s2484_s0 }
   0x2   :  { %2505 = sst [smem:[#allocation19_spill]] %s2485_s1 }
   0x3   :  { %2506 = sst [smem:[#allocation20_spill]] %s2486_s2 }
   0x4   :  { %2507 = sst [smem:[#allocation21_spill]] %s2488_s4 }
   0x5   :  { %2508 = sst [smem:[#allocation22_spill]] %s2492_s8 }
   0x6   :  { %2509 = sst [smem:[#allocation23_spill]] %s2502_s18 }
   0x7   :  { %23 = vsyncpa [#allocation4], 0 }
   0x8   :  { %24 = vsyncpa [#allocation6], 0 }
   0x9   :  { %25 = vsyncpa [#allocation9], 0 }
   0xa   :  { %26 = vsyncpa [#allocation12], 0  ;;  %s2318_s27 = smov 0  }
   0xb LB: > { %2510 = sst [smem:[#allocation17_spill]] %s2206_s27  ;;  %s2324_s28 = sadd.s32 4294967295, %s2206_s27   ;;  %s2206_s27 = sphi %s2318_s27, %s32_s27  }
   0xc   : > { %p1629_p0 = scmp.ge.s32.totalorder %s2206_s27, 1  ;;  %p451_p1 = scmp.lt.s32.totalorder %s2206_s27, 3 }
   0xd   : > { %p1939_p2 = scmp.eq.s32.totalorder %s2324_s28, 0  ;;  %s2511_s4 = sld [smem:[#allocation21_spill]] }
   0xe   : > { %p2332_p3 = pnand %p1629_p0, %p451_p1  ;;  %s2513_s8 = sld [smem:[#allocation22_spill]] }
   0xf   : > { %s2208_s22 = smov [#allocation5]   ;;  %s2209_s24 = smov [#allocation8]  }
  0x10   : > { %p1920_p4 = pneg %p2332_p3  ;;  %s481_s2 = sshll.u32 %s2208_s22, 4  ;;  %s482_s2 = int_to_ptr.vmem [resolvable:$true] %s481_s2 }
  0x11   : > { %s515_s25 = sshll.u32 %s2209_s24, 4  ;;  %s2515_s30 = sld [smem:[#allocation20_spill]]  ;;  %s516_s25 = int_to_ptr.vmem [resolvable:$true] %s515_s25 }
  0x12   : > { %p2343_p5 = pnand %p1939_p2, %p1920_p4  ;;  %s2210_s20 = smov 64  }
  0x13   : > { %s479_s0 = sshll.u32 %s2511_s4, 4  ;;  %s2211_s22 = smov 4   ;;  %s480_s0 = int_to_ptr.hbm [resolvable:$true] %s479_s0 }
  0x14   : > { %s513_s21 = sshll.u32 %s2513_s8, 4  ;;  %s2212_s4 = smov [#allocation3]   ;;  %s514_s21 = int_to_ptr.hbm [resolvable:$true] %s513_s21 }
  0x15   : > { %1926 = dma.hbm_to_vmem [thread:$0]  (!%p2343_p5), %s480_s0, 1024, %s482_s2, [#allocation6], %s2210_s20, %s2210_s20, %s2211_s22  }
  0x16   : > { %1932 = dma.hbm_to_vmem [thread:$0]  (!%p2343_p5), %s514_s21, 1024, %s516_s25, [#allocation9], %s2210_s20, %s2210_s20, %s2211_s22  }
  0x17   : > { %s462_s1 = sshll.u32 %s2515_s30, 4  ;;  %s464_s8 = sshll.u32 %s2212_s4, 4  ;;  %s463_s1 = int_to_ptr.hbm [resolvable:$true] %s462_s1  ;;  %s465_s8 = int_to_ptr.vmem [resolvable:$true] %s464_s8 }
  0x18   : > { %s496_s24 = sshll.u32 %s2490_s6, 4  ;;  %s536_s30 = sshll.u32 %s2496_s12, 4  ;;  %s497_s24 = int_to_ptr.hbm [resolvable:$true] %s496_s24  ;;  %s537_s30 = int_to_ptr.hbm [resolvable:$true] %s536_s30 }
  0x19   : > { %1923 = dma.hbm_to_vmem [thread:$0]  (!%p2343_p5), %s463_s1, 1024, %s465_s8, [#allocation4], %s2210_s20, %s2210_s20, %s2211_s22  }
  0x1a   : > { %s2213_s0 = smov [#allocation7]   ;;  %s2214_s4 = smov [#allocation10]  }
  0x1b   : > { %s498_s2 = sshll.u32 %s2213_s0, 4  ;;  %s538_s21 = sshll.u32 %s2214_s4, 4  ;;  %s499_s2 = int_to_ptr.vmem [resolvable:$true] %s498_s2  ;;  %s539_s21 = int_to_ptr.vmem [resolvable:$true] %s538_s21 }
  0x1c   : > { %1929 = dma.hbm_to_vmem [thread:$0]  (!%p2343_p5), %s497_s24, 1024, %s499_s2, [#allocation6], %s2210_s20, %s2210_s20, %s2211_s22  }
  0x1d   : > { %s553_s27 = sshll.u32 %s2498_s14, 4  ;;  %s2215_s8 = smov [#allocation11]   ;;  %s554_s27 = int_to_ptr.hbm [resolvable:$true] %s553_s27 }
  0x1e   : > { %1935 = dma.hbm_to_vmem [thread:$0]  (!%p2343_p5), %s537_s30, 1024, %s539_s21, [#allocation9], %s2210_s20, %s2210_s20, %s2211_s22  }
  0x1f   : > { %s555_s1 = sshll.u32 %s2215_s8, 4  ;;  %593 = sbr.rel (%p2332_p3) target bundleno = 1991 (0x7c7), region = 92  ;;  %s556_s1 = int_to_ptr.vmem [resolvable:$true] %s555_s1 }
  0x20   : > { %1938 = dma.hbm_to_vmem [thread:$0]  (!%p2343_p5), %s554_s27, 1024, %s556_s1, [#allocation12], %s2210_s20, %s2210_s20, %s2211_s22  }
  0x24   : > { %2189 = dma.done.wait (%p1939_p2), [#allocation4], 1024  }
  0x25   : > { %2191 = vsyncadd (%p1939_p2), [#allocation4], 4294966272 }
  0x26   : > { %2193 = dma.done.wait (%p1939_p2), [#allocation6], 2048  }
  0x27   : > { %2195 = vsyncadd (%p1939_p2), [#allocation6], 4294965248 }
  0x28   : > { %2197 = dma.done.wait (%p1939_p2), [#allocation9], 2048  }
  0x29   : > { %2199 = vsyncadd (%p1939_p2), [#allocation9], 4294965248 }
  0x2a   : > { %2201 = dma.done.wait (%p1939_p2), [#allocation12], 1024  }
  0x2b   : > { %2203 = vsyncadd (%p1939_p2), [#allocation12], 4294966272  ;;  %v1855_v0 = vld [vmem:[#allocation3 + $0x38] sm:$0xff]  ;;  %v1854_v2 = vld [vmem:[#allocation3 + $0x30] sm:$0xff]  ;;  %p674_p6 = scmp.lt.s32.totalorder %s2324_s28, 1  ;;  %s2516_s22 = sld [smem:[#allocation18_spill]] }
  0x2c   : > { %v1863_v1 = vld [vmem:[#allocation5 + $0x38] sm:$0xff]  ;;  %812 = vmatpush.bf16.msra.mxu0 %v1855_v0  ;;  %v1862_v3 = vld [vmem:[#allocation5 + $0x30] sm:$0xff]  ;;  %v1853_v5 = vld [vmem:[#allocation3 + $0x28] sm:$0xff]  ;;  %vm961_vm0 = vcmask 64512   ;;  %s2216_s2 = smov 112   ;;  %s2217_s4 = smov 120  }
  0x2d   : > { %877 = vmatpush.bf16.msra.mxu1 %v1863_v1  ;;  %v1871_v4 = vld [vmem:[#allocation7 + $0x38] sm:$0xff]  ;;  %v1861_v6 = vld [vmem:[#allocation5 + $0x28] sm:$0xff]  ;;  %v1870_v7 = vld [vmem:[#allocation7 + $0x30] sm:$0xff]  ;;  %s2521_s28 = smov (!%p674_p6, %s2324_s28), 1  ;;  %s2218_s21 = smov 104   ;;  %vm996_vm1 = vcmask 1043456  }
  0x2e   : > { %941 = vmatpush.bf16.msra.mxu2 %v1871_v4  ;;  %v1852_v8 = vld [vmem:[#allocation3 + $0x20] sm:$0xff]  ;;  %v1869_v10 = vld [vmem:[#allocation7 + $0x28] sm:$0xff]  ;;  %v1851_v11 = vld [vmem:[#allocation3 + $0x18] sm:$0xff]  ;;  %s1644_s19 = sshll.u32 %s2521_s28, 3  ;;  %s2517_s1 = sld [smem:[#allocation19_spill]]  ;;  %vm1083_vm2 = vcmask 130112  }
  0x2f   : > { %v1860_v9 = vld [vmem:[#allocation5 + $0x20] sm:$0xff]  ;;  %v1859_v12 = vld [vmem:[#allocation5 + $0x18] sm:$0xff]  ;;  %v1850_v14 = vld [vmem:[#allocation3 + $0x10] sm:$0xff]  ;;  %s2220_s20 = smov 8   ;;  %vm1145_vm3 = vcmask 195712   ;;  %vm1207_vm4 = vcmask 261312  }
  0x30   : > { %813 = vmatpush.bf16.msra.mxu0 %v1854_v2  ;;  %v1868_v13 = vld [vmem:[#allocation7 + $0x20] sm:$0xff]  ;;  %v1858_v15 = vld [vmem:[#allocation5 + $0x10] sm:$0xff]  ;;  %v1867_v16 = vld [vmem:[#allocation7 + $0x18] sm:$0xff]  ;;  %s2518_s26 = sld [smem:[#allocation23_spill]] }
  0x31   : > { %878 = vmatpush.bf16.msra.mxu1 %v1862_v3  ;;  %v1849_v17 = vld [vmem:[#allocation3 + $0x8] sm:$0xff]  ;;  %s677_s24 = scalar_lea.vmem %s2516_s22, %s1644_s19  ;;  %v1866_v19 = vld [vmem:[#allocation7 + $0x10] sm:$0xff]  ;;  %v1848_v20 = vld [vmem:[#allocation3] sm:$0xff]  ;;  %s2221_s22 = smov 16  }
  0x32   : > { %942 = vmatpush.bf16.msra.mxu2 %v1870_v7  ;;  %v1857_v18 = vld [vmem:[#allocation5 + $0x8] sm:$0xff]  ;;  %v1856_v21 = vld [vmem:[#allocation5] sm:$0xff]  ;;  %v2399_v22 = vld [vmem:[%s677_s24] sm:$0xff]  ;;  %v2219_v7 = vmov 0.0   ;;  %s2222_s24 = smov 24  }
  0x33   : > { %v1865_v23 = vld [vmem:[#allocation7 + $0x8] sm:$0xff]  ;;  %v760_v24 = vpack.c.bf16 %v2399_v22, %v2399_v22  ;;  %v1864_v25 = vld [vmem:[#allocation7] sm:$0xff]  ;;  %v1974_v26 = vld [vmem:[%s2487_s3] ss:$0 sm:$0xff]  ;;  %957 = vst [vmem:[#allocation2] sm:$0xff] %v2219_v7 }
  0x34   : > { %814 = vmatpush.bf16.msra.mxu0 %v1853_v5  ;;  %v1975_v27 = vld [vmem:[%s2489_s5] ss:$0 sm:$0xff]  ;;  %s680_s23 = scalar_lea.vmem %s2517_s1, %s2521_s28 }
  0x35   : > { %879 = vmatpush.bf16.msra.mxu1 %v1861_v6  ;;  %v1976_v43 = vld [vmem:[%s2491_s7] ss:$0 sm:$0xff] }
  0x36   : > { %943 = vmatpush.bf16.msra.mxu2 %v1869_v10  ;;  %v687_v52 = vld [vmem:[%s680_s23] sm:$0x1]  ;;  %s684_s29 = scalar_lea.vmem %s2518_s26, %s1644_s19 }
  0x37   : > { %v688_v53 = vsub.f32 1.0, %v687_v52  ;;  %v1875_v7 = vld [vmem:[#allocation8 + $0x18] sm:$0xff] }
  0x38   : > { %815 = vmatpush.bf16.msra.mxu0 %v1852_v8 }
  0x39   : > { %880 = vmatpush.bf16.msra.mxu1 %v1860_v9  ;;  %v689_v54 = vmul.f32 -1e+09, %v688_v53 }
  0x3a   : > { %944 = vmatpush.bf16.msra.mxu2 %v1868_v13 }
  0x3b   : > { %v959_v55 = vperm.slane %v689_v54, 0 }
  0x3c   : > { %816 = vmatpush.bf16.msra.mxu0 %v1851_v11 }
  0x3d   : > { %881 = vmatpush.bf16.msra.mxu1 %v1859_v12 }
  0x3e   : > { %945 = vmatpush.bf16.msra.mxu2 %v1867_v16 }
  0x40   : > { %817 = vmatpush.bf16.msra.mxu0 %v1850_v14 }
  0x41   : > { %882 = vmatpush.bf16.msra.mxu1 %v1858_v15 }
  0x42   : > { %946 = vmatpush.bf16.msra.mxu2 %v1866_v19 }
  0x44   : > { %818 = vmatpush.bf16.msra.mxu0 %v1849_v17 }
  0x45   : > { %883 = vmatpush.bf16.msra.mxu1 %v1857_v18 }
  0x46   : > { %947 = vmatpush.bf16.msra.mxu2 %v1865_v23 }
  0x48   : > { %819 = vmatpush.bf16.msra.mxu0 %v1848_v20 }
  0x49   : > { %884 = vmatpush.bf16.msra.mxu1 %v1856_v21 }
  0x4a   : > { %948 = vmatpush.bf16.msra.mxu2 %v1864_v25 }
  0x4b   : > { %820 = vmatmul.bf16.vlgmr.msra.gmra.mxu0 %v760_v24 }
  0x4c   : > { %885 = vmatmul.bf16.vlgmr.msra.gmra.mxu1 %v760_v24 }
  0x4d   : > { %949 = vmatmul.bf16.vlgmr.msra.gmra.mxu2 %v760_v24 }
  0xc8   : > { %v821_v28 = vpop.f32.mrf.mxu0 }
  0xc9   : > { %v886_v29 = vpop.f32.mrf.mxu1  ;;  %v822_v30 = vadd.f32 %v1974_v26, %v821_v28 }
  0xca   : > { %v887_v31 = vadd.f32 %v1975_v27, %v886_v29 }
  0xcb   : > { %v825_v32 = vmul.f32 0.35355338, %v822_v30 }
  0xcc   : > { %v955_v33 = vpack.c.bf16 %v887_v31, %v887_v31 }
  0xcd   : > { %v954_v34 = vpack.c.bf16 %v825_v32, %v825_v32 }
  0xce   : > { %v1020_v35 = vunpack.c.l.b16 %v955_v33  ;;  %v966_v36 = vsel %vm961_vm0, %v955_v33, 0 }
  0xcf   : > { %975 = vmatpush.bf16.xpose.msrb.mxu0 %v966_v36  ;;  %v1015_v40 = vunpack.c.l.b16 %v954_v34 }
  0xd0   : > { %v1021_v37 = vpack.c.b16 %v1020_v35, %v1020_v35  ;;  %v823_v38 = vpop.f32.mrf.mxu0  ;;  %v950_v42 = vpop.f32.mrf.mxu2 }
  0xd1   : > { %v888_v39 = vpop.f32.mrf.mxu1  ;;  %v1016_v41 = vpack.c.b16 %v1015_v40, %v1015_v40  ;;  %v951_v44 = vadd.f32 %v1976_v43, %v950_v42 }
  0xd2   : > { %1087 = vrot.lane.b32.xlu2 %v1021_v37, %s2216_s2  ;;  %1022 = vrot.lane.b32.xlu1 %v1021_v37, %s2217_s4 }
  0xd3   : > { %v2419_v46 = vpack.c.bf16 %v951_v44, %v951_v44 }
  0xd5   : > { %v998_v47 = vsel %vm996_vm1, %v2419_v46, 0  ;;  %v1056_v26 = vunpack.c.l.b16 %v2419_v46 }
  0xd6   : > { %1742 = vmatmul.msk.bf16.vlgmr.msrb.gmra.mxu0 %vm961_vm0, %v954_v34  ;;  %1007 = vmatpush.bf16.msra.mxu3 %v998_v47 }
  0xd7   : > { %v1057_v27 = vpack.c.b16 %v1056_v26, %v1056_v26  ;;  %v1884_v26 = vld [vmem:[#allocation10 + $0x20] sm:$0xff] }
  0xd8   : > { %v952_v45 = vpop.f32.mrf.mxu2 }
  0xda   : > { %1149 = vrot.lane.b32.xlu2 %v1021_v37, %s2218_s21  ;;  %1017 = vrot.lane.b32.xlu1 %v1016_v41, %s2217_s4 }
  0xe2   : > { %1147 = vrot.lane.b32.xlu1 %v1016_v41, %s2218_s21 }
 0x12c   : > { %v1088_v48 = vpop.permute.xlu2 %1087 }
 0x12d   : > { %v1093_v49 = vsel %vm961_vm0, %v1088_v48, 0 }
 0x12e   : > { %1102 = vmatpush.bf16.xpose.msrb.mxu1 %v1093_v49 }
 0x134   : > { %v1150_v4 = vpop.permute.xlu2 %1149 }
 0x135   : > { %v1155_v6 = vsel %vm961_vm0, %v1150_v4, 0  ;;  %v1878_v4 = vld [vmem:[#allocation8 + $0x30] sm:$0xff] }
 0x144   : > { %v1023_v50 = vpop.permute.xlu1 %1022 }
 0x145   : > { %v1028_v51 = vsel %vm961_vm0, %v1023_v50, 0 }
 0x146   : > { %1037 = vmatpush.bf16.xpose.msrb.mxu3 %v1028_v51 }
 0x14c   : > { %v1018_v9 = vpop.permute.xlu1 %1017 }
 0x153   : > { %v977_v56 = vpop.f32.mrf.mxu0 }
 0x154   : > { %v978_v57 = vadd.f32 %v977_v56, %v959_v55  ;;  %v1148_v10 = vpop.permute.xlu1 %1147 }
 0x156   : > { %v981_v58 = vsel %vm961_vm0, %v978_v57, -inf }
 0x157   : > { %982 = vmax.xlane.f32.xlu0 %v981_v58 }
 0x15b   : > { %v979_v59 = vpop.f32.mrf.mxu0 }
 0x1ca   : > { %v983_v60 = vpop.xlane.xlu0 %982 }
 0x1cb   : > { %v984_v61 = vsub.f32 %v978_v57, %v983_v60 }
 0x1cd   : > { %v985_v62 = vmul.f32 1.442695, %v984_v61 }
 0x1cf   : > { %1984 = vpow2.f32 %v985_v62 }
 0x1d5   : > { %v1985_v63 = vpop.eup %1984 }
 0x1d6   : > { %v987_v0 = vsel %vm961_vm0, %v1985_v63, 0.0 }
 0x1d7   : > { %988 = vadd.xlane.f32.xlu0 %v987_v0 }
 0x1eb   : > { %1085 = vrot.lane.b32.xlu0 %v1016_v41, %s2216_s2 }
 0x24a   : > { %v989_v1 = vpop.xlane.xlu0 %988 }
 0x24b   : > { %1986 = vrcp.f32 %v989_v1 }
 0x251   : > { %v1987_v2 = vpop.eup %1986 }
 0x252   : > { %v991_v3 = vmul.f32 %v1987_v2, %v1985_v63 }
 0x254   : > { %v992_v5 = vpack.c.bf16 %v991_v3, %v991_v3  ;;  %v1879_v3 = vld [vmem:[#allocation8 + $0x38] sm:$0xff] }
 0x255   : > { %1262 = vmatpush.bf16.msra.mxu1 %v1879_v3 }
 0x256   : > { %1743 = vmatmul.msk.bf16.vlgmr.msra.gmra.mxu3 %vm961_vm0, %v992_v5  ;;  %v1877_v5 = vld [vmem:[#allocation8 + $0x28] sm:$0xff] }
 0x257   : > { %1164 = vmatpush.bf16.xpose.msra.mxu3 %v1155_v6  ;;  %v1876_v6 = vld [vmem:[#allocation8 + $0x20] sm:$0xff] }
 0x259   : > { %1263 = vmatpush.bf16.msra.mxu1 %v1878_v4 }
 0x25d   : > { %v1086_v8 = vpop.permute.xlu0 %1085  ;;  %1264 = vmatpush.bf16.msra.mxu1 %v1877_v5 }
 0x25e   : > { %1746 = vmatmul.msk.bf16.vlgmr.msrb.gmra.mxu1 %vm961_vm0, %v1086_v8  ;;  %v1874_v8 = vld [vmem:[#allocation8 + $0x10] sm:$0xff] }
 0x261   : > { %1265 = vmatpush.bf16.msra.mxu1 %v1876_v6 }
 0x265   : > { %1266 = vmatpush.bf16.msra.mxu1 %v1875_v7 }
 0x266   : > { %1744 = vmatmul.msk.bf16.vlgmr.msrb.gmra.mxu3 %vm961_vm0, %v1018_v9 }
 0x269   : > { %1267 = vmatpush.bf16.msra.mxu1 %v1874_v8 }
 0x276   : > { %1748 = vmatmul.msk.bf16.vlgmr.msra.gmra.mxu3 %vm961_vm0, %v1148_v10 }
 0x2d9   : > { %v1009_v11 = vpop.f32.mrf.mxu3 }
 0x2da   : > { %1013 = vst.msk [vmem:[#allocation2] sm:$0xff] %vm961_vm0, %v1009_v11  ;;  %v1873_v11 = vld [vmem:[#allocation8 + $0x8] sm:$0xff] }
 0x2db   : > { %v1104_v12 = vpop.f32.mrf.mxu1  ;;  %1268 = vmatpush.bf16.msra.mxu1 %v1873_v11 }
 0x2dc   : > { %v1105_v13 = vadd.f32 %v1104_v12, %v959_v55  ;;  %v1872_v12 = vld [vmem:[#allocation8] sm:$0xff] }
 0x2de   : > { %v1108_v14 = vsel %vm961_vm0, %v1105_v13, -inf }
 0x2df   : > { %1109 = vmax.xlane.f32.xlu1 %v1108_v14  ;;  %1269 = vmatpush.bf16.msra.mxu1 %v1872_v12 }
 0x2e1   : > { %v1011_v15 = vpop.f32.mrf.mxu3 }
 0x2e3   : > { %v1106_v16 = vpop.f32.mrf.mxu1 }
 0x2e4   : > { %v1977_v16 = vld [vmem:[%s2493_s9] ss:$0 sm:$0xff] }
 0x2e9   : > { %v1039_v17 = vpop.f32.mrf.mxu3 }
 0x2ea   : > { %v1040_v18 = vadd.f32 %v1039_v17, %v959_v55 }
 0x2ec   : > { %v1043_v19 = vsel %vm961_vm0, %v1040_v18, -inf }
 0x2ed   : > { %1044 = vmax.xlane.f32.xlu2 %v1043_v19 }
 0x2f1   : > { %v1041_v20 = vpop.f32.mrf.mxu3 }
 0x2f9   : > { %v1166_v21 = vpop.f32.mrf.mxu3 }
 0x2fa   : > { %v1167_v23 = vadd.f32 %v1166_v21, %v959_v55 }
 0x2fc   : > { %v1170_v24 = vsel %vm961_vm0, %v1167_v23, -inf }
 0x2fd   : > { %1171 = vmax.xlane.f32.xlu0 %v1170_v24  ;;  %v1886_v24 = vld [vmem:[#allocation10 + $0x30] sm:$0xff] }
 0x301   : > { %v1168_v25 = vpop.f32.mrf.mxu3 }
 0x302   : > { %v1885_v25 = vld [vmem:[#allocation10 + $0x28] sm:$0xff] }
 0x311   : > { %1120 = vrot.lane.b32.xlu0 %v1057_v27, %s2216_s2 }
 0x352   : > { %v1110_v28 = vpop.xlane.xlu1 %1109 }
 0x353   : > { %v1111_v29 = vsub.f32 %v1105_v13, %v1110_v28  ;;  %v1882_v28 = vld [vmem:[#allocation10 + $0x10] sm:$0xff] }
 0x355   : > { %v1112_v30 = vmul.f32 1.442695, %v1111_v29  ;;  %v1881_v29 = vld [vmem:[#allocation10 + $0x8] sm:$0xff] }
 0x357   : > { %1988 = vpow2.f32 %v1112_v30  ;;  %v1880_v30 = vld [vmem:[#allocation10] sm:$0xff] }
 0x35d   : > { %v1989_v31 = vpop.eup %1988 }
 0x35e   : > { %v1114_v32 = vsel %vm961_vm0, %v1989_v31, 0.0 }
 0x35f   : > { %1115 = vadd.xlane.f32.xlu1 %v1114_v32 }
 0x360   : > { %v1045_v33 = vpop.xlane.xlu2 %1044 }
 0x361   : > { %v1046_v34 = vsub.f32 %v1040_v18, %v1045_v33 }
 0x363   : > { %v1047_v35 = vmul.f32 1.442695, %v1046_v34 }
 0x365   : > { %1990 = vpow2.f32 %v1047_v35  ;;  %v1895_v35 = vld [vmem:[#allocation11 + $0x38] sm:$0xff] }
 0x366   : > { %1460 = vmatpush.bf16.msrb.mxu3 %v1895_v35 }
 0x36b   : > { %v1991_v36 = vpop.eup %1990 }
 0x36c   : > { %v1049_v37 = vsel %vm961_vm0, %v1991_v36, 0.0 }
 0x36d   : > { %1050 = vadd.xlane.f32.xlu2 %v1049_v37  ;;  %v1894_v37 = vld [vmem:[#allocation11 + $0x30] sm:$0xff] }
 0x36e   : > { %1461 = vmatpush.bf16.msrb.mxu3 %v1894_v37 }
 0x370   : > { %v1172_v38 = vpop.xlane.xlu0 %1171 }
 0x371   : > { %v1173_v39 = vsub.f32 %v1167_v23, %v1172_v38  ;;  %v1887_v23 = vld [vmem:[#allocation10 + $0x38] sm:$0xff] }
 0x373   : > { %v1174_v40 = vmul.f32 1.442695, %v1173_v39  ;;  %v1893_v39 = vld [vmem:[#allocation11 + $0x28] sm:$0xff] }
 0x374   : > { %1462 = vmatpush.bf16.msrb.mxu3 %v1893_v39 }
 0x375   : > { %1992 = vpow2.f32 %v1174_v40  ;;  %v1892_v40 = vld [vmem:[#allocation11 + $0x20] sm:$0xff] }
 0x378   : > { %1463 = vmatpush.bf16.msrb.mxu3 %v1892_v40 }
 0x37b   : > { %v1993_v41 = vpop.eup %1992 }
 0x37c   : > { %v1176_v42 = vsel %vm961_vm0, %v1993_v41, 0.0 }
 0x37d   : > { %1177 = vadd.xlane.f32.xlu1 %v1176_v42 }
 0x383   : > { %v1121_v43 = vpop.permute.xlu0 %1120 }
 0x384   : > { %v1126_v44 = vsel %vm996_vm1, %v1121_v43, 0  ;;  %v1891_v43 = vld [vmem:[#allocation11 + $0x18] sm:$0xff] }
 0x385   : > { %1058 = vrot.lane.b32.xlu2 %v1057_v27, %s2217_s4  ;;  %1135 = vmatpush.bf16.msrb.mxu2 %v1126_v44 }
 0x386   : > { %1464 = vmatpush.bf16.msrb.mxu3 %v1891_v43 }
 0x389   : > { %1394 = vmatpush.bf16.msra.mxu2 %v1887_v23 }
 0x38d   : > { %1395 = vmatpush.bf16.msra.mxu2 %v1886_v24  ;;  %v1983_v24 = vld [vmem:[%s2501_s17] ss:$0 sm:$0xff] }
 0x391   : > { %1396 = vmatpush.bf16.msra.mxu2 %v1885_v25 }
 0x395   : > { %1397 = vmatpush.bf16.msra.mxu2 %v1884_v26 }
 0x396   : > { %1182 = vrot.lane.b32.xlu1 %v1057_v27, %s2218_s21  ;;  %v1883_v27 = vld [vmem:[#allocation10 + $0x18] sm:$0xff] }
 0x399   : > { %1398 = vmatpush.bf16.msra.mxu2 %v1883_v27 }
 0x39d   : > { %1399 = vmatpush.bf16.msra.mxu2 %v1882_v28 }
 0x3a1   : > { %1400 = vmatpush.bf16.msra.mxu2 %v1881_v29 }
 0x3a5   : > { %1401 = vmatpush.bf16.msra.mxu2 %v1880_v30 }
 0x3d2   : > { %v1116_v45 = vpop.xlane.xlu1 %1115 }
 0x3d3   : > { %1994 = vrcp.f32 %v1116_v45 }
 0x3d9   : > { %v1995_v46 = vpop.eup %1994 }
 0x3da   : > { %v1118_v47 = vmul.f32 %v1995_v46, %v1989_v31  ;;  %v1890_v46 = vld [vmem:[#allocation11 + $0x10] sm:$0xff] }
 0x3db   : > { %1465 = vmatpush.bf16.msrb.mxu3 %v1890_v46 }
 0x3dc   : > { %v1119_v48 = vpack.c.bf16 %v1118_v47, %v1118_v47 }
 0x3de   : > { %1747 = vmatmul.msk.bf16.vlgmr.msrb.gmra.mxu2 %vm961_vm0, %v1119_v48 }
 0x3e0   : > { %v1051_v49 = vpop.xlane.xlu2 %1050 }
 0x3e1   : > { %1996 = vrcp.f32 %v1051_v49 }
 0x3e7   : > { %v1997_v50 = vpop.eup %1996 }
 0x3e8   : > { %v1053_v51 = vmul.f32 %v1997_v50, %v1991_v36  ;;  %v1059_v52 = vpop.permute.xlu2 %1058  ;;  %v1978_v50 = vld [vmem:[%s2494_s10] ss:$0 sm:$0xff] }
 0x3e9   : > { %v1064_v53 = vsel %vm996_vm1, %v1059_v52, 0 }
 0x3ea   : > { %v1054_v54 = vpack.c.bf16 %v1053_v51, %v1053_v51  ;;  %1073 = vmatpush.bf16.msra.mxu0 %v1064_v53  ;;  %v1979_v53 = vld [vmem:[%s2495_s11] ss:$0 sm:$0xff] }
 0x3ed   : > { %1745 = vmatmul.msk.bf16.vlgmr.msra.gmra.mxu0 %vm961_vm0, %v1054_v54 }
 0x3f0   : > { %v1178_v55 = vpop.xlane.xlu1 %1177 }
 0x3f1   : > { %1998 = vrcp.f32 %v1178_v55 }
 0x3f7   : > { %v1999_v56 = vpop.eup %1998 }
 0x3f8   : > { %v1180_v57 = vmul.f32 %v1999_v56, %v1993_v41 }
 0x3fa   : > { %v1181_v60 = vpack.c.bf16 %v1180_v57, %v1180_v57  ;;  %v1889_v57 = vld [vmem:[#allocation11 + $0x8] sm:$0xff] }
 0x3fb   : > { %1466 = vmatpush.bf16.msrb.mxu3 %v1889_v57 }
 0x408   : > { %v1183_v58 = vpop.permute.xlu1 %1182 }
 0x409   : > { %v1188_v59 = vsel %vm996_vm1, %v1183_v58, 0  ;;  %v1888_v58 = vld [vmem:[#allocation11] sm:$0xff] }
 0x40a   : > { %1197 = vmatpush.bf16.msrb.mxu0 %v1188_v59  ;;  %1467 = vmatpush.bf16.msrb.mxu3 %v1888_v58  ;;  %v1980_v59 = vld [vmem:[%s2497_s13] ss:$0 sm:$0xff] }
 0x40d   : > { %1749 = vmatmul.msk.bf16.vlgmr.msrb.gmra.mxu0 %vm961_vm0, %v1181_v60 }
 0x461   : > { %v1137_v61 = vpop.f32.mrf.mxu2 }
 0x469   : > { %v1139_v62 = vpop.f32.mrf.mxu2 }
 0x46a   : > { %v1075_v63 = vpop.f32.mrf.mxu0 }
 0x46b   : > { %1080 = vrot.lane.b32.xlu2 %v1075_v63, %s2220_s20 }
 0x472   : > { %v1077_v0 = vpop.f32.mrf.mxu0 }
 0x473   : > { %1142 = vrot.lane.b32.xlu2 %v1137_v61, %s2221_s22 }
 0x48a   : > { %v1199_v1 = vpop.f32.mrf.mxu0 }
 0x48b   : > { %1204 = vrot.lane.b32.xlu0 %v1199_v1, %s2222_s24  ;;  %v1981_v1 = vld [vmem:[%s2499_s15] ss:$0 sm:$0xff] }
 0x492   : > { %v1201_v2 = vpop.f32.mrf.mxu0 }
 0x4c5   : > { %v1081_v9 = vpop.permute.xlu2 %1080 }
 0x4c6   : > { %1084 = vst.msk [vmem:[#allocation2] sm:$0xff] %vm1083_vm2, %v1081_v9 }
 0x4cd   : > { %v1143_v10 = vpop.permute.xlu2 %1142 }
 0x4ce   : > { %1146 = vst.msk [vmem:[#allocation2] sm:$0xff] %vm1145_vm3, %v1143_v10 }
 0x4fd   : > { %v1205_v13 = vpop.permute.xlu0 %1204 }
 0x4fe   : > { %1208 = vst.msk [vmem:[#allocation2] sm:$0xff] %vm1207_vm4, %v1205_v13 }
 0x505   : > { %v1209_v14 = vld [vmem:[#allocation2] sm:$0xff] }
 0x506   : > { %v1210_v15 = vpack.c.bf16 %v1209_v14, %v1209_v14 }
 0x508   : > { %1270 = vmatmul.bf16.vlgmr.msra.gmra.mxu1 %v1210_v15 }
 0x585   : > { %v1271_v17 = vpop.f32.mrf.mxu1 }
 0x586   : > { %v1272_v18 = vadd.f32 %v1977_v16, %v1271_v17 }
 0x588   : > { %v1275_v19 = vadd.f32 %v1272_v18, %v2399_v22 }
 0x58a   : > { %1276 = vadd.xlane.f32.xlu2 %v1275_v19  ;;  %v1279_v20 = vmul.f32 %v1275_v19, %v1275_v19 }
 0x58c   : > { %1280 = vadd.xlane.f32.xlu0 %v1279_v20 }
 0x58d   : > { %v1273_v21 = vpop.f32.mrf.mxu1 }
 0x58e   : > { %v1982_v21 = vld [vmem:[%s2500_s16] ss:$0 sm:$0xff] }
 0x5fd   : > { %v1277_v22 = vpop.xlane.xlu2 %1276 }
 0x5fe   : > { %v1278_v31 = vmul.f32 0.03125, %v1277_v22 }
 0x5ff   : > { %v1281_v32 = vpop.xlane.xlu0 %1280 }
 0x600   : > { %v1283_v33 = vmul.f32 %v1278_v31, %v1278_v31  ;;  %v1282_v34 = vmul.f32 0.03125, %v1281_v32  ;;  %v1285_v49 = vsub.f32 %v1275_v19, %v1278_v31 }
 0x602   : > { %v1284_v36 = vsub.f32 %v1282_v34, %v1283_v33 }
 0x604   : > { %v1286_v38 = vadd.f32 1e-05, %v1284_v36 }
 0x606   : > { %2000 = vrsqrt.f32 %v1286_v38  ;;  %vm1293_vm6 = vweird.f32 %v1286_v38 }
 0x60c   : > { %v2001_v41 = vpop.eup %2000 }
 0x60d   : > { %v1288_v42 = vmul.f32 %v2001_v41, %v1286_v38  ;;  %vm1294_vm5 = vweird.f32 %v2001_v41 }
 0x60e   : > { %vm1295_vm7 = vmor %vm1293_vm6, %vm1294_vm5 }
 0x60f   : > { %v1289_v44 = vmul.f32 %v2001_v41, %v1288_v42 }
 0x611   : > { %v1290_v45 = vmul.f32 0.5, %v1289_v44 }
 0x613   : > { %v1291_v47 = vsub.f32 1.5, %v1290_v45 }
 0x615   : > { %v1292_v48 = vmul.f32 %v2001_v41, %v1291_v47 }
 0x617   : > { %v1296_v51 = vsel %vm1295_vm7, %v2001_v41, %v1292_v48 }
 0x618   : > { %v1297_v52 = vmul.f32 %v1296_v51, %v1285_v49 }
 0x61a   : > { %v1301_v54 = vmul.f32 %v1978_v50, %v1297_v52 }
 0x61c   : > { %v1305_v55 = vadd.f32 %v1979_v53, %v1301_v54 }
 0x61e   : > { %v1342_v56 = vpack.c.bf16 %v1305_v55, %v1305_v55 }
 0x620   : > { %1402 = vmatmul.bf16.vlgmr.msra.gmra.mxu2 %v1342_v56 }
 0x6a3   : > { %v1403_v60 = vpop.f32.mrf.mxu2 }
 0x6a4   : > { %v1404_v61 = vadd.f32 %v1980_v59, %v1403_v60 }
 0x6a6   : > { %v1407_v62 = vmax.f32 %v1404_v61, 0.0 }
 0x6a8   : > { %v1408_v63 = vpack.c.bf16 %v1407_v62, %v1407_v62 }
 0x6aa   : > { %1468 = vmatmul.bf16.vlgmr.msrb.gmra.mxu3 %v1408_v63 }
 0x6ab   : > { %v1405_v0 = vpop.f32.mrf.mxu2 }
 0x72d   : > { %v1469_v2 = vpop.f32.mrf.mxu3 }
 0x72e   : > { %v1470_v3 = vadd.f32 %v1981_v1, %v1469_v2 }
 0x730   : > { %v1473_v4 = vadd.f32 %v1470_v3, %v1305_v55 }
 0x732   : > { %1474 = vadd.xlane.f32.xlu1 %v1473_v4  ;;  %v1477_v5 = vmul.f32 %v1473_v4, %v1473_v4 }
 0x734   : > { %1478 = vadd.xlane.f32.xlu2 %v1477_v5 }
 0x735   : > { %v1471_v6 = vpop.f32.mrf.mxu3 }
 0x7a5   : > { %v1475_v7 = vpop.xlane.xlu1 %1474 }
 0x7a6   : > { %v1476_v8 = vmul.f32 0.03125, %v1475_v7 }
 0x7a7   : > { %v1479_v9 = vpop.xlane.xlu2 %1478 }
 0x7a8   : > { %v1481_v10 = vmul.f32 %v1476_v8, %v1476_v8  ;;  %v1480_v11 = vmul.f32 0.03125, %v1479_v9  ;;  %v1483_v20 = vsub.f32 %v1473_v4, %v1476_v8 }
 0x7aa   : > { %v1482_v12 = vsub.f32 %v1480_v11, %v1481_v10 }
 0x7ac   : > { %v1484_v13 = vadd.f32 1e-05, %v1482_v12 }
 0x7ae   : > { %2002 = vrsqrt.f32 %v1484_v13  ;;  %vm1491_vm9 = vweird.f32 %v1484_v13 }
 0x7b4   : > { %v2003_v14 = vpop.eup %2002 }
 0x7b5   : > { %v1486_v15 = vmul.f32 %v2003_v14, %v1484_v13  ;;  %vm1492_vm8 = vweird.f32 %v2003_v14 }
 0x7b6   : > { %vm1493_vm10 = vmor %vm1491_vm9, %vm1492_vm8 }
 0x7b7   : > { %v1487_v16 = vmul.f32 %v2003_v14, %v1486_v15 }
 0x7b9   : > { %v1488_v17 = vmul.f32 0.5, %v1487_v16 }
 0x7bb   : > { %v1489_v18 = vsub.f32 1.5, %v1488_v17 }
 0x7bd   : > { %v1490_v19 = vmul.f32 %v2003_v14, %v1489_v18 }
 0x7bf   : > { %v1494_v23 = vsel %vm1493_vm10, %v2003_v14, %v1490_v19 }
 0x7c0   : > { %v1495_v25 = vmul.f32 %v1494_v23, %v1483_v20 }
 0x7c2   : > { %v1499_v26 = vmul.f32 %v1982_v21, %v1495_v25 }
 0x7c4   : > { %v1503_v27 = vadd.f32 %v1983_v24, %v1499_v26 }
 0x7c6   : > { %1504 = vst [vmem:[%s684_s29] sm:$0xff] %v1503_v27 }
 0x7c7 PF: > { %s2519_s30 = sld [smem:[#allocation17_spill]] }
 0x7cd   : > { %s32_s27 = sadd.s32 1, %s2519_s30  }
 0x7ce   : > { %p29_p7 = scmp.ge.s32.totalorder %s32_s27, 4  }
 0x7d0   :  { %31 = sbr.rel (!%p29_p7) target bundleno = 11 (0xb), region = 150 }
 0x7d5   :  { %1524 = vsyncpa [#allocation4], 1 }
 0x7d6   :  { %1526 = vsyncpa [#allocation4 + $0x1], 1 }
 0x7d7   :  { %1527 = vsyncpa [#allocation6], 1 }
 0x7d8   :  { %1528 = vsyncpa [#allocation9], 1 }
 0x7d9   :  { %1529 = vsyncpa [#allocation12], 1 }

// kernel: transformer_forward.7
= control target key start
LH: loop header
LB: loop body
LE: loop exit
PB: predicated region body
PF: predicated region fallthrough
CT: control target
= control target key end

     0   :  { %s3772_s6 = smov 1   ;;  %s3773_s10 = smov 2   ;;  %s4312_s0 = inlined_call_operand.smem [shape: u32[31], index: -1, kind: input, shape index: {}] }
   0x1   :  { %s3830_s5 = sld [smem:[%s4312_s0]]   ;;  %s3774_s14 = smov 3  }
   0x2   :  { %s3835_s9 = sld [smem:[%s4312_s0 + %s3772_s6]]   ;;  %s3775_s18 = smov 4  }
   0x3   :  { %s3840_s13 = sld [smem:[%s4312_s0 + %s3773_s10]]   ;;  %s3776_s22 = smov 5  }
   0x4   :  { %s3845_s17 = sld [smem:[%s4312_s0 + %s3774_s14]]   ;;  %s3777_s26 = smov 6  }
   0x5   :  { %s3850_s21 = sld [smem:[%s4312_s0 + %s3775_s18]]   ;;  %s3778_s30 = smov 7  }
   0x6   :  { %s3855_s25 = sld [smem:[%s4312_s0 + %s3776_s22]]   ;;  %s3779_s4 = smov 8  }
   0x7   :  { %s3860_s29 = sld [smem:[%s4312_s0 + %s3777_s26]]   ;;  %s3780_s10 = smov 9  }
   0x8   :  { %4317 = sst [smem:[#allocation25_spill]] %s3835_s9  ;;  %s3781_s15 = smov 10  }
   0x9   :  { %4318 = sst [smem:[#allocation26_spill]] %s3840_s13  ;;  %s3782_s20 = smov 11  }
   0xa   :  { %4319 = sst [smem:[#allocation27_spill]] %s3845_s17  ;;  %s3783_s26 = smov 12  }
   0xb   :  { %s3865_s3 = sld [smem:[%s4312_s0 + %s3778_s30]]   ;;  %s3784_s1 = smov 13  }
   0xc   :  { %s3870_s8 = sld [smem:[%s4312_s0 + %s3779_s4]]   ;;  %s3785_s7 = smov 14  }
   0xd   :  { %4320 = sst [smem:[#allocation28_spill]] %s3860_s29  ;;  %s3787_s22 = smov 16  }
   0xe   :  { %s3875_s14 = sld [smem:[%s4312_s0 + %s3780_s10]]   ;;  %s3788_s28 = smov 17  }
   0xf   :  { %s3880_s19 = sld [smem:[%s4312_s0 + %s3781_s15]]   ;;  %s3786_s15 = smov 15  }
  0x10   :  { %s3885_s24 = sld [smem:[%s4312_s0 + %s3782_s20]]  }
  0x11   :  { %s3890_s30 = sld [smem:[%s4312_s0 + %s3783_s26]]  }
  0x12   :  { %s3895_s6 = sld [smem:[%s4312_s0 + %s3784_s1]]  }
  0x13   :  { %s3900_s12 = sld [smem:[%s4312_s0 + %s3785_s7]]   ;;  %s3789_s7 = smov 18  }
  0x14   :  { %s3905_s20 = sld [smem:[%s4312_s0 + %s3786_s15]]   ;;  %s3790_s15 = smov 19  }
  0x15   :  { %4321 = sst [smem:[#allocation29_spill]] %s3880_s19 }
  0x16   :  { %4322 = sst [smem:[#allocation30_spill]] %s3885_s24 }
  0x17   :  { %4323 = sst [smem:[#allocation31_spill]] %s3890_s30 }
  0x18   :  { %4324 = sst [smem:[#allocation32_spill]] %s3895_s6 }
  0x19   :  { %s3910_s27 = sld [smem:[%s4312_s0 + %s3787_s22]]   ;;  %s3791_s22 = smov 20  }
  0x1a   :  { %4325 = sst [smem:[#allocation33_spill]] %s3905_s20 }
  0x1b   :  { %s3915_s4 = sld [smem:[%s4312_s0 + %s3788_s28]]   ;;  %s3792_s28 = smov 21  }
  0x1c   :  { %s3920_s17 = sld [smem:[%s4312_s0 + %s3789_s7]]   ;;  %s3793_s7 = smov 22  }
  0x1d   :  { %s3925_s20 = sld [smem:[%s4312_s0 + %s3790_s15]]   ;;  %s3794_s15 = smov 23  }
  0x1e   :  { %s3930_s6 = sld [smem:[%s4312_s0 + %s3791_s22]]   ;;  %s3795_s22 = smov 24  }
  0x1f   :  { %s3940_s30 = sld [smem:[%s4312_s0 + %s3793_s7]]   ;;  %s3797_s7 = smov 26  }
  0x20   :  { %s3950_s13 = sld [smem:[%s4312_s0 + %s3795_s22]]   ;;  %s3799_s22 = smov 28  }
  0x21   :  { %4326 = sst [smem:[#allocation34_spill]] %s3915_s4 }
  0x22   :  { %s3935_s4 = sld [smem:[%s4312_s0 + %s3792_s28]]   ;;  %s3796_s28 = smov 25  }
  0x23   :  { %4327 = sst [smem:[#allocation35_spill]] %s3925_s20 }
  0x24   :  { %s3945_s20 = sld [smem:[%s4312_s0 + %s3794_s15]]   ;;  %s3798_s15 = smov 27  }
  0x25   :  { %4329 = sst [smem:[#allocation37_spill]] %s3940_s30 }
  0x26   :  { %s3960_s30 = sld [smem:[%s4312_s0 + %s3797_s7]]   ;;  %s3801_s7 = smov 30  }
  0x27   :  { %s3970_s24 = sld [smem:[%s4312_s0 + %s3799_s22]]  }
  0x28   :  { %4328 = sst [smem:[#allocation36_spill]] %s3935_s4 }
  0x29   :  { %s3955_s4 = sld [smem:[%s4312_s0 + %s3796_s28]]   ;;  %s3800_s28 = smov 29  }
  0x2a   :  { %4330 = sst [smem:[#allocation38_spill]] %s3945_s20 }
  0x2b   :  { %s3965_s20 = sld [smem:[%s4312_s0 + %s3798_s15]]  }
  0x2c   :  { %s3980_s9 = sld [smem:[%s4312_s0 + %s3801_s7]]  }
  0x2f   :  { %4331 = sst [smem:[#allocation39_spill]] %s3955_s4 }
  0x30   :  { %s3975_s4 = sld [smem:[%s4312_s0 + %s3800_s28]]  }
  0x31   :  { %66 = vsyncpa [#allocation4], 0 }
  0x32   :  { %67 = vsyncpa [#allocation6], 0 }
  0x33   :  { %68 = vsyncpa [#allocation9], 0 }
  0x34   :  { %69 = vsyncpa [#allocation12], 0 }
  0x35   :  { %70 = vsyncpa [#allocation15], 0 }
  0x36   :  { %71 = vsyncpa [#allocation18], 0  ;;  %s3982_s15 = smov 0  }
  0x37 LB: > { %s4332_s29 = sld [smem:[#allocation28_spill]]  ;;  %s3988_s0 = sadd.s32 4294967295, %s3770_s15   ;;  %s3770_s15 = sphi %s3982_s15, %s77_s15  }
  0x38   : > { %s4333_s19 = sld [smem:[#allocation29_spill]]  ;;  %p2793_p0 = scmp.ge.s32.totalorder %s3770_s15, 1 }
  0x39   : > { %4334 = sst [smem:[#allocation40_spill]] %s3770_s15  ;;  %p758_p1 = scmp.lt.s32.totalorder %s3770_s15, 3 }
  0x3a   : > { %p3308_p2 = scmp.eq.s32.totalorder %s3988_s0, 0  ;;  %s3802_s23 = smov [#allocation5]  }
  0x3b   : > { %p3994_p3 = pnand %p2793_p0, %p758_p1  ;;  %s788_s26 = sshll.u32 %s3802_s23, 4  ;;  %s789_s26 = int_to_ptr.vmem [resolvable:$true] %s788_s26 }
  0x3c   : > { %s3803_s1 = smov [#allocation8]  }
  0x3d   : > { %s786_s16 = sshll.u32 %s4332_s29, 4  ;;  %p3277_p4 = pneg %p3994_p3  ;;  %s3998_s16 = int_to_ptr.hbm [resolvable:$true] %s786_s16 }
  0x3e   : > { %s820_s22 = sshll.u32 %s4333_s19, 4  ;;  %s4011_s2 = sshll.u32 %s3803_s1, 4  ;;  %s4003_s22 = int_to_ptr.hbm [resolvable:$true] %s820_s22 }
  0x3f   : > { %p4007_p5 = pnand %p3308_p2, %p3277_p4  ;;  %4337 = sst [smem:[#allocation41_spill]] %s4011_s2 }
  0x40   : > { %s3440_s10 = sshra.s32 %s3998_s16, 4  ;;  %s3447_s15 = scalar_lea.hbm %s4332_s29, 64  ;;  %s3441_s10 = int_to_ptr.hbm [resolvable:$true] %s3440_s10 }
  0x41   : > { %s3442_s11 = scalar_lea.hbm %s3441_s10, 64  ;;  %p4018_p7 = pneg %p4007_p5 }
  0x42   : > { %p3443_p6 = scmp.ne.s32.totalorder %s3441_s10, %s3442_s11  ;;  %p3448_p10 = scmp.lt.s32.totalorder %s3441_s10, %s4332_s29 }
  0x43   : > { %p3449_p11 = scmp.lt.s32.totalorder %s3447_s15, %s3442_s11 }
  0x44   : > { %p3445_p8 = pnand %p4018_p7, %p3443_p6 }
  0x45   : > { %p3450_p12 = por %p3449_p11, %p3448_p10 }
  0x46   : > { %p3446_p9 = pneg %p3445_p8 }
  0x48   : > { %p3451_p13 = pnand %p3450_p12, %p3446_p9 }
  0x4a   : > { %3454 = shalt.err (!%p3451_p13)
}
  0x4b   : > { %s3804_s1 = smov 64   ;;  %s3805_s7 = smov 4  }
  0x4c   : > { %3283 = dma.hbm_to_vmem [thread:$0]  (!%p4007_p5), %s3998_s16, 1024, %s789_s26, [#allocation6], %s3804_s1, %s3804_s1, %s3805_s7  }
  0x4d   : > { %s3470_s2 = sshra.s32 %s4003_s22, 4  ;;  %s3477_s15 = scalar_lea.hbm %s4333_s19, 64  ;;  %s3471_s2 = int_to_ptr.hbm [resolvable:$true] %s3470_s2 }
  0x4e   : > { %s3472_s10 = scalar_lea.hbm %s3471_s2, 64  ;;  %p3478_p6 = scmp.lt.s32.totalorder %s3471_s2, %s4333_s19 }
  0x4f   : > { %p3473_p0 = scmp.ne.s32.totalorder %s3471_s2, %s3472_s10  ;;  %p3479_p8 = scmp.lt.s32.totalorder %s3477_s15, %s3472_s10 }
  0x51   : > { %p3475_p1 = pnand %p3473_p0, %p4018_p7  ;;  %p3480_p9 = por %p3479_p8, %p3478_p6 }
  0x53   : > { %p3476_p4 = pneg %p3475_p1 }
  0x55   : > { %p3481_p10 = pnand %p3480_p9, %p3476_p4 }
  0x57   : > { %3484 = shalt.err (!%p3481_p10)
}
  0x58   : > { %s4339_s11 = sld [smem:[#allocation41_spill]]  ;;  %s4341_s26 = sshll.u32 %s3910_s27, 4  ;;  %s861_s26 = int_to_ptr.hbm [resolvable:$true] %s4341_s26 }
  0x59   : > { %s3806_s2 = smov [#allocation11]   ;;  %s894_s15 = sshll.u32 %s3930_s6, 4  ;;  %s4048_s15 = int_to_ptr.hbm [resolvable:$true] %s894_s15 }
  0x5a   : > { %s862_s10 = sshll.u32 %s3806_s2, 4  ;;  %s3500_s19 = sshra.s32 %s861_s26, 4  ;;  %s863_s10 = int_to_ptr.vmem [resolvable:$true] %s862_s10  ;;  %s3501_s19 = int_to_ptr.hbm [resolvable:$true] %s3500_s19 }
  0x5b   : > { %s3502_s29 = scalar_lea.hbm %s3501_s19, 64  ;;  %p3508_p0 = scmp.lt.s32.totalorder %s3501_s19, %s3910_s27 }
  0x5c   : > { %p3503_p11 = scmp.ne.s32.totalorder %s3501_s19, %s3502_s29 }
  0x5e   : > { %s4340_s16 = int_to_ptr.vmem [resolvable:$true] %s4339_s11  ;;  %p3505_p12 = pnand %p3503_p11, %p4018_p7 }
  0x5f   : > { %3289 = dma.hbm_to_vmem [thread:$0]  (!%p4007_p5), %s4003_s22, 1024, %s4340_s16, [#allocation9], %s3804_s1, %s3804_s1, %s3805_s7  }
  0x60   : > { %p3506_p13 = pneg %p3505_p12  ;;  %s3507_s11 = scalar_lea.hbm %s3910_s27, 64 }
  0x61   : > { %p3509_p1 = scmp.lt.s32.totalorder %s3507_s11, %s3502_s29 }
  0x63   : > { %p3510_p4 = por %p3509_p1, %p3508_p0 }
  0x65   : > { %p3511_p6 = pnand %p3510_p4, %p3506_p13 }
  0x67   : > { %3514 = shalt.err (!%p3511_p6)
}
  0x68   : > { %3295 = dma.hbm_to_vmem [thread:$0]  (!%p4007_p5), %s861_s26, 1024, %s863_s10, [#allocation12], %s3804_s1, %s3804_s1, %s3805_s7  }
  0x69   : > { %s769_s22 = sshll.u32 %s3850_s21, 4  ;;  %s3807_s16 = smov [#allocation14]   ;;  %s4060_s22 = int_to_ptr.hbm [resolvable:$true] %s769_s22 }
  0x6a   : > { %s896_s2 = sshll.u32 %s3807_s16, 4  ;;  %s3530_s29 = sshra.s32 %s4048_s15, 4  ;;  %s897_s2 = int_to_ptr.vmem [resolvable:$true] %s896_s2  ;;  %s3531_s29 = int_to_ptr.hbm [resolvable:$true] %s3530_s29 }
  0x6b   : > { %s3532_s19 = scalar_lea.hbm %s3531_s29, 64  ;;  %s3537_s11 = scalar_lea.hbm %s3930_s6, 64 }
  0x6c   : > { %p3533_p8 = scmp.ne.s32.totalorder %s3531_s29, %s3532_s19  ;;  %p3538_p11 = scmp.lt.s32.totalorder %s3531_s29, %s3930_s6 }
  0x6d   : > { %p3539_p12 = scmp.lt.s32.totalorder %s3537_s11, %s3532_s19 }
  0x6e   : > { %p3535_p9 = pnand %p3533_p8, %p4018_p7 }
  0x6f   : > { %p3540_p13 = por %p3539_p12, %p3538_p11 }
  0x70   : > { %p3536_p10 = pneg %p3535_p9 }
  0x72   : > { %p3541_p0 = pnand %p3540_p13, %p3536_p10 }
  0x74   : > { %3544 = shalt.err (!%p3541_p0)
}
  0x75   : > { %3301 = dma.hbm_to_vmem [thread:$0]  (!%p4007_p5), %s4048_s15, 1024, %s897_s2, [#allocation15], %s3804_s1, %s3804_s1, %s3805_s7  }
  0x76   : > { %s3808_s26 = smov [#allocation3]   ;;  %s803_s16 = sshll.u32 %s3870_s8, 4  ;;  %s4074_s16 = int_to_ptr.hbm [resolvable:$true] %s803_s16 }
  0x77   : > { %s771_s10 = sshll.u32 %s3808_s26, 4  ;;  %s3560_s29 = sshra.s32 %s4060_s22, 4  ;;  %s772_s10 = int_to_ptr.vmem [resolvable:$true] %s771_s10  ;;  %s3561_s29 = int_to_ptr.hbm [resolvable:$true] %s3560_s29 }
  0x78   : > { %s3562_s19 = scalar_lea.hbm %s3561_s29, 64  ;;  %s3567_s11 = scalar_lea.hbm %s3850_s21, 64 }
  0x79   : > { %p3563_p1 = scmp.ne.s32.totalorder %s3561_s29, %s3562_s19  ;;  %p3568_p8 = scmp.lt.s32.totalorder %s3561_s29, %s3850_s21 }
  0x7a   : > { %p3569_p9 = scmp.lt.s32.totalorder %s3567_s11, %s3562_s19 }
  0x7b   : > { %p3565_p4 = pnand %p3563_p1, %p4018_p7 }
  0x7c   : > { %p3570_p10 = por %p3569_p9, %p3568_p8 }
  0x7d   : > { %p3566_p6 = pneg %p3565_p4 }
  0x7f   : > { %p3571_p11 = pnand %p3570_p10, %p3566_p6 }
  0x81   : > { %3574 = shalt.err (!%p3571_p11)
}
  0x82   : > { %3280 = dma.hbm_to_vmem [thread:$0]  (!%p4007_p5), %s4060_s22, 1024, %s772_s10, [#allocation4], %s3804_s1, %s3804_s1, %s3805_s7  }
  0x83   : > { %s843_s15 = sshll.u32 %s3900_s12, 4  ;;  %s3809_s2 = smov [#allocation7]   ;;  %s4088_s15 = int_to_ptr.hbm [resolvable:$true] %s843_s15 }
  0x84   : > { %s805_s26 = sshll.u32 %s3809_s2, 4  ;;  %s3590_s29 = sshra.s32 %s4074_s16, 4  ;;  %s806_s26 = int_to_ptr.vmem [resolvable:$true] %s805_s26  ;;  %s3591_s29 = int_to_ptr.hbm [resolvable:$true] %s3590_s29 }
  0x85   : > { %s3592_s19 = scalar_lea.hbm %s3591_s29, 64  ;;  %s3597_s11 = scalar_lea.hbm %s3870_s8, 64 }
  0x86   : > { %p3593_p12 = scmp.ne.s32.totalorder %s3591_s29, %s3592_s19  ;;  %p3598_p1 = scmp.lt.s32.totalorder %s3591_s29, %s3870_s8 }
  0x87   : > { %p3599_p4 = scmp.lt.s32.totalorder %s3597_s11, %s3592_s19 }
  0x88   : > { %p3595_p13 = pnand %p3593_p12, %p4018_p7 }
  0x89   : > { %p3600_p6 = por %p3599_p4, %p3598_p1 }
  0x8a   : > { %p3596_p0 = pneg %p3595_p13 }
  0x8c   : > { %p3601_p8 = pnand %p3600_p6, %p3596_p0 }
  0x8e   : > { %3604 = shalt.err (!%p3601_p8)
}
  0x8f   : > { %3286 = dma.hbm_to_vmem [thread:$0]  (!%p4007_p5), %s4074_s16, 1024, %s806_s26, [#allocation6], %s3804_s1, %s3804_s1, %s3805_s7  }
  0x90   : > { %s3810_s22 = smov [#allocation10]   ;;  %s877_s2 = sshll.u32 %s3920_s17, 4  ;;  %s4102_s2 = int_to_ptr.hbm [resolvable:$true] %s877_s2 }
  0x91   : > { %s845_s10 = sshll.u32 %s3810_s22, 4  ;;  %s3620_s29 = sshra.s32 %s4088_s15, 4  ;;  %s846_s10 = int_to_ptr.vmem [resolvable:$true] %s845_s10  ;;  %s3621_s29 = int_to_ptr.hbm [resolvable:$true] %s3620_s29 }
  0x92   : > { %s3622_s19 = scalar_lea.hbm %s3621_s29, 64  ;;  %s3627_s11 = scalar_lea.hbm %s3900_s12, 64 }
  0x93   : > { %p3623_p9 = scmp.ne.s32.totalorder %s3621_s29, %s3622_s19  ;;  %p3628_p12 = scmp.lt.s32.totalorder %s3621_s29, %s3900_s12 }
  0x94   : > { %p3629_p13 = scmp.lt.s32.totalorder %s3627_s11, %s3622_s19 }
  0x95   : > { %p3625_p10 = pnand %p3623_p9, %p4018_p7 }
  0x96   : > { %p3630_p0 = por %p3629_p13, %p3628_p12 }
  0x97   : > { %p3626_p11 = pneg %p3625_p10 }
  0x99   : > { %p3631_p1 = pnand %p3630_p0, %p3626_p11 }
  0x9b   : > { %3634 = shalt.err (!%p3631_p1)
}
  0x9c   : > { %3292 = dma.hbm_to_vmem [thread:$0]  (!%p4007_p5), %s4088_s15, 1024, %s846_s10, [#allocation9], %s3804_s1, %s3804_s1, %s3805_s7  }
  0x9d   : > { %s917_s16 = sshll.u32 %s3950_s13, 4  ;;  %s3811_s26 = smov [#allocation13]   ;;  %s4116_s16 = int_to_ptr.hbm [resolvable:$true] %s917_s16 }
  0x9e   : > { %s879_s22 = sshll.u32 %s3811_s26, 4  ;;  %s3650_s29 = sshra.s32 %s4102_s2, 4  ;;  %s880_s22 = int_to_ptr.vmem [resolvable:$true] %s879_s22  ;;  %s3651_s29 = int_to_ptr.hbm [resolvable:$true] %s3650_s29 }
  0x9f   : > { %s3652_s19 = scalar_lea.hbm %s3651_s29, 64  ;;  %s3657_s11 = scalar_lea.hbm %s3920_s17, 64 }
  0xa0   : > { %p3653_p4 = scmp.ne.s32.totalorder %s3651_s29, %s3652_s19  ;;  %p3658_p9 = scmp.lt.s32.totalorder %s3651_s29, %s3920_s17 }
  0xa1   : > { %p3659_p10 = scmp.lt.s32.totalorder %s3657_s11, %s3652_s19 }
  0xa2   : > { %p3655_p6 = pnand %p3653_p4, %p4018_p7 }
  0xa3   : > { %p3660_p11 = por %p3659_p10, %p3658_p9 }
  0xa4   : > { %p3656_p8 = pneg %p3655_p6 }
  0xa6   : > { %p3661_p12 = pnand %p3660_p11, %p3656_p8 }
  0xa8   : > { %3664 = shalt.err (!%p3661_p12)
}
  0xa9   : > { %3298 = dma.hbm_to_vmem [thread:$0]  (!%p4007_p5), %s4102_s2, 1024, %s880_s22, [#allocation12], %s3804_s1, %s3804_s1, %s3805_s7  }
  0xaa   : > { %s3812_s15 = smov [#allocation16]   ;;  %s934_s26 = sshll.u32 %s3960_s30, 4  ;;  %s935_s26 = int_to_ptr.hbm [resolvable:$true] %s934_s26 }
  0xab   : > { %s919_s10 = sshll.u32 %s3812_s15, 4  ;;  %s3680_s29 = sshra.s32 %s4116_s16, 4  ;;  %s920_s10 = int_to_ptr.vmem [resolvable:$true] %s919_s10  ;;  %s3681_s29 = int_to_ptr.hbm [resolvable:$true] %s3680_s29 }
  0xac   : > { %s3682_s19 = scalar_lea.hbm %s3681_s29, 64  ;;  %s3687_s11 = scalar_lea.hbm %s3950_s13, 64 }
  0xad   : > { %p3683_p13 = scmp.ne.s32.totalorder %s3681_s29, %s3682_s19  ;;  %p3688_p4 = scmp.lt.s32.totalorder %s3681_s29, %s3950_s13 }
  0xae   : > { %p3689_p6 = scmp.lt.s32.totalorder %s3687_s11, %s3682_s19 }
  0xaf   : > { %p3685_p0 = pnand %p3683_p13, %p4018_p7 }
  0xb0   : > { %p3690_p8 = por %p3689_p6, %p3688_p4 }
  0xb1   : > { %p3686_p1 = pneg %p3685_p0 }
  0xb3   : > { %p3691_p9 = pnand %p3690_p8, %p3686_p1 }
  0xb5   : > { %3694 = shalt.err (!%p3691_p9)
}
  0xb6   : > { %3304 = dma.hbm_to_vmem [thread:$0]  (!%p4007_p5), %s4116_s16, 1024, %s920_s10, [#allocation15], %s3804_s1, %s3804_s1, %s3805_s7  }
  0xb7   : > { %s3813_s2 = smov [#allocation17]   ;;  %s3710_s15 = sshra.s32 %s935_s26, 4  ;;  %s3711_s15 = int_to_ptr.hbm [resolvable:$true] %s3710_s15 }
  0xb8   : > { %s936_s22 = sshll.u32 %s3813_s2, 4  ;;  %s3712_s29 = scalar_lea.hbm %s3711_s15, 64  ;;  %s937_s22 = int_to_ptr.vmem [resolvable:$true] %s936_s22 }
  0xb9   : > { %p3713_p10 = scmp.ne.s32.totalorder %s3711_s15, %s3712_s29  ;;  %s3717_s19 = scalar_lea.hbm %s3960_s30, 64 }
  0xba   : > { %p3718_p13 = scmp.lt.s32.totalorder %s3711_s15, %s3960_s30  ;;  %p3719_p0 = scmp.lt.s32.totalorder %s3717_s19, %s3712_s29 }
  0xbb   : > { %p3715_p11 = pnand %p3713_p10, %p4018_p7 }
  0xbc   : > { %p3720_p1 = por %p3719_p0, %p3718_p13 }
  0xbd   : > { %p3716_p12 = pneg %p3715_p11 }
  0xbf   : > { %p3721_p4 = pnand %p3720_p1, %p3716_p12 }
  0xc1   : > { %3724 = shalt.err (!%p3721_p4)
}
  0xc2   : > { %3307 = dma.hbm_to_vmem [thread:$0]  (!%p4007_p5), %s935_s26, 1024, %s937_s22, [#allocation18], %s3804_s1, %s3804_s1, %s3805_s7  }
  0xc3   : > { %987 = sbr.rel (%p3994_p3) target bundleno = 3380 (0xd34), region = 140 }
  0xc8   : > { %3745 = dma.done.wait (%p3308_p2), [#allocation4], 1024  }
  0xc9   : > { %3747 = vsyncadd (%p3308_p2), [#allocation4], 4294966272 }
  0xca   : > { %3749 = dma.done.wait (%p3308_p2), [#allocation6], 2048  }
  0xcb   : > { %3751 = vsyncadd (%p3308_p2), [#allocation6], 4294965248 }
  0xcc   : > { %3753 = dma.done.wait (%p3308_p2), [#allocation9], 2048  }
  0xcd   : > { %3755 = vsyncadd (%p3308_p2), [#allocation9], 4294965248 }
  0xce   : > { %3757 = dma.done.wait (%p3308_p2), [#allocation12], 2048  }
  0xcf   : > { %3759 = vsyncadd (%p3308_p2), [#allocation12], 4294965248 }
  0xd0   : > { %3761 = dma.done.wait (%p3308_p2), [#allocation15], 2048  }
  0xd1   : > { %3763 = vsyncadd (%p3308_p2), [#allocation15], 4294965248 }
  0xd2   : > { %3765 = dma.done.wait (%p3308_p2), [#allocation18], 1024  }
  0xd3   : > { %3767 = vsyncadd (%p3308_p2), [#allocation18], 4294966272  ;;  %v3164_v0 = vld [vmem:[#allocation3 + $0x38] sm:$0xff]  ;;  %v3163_v2 = vld [vmem:[#allocation3 + $0x30] sm:$0xff]  ;;  %p1119_p3 = scmp.lt.s32.totalorder %s3988_s0, 1  ;;  %vm1424_vm0 = vcmask 64512   ;;  %v1140_v51 = vlaneseq }
  0xd4   : > { %v3172_v1 = vld [vmem:[#allocation5 + $0x38] sm:$0xff]  ;;  %1278 = vmatpush.bf16.msra.mxu0 %v3164_v0  ;;  %v3171_v3 = vld [vmem:[#allocation5 + $0x30] sm:$0xff]  ;;  %v3162_v5 = vld [vmem:[#allocation3 + $0x28] sm:$0xff]  ;;  %s3814_s7 = smov 112   ;;  %s3815_s23 = smov 120   ;;  %vm1459_vm1 = vcmask 1043456  }
  0xd5   : > { %1343 = vmatpush.bf16.msra.mxu1 %v3172_v1  ;;  %v3180_v4 = vld [vmem:[#allocation7 + $0x38] sm:$0xff]  ;;  %v3170_v6 = vld [vmem:[#allocation5 + $0x28] sm:$0xff]  ;;  %v3179_v7 = vld [vmem:[#allocation7 + $0x30] sm:$0xff]  ;;  %s4357_s0 = smov (!%p1119_p3, %s3988_s0), 1  ;;  %s4342_s1 = sld [smem:[#allocation25_spill]]  ;;  %v1141_v55 = vshrl.u32 %v1140_v51, 7 }
  0xd6   : > { %1407 = vmatpush.bf16.msra.mxu2 %v3180_v4  ;;  %v3161_v8 = vld [vmem:[#allocation3 + $0x20] sm:$0xff]  ;;  %v3178_v10 = vld [vmem:[#allocation7 + $0x28] sm:$0xff]  ;;  %v3160_v11 = vld [vmem:[#allocation3 + $0x18] sm:$0xff]  ;;  %s4181_s18 = sshll.u32 %s4357_s0, 3  ;;  %s3816_s16 = smov 104   ;;  %v1143_v56 = vand.u32 127, %v1140_v51 }
  0xd7   : > { %v3169_v9 = vld [vmem:[#allocation5 + $0x20] sm:$0xff]  ;;  %v3168_v12 = vld [vmem:[#allocation5 + $0x18] sm:$0xff]  ;;  %v3159_v14 = vld [vmem:[#allocation3 + $0x10] sm:$0xff]  ;;  %s1122_s28 = scalar_lea.vmem %s3830_s5, %s4181_s18  ;;  %v3817_v59 = vmov -1e+09   ;;  %s3819_s26 = smov 8  }
  0xd8   : > { %1279 = vmatpush.bf16.msra.mxu0 %v3163_v2  ;;  %v3177_v13 = vld [vmem:[#allocation7 + $0x20] sm:$0xff]  ;;  %v3167_v15 = vld [vmem:[#allocation5 + $0x10] sm:$0xff]  ;;  %v3176_v16 = vld [vmem:[#allocation7 + $0x18] sm:$0xff]  ;;  %vm1147_vm2 = vcmp.le.s32.totalorder %v1143_v56, %v1141_v55  ;;  %s3820_s11 = smov 16   ;;  %s3821_s2 = smov 24   ;;  %vm1546_vm3 = vcmask 130112  }
  0xd9   : > { %1344 = vmatpush.bf16.msra.mxu1 %v3171_v3  ;;  %v3158_v17 = vld [vmem:[#allocation3 + $0x8] sm:$0xff]  ;;  %v3175_v19 = vld [vmem:[#allocation7 + $0x10] sm:$0xff]  ;;  %v3157_v20 = vld [vmem:[#allocation3] sm:$0xff]  ;;  %v1148_v60 = vsel %vm1147_vm2, 0.0, %v3817_v59  ;;  %vm1608_vm4 = vcmask 195712   ;;  %vm1670_vm5 = vcmask 261312  }
  0xda   : > { %1408 = vmatpush.bf16.msra.mxu2 %v3179_v7  ;;  %v3166_v18 = vld [vmem:[#allocation5 + $0x8] sm:$0xff]  ;;  %v3165_v21 = vld [vmem:[#allocation5] sm:$0xff]  ;;  %v4185_v22 = vld [vmem:[%s1122_s28] sm:$0xff]  ;;  %s4343_s22 = sld [smem:[#allocation30_spill]] }
  0xdb   : > { %v3174_v23 = vld [vmem:[#allocation7 + $0x8] sm:$0xff]  ;;  %v1226_v24 = vpack.c.bf16 %v4185_v22, %v4185_v22  ;;  %v3173_v25 = vld [vmem:[#allocation7] sm:$0xff]  ;;  %v3386_v26 = vld [vmem:[%s3855_s25] ss:$0 sm:$0xff]  ;;  %s1125_s10 = scalar_lea.vmem %s4342_s1, %s4357_s0  ;;  %s4344_s15 = sld [smem:[#allocation26_spill]] }
  0xdc   : > { %1280 = vmatpush.bf16.msra.mxu0 %v3162_v5  ;;  %v3387_v27 = vld [vmem:[%s3865_s3] ss:$0 sm:$0xff]  ;;  %s4345_s19 = sld [smem:[#allocation31_spill]] }
  0xdd   : > { %1345 = vmatpush.bf16.msra.mxu1 %v3170_v6  ;;  %v3388_v43 = vld [vmem:[%s3875_s14] ss:$0 sm:$0xff]  ;;  %s4346_s28 = sld [smem:[#allocation32_spill]] }
  0xde   : > { %1409 = vmatpush.bf16.msra.mxu2 %v3178_v10  ;;  %v1144_v50 = vld [vmem:[%s1125_s10] sm:$0x1]  ;;  %s4347_s1 = sld [smem:[#allocation34_spill]] }
  0xdf   : > { %v1145_v53 = vsub.f32 1.0, %v1144_v50  ;;  %s4348_s10 = sld [smem:[#allocation33_spill]] }
  0xe0   : > { %1281 = vmatpush.bf16.msra.mxu0 %v3161_v8 }
  0xe1   : > { %1346 = vmatpush.bf16.msra.mxu1 %v3169_v9  ;;  %v1146_v57 = vmul.f32 -1e+09, %v1145_v53  ;;  %s1129_s29 = scalar_lea.vmem %s4344_s15, %s4181_s18 }
  0xe2   : > { %1410 = vmatpush.bf16.msra.mxu2 %v3177_v13  ;;  %v3818_v13 = vmov 0.0  }
  0xe3   : > { %v1150_v58 = vperm.slane %v1146_v57, 0  ;;  %1423 = vst [vmem:[#allocation2] sm:$0xff] %v3818_v13 }
  0xe4   : > { %1282 = vmatpush.bf16.msra.mxu0 %v3160_v11 }
  0xe5   : > { %1347 = vmatpush.bf16.msra.mxu1 %v3168_v12  ;;  %v1152_v61 = vadd.f32 %v1150_v58, %v1148_v60 }
  0xe6   : > { %1411 = vmatpush.bf16.msra.mxu2 %v3176_v16 }
  0xe8   : > { %1283 = vmatpush.bf16.msra.mxu0 %v3159_v14 }
  0xe9   : > { %1348 = vmatpush.bf16.msra.mxu1 %v3167_v15 }
  0xea   : > { %1412 = vmatpush.bf16.msra.mxu2 %v3175_v19 }
  0xec   : > { %1284 = vmatpush.bf16.msra.mxu0 %v3158_v17 }
  0xed   : > { %1349 = vmatpush.bf16.msra.mxu1 %v3166_v18 }
  0xee   : > { %1413 = vmatpush.bf16.msra.mxu2 %v3174_v23 }
  0xf0   : > { %1285 = vmatpush.bf16.msra.mxu0 %v3157_v20 }
  0xf1   : > { %1350 = vmatpush.bf16.msra.mxu1 %v3165_v21 }
  0xf2   : > { %1414 = vmatpush.bf16.msra.mxu2 %v3173_v25 }
  0xf3   : > { %1286 = vmatmul.bf16.vlgmr.msra.gmra.mxu0 %v1226_v24 }
  0xf4   : > { %1351 = vmatmul.bf16.vlgmr.msra.gmra.mxu1 %v1226_v24 }
  0xf5   : > { %1415 = vmatmul.bf16.vlgmr.msra.gmra.mxu2 %v1226_v24 }
 0x170   : > { %v1287_v28 = vpop.f32.mrf.mxu0 }
 0x171   : > { %v1352_v29 = vpop.f32.mrf.mxu1  ;;  %v1288_v30 = vadd.f32 %v3386_v26, %v1287_v28 }
 0x172   : > { %v1353_v31 = vadd.f32 %v3387_v27, %v1352_v29 }
 0x173   : > { %v1291_v32 = vmul.f32 0.35355338, %v1288_v30 }
 0x174   : > { %v1421_v33 = vpack.c.bf16 %v1353_v31, %v1353_v31 }
 0x175   : > { %v1420_v34 = vpack.c.bf16 %v1291_v32, %v1291_v32 }
 0x176   : > { %v1483_v35 = vunpack.c.l.b16 %v1421_v33  ;;  %v1429_v36 = vsel %vm1424_vm0, %v1421_v33, 0 }
 0x177   : > { %1438 = vmatpush.bf16.xpose.msrb.mxu0 %v1429_v36  ;;  %v1478_v40 = vunpack.c.l.b16 %v1420_v34 }
 0x178   : > { %v1484_v37 = vpack.c.b16 %v1483_v35, %v1483_v35  ;;  %v1289_v38 = vpop.f32.mrf.mxu0  ;;  %v1416_v42 = vpop.f32.mrf.mxu2 }
 0x179   : > { %v1354_v39 = vpop.f32.mrf.mxu1  ;;  %v1479_v41 = vpack.c.b16 %v1478_v40, %v1478_v40  ;;  %v1417_v44 = vadd.f32 %v3388_v43, %v1416_v42 }
 0x17a   : > { %1550 = vrot.lane.b32.xlu2 %v1484_v37, %s3814_s7  ;;  %1485 = vrot.lane.b32.xlu1 %v1484_v37, %s3815_s23 }
 0x17b   : > { %v4199_v46 = vpack.c.bf16 %v1417_v44, %v1417_v44 }
 0x17d   : > { %v1461_v47 = vsel %vm1459_vm1, %v4199_v46, 0  ;;  %v1519_v32 = vunpack.c.l.b16 %v4199_v46 }
 0x17e   : > { %2915 = vmatmul.msk.bf16.vlgmr.msrb.gmra.mxu0 %vm1424_vm0, %v1420_v34  ;;  %1470 = vmatpush.bf16.msra.mxu3 %v1461_v47 }
 0x17f   : > { %v1520_v33 = vpack.c.b16 %v1519_v32, %v1519_v32 }
 0x180   : > { %v1418_v45 = vpop.f32.mrf.mxu2 }
 0x182   : > { %1612 = vrot.lane.b32.xlu2 %v1484_v37, %s3816_s16  ;;  %1480 = vrot.lane.b32.xlu1 %v1479_v41, %s3815_s23 }
 0x18a   : > { %1610 = vrot.lane.b32.xlu1 %v1479_v41, %s3816_s16 }
 0x1d4   : > { %v1551_v48 = vpop.permute.xlu2 %1550 }
 0x1d5   : > { %v1556_v49 = vsel %vm1424_vm0, %v1551_v48, 0 }
 0x1d6   : > { %1565 = vmatpush.bf16.xpose.msrb.mxu1 %v1556_v49 }
 0x1dc   : > { %v1613_v10 = vpop.permute.xlu2 %1612 }
 0x1dd   : > { %v1618_v12 = vsel %vm1424_vm0, %v1613_v10, 0  ;;  %v3187_v10 = vld [vmem:[#allocation8 + $0x30] sm:$0xff] }
 0x1ec   : > { %v1486_v52 = vpop.permute.xlu1 %1485 }
 0x1ed   : > { %v1491_v54 = vsel %vm1424_vm0, %v1486_v52, 0 }
 0x1ee   : > { %1500 = vmatpush.bf16.xpose.msrb.mxu3 %v1491_v54 }
 0x1f4   : > { %v1481_v15 = vpop.permute.xlu1 %1480 }
 0x1fb   : > { %v1440_v62 = vpop.f32.mrf.mxu0 }
 0x1fc   : > { %v1441_v63 = vadd.f32 %v1440_v62, %v1152_v61  ;;  %v1611_v16 = vpop.permute.xlu1 %1610 }
 0x1fe   : > { %v1444_v0 = vsel %vm1424_vm0, %v1441_v63, -inf }
 0x1ff   : > { %1445 = vmax.xlane.f32.xlu0 %v1444_v0 }
 0x203   : > { %v1442_v1 = vpop.f32.mrf.mxu0 }
 0x272   : > { %v1446_v2 = vpop.xlane.xlu0 %1445 }
 0x273   : > { %v1447_v3 = vsub.f32 %v1441_v63, %v1446_v2 }
 0x275   : > { %v1448_v4 = vmul.f32 1.442695, %v1447_v3 }
 0x277   : > { %3402 = vpow2.f32 %v1448_v4 }
 0x27d   : > { %v3403_v5 = vpop.eup %3402 }
 0x27e   : > { %v1450_v6 = vsel %vm1424_vm0, %v3403_v5, 0.0 }
 0x27f   : > { %1451 = vadd.xlane.f32.xlu0 %v1450_v6 }
 0x293   : > { %1548 = vrot.lane.b32.xlu0 %v1479_v41, %s3814_s7 }
 0x2f2   : > { %v1452_v7 = vpop.xlane.xlu0 %1451 }
 0x2f3   : > { %3404 = vrcp.f32 %v1452_v7 }
 0x2f9   : > { %v3405_v8 = vpop.eup %3404 }
 0x2fa   : > { %v1454_v9 = vmul.f32 %v3405_v8, %v3403_v5 }
 0x2fc   : > { %v1455_v11 = vpack.c.bf16 %v1454_v9, %v1454_v9  ;;  %v3188_v9 = vld [vmem:[#allocation8 + $0x38] sm:$0xff] }
 0x2fd   : > { %1725 = vmatpush.bf16.msra.mxu1 %v3188_v9 }
 0x2fe   : > { %2916 = vmatmul.msk.bf16.vlgmr.msra.gmra.mxu3 %vm1424_vm0, %v1455_v11  ;;  %v3186_v11 = vld [vmem:[#allocation8 + $0x28] sm:$0xff] }
 0x2ff   : > { %1627 = vmatpush.bf16.xpose.msra.mxu3 %v1618_v12  ;;  %v3185_v12 = vld [vmem:[#allocation8 + $0x20] sm:$0xff] }
 0x301   : > { %1726 = vmatpush.bf16.msra.mxu1 %v3187_v10 }
 0x305   : > { %v1549_v14 = vpop.permute.xlu0 %1548  ;;  %1727 = vmatpush.bf16.msra.mxu1 %v3186_v11  ;;  %v3393_v11 = vld [vmem:[%s4348_s10] ss:$0 sm:$0xff] }
 0x306   : > { %2919 = vmatmul.msk.bf16.vlgmr.msrb.gmra.mxu1 %vm1424_vm0, %v1549_v14  ;;  %v3184_v14 = vld [vmem:[#allocation8 + $0x18] sm:$0xff] }
 0x309   : > { %1728 = vmatpush.bf16.msra.mxu1 %v3185_v12 }
 0x30d   : > { %1729 = vmatpush.bf16.msra.mxu1 %v3184_v14 }
 0x30e   : > { %2917 = vmatmul.msk.bf16.vlgmr.msrb.gmra.mxu3 %vm1424_vm0, %v1481_v15  ;;  %v3183_v15 = vld [vmem:[#allocation8 + $0x10] sm:$0xff] }
 0x311   : > { %1730 = vmatpush.bf16.msra.mxu1 %v3183_v15 }
 0x31e   : > { %2921 = vmatmul.msk.bf16.vlgmr.msra.gmra.mxu3 %vm1424_vm0, %v1611_v16 }
 0x381   : > { %v1472_v17 = vpop.f32.mrf.mxu3 }
 0x382   : > { %1476 = vst.msk [vmem:[#allocation2] sm:$0xff] %vm1424_vm0, %v1472_v17 }
 0x383   : > { %v1567_v18 = vpop.f32.mrf.mxu1 }
 0x384   : > { %v1568_v19 = vadd.f32 %v1567_v18, %v1152_v61  ;;  %v3182_v18 = vld [vmem:[#allocation8 + $0x8] sm:$0xff] }
 0x385   : > { %1731 = vmatpush.bf16.msra.mxu1 %v3182_v18 }
 0x386   : > { %v1571_v20 = vsel %vm1424_vm0, %v1568_v19, -inf }
 0x387   : > { %1572 = vmax.xlane.f32.xlu1 %v1571_v20 }
 0x389   : > { %v1474_v21 = vpop.f32.mrf.mxu3 }
 0x38b   : > { %v1569_v23 = vpop.f32.mrf.mxu1 }
 0x391   : > { %v1502_v24 = vpop.f32.mrf.mxu3 }
 0x392   : > { %v1503_v25 = vadd.f32 %v1502_v24, %v1152_v61  ;;  %v3204_v24 = vld [vmem:[#allocation11 + $0x38] sm:$0xff] }
 0x393   : > { %1957 = vmatpush.bf16.msrb.mxu3 %v3204_v24 }
 0x394   : > { %v1506_v26 = vsel %vm1424_vm0, %v1503_v25, -inf }
 0x395   : > { %1507 = vmax.xlane.f32.xlu2 %v1506_v26  ;;  %v3202_v26 = vld [vmem:[#allocation11 + $0x28] sm:$0xff] }
 0x399   : > { %v1504_v27 = vpop.f32.mrf.mxu3 }
 0x39a   : > { %v3201_v27 = vld [vmem:[#allocation11 + $0x20] sm:$0xff] }
 0x3a1   : > { %v1629_v28 = vpop.f32.mrf.mxu3 }
 0x3a2   : > { %v1630_v29 = vadd.f32 %v1629_v28, %v1152_v61  ;;  %v3200_v28 = vld [vmem:[#allocation11 + $0x18] sm:$0xff] }
 0x3a4   : > { %v1633_v30 = vsel %vm1424_vm0, %v1630_v29, -inf }
 0x3a5   : > { %1634 = vmax.xlane.f32.xlu0 %v1633_v30 }
 0x3a9   : > { %v1631_v31 = vpop.f32.mrf.mxu3 }
 0x3b9   : > { %1583 = vrot.lane.b32.xlu0 %v1520_v33, %s3814_s7 }
 0x3fa   : > { %v1573_v34 = vpop.xlane.xlu1 %1572 }
 0x3fb   : > { %v1574_v35 = vsub.f32 %v1568_v19, %v1573_v34  ;;  %v3181_v19 = vld [vmem:[#allocation8] sm:$0xff]  ;;  %v3199_v34 = vld [vmem:[#allocation11 + $0x10] sm:$0xff] }
 0x3fc   : > { %1732 = vmatpush.bf16.msra.mxu1 %v3181_v19 }
 0x3fd   : > { %v1575_v36 = vmul.f32 1.442695, %v1574_v35  ;;  %v3196_v35 = vld [vmem:[#allocation10 + $0x38] sm:$0xff] }
 0x3ff   : > { %3406 = vpow2.f32 %v1575_v36  ;;  %v3198_v36 = vld [vmem:[#allocation11 + $0x8] sm:$0xff] }
 0x405   : > { %v3407_v37 = vpop.eup %3406 }
 0x406   : > { %v1577_v38 = vsel %vm1424_vm0, %v3407_v37, 0.0 }
 0x407   : > { %1578 = vadd.xlane.f32.xlu1 %v1577_v38  ;;  %v3197_v38 = vld [vmem:[#allocation11] sm:$0xff] }
 0x408   : > { %v1508_v39 = vpop.xlane.xlu2 %1507 }
 0x409   : > { %v1509_v40 = vsub.f32 %v1503_v25, %v1508_v39  ;;  %v3203_v25 = vld [vmem:[#allocation11 + $0x30] sm:$0xff]  ;;  %v3194_v39 = vld [vmem:[#allocation10 + $0x28] sm:$0xff] }
 0x40a   : > { %1958 = vmatpush.bf16.msrb.mxu3 %v3203_v25  ;;  %v3212_v25 = vld [vmem:[#allocation13 + $0x38] sm:$0xff] }
 0x40b   : > { %v1510_v41 = vmul.f32 1.442695, %v1509_v40  ;;  %v1139_v40 = vld [vmem:[%s1129_s29] sm:$0xff] }
 0x40d   : > { %3408 = vpow2.f32 %v1510_v41  ;;  %v4244_v41 = vpack.c.bf16 %v1139_v40, %v1139_v40 }
 0x40e   : > { %1959 = vmatpush.bf16.msrb.mxu3 %v3202_v26  ;;  %v3211_v26 = vld [vmem:[#allocation13 + $0x30] sm:$0xff] }
 0x412   : > { %1960 = vmatpush.bf16.msrb.mxu3 %v3201_v27  ;;  %v3210_v27 = vld [vmem:[#allocation13 + $0x28] sm:$0xff] }
 0x413   : > { %v3409_v42 = vpop.eup %3408 }
 0x414   : > { %v1512_v43 = vsel %vm1424_vm0, %v3409_v42, 0.0 }
 0x415   : > { %1513 = vadd.xlane.f32.xlu2 %v1512_v43  ;;  %v3191_v43 = vld [vmem:[#allocation10 + $0x10] sm:$0xff] }
 0x416   : > { %1961 = vmatpush.bf16.msrb.mxu3 %v3200_v28 }
 0x418   : > { %v1635_v44 = vpop.xlane.xlu0 %1634 }
 0x419   : > { %v1636_v45 = vsub.f32 %v1630_v29, %v1635_v44  ;;  %v3389_v29 = vld [vmem:[%s4343_s22] ss:$0 sm:$0xff]  ;;  %v3190_v44 = vld [vmem:[#allocation10 + $0x8] sm:$0xff]  ;;  %s4349_s22 = sld [smem:[#allocation27_spill]] }
 0x41a   : > { %1962 = vmatpush.bf16.msrb.mxu3 %v3199_v34 }
 0x41b   : > { %v1637_v46 = vmul.f32 1.442695, %v1636_v45  ;;  %v3189_v45 = vld [vmem:[#allocation10] sm:$0xff] }
 0x41d   : > { %3410 = vpow2.f32 %v1637_v46 }
 0x41e   : > { %1963 = vmatpush.bf16.msrb.mxu3 %v3198_v36  ;;  %v3206_v36 = vld [vmem:[#allocation13 + $0x8] sm:$0xff] }
 0x41f   : > { %s1132_s15 = scalar_lea.vmem %s4349_s22, %s4357_s0  ;;  %s4350_s0 = sld [smem:[#allocation35_spill]] }
 0x420   : > { %v1153_v28 = vld [vmem:[%s1132_s15] sm:$0x1] }
 0x422   : > { %1964 = vmatpush.bf16.msrb.mxu3 %v3197_v38 }
 0x423   : > { %v3411_v47 = vpop.eup %3410 }
 0x424   : > { %v1639_v48 = vsel %vm1424_vm0, %v3411_v47, 0.0 }
 0x425   : > { %1640 = vadd.xlane.f32.xlu1 %v1639_v48  ;;  %1965 = vmatmul.bf16.vlgmr.msrb.gmra.mxu3 %v4244_v41 }
 0x42b   : > { %v1584_v49 = vpop.permute.xlu0 %1583 }
 0x42c   : > { %v1589_v50 = vsel %vm1459_vm1, %v1584_v49, 0 }
 0x42d   : > { %1521 = vrot.lane.b32.xlu2 %v1520_v33, %s3815_s23  ;;  %1598 = vmatpush.bf16.msrb.mxu2 %v1589_v50 }
 0x431   : > { %1892 = vmatpush.bf16.msra.mxu2 %v3196_v35 }
 0x43e   : > { %1645 = vrot.lane.b32.xlu1 %v1520_v33, %s3816_s16 }
 0x47a   : > { %v1579_v51 = vpop.xlane.xlu1 %1578 }
 0x47b   : > { %3412 = vrcp.f32 %v1579_v51 }
 0x481   : > { %v3413_v52 = vpop.eup %3412 }
 0x482   : > { %v1581_v53 = vmul.f32 %v3413_v52, %v3407_v37  ;;  %v3195_v37 = vld [vmem:[#allocation10 + $0x30] sm:$0xff] }
 0x483   : > { %1893 = vmatpush.bf16.msra.mxu2 %v3195_v37 }
 0x484   : > { %v1582_v54 = vpack.c.bf16 %v1581_v53, %v1581_v53 }
 0x486   : > { %2920 = vmatmul.msk.bf16.vlgmr.msrb.gmra.mxu2 %vm1424_vm0, %v1582_v54 }
 0x487   : > { %1894 = vmatpush.bf16.msra.mxu2 %v3194_v39 }
 0x488   : > { %v1514_v55 = vpop.xlane.xlu2 %1513 }
 0x489   : > { %3414 = vrcp.f32 %v1514_v55 }
 0x48f   : > { %v3415_v56 = vpop.eup %3414 }
 0x490   : > { %v1516_v57 = vmul.f32 %v3415_v56, %v3409_v42  ;;  %v1522_v58 = vpop.permute.xlu2 %1521  ;;  %v3192_v42 = vld [vmem:[#allocation10 + $0x18] sm:$0xff] }
 0x491   : > { %v1527_v59 = vsel %vm1459_vm1, %v1522_v58, 0 }
 0x492   : > { %v1517_v60 = vpack.c.bf16 %v1516_v57, %v1516_v57  ;;  %1536 = vmatpush.bf16.msra.mxu0 %v1527_v59 }
 0x495   : > { %2918 = vmatmul.msk.bf16.vlgmr.msra.gmra.mxu0 %vm1424_vm0, %v1517_v60  ;;  %v3390_v60 = vld [vmem:[%s4345_s19] ss:$0 sm:$0xff] }
 0x498   : > { %v1641_v61 = vpop.xlane.xlu1 %1640 }
 0x499   : > { %3416 = vrcp.f32 %v1641_v61 }
 0x49f   : > { %v3417_v62 = vpop.eup %3416 }
 0x4a0   : > { %v1643_v63 = vmul.f32 %v3417_v62, %v3411_v47 }
 0x4a2   : > { %v1644_v2 = vpack.c.bf16 %v1643_v63, %v1643_v63  ;;  %v3391_v63 = vld [vmem:[%s4346_s28] ss:$0 sm:$0xff] }
 0x4b0   : > { %v1646_v0 = vpop.permute.xlu1 %1645 }
 0x4b1   : > { %v1651_v1 = vsel %vm1459_vm1, %v1646_v0, 0 }
 0x4b2   : > { %1660 = vmatpush.bf16.msrb.mxu0 %v1651_v1 }
 0x4b5   : > { %2922 = vmatmul.msk.bf16.vlgmr.msrb.gmra.mxu0 %vm1424_vm0, %v1644_v2 }
 0x4b6   : > { %2021 = vmatpush.bf16.msra.mxu0 %v3212_v25 }
 0x4ba   : > { %2022 = vmatpush.bf16.msra.mxu0 %v3211_v26 }
 0x4be   : > { %2023 = vmatpush.bf16.msra.mxu0 %v3210_v27 }
 0x509   : > { %v1600_v3 = vpop.f32.mrf.mxu2 }
 0x511   : > { %v1602_v4 = vpop.f32.mrf.mxu2 }
 0x512   : > { %v1538_v5 = vpop.f32.mrf.mxu0  ;;  %v1966_v4 = vpop.f32.mrf.mxu3 }
 0x513   : > { %1543 = vrot.lane.b32.xlu2 %v1538_v5, %s3819_s26 }
 0x51a   : > { %v1540_v6 = vpop.f32.mrf.mxu0  ;;  %v1968_v10 = vpop.f32.mrf.mxu3 }
 0x51b   : > { %1605 = vrot.lane.b32.xlu2 %v1600_v3, %s3820_s11  ;;  %v3392_v3 = vld [vmem:[%s4347_s1] ss:$0 sm:$0xff] }
 0x51c   : > { %v1967_v5 = vadd.f32 %v3392_v3, %v1966_v4 }
 0x51e   : > { %v2035_v6 = vpack.c.bf16 %v1967_v5, %v1967_v5 }
 0x532   : > { %v1662_v7 = vpop.f32.mrf.mxu0 }
 0x533   : > { %1667 = vrot.lane.b32.xlu0 %v1662_v7, %s3821_s2  ;;  %v2045_v7 = vsel %vm1424_vm0, %v2035_v6, 0 }
 0x534   : > { %2054 = vmatpush.bf16.xpose.msrb.mxu1 %v2045_v7 }
 0x53a   : > { %v1664_v8 = vpop.f32.mrf.mxu0 }
 0x53b   : > { %v2098_v8 = vunpack.c.l.b16 %v2035_v6 }
 0x53d   : > { %v2099_v9 = vpack.c.b16 %v2098_v8, %v2098_v8 }
 0x53f   : > { %2100 = vrot.lane.b32.xlu1 %v2099_v9, %s3815_s23 }
 0x547   : > { %2164 = vrot.lane.b32.xlu1 %v2099_v9, %s3814_s7 }
 0x56d   : > { %v1544_v16 = vpop.permute.xlu2 %1543 }
 0x56e   : > { %1547 = vst.msk [vmem:[#allocation2] sm:$0xff] %vm1546_vm3, %v1544_v16 }
 0x575   : > { %v1606_v17 = vpop.permute.xlu2 %1605 }
 0x576   : > { %1609 = vst.msk [vmem:[#allocation2] sm:$0xff] %vm1608_vm4, %v1606_v17 }
 0x5a5   : > { %v1668_v20 = vpop.permute.xlu0 %1667 }
 0x5a6   : > { %1671 = vst.msk [vmem:[#allocation2] sm:$0xff] %vm1670_vm5, %v1668_v20 }
 0x5ad   : > { %v1672_v21 = vld [vmem:[#allocation2] sm:$0xff] }
 0x5ae   : > { %v1673_v23 = vpack.c.bf16 %v1672_v21, %v1672_v21  ;;  %2037 = vst [vmem:[#allocation2] sm:$0xff] %v3818_v13 }
 0x5b0   : > { %1733 = vmatmul.bf16.vlgmr.msra.gmra.mxu1 %v1673_v23 }
 0x5b1   : > { %v2101_v20 = vpop.permute.xlu1 %2100 }
 0x5b2   : > { %v2106_v21 = vsel %vm1424_vm0, %v2101_v20, 0 }
 0x5b3   : > { %2115 = vmatpush.bf16.xpose.msra.mxu3 %v2106_v21 }
 0x5b9   : > { %v2165_v23 = vpop.permute.xlu1 %2164 }
 0x5ba   : > { %v2170_v24 = vsel %vm1424_vm0, %v2165_v23, 0 }
 0x5bb   : > { %2179 = vmatpush.bf16.xpose.msra.mxu1 %v2170_v24 }
 0x62d   : > { %v1734_v30 = vpop.f32.mrf.mxu1 }
 0x62e   : > { %v1735_v31 = vadd.f32 %v3389_v29, %v1734_v30  ;;  %v3209_v29 = vld [vmem:[#allocation13 + $0x20] sm:$0xff]  ;;  %v1154_v30 = vsub.f32 1.0, %v1153_v28 }
 0x62f   : > { %2024 = vmatpush.bf16.msra.mxu0 %v3209_v29 }
 0x630   : > { %v1738_v32 = vadd.f32 %v1735_v31, %v4185_v22  ;;  %v3193_v22 = vld [vmem:[#allocation10 + $0x20] sm:$0xff]  ;;  %v3208_v31 = vld [vmem:[#allocation13 + $0x18] sm:$0xff] }
 0x631   : > { %1895 = vmatpush.bf16.msra.mxu2 %v3193_v22  ;;  %v3205_v22 = vld [vmem:[#allocation13] sm:$0xff] }
 0x632   : > { %1739 = vadd.xlane.f32.xlu2 %v1738_v32  ;;  %v1742_v13 = vmul.f32 %v1738_v32, %v1738_v32 }
 0x633   : > { %2025 = vmatpush.bf16.msra.mxu0 %v3208_v31 }
 0x634   : > { %1743 = vadd.xlane.f32.xlu0 %v1742_v13  ;;  %v1155_v13 = vmul.f32 -1e+09, %v1154_v30 }
 0x635   : > { %v1736_v33 = vpop.f32.mrf.mxu1  ;;  %1896 = vmatpush.bf16.msra.mxu2 %v3192_v42 }
 0x636   : > { %v3207_v33 = vld [vmem:[#allocation13 + $0x10] sm:$0xff]  ;;  %v2039_v34 = vperm.slane %v1155_v13, 0 }
 0x637   : > { %2026 = vmatpush.bf16.msra.mxu0 %v3207_v33 }
 0x639   : > { %1897 = vmatpush.bf16.msra.mxu2 %v3191_v43 }
 0x63b   : > { %2027 = vmatpush.bf16.msra.mxu0 %v3206_v36 }
 0x63d   : > { %1898 = vmatpush.bf16.msra.mxu2 %v3190_v44 }
 0x63f   : > { %2028 = vmatpush.bf16.msra.mxu0 %v3205_v22 }
 0x641   : > { %1899 = vmatpush.bf16.msra.mxu2 %v3189_v45 }
 0x642   : > { %2029 = vmatmul.bf16.vlgmr.msra.gmra.mxu0 %v4244_v41 }
 0x6a5   : > { %v1740_v46 = vpop.xlane.xlu2 %1739 }
 0x6a6   : > { %v1741_v47 = vmul.f32 0.03125, %v1740_v46 }
 0x6a7   : > { %v1744_v48 = vpop.xlane.xlu0 %1743 }
 0x6a8   : > { %v1746_v49 = vmul.f32 %v1741_v47, %v1741_v47  ;;  %v1745_v50 = vmul.f32 0.03125, %v1744_v48  ;;  %v1748_v59 = vsub.f32 %v1738_v32, %v1741_v47 }
 0x6aa   : > { %v1747_v51 = vsub.f32 %v1745_v50, %v1746_v49 }
 0x6ac   : > { %v1749_v52 = vadd.f32 1e-05, %v1747_v51 }
 0x6ae   : > { %3418 = vrsqrt.f32 %v1749_v52  ;;  %vm1756_vm7 = vweird.f32 %v1749_v52 }
 0x6b4   : > { %v3419_v53 = vpop.eup %3418 }
 0x6b5   : > { %v1751_v54 = vmul.f32 %v3419_v53, %v1749_v52  ;;  %vm1757_vm6 = vweird.f32 %v3419_v53  ;;  %v3394_v52 = vld [vmem:[%s4350_s0] ss:$0 sm:$0xff] }
 0x6b6   : > { %vm1758_vm8 = vmor %vm1756_vm7, %vm1757_vm6 }
 0x6b7   : > { %v1752_v55 = vmul.f32 %v3419_v53, %v1751_v54 }
 0x6b9   : > { %v1753_v56 = vmul.f32 0.5, %v1752_v55 }
 0x6bb   : > { %v1754_v57 = vsub.f32 1.5, %v1753_v56 }
 0x6bd   : > { %v1755_v58 = vmul.f32 %v3419_v53, %v1754_v57 }
 0x6bf   : > { %v1759_v61 = vsel %vm1758_vm8, %v3419_v53, %v1755_v58  ;;  %v2030_v55 = vpop.f32.mrf.mxu0 }
 0x6c0   : > { %v1760_v62 = vmul.f32 %v1759_v61, %v1748_v59  ;;  %v2031_v56 = vadd.f32 %v3394_v52, %v2030_v55  ;;  %v3220_v52 = vld [vmem:[#allocation14 + $0x38] sm:$0xff]  ;;  %v3217_v55 = vld [vmem:[#allocation14 + $0x20] sm:$0xff] }
 0x6c2   : > { %v1764_v0 = vmul.f32 %v3390_v60, %v1760_v62  ;;  %v2036_v58 = vpack.c.bf16 %v2031_v56, %v2031_v56  ;;  %v3216_v56 = vld [vmem:[#allocation14 + $0x18] sm:$0xff] }
 0x6c4   : > { %v4249_v1 = vadd.f32 %v3391_v63, %v1764_v0  ;;  %v2076_v59 = vsel %vm1459_vm1, %v2036_v58, 0  ;;  %v2134_v4 = vunpack.c.l.b16 %v2036_v58  ;;  %v3214_v58 = vld [vmem:[#allocation14 + $0x8] sm:$0xff] }
 0x6c5   : > { %2085 = vmatpush.bf16.msrb.mxu2 %v2076_v59 }
 0x6c6   : > { %v1839_v2 = vpack.c.bf16 %v4249_v1, %v4249_v1  ;;  %v2135_v5 = vpack.c.b16 %v2134_v4, %v2134_v4 }
 0x6c7   : > { %v2032_v62 = vpop.f32.mrf.mxu0 }
 0x6c8   : > { %1900 = vmatmul.bf16.vlgmr.msra.gmra.mxu2 %v1839_v2 }
 0x74b   : > { %v1901_v12 = vpop.f32.mrf.mxu2 }
 0x74c   : > { %v1902_v14 = vadd.f32 %v3393_v11, %v1901_v12 }
 0x74e   : > { %v1905_v15 = vmul.f32 0.35355338, %v1902_v14 }
 0x750   : > { %v2034_v16 = vpack.c.bf16 %v1905_v15, %v1905_v15 }
 0x752   : > { %v2093_v17 = vunpack.c.l.b16 %v2034_v16  ;;  %3051 = vmatmul.msk.bf16.vlgmr.msrb.gmra.mxu1 %vm1424_vm0, %v2034_v16 }
 0x753   : > { %v1903_v18 = vpop.f32.mrf.mxu2  ;;  %2337 = vmatpush.bf16.msrb.mxu1 %v3220_v52 }
 0x754   : > { %v2094_v19 = vpack.c.b16 %v2093_v17, %v2093_v17 }
 0x756   : > { %2223 = vrot.lane.b32.xlu2 %v2094_v19, %s3816_s16  ;;  %2095 = vrot.lane.b32.xlu1 %v2094_v19, %s3815_s23 }
 0x75e   : > { %2225 = vrot.lane.b32.xlu1 %v2099_v9, %s3816_s16 }
 0x766   : > { %2162 = vrot.lane.b32.xlu1 %v2094_v19, %s3814_s7 }
 0x7b0   : > { %v2224_v43 = vpop.permute.xlu2 %2223 }
 0x7c8   : > { %v2096_v32 = vpop.permute.xlu1 %2095 }
 0x7c9   : > { %3053 = vmatmul.msk.bf16.vlgmr.msra.gmra.mxu3 %vm1424_vm0, %v2096_v32 }
 0x7cf   : > { %v2056_v35 = vpop.f32.mrf.mxu1 }
 0x7d0   : > { %v2057_v37 = vadd.f32 %v2056_v35, %v2039_v34  ;;  %v2226_v38 = vpop.permute.xlu1 %2225 }
 0x7d1   : > { %v2231_v39 = vsel %vm1424_vm0, %v2226_v38, 0 }
 0x7d2   : > { %2240 = vmatpush.bf16.xpose.msrb.mxu3 %v2231_v39  ;;  %v2060_v40 = vsel %vm1424_vm0, %v2057_v37, -inf }
 0x7d3   : > { %2061 = vmax.xlane.f32.xlu1 %v2060_v40 }
 0x7d7   : > { %v2058_v42 = vpop.f32.mrf.mxu1 }
 0x7d8   : > { %v2163_v44 = vpop.permute.xlu1 %2162 }
 0x7d9   : > { %3055 = vmatmul.msk.bf16.vlgmr.msra.gmra.mxu1 %vm1424_vm0, %v2163_v44  ;;  %3057 = vmatmul.msk.bf16.vlgmr.msrb.gmra.mxu3 %vm1424_vm0, %v2224_v43 }
 0x846   : > { %v2062_v45 = vpop.xlane.xlu1 %2061 }
 0x847   : > { %v2063_v46 = vsub.f32 %v2057_v37, %v2062_v45 }
 0x849   : > { %v2064_v47 = vmul.f32 1.442695, %v2063_v46 }
 0x84b   : > { %3420 = vpow2.f32 %v2064_v47 }
 0x84c   : > { %v2117_v48 = vpop.f32.mrf.mxu3 }
 0x84d   : > { %v2118_v60 = vadd.f32 %v2117_v48, %v2039_v34 }
 0x84f   : > { %v2121_v63 = vsel %vm1424_vm0, %v2118_v60, -inf }
 0x851   : > { %v3421_v49 = vpop.eup %3420 }
 0x852   : > { %v2066_v50 = vsel %vm1424_vm0, %v3421_v49, 0.0 }
 0x853   : > { %2067 = vadd.xlane.f32.xlu2 %v2066_v50 }
 0x854   : > { %v2119_v51 = vpop.f32.mrf.mxu3 }
 0x856   : > { %v2181_v53 = vpop.f32.mrf.mxu1 }
 0x857   : > { %v2182_v54 = vadd.f32 %v2181_v53, %v2039_v34  ;;  %v3219_v53 = vld [vmem:[#allocation14 + $0x30] sm:$0xff] }
 0x858   : > { %2338 = vmatpush.bf16.msrb.mxu1 %v3219_v53 }
 0x859   : > { %v2185_v57 = vsel %vm1424_vm0, %v2182_v54, -inf }
 0x85a   : > { %2186 = vmax.xlane.f32.xlu0 %v2185_v57  ;;  %v3215_v57 = vld [vmem:[#allocation14 + $0x10] sm:$0xff] }
 0x85c   : > { %v2242_v41 = vpop.f32.mrf.mxu3 }
 0x85d   : > { %v2243_v2 = vadd.f32 %v2242_v41, %v2039_v34  ;;  %v3213_v41 = vld [vmem:[#allocation14] sm:$0xff] }
 0x85e   : > { %v2183_v61 = vpop.f32.mrf.mxu1 }
 0x85f   : > { %v2246_v3 = vsel %vm1424_vm0, %v2243_v2, -inf }
 0x862   : > { %2122 = vmax.xlane.f32.xlu0 %v2121_v63 }
 0x864   : > { %v2244_v0 = vpop.f32.mrf.mxu3 }
 0x86a   : > { %2247 = vmax.xlane.f32.xlu0 %v2246_v3 }
 0x87e   : > { %2136 = vrot.lane.b32.xlu0 %v2135_v5, %s3815_s23  ;;  %s4352_s23 = sld [smem:[#allocation37_spill]] }
 0x8c6   : > { %v2068_v6 = vpop.xlane.xlu2 %2067 }
 0x8c7   : > { %3422 = vrcp.f32 %v2068_v6 }
 0x8cd   : > { %v3423_v7 = vpop.eup %3422  ;;  %v2187_v8 = vpop.xlane.xlu0 %2186 }
 0x8ce   : > { %v2070_v9 = vmul.f32 %v3423_v7, %v3421_v49  ;;  %v2188_v10 = vsub.f32 %v2182_v54, %v2187_v8  ;;  %v3218_v54 = vld [vmem:[#allocation14 + $0x28] sm:$0xff]  ;;  %v3228_v7 = vld [vmem:[#allocation16 + $0x38] sm:$0xff]  ;;  %v3227_v8 = vld [vmem:[#allocation16 + $0x30] sm:$0xff] }
 0x8cf   : > { %2339 = vmatpush.bf16.msrb.mxu1 %v3218_v54 }
 0x8d0   : > { %v2071_v11 = vpack.c.bf16 %v2070_v9, %v2070_v9  ;;  %v2189_v12 = vmul.f32 1.442695, %v2188_v10  ;;  %v3226_v9 = vld [vmem:[#allocation16 + $0x28] sm:$0xff]  ;;  %v3225_v10 = vld [vmem:[#allocation16 + $0x20] sm:$0xff] }
 0x8d2   : > { %3424 = vpow2.f32 %v2189_v12  ;;  %3052 = vmatmul.msk.bf16.vlgmr.msrb.gmra.mxu2 %vm1424_vm0, %v2071_v11  ;;  %v3224_v11 = vld [vmem:[#allocation16 + $0x18] sm:$0xff]  ;;  %v3223_v12 = vld [vmem:[#allocation16 + $0x10] sm:$0xff] }
 0x8d3   : > { %2340 = vmatpush.bf16.msrb.mxu1 %v3217_v55 }
 0x8d5   : > { %v2123_v14 = vpop.xlane.xlu0 %2122 }
 0x8d6   : > { %v2124_v15 = vsub.f32 %v2118_v60, %v2123_v14  ;;  %v3222_v14 = vld [vmem:[#allocation16 + $0x8] sm:$0xff] }
 0x8d7   : > { %2341 = vmatpush.bf16.msrb.mxu1 %v3216_v56 }
 0x8d8   : > { %v3425_v16 = vpop.eup %3424  ;;  %v2125_v17 = vmul.f32 1.442695, %v2124_v15  ;;  %v3221_v15 = vld [vmem:[#allocation16] sm:$0xff] }
 0x8d9   : > { %v2191_v18 = vsel %vm1424_vm0, %v3425_v16, 0.0 }
 0x8da   : > { %3426 = vpow2.f32 %v2125_v17  ;;  %2192 = vadd.xlane.f32.xlu1 %v2191_v18 }
 0x8db   : > { %2342 = vmatpush.bf16.msrb.mxu1 %v3215_v57 }
 0x8dd   : > { %v2248_v19 = vpop.xlane.xlu0 %2247 }
 0x8de   : > { %v2249_v20 = vsub.f32 %v2243_v2, %v2248_v19 }
 0x8df   : > { %2343 = vmatpush.bf16.msrb.mxu1 %v3214_v58 }
 0x8e0   : > { %v3427_v21 = vpop.eup %3426  ;;  %v2250_v23 = vmul.f32 1.442695, %v2249_v20  ;;  %v3236_v20 = vld [vmem:[#allocation17 + $0x38] sm:$0xff] }
 0x8e1   : > { %v2127_v24 = vsel %vm1424_vm0, %v3427_v21, 0.0  ;;  %2535 = vmatpush.bf16.msra.mxu3 %v3236_v20 }
 0x8e2   : > { %3428 = vpow2.f32 %v2250_v23  ;;  %2128 = vadd.xlane.f32.xlu0 %v2127_v24  ;;  %v3235_v23 = vld [vmem:[#allocation17 + $0x30] sm:$0xff] }
 0x8e3   : > { %2344 = vmatpush.bf16.msrb.mxu1 %v3213_v41 }
 0x8e5   : > { %2536 = vmatpush.bf16.msra.mxu3 %v3235_v23 }
 0x8e8   : > { %v3429_v25 = vpop.eup %3428 }
 0x8e9   : > { %v2252_v26 = vsel %vm1424_vm0, %v3429_v25, 0.0 }
 0x8ea   : > { %2253 = vadd.xlane.f32.xlu1 %v2252_v26  ;;  %v3233_v26 = vld [vmem:[#allocation17 + $0x20] sm:$0xff] }
 0x8f0   : > { %v2137_v27 = vpop.permute.xlu0 %2136 }
 0x8f1   : > { %v2142_v28 = vsel %vm1459_vm1, %v2137_v27, 0 }
 0x8f2   : > { %2151 = vmatpush.bf16.msrb.mxu0 %v2142_v28 }
 0x8f6   : > { %2197 = vrot.lane.b32.xlu0 %v2135_v5, %s3814_s7  ;;  %s4351_s7 = sld [smem:[#allocation36_spill]] }
 0x8fc   : > { %v3395_v0 = vld [vmem:[%s4351_s7] ss:$0 sm:$0xff] }
 0x903   : > { %2258 = vrot.lane.b32.xlu1 %v2135_v5, %s3816_s16  ;;  %s4353_s16 = sld [smem:[#allocation38_spill]] }
 0x94d   : > { %v2193_v31 = vpop.xlane.xlu1 %2192 }
 0x955   : > { %v2129_v29 = vpop.xlane.xlu0 %2128  ;;  %v2087_v30 = vpop.f32.mrf.mxu2 }
 0x956   : > { %3430 = vrcp.f32 %v2129_v29  ;;  %2091 = vst.msk [vmem:[#allocation2] sm:$0xff] %vm1424_vm0, %v2087_v30  ;;  %v3232_v29 = vld [vmem:[#allocation17 + $0x18] sm:$0xff] }
 0x957   : > { %3432 = vrcp.f32 %v2193_v31 }
 0x95c   : > { %v3431_v32 = vpop.eup %3430 }
 0x95d   : > { %v2131_v13 = vmul.f32 %v3431_v32, %v3427_v21  ;;  %v2089_v33 = vpop.f32.mrf.mxu2  ;;  %v3433_v35 = vpop.eup %3432  ;;  %v3231_v32 = vld [vmem:[#allocation17 + $0x10] sm:$0xff] }
 0x95e   : > { %v2195_v36 = vmul.f32 %v3433_v35, %v3425_v16  ;;  %v2254_v37 = vpop.xlane.xlu1 %2253  ;;  %v3396_v35 = vld [vmem:[%s4352_s23] ss:$0 sm:$0xff] }
 0x95f   : > { %v2132_v34 = vpack.c.bf16 %v2131_v13, %v2131_v13  ;;  %3434 = vrcp.f32 %v2254_v37 }
 0x960   : > { %v2196_v40 = vpack.c.bf16 %v2195_v36, %v2195_v36 }
 0x961   : > { %3054 = vmatmul.msk.bf16.vlgmr.msrb.gmra.mxu0 %vm1424_vm0, %v2132_v34 }
 0x965   : > { %v3435_v22 = vpop.eup %3434 }
 0x966   : > { %v2256_v42 = vmul.f32 %v3435_v22, %v3429_v25  ;;  %v3234_v25 = vld [vmem:[#allocation17 + $0x28] sm:$0xff] }
 0x967   : > { %2537 = vmatpush.bf16.msra.mxu3 %v3234_v25 }
 0x968   : > { %v2198_v38 = vpop.permute.xlu0 %2197  ;;  %v2257_v45 = vpack.c.bf16 %v2256_v42, %v2256_v42  ;;  %v3230_v42 = vld [vmem:[#allocation17 + $0x8] sm:$0xff] }
 0x969   : > { %v2203_v39 = vsel %vm1459_vm1, %v2198_v38, 0  ;;  %v3397_v38 = vld [vmem:[%s4353_s16] ss:$0 sm:$0xff] }
 0x96a   : > { %2212 = vmatpush.bf16.msra.mxu2 %v2203_v39 }
 0x96b   : > { %2538 = vmatpush.bf16.msra.mxu3 %v3233_v26 }
 0x96d   : > { %3056 = vmatmul.msk.bf16.vlgmr.msra.gmra.mxu2 %vm1424_vm0, %v2196_v40 }
 0x96e   : > { %2469 = vmatpush.bf16.msrb.mxu2 %v3228_v7 }
 0x96f   : > { %2539 = vmatpush.bf16.msra.mxu3 %v3232_v29 }
 0x972   : > { %2470 = vmatpush.bf16.msrb.mxu2 %v3227_v8  ;;  %v3401_v8 = vld [vmem:[%s3975_s4] ss:$0 sm:$0xff] }
 0x973   : > { %2540 = vmatpush.bf16.msra.mxu3 %v3231_v32 }
 0x975   : > { %v2259_v43 = vpop.permute.xlu1 %2258 }
 0x976   : > { %v2264_v44 = vsel %vm1459_vm1, %v2259_v43, 0  ;;  %2471 = vmatpush.bf16.msrb.mxu2 %v3226_v9  ;;  %v3229_v43 = vld [vmem:[#allocation17] sm:$0xff] }
 0x977   : > { %2273 = vmatpush.bf16.msra.mxu0 %v2264_v44  ;;  %2541 = vmatpush.bf16.msra.mxu3 %v3230_v42 }
 0x97a   : > { %3058 = vmatmul.msk.bf16.vlgmr.msra.gmra.mxu0 %vm1424_vm0, %v2257_v45  ;;  %2472 = vmatpush.bf16.msrb.mxu2 %v3225_v10 }
 0x97b   : > { %2542 = vmatpush.bf16.msra.mxu3 %v3229_v43 }
 0x97e   : > { %2473 = vmatpush.bf16.msrb.mxu2 %v3224_v11 }
 0x982   : > { %2474 = vmatpush.bf16.msrb.mxu2 %v3223_v12 }
 0x986   : > { %2475 = vmatpush.bf16.msrb.mxu2 %v3222_v14 }
 0x98a   : > { %2476 = vmatpush.bf16.msrb.mxu2 %v3221_v15 }
 0x9de   : > { %v2153_v46 = vpop.f32.mrf.mxu0 }
 0x9df   : > { %2158 = vrot.lane.b32.xlu0 %v2153_v46, %s3819_s26  ;;  %s4354_s26 = sld [smem:[#allocation39_spill]] }
 0x9e5   : > { %v3398_v44 = vld [vmem:[%s4354_s26] ss:$0 sm:$0xff] }
 0x9e6   : > { %v2155_v47 = vpop.f32.mrf.mxu0 }
 0x9f0   : > { %v2214_v48 = vpop.f32.mrf.mxu2 }
 0x9f1   : > { %2219 = vrot.lane.b32.xlu2 %v2214_v48, %s3820_s11  ;;  %s1136_s11 = scalar_lea.vmem %s3980_s9, %s4181_s18 }
 0x9f7   : > { %v2275_v49 = vpop.f32.mrf.mxu0 }
 0x9f8   : > { %v2216_v50 = vpop.f32.mrf.mxu2  ;;  %2280 = vrot.lane.b32.xlu0 %v2275_v49, %s3821_s2 }
 0x9f9   : > { %v3399_v50 = vld [vmem:[%s3965_s20] ss:$0 sm:$0xff] }
 0x9ff   : > { %v2277_v51 = vpop.f32.mrf.mxu0 }
 0xa4b   : > { %v2220_v60 = vpop.permute.xlu2 %2219 }
 0xa51   : > { %v2159_v59 = vpop.permute.xlu0 %2158 }
 0xa52   : > { %2161 = vst.msk [vmem:[#allocation2] sm:$0xff] %vm1546_vm3, %v2159_v59 }
 0xa53   : > { %2222 = vst.msk [vmem:[#allocation2] sm:$0xff] %vm1608_vm4, %v2220_v60 }
 0xa6a   : > { %v2281_v61 = vpop.permute.xlu0 %2280 }
 0xa6b   : > { %2283 = vst.msk [vmem:[#allocation2] sm:$0xff] %vm1670_vm5, %v2281_v61 }
 0xa72   : > { %v2284_v62 = vld [vmem:[#allocation2] sm:$0xff] }
 0xa73   : > { %v2285_v63 = vpack.c.bf16 %v2284_v62, %v2284_v62 }
 0xa75   : > { %2345 = vmatmul.bf16.vlgmr.msrb.gmra.mxu1 %v2285_v63 }
 0xaf2   : > { %v2346_v2 = vpop.f32.mrf.mxu1 }
 0xaf3   : > { %v2347_v3 = vadd.f32 %v3395_v0, %v2346_v2 }
 0xaf5   : > { %v2350_v4 = vadd.f32 %v2347_v3, %v4249_v1 }
 0xaf7   : > { %2351 = vadd.xlane.f32.xlu0 %v2350_v4  ;;  %v2354_v5 = vmul.f32 %v2350_v4, %v2350_v4 }
 0xaf9   : > { %2355 = vadd.xlane.f32.xlu1 %v2354_v5 }
 0xafa   : > { %v2348_v6 = vpop.f32.mrf.mxu1 }
 0xafb   : > { %v3400_v6 = vld [vmem:[%s3970_s24] ss:$0 sm:$0xff] }
 0xb6a   : > { %v2352_v1 = vpop.xlane.xlu0 %2351 }
 0xb6b   : > { %v2353_v16 = vmul.f32 0.03125, %v2352_v1 }
 0xb6c   : > { %v2356_v17 = vpop.xlane.xlu1 %2355 }
 0xb6d   : > { %v2358_v18 = vmul.f32 %v2353_v16, %v2353_v16  ;;  %v2357_v19 = vmul.f32 0.03125, %v2356_v17  ;;  %v2360_v34 = vsub.f32 %v2350_v4, %v2353_v16 }
 0xb6f   : > { %v2359_v21 = vsub.f32 %v2357_v19, %v2358_v18 }
 0xb71   : > { %v2361_v24 = vadd.f32 1e-05, %v2359_v21 }
 0xb73   : > { %3436 = vrsqrt.f32 %v2361_v24  ;;  %vm2368_vm10 = vweird.f32 %v2361_v24 }
 0xb79   : > { %v3437_v27 = vpop.eup %3436 }
 0xb7a   : > { %v2363_v28 = vmul.f32 %v3437_v27, %v2361_v24  ;;  %vm2369_vm9 = vweird.f32 %v3437_v27 }
 0xb7b   : > { %vm2370_vm11 = vmor %vm2368_vm10, %vm2369_vm9 }
 0xb7c   : > { %v2364_v30 = vmul.f32 %v3437_v27, %v2363_v28 }
 0xb7e   : > { %v2365_v31 = vmul.f32 0.5, %v2364_v30 }
 0xb80   : > { %v2366_v13 = vsub.f32 1.5, %v2365_v31 }
 0xb82   : > { %v2367_v33 = vmul.f32 %v3437_v27, %v2366_v13 }
 0xb84   : > { %v2371_v36 = vsel %vm2370_vm11, %v3437_v27, %v2367_v33 }
 0xb85   : > { %v2372_v37 = vmul.f32 %v2371_v36, %v2360_v34 }
 0xb87   : > { %v2376_v39 = vmul.f32 %v3396_v35, %v2372_v37 }
 0xb89   : > { %v2380_v40 = vadd.f32 %v3397_v38, %v2376_v39 }
 0xb8b   : > { %v2417_v22 = vpack.c.bf16 %v2380_v40, %v2380_v40 }
 0xb8d   : > { %2477 = vmatmul.bf16.vlgmr.msrb.gmra.mxu2 %v2417_v22 }
 0xc10   : > { %v2478_v45 = vpop.f32.mrf.mxu2 }
 0xc11   : > { %v2479_v46 = vadd.f32 %v3398_v44, %v2478_v45 }
 0xc13   : > { %v2482_v47 = vmax.f32 %v2479_v46, 0.0 }
 0xc15   : > { %v2483_v48 = vpack.c.bf16 %v2482_v47, %v2482_v47 }
 0xc17   : > { %2543 = vmatmul.bf16.vlgmr.msra.gmra.mxu3 %v2483_v48 }
 0xc18   : > { %v2480_v49 = vpop.f32.mrf.mxu2 }
 0xc9a   : > { %v2544_v51 = vpop.f32.mrf.mxu3 }
 0xc9b   : > { %v2545_v52 = vadd.f32 %v3399_v50, %v2544_v51 }
 0xc9d   : > { %v2548_v53 = vadd.f32 %v2545_v52, %v2380_v40 }
 0xc9f   : > { %2549 = vadd.xlane.f32.xlu2 %v2548_v53  ;;  %v2552_v54 = vmul.f32 %v2548_v53, %v2548_v53 }
 0xca1   : > { %2553 = vadd.xlane.f32.xlu0 %v2552_v54 }
 0xca2   : > { %v2546_v55 = vpop.f32.mrf.mxu3 }
 0xd12   : > { %v2550_v56 = vpop.xlane.xlu2 %2549 }
 0xd13   : > { %v2551_v57 = vmul.f32 0.03125, %v2550_v56 }
 0xd14   : > { %v2554_v58 = vpop.xlane.xlu0 %2553 }
 0xd15   : > { %v2556_v41 = vmul.f32 %v2551_v57, %v2551_v57  ;;  %v2555_v59 = vmul.f32 0.03125, %v2554_v58  ;;  %v2558_v5 = vsub.f32 %v2548_v53, %v2551_v57 }
 0xd17   : > { %v2557_v60 = vsub.f32 %v2555_v59, %v2556_v41 }
 0xd19   : > { %v2559_v61 = vadd.f32 1e-05, %v2557_v60 }
 0xd1b   : > { %3438 = vrsqrt.f32 %v2559_v61  ;;  %vm2566_vm13 = vweird.f32 %v2559_v61 }
 0xd21   : > { %v3439_v62 = vpop.eup %3438 }
 0xd22   : > { %v2561_v63 = vmul.f32 %v3439_v62, %v2559_v61  ;;  %vm2567_vm12 = vweird.f32 %v3439_v62 }
 0xd23   : > { %vm2568_vm14 = vmor %vm2566_vm13, %vm2567_vm12 }
 0xd24   : > { %v2562_v0 = vmul.f32 %v3439_v62, %v2561_v63 }
 0xd26   : > { %v2563_v2 = vmul.f32 0.5, %v2562_v0 }
 0xd28   : > { %v2564_v3 = vsub.f32 1.5, %v2563_v2 }
 0xd2a   : > { %v2565_v4 = vmul.f32 %v3439_v62, %v2564_v3 }
 0xd2c   : > { %v2569_v7 = vsel %vm2568_vm14, %v3439_v62, %v2565_v4 }
 0xd2d   : > { %v2570_v9 = vmul.f32 %v2569_v7, %v2558_v5 }
 0xd2f   : > { %v2574_v10 = vmul.f32 %v3400_v6, %v2570_v9 }
 0xd31   : > { %v2578_v11 = vadd.f32 %v3401_v8, %v2574_v10 }
 0xd33   : > { %2579 = vst [vmem:[%s1136_s11] sm:$0xff] %v2578_v11 }
 0xd34 PF: > { %s4355_s2 = sld [smem:[#allocation40_spill]] }
 0xd3a   : > { %s77_s15 = sadd.s32 1, %s4355_s2  }
 0xd3b   : > { %p74_p2 = scmp.ge.s32.totalorder %s77_s15, 4  }
 0xd3d   :  { %76 = sbr.rel (!%p74_p2) target bundleno = 55 (0x37), region = 250 }
 0xd42   :  { %2599 = vsyncpa [#allocation4], 1 }
 0xd43   :  { %2601 = vsyncpa [#allocation4 + $0x1], 1 }
 0xd44   :  { %2602 = vsyncpa [#allocation6], 1 }
 0xd45   :  { %2603 = vsyncpa [#allocation9], 1 }
 0xd46   :  { %2604 = vsyncpa [#allocation12], 1 }
 0xd47   :  { %2605 = vsyncpa [#allocation15], 1 }
 0xd48   :  { %2606 = vsyncpa [#allocation18], 1 }

// kernel: transformer_forward.8
= control target key start
LH: loop header
LB: loop body
LE: loop exit
PB: predicated region body
PF: predicated region fallthrough
CT: control target
= control target key end

     0   :  { %s3908_s6 = smov 1   ;;  %s3909_s10 = smov 2   ;;  %s4474_s0 = inlined_call_operand.smem [shape: u32[31], index: -1, kind: input, shape index: {}] }
   0x1   :  { %s3968_s5 = sld [smem:[%s4474_s0]]   ;;  %s3910_s14 = smov 3  }
   0x2   :  { %s3973_s9 = sld [smem:[%s4474_s0 + %s3908_s6]]   ;;  %s3911_s18 = smov 4  }
   0x3   :  { %s3978_s13 = sld [smem:[%s4474_s0 + %s3909_s10]]   ;;  %s3912_s22 = smov 5  }
   0x4   :  { %s3983_s17 = sld [smem:[%s4474_s0 + %s3910_s14]]   ;;  %s3913_s26 = smov 6  }
   0x5   :  { %s3988_s21 = sld [smem:[%s4474_s0 + %s3911_s18]]   ;;  %s3914_s30 = smov 7  }
   0x6   :  { %s3993_s25 = sld [smem:[%s4474_s0 + %s3912_s22]]   ;;  %s3915_s4 = smov 8  }
   0x7   :  { %s3998_s29 = sld [smem:[%s4474_s0 + %s3913_s26]]   ;;  %s3916_s10 = smov 9  }
   0x8   :  { %4479 = sst [smem:[#allocation29_spill]] %s3973_s9  ;;  %s3917_s15 = smov 10  }
   0x9   :  { %4480 = sst [smem:[#allocation30_spill]] %s3978_s13  ;;  %s3918_s20 = smov 11  }
   0xa   :  { %4481 = sst [smem:[#allocation31_spill]] %s3983_s17  ;;  %s3919_s26 = smov 12  }
   0xb   :  { %s4003_s3 = sld [smem:[%s4474_s0 + %s3914_s30]]   ;;  %s3920_s1 = smov 13  }
   0xc   :  { %s4008_s8 = sld [smem:[%s4474_s0 + %s3915_s4]]   ;;  %s3921_s7 = smov 14  }
   0xd   :  { %4482 = sst [smem:[#allocation32_spill]] %s3998_s29  ;;  %s3923_s22 = smov 16  }
   0xe   :  { %s4013_s14 = sld [smem:[%s4474_s0 + %s3916_s10]]   ;;  %s3924_s28 = smov 17  }
   0xf   :  { %s4018_s19 = sld [smem:[%s4474_s0 + %s3917_s15]]   ;;  %s3922_s15 = smov 15  }
  0x10   :  { %s4023_s24 = sld [smem:[%s4474_s0 + %s3918_s20]]  }
  0x11   :  { %s4028_s30 = sld [smem:[%s4474_s0 + %s3919_s26]]  }
  0x12   :  { %s4033_s6 = sld [smem:[%s4474_s0 + %s3920_s1]]  }
  0x13   :  { %s4038_s12 = sld [smem:[%s4474_s0 + %s3921_s7]]   ;;  %s3925_s7 = smov 18  }
  0x14   :  { %s4043_s20 = sld [smem:[%s4474_s0 + %s3922_s15]]   ;;  %s3926_s15 = smov 19  }
  0x15   :  { %4483 = sst [smem:[#allocation33_spill]] %s4018_s19 }
  0x16   :  { %4484 = sst [smem:[#allocation34_spill]] %s4023_s24 }
  0x17   :  { %4485 = sst [smem:[#allocation35_spill]] %s4028_s30 }
  0x18   :  { %4486 = sst [smem:[#allocation36_spill]] %s4033_s6 }
  0x19   :  { %s4048_s27 = sld [smem:[%s4474_s0 + %s3923_s22]]   ;;  %s3927_s22 = smov 20  }
  0x1a   :  { %4487 = sst [smem:[#allocation37_spill]] %s4043_s20 }
  0x1b   :  { %s4053_s4 = sld [smem:[%s4474_s0 + %s3924_s28]]   ;;  %s3928_s28 = smov 21  }
  0x1c   :  { %s4058_s17 = sld [smem:[%s4474_s0 + %s3925_s7]]   ;;  %s3929_s7 = smov 22  }
  0x1d   :  { %s4063_s20 = sld [smem:[%s4474_s0 + %s3926_s15]]   ;;  %s3930_s15 = smov 23  }
  0x1e   :  { %s4068_s6 = sld [smem:[%s4474_s0 + %s3927_s22]]   ;;  %s3931_s22 = smov 24  }
  0x1f   :  { %s4078_s30 = sld [smem:[%s4474_s0 + %s3929_s7]]   ;;  %s3933_s7 = smov 26  }
  0x20   :  { %s4088_s13 = sld [smem:[%s4474_s0 + %s3931_s22]]   ;;  %s3935_s22 = smov 28  }
  0x21   :  { %4488 = sst [smem:[#allocation38_spill]] %s4053_s4 }
  0x22   :  { %s4073_s4 = sld [smem:[%s4474_s0 + %s3928_s28]]   ;;  %s3932_s28 = smov 25  }
  0x23   :  { %4489 = sst [smem:[#allocation39_spill]] %s4063_s20 }
  0x24   :  { %s4083_s20 = sld [smem:[%s4474_s0 + %s3930_s15]]   ;;  %s3934_s15 = smov 27  }
  0x25   :  { %4491 = sst [smem:[#allocation41_spill]] %s4078_s30 }
  0x26   :  { %s4098_s30 = sld [smem:[%s4474_s0 + %s3933_s7]]   ;;  %s3937_s7 = smov 30  }
  0x27   :  { %s4108_s24 = sld [smem:[%s4474_s0 + %s3935_s22]]  }
  0x28   :  { %4490 = sst [smem:[#allocation40_spill]] %s4073_s4 }
  0x29   :  { %s4093_s4 = sld [smem:[%s4474_s0 + %s3932_s28]]   ;;  %s3936_s28 = smov 29  }
  0x2a   :  { %4492 = sst [smem:[#allocation42_spill]] %s4083_s20 }
  0x2b   :  { %s4103_s20 = sld [smem:[%s4474_s0 + %s3934_s15]]  }
  0x2c   :  { %s4118_s9 = sld [smem:[%s4474_s0 + %s3937_s7]]  }
  0x2f   :  { %4493 = sst [smem:[#allocation43_spill]] %s4093_s4 }
  0x30   :  { %s4113_s4 = sld [smem:[%s4474_s0 + %s3936_s28]]  }
  0x31   :  { %66 = vsyncpa [#allocation4], 0 }
  0x32   :  { %67 = vsyncpa [#allocation6], 0 }
  0x33   :  { %68 = vsyncpa [#allocation9], 0 }
  0x34   :  { %69 = vsyncpa [#allocation12], 0 }
  0x35   :  { %70 = vsyncpa [#allocation15], 0 }
  0x36   :  { %71 = vsyncpa [#allocation18], 0 }
  0x37   :  { %72 = vsyncpa [#allocation21], 0  ;;  %s4120_s15 = smov 0  }
  0x38 LB: > { %s4494_s29 = sld [smem:[#allocation32_spill]]  ;;  %s4126_s0 = sadd.s32 4294967295, %s3906_s15   ;;  %s3906_s15 = sphi %s4120_s15, %s78_s15  }
  0x39   : > { %s4495_s19 = sld [smem:[#allocation33_spill]]  ;;  %p2841_p0 = scmp.ge.s32.totalorder %s3906_s15, 1 }
  0x3a   : > { %4496 = sst [smem:[#allocation44_spill]] %s3906_s15  ;;  %p759_p1 = scmp.lt.s32.totalorder %s3906_s15, 3 }
  0x3b   : > { %p3374_p2 = scmp.eq.s32.totalorder %s4126_s0, 0  ;;  %s3938_s23 = smov [#allocation5]  }
  0x3c   : > { %p4132_p3 = pnand %p2841_p0, %p759_p1  ;;  %s789_s26 = sshll.u32 %s3938_s23, 4  ;;  %s790_s26 = int_to_ptr.vmem [resolvable:$true] %s789_s26 }
  0x3d   : > { %s3939_s1 = smov [#allocation8]  }
  0x3e   : > { %s787_s16 = sshll.u32 %s4494_s29, 4  ;;  %p3337_p4 = pneg %p4132_p3  ;;  %s4136_s16 = int_to_ptr.hbm [resolvable:$true] %s787_s16 }
  0x3f   : > { %s821_s22 = sshll.u32 %s4495_s19, 4  ;;  %s4149_s2 = sshll.u32 %s3939_s1, 4  ;;  %s4141_s22 = int_to_ptr.hbm [resolvable:$true] %s821_s22 }
  0x40   : > { %p4145_p5 = pnand %p3374_p2, %p3337_p4  ;;  %4499 = sst [smem:[#allocation45_spill]] %s4149_s2 }
  0x41   : > { %s3512_s10 = sshra.s32 %s4136_s16, 4  ;;  %s3519_s15 = scalar_lea.hbm %s4494_s29, 64  ;;  %s3513_s10 = int_to_ptr.hbm [resolvable:$true] %s3512_s10 }
  0x42   : > { %s3514_s11 = scalar_lea.hbm %s3513_s10, 64  ;;  %p4156_p7 = pneg %p4145_p5 }
  0x43   : > { %p3515_p6 = scmp.ne.s32.totalorder %s3513_s10, %s3514_s11  ;;  %p3520_p10 = scmp.lt.s32.totalorder %s3513_s10, %s4494_s29 }
  0x44   : > { %p3521_p11 = scmp.lt.s32.totalorder %s3519_s15, %s3514_s11 }
  0x45   : > { %p3517_p8 = pnand %p4156_p7, %p3515_p6 }
  0x46   : > { %p3522_p12 = por %p3521_p11, %p3520_p10 }
  0x47   : > { %p3518_p9 = pneg %p3517_p8 }
  0x49   : > { %p3523_p13 = pnand %p3522_p12, %p3518_p9 }
  0x4b   : > { %3526 = shalt.err (!%p3523_p13)
}
  0x4c   : > { %s3940_s1 = smov 64   ;;  %s3941_s7 = smov 4  }
  0x4d   : > { %3343 = dma.hbm_to_vmem [thread:$0]  (!%p4145_p5), %s4136_s16, 1024, %s790_s26, [#allocation6], %s3940_s1, %s3940_s1, %s3941_s7  }
  0x4e   : > { %s3542_s2 = sshra.s32 %s4141_s22, 4  ;;  %s3549_s15 = scalar_lea.hbm %s4495_s19, 64  ;;  %s3543_s2 = int_to_ptr.hbm [resolvable:$true] %s3542_s2 }
  0x4f   : > { %s3544_s10 = scalar_lea.hbm %s3543_s2, 64  ;;  %p3550_p6 = scmp.lt.s32.totalorder %s3543_s2, %s4495_s19 }
  0x50   : > { %p3545_p0 = scmp.ne.s32.totalorder %s3543_s2, %s3544_s10  ;;  %p3551_p8 = scmp.lt.s32.totalorder %s3549_s15, %s3544_s10 }
  0x52   : > { %p3547_p1 = pnand %p3545_p0, %p4156_p7  ;;  %p3552_p9 = por %p3551_p8, %p3550_p6 }
  0x54   : > { %p3548_p4 = pneg %p3547_p1 }
  0x56   : > { %p3553_p10 = pnand %p3552_p9, %p3548_p4 }
  0x58   : > { %3556 = shalt.err (!%p3553_p10)
}
  0x59   : > { %s4501_s11 = sld [smem:[#allocation45_spill]]  ;;  %s4503_s26 = sshll.u32 %s4048_s27, 4  ;;  %s862_s26 = int_to_ptr.hbm [resolvable:$true] %s4503_s26 }
  0x5a   : > { %s3942_s2 = smov [#allocation11]   ;;  %s895_s15 = sshll.u32 %s4068_s6, 4  ;;  %s4186_s15 = int_to_ptr.hbm [resolvable:$true] %s895_s15 }
  0x5b   : > { %s863_s10 = sshll.u32 %s3942_s2, 4  ;;  %s3572_s19 = sshra.s32 %s862_s26, 4  ;;  %s864_s10 = int_to_ptr.vmem [resolvable:$true] %s863_s10  ;;  %s3573_s19 = int_to_ptr.hbm [resolvable:$true] %s3572_s19 }
  0x5c   : > { %s3574_s29 = scalar_lea.hbm %s3573_s19, 64  ;;  %p3580_p0 = scmp.lt.s32.totalorder %s3573_s19, %s4048_s27 }
  0x5d   : > { %p3575_p11 = scmp.ne.s32.totalorder %s3573_s19, %s3574_s29 }
  0x5f   : > { %s4502_s16 = int_to_ptr.vmem [resolvable:$true] %s4501_s11  ;;  %p3577_p12 = pnand %p3575_p11, %p4156_p7 }
  0x60   : > { %3349 = dma.hbm_to_vmem [thread:$0]  (!%p4145_p5), %s4141_s22, 1024, %s4502_s16, [#allocation9], %s3940_s1, %s3940_s1, %s3941_s7  }
  0x61   : > { %p3578_p13 = pneg %p3577_p12  ;;  %s3579_s11 = scalar_lea.hbm %s4048_s27, 64 }
  0x62   : > { %p3581_p1 = scmp.lt.s32.totalorder %s3579_s11, %s3574_s29 }
  0x64   : > { %p3582_p4 = por %p3581_p1, %p3580_p0 }
  0x66   : > { %p3583_p6 = pnand %p3582_p4, %p3578_p13 }
  0x68   : > { %3586 = shalt.err (!%p3583_p6)
}
  0x69   : > { %3355 = dma.hbm_to_vmem [thread:$0]  (!%p4145_p5), %s862_s26, 1024, %s864_s10, [#allocation12], %s3940_s1, %s3940_s1, %s3941_s7  }
  0x6a   : > { %s935_s22 = sshll.u32 %s4098_s30, 4  ;;  %s3943_s16 = smov [#allocation14]   ;;  %s4198_s22 = int_to_ptr.hbm [resolvable:$true] %s935_s22 }
  0x6b   : > { %s897_s2 = sshll.u32 %s3943_s16, 4  ;;  %s3602_s29 = sshra.s32 %s4186_s15, 4  ;;  %s898_s2 = int_to_ptr.vmem [resolvable:$true] %s897_s2  ;;  %s3603_s29 = int_to_ptr.hbm [resolvable:$true] %s3602_s29 }
  0x6c   : > { %s3604_s19 = scalar_lea.hbm %s3603_s29, 64  ;;  %s3609_s11 = scalar_lea.hbm %s4068_s6, 64 }
  0x6d   : > { %p3605_p8 = scmp.ne.s32.totalorder %s3603_s29, %s3604_s19  ;;  %p3610_p11 = scmp.lt.s32.totalorder %s3603_s29, %s4068_s6 }
  0x6e   : > { %p3611_p12 = scmp.lt.s32.totalorder %s3609_s11, %s3604_s19 }
  0x6f   : > { %p3607_p9 = pnand %p3605_p8, %p4156_p7 }
  0x70   : > { %p3612_p13 = por %p3611_p12, %p3610_p11 }
  0x71   : > { %p3608_p10 = pneg %p3607_p9 }
  0x73   : > { %p3613_p0 = pnand %p3612_p13, %p3608_p10 }
  0x75   : > { %3616 = shalt.err (!%p3613_p0)
}
  0x76   : > { %3361 = dma.hbm_to_vmem [thread:$0]  (!%p4145_p5), %s4186_s15, 1024, %s898_s2, [#allocation15], %s3940_s1, %s3940_s1, %s3941_s7  }
  0x77   : > { %s3944_s26 = smov [#allocation17]   ;;  %s770_s16 = sshll.u32 %s3988_s21, 4  ;;  %s4212_s16 = int_to_ptr.hbm [resolvable:$true] %s770_s16 }
  0x78   : > { %s937_s10 = sshll.u32 %s3944_s26, 4  ;;  %s3632_s29 = sshra.s32 %s4198_s22, 4  ;;  %s938_s10 = int_to_ptr.vmem [resolvable:$true] %s937_s10  ;;  %s3633_s29 = int_to_ptr.hbm [resolvable:$true] %s3632_s29 }
  0x79   : > { %s3634_s19 = scalar_lea.hbm %s3633_s29, 64  ;;  %s3639_s11 = scalar_lea.hbm %s4098_s30, 64 }
  0x7a   : > { %p3635_p1 = scmp.ne.s32.totalorder %s3633_s29, %s3634_s19  ;;  %p3640_p8 = scmp.lt.s32.totalorder %s3633_s29, %s4098_s30 }
  0x7b   : > { %p3641_p9 = scmp.lt.s32.totalorder %s3639_s11, %s3634_s19 }
  0x7c   : > { %p3637_p4 = pnand %p3635_p1, %p4156_p7 }
  0x7d   : > { %p3642_p10 = por %p3641_p9, %p3640_p8 }
  0x7e   : > { %p3638_p6 = pneg %p3637_p4 }
  0x80   : > { %p3643_p11 = pnand %p3642_p10, %p3638_p6 }
  0x82   : > { %3646 = shalt.err (!%p3643_p11)
}
  0x83   : > { %3367 = dma.hbm_to_vmem [thread:$0]  (!%p4145_p5), %s4198_s22, 1024, %s938_s10, [#allocation18], %s3940_s1, %s3940_s1, %s3941_s7  }
  0x84   : > { %s804_s15 = sshll.u32 %s4008_s8, 4  ;;  %s3945_s2 = smov [#allocation3]   ;;  %s4226_s15 = int_to_ptr.hbm [resolvable:$true] %s804_s15 }
  0x85   : > { %s772_s26 = sshll.u32 %s3945_s2, 4  ;;  %s3662_s29 = sshra.s32 %s4212_s16, 4  ;;  %s773_s26 = int_to_ptr.vmem [resolvable:$true] %s772_s26  ;;  %s3663_s29 = int_to_ptr.hbm [resolvable:$true] %s3662_s29 }
  0x86   : > { %s3664_s19 = scalar_lea.hbm %s3663_s29, 64  ;;  %s3669_s11 = scalar_lea.hbm %s3988_s21, 64 }
  0x87   : > { %p3665_p12 = scmp.ne.s32.totalorder %s3663_s29, %s3664_s19  ;;  %p3670_p1 = scmp.lt.s32.totalorder %s3663_s29, %s3988_s21 }
  0x88   : > { %p3671_p4 = scmp.lt.s32.totalorder %s3669_s11, %s3664_s19 }
  0x89   : > { %p3667_p13 = pnand %p3665_p12, %p4156_p7 }
  0x8a   : > { %p3672_p6 = por %p3671_p4, %p3670_p1 }
  0x8b   : > { %p3668_p0 = pneg %p3667_p13 }
  0x8d   : > { %p3673_p8 = pnand %p3672_p6, %p3668_p0 }
  0x8f   : > { %3676 = shalt.err (!%p3673_p8)
}
  0x90   : > { %3340 = dma.hbm_to_vmem [thread:$0]  (!%p4145_p5), %s4212_s16, 1024, %s773_s26, [#allocation4], %s3940_s1, %s3940_s1, %s3941_s7  }
  0x91   : > { %s3946_s22 = smov [#allocation7]   ;;  %s844_s2 = sshll.u32 %s4038_s12, 4  ;;  %s4240_s2 = int_to_ptr.hbm [resolvable:$true] %s844_s2 }
  0x92   : > { %s806_s10 = sshll.u32 %s3946_s22, 4  ;;  %s3692_s29 = sshra.s32 %s4226_s15, 4  ;;  %s807_s10 = int_to_ptr.vmem [resolvable:$true] %s806_s10  ;;  %s3693_s29 = int_to_ptr.hbm [resolvable:$true] %s3692_s29 }
  0x93   : > { %s3694_s19 = scalar_lea.hbm %s3693_s29, 64  ;;  %s3699_s11 = scalar_lea.hbm %s4008_s8, 64 }
  0x94   : > { %p3695_p9 = scmp.ne.s32.totalorder %s3693_s29, %s3694_s19  ;;  %p3700_p12 = scmp.lt.s32.totalorder %s3693_s29, %s4008_s8 }
  0x95   : > { %p3701_p13 = scmp.lt.s32.totalorder %s3699_s11, %s3694_s19 }
  0x96   : > { %p3697_p10 = pnand %p3695_p9, %p4156_p7 }
  0x97   : > { %p3702_p0 = por %p3701_p13, %p3700_p12 }
  0x98   : > { %p3698_p11 = pneg %p3697_p10 }
  0x9a   : > { %p3703_p1 = pnand %p3702_p0, %p3698_p11 }
  0x9c   : > { %3706 = shalt.err (!%p3703_p1)
}
  0x9d   : > { %3346 = dma.hbm_to_vmem [thread:$0]  (!%p4145_p5), %s4226_s15, 1024, %s807_s10, [#allocation6], %s3940_s1, %s3940_s1, %s3941_s7  }
  0x9e   : > { %s878_s16 = sshll.u32 %s4058_s17, 4  ;;  %s3947_s26 = smov [#allocation10]   ;;  %s4254_s16 = int_to_ptr.hbm [resolvable:$true] %s878_s16 }
  0x9f   : > { %s846_s22 = sshll.u32 %s3947_s26, 4  ;;  %s3722_s29 = sshra.s32 %s4240_s2, 4  ;;  %s847_s22 = int_to_ptr.vmem [resolvable:$true] %s846_s22  ;;  %s3723_s29 = int_to_ptr.hbm [resolvable:$true] %s3722_s29 }
  0xa0   : > { %s3724_s19 = scalar_lea.hbm %s3723_s29, 64  ;;  %s3729_s11 = scalar_lea.hbm %s4038_s12, 64 }
  0xa1   : > { %p3725_p4 = scmp.ne.s32.totalorder %s3723_s29, %s3724_s19  ;;  %p3730_p9 = scmp.lt.s32.totalorder %s3723_s29, %s4038_s12 }
  0xa2   : > { %p3731_p10 = scmp.lt.s32.totalorder %s3729_s11, %s3724_s19 }
  0xa3   : > { %p3727_p6 = pnand %p3725_p4, %p4156_p7 }
  0xa4   : > { %p3732_p11 = por %p3731_p10, %p3730_p9 }
  0xa5   : > { %p3728_p8 = pneg %p3727_p6 }
  0xa7   : > { %p3733_p12 = pnand %p3732_p11, %p3728_p8 }
  0xa9   : > { %3736 = shalt.err (!%p3733_p12)
}
  0xaa   : > { %3352 = dma.hbm_to_vmem [thread:$0]  (!%p4145_p5), %s4240_s2, 1024, %s847_s22, [#allocation9], %s3940_s1, %s3940_s1, %s3941_s7  }
  0xab   : > { %s3948_s15 = smov [#allocation13]   ;;  %s918_s26 = sshll.u32 %s4088_s13, 4  ;;  %s4268_s26 = int_to_ptr.hbm [resolvable:$true] %s918_s26 }
  0xac   : > { %s880_s10 = sshll.u32 %s3948_s15, 4  ;;  %s3752_s29 = sshra.s32 %s4254_s16, 4  ;;  %s881_s10 = int_to_ptr.vmem [resolvable:$true] %s880_s10  ;;  %s3753_s29 = int_to_ptr.hbm [resolvable:$true] %s3752_s29 }
  0xad   : > { %s3754_s19 = scalar_lea.hbm %s3753_s29, 64  ;;  %s3759_s11 = scalar_lea.hbm %s4058_s17, 64 }
  0xae   : > { %p3755_p13 = scmp.ne.s32.totalorder %s3753_s29, %s3754_s19  ;;  %p3760_p4 = scmp.lt.s32.totalorder %s3753_s29, %s4058_s17 }
  0xaf   : > { %p3761_p6 = scmp.lt.s32.totalorder %s3759_s11, %s3754_s19 }
  0xb0   : > { %p3757_p0 = pnand %p3755_p13, %p4156_p7 }
  0xb1   : > { %p3762_p8 = por %p3761_p6, %p3760_p4 }
  0xb2   : > { %p3758_p1 = pneg %p3757_p0 }
  0xb4   : > { %p3763_p9 = pnand %p3762_p8, %p3758_p1 }
  0xb6   : > { %3766 = shalt.err (!%p3763_p9)
}
  0xb7   : > { %3358 = dma.hbm_to_vmem [thread:$0]  (!%p4145_p5), %s4254_s16, 1024, %s881_s10, [#allocation12], %s3940_s1, %s3940_s1, %s3941_s7  }
  0xb8   : > { %s953_s2 = sshll.u32 %s4108_s24, 4  ;;  %s3949_s22 = smov [#allocation16]   ;;  %s4282_s2 = int_to_ptr.hbm [resolvable:$true] %s953_s2 }
  0xb9   : > { %s920_s15 = sshll.u32 %s3949_s22, 4  ;;  %s3782_s29 = sshra.s32 %s4268_s26, 4  ;;  %s921_s15 = int_to_ptr.vmem [resolvable:$true] %s920_s15  ;;  %s3783_s29 = int_to_ptr.hbm [resolvable:$true] %s3782_s29 }
  0xba   : > { %s3784_s19 = scalar_lea.hbm %s3783_s29, 64  ;;  %s3789_s11 = scalar_lea.hbm %s4088_s13, 64 }
  0xbb   : > { %p3785_p10 = scmp.ne.s32.totalorder %s3783_s29, %s3784_s19  ;;  %p3790_p13 = scmp.lt.s32.totalorder %s3783_s29, %s4088_s13 }
  0xbc   : > { %p3791_p0 = scmp.lt.s32.totalorder %s3789_s11, %s3784_s19 }
  0xbd   : > { %p3787_p11 = pnand %p3785_p10, %p4156_p7 }
  0xbe   : > { %p3792_p1 = por %p3791_p0, %p3790_p13 }
  0xbf   : > { %p3788_p12 = pneg %p3787_p11 }
  0xc1   : > { %p3793_p4 = pnand %p3792_p1, %p3788_p12 }
  0xc3   : > { %3796 = shalt.err (!%p3793_p4)
}
  0xc4   : > { %3364 = dma.hbm_to_vmem [thread:$0]  (!%p4145_p5), %s4268_s26, 1024, %s921_s15, [#allocation15], %s3940_s1, %s3940_s1, %s3941_s7  }
  0xc5   : > { %s3950_s16 = smov [#allocation19]   ;;  %s965_s22 = sshll.u32 %s4113_s4, 4  ;;  %s966_s22 = int_to_ptr.hbm [resolvable:$true] %s965_s22 }
  0xc6   : > { %s955_s10 = sshll.u32 %s3950_s16, 4  ;;  %s3812_s29 = sshra.s32 %s4282_s2, 4  ;;  %s956_s10 = int_to_ptr.vmem [resolvable:$true] %s955_s10  ;;  %s3813_s29 = int_to_ptr.hbm [resolvable:$true] %s3812_s29 }
  0xc7   : > { %s3814_s19 = scalar_lea.hbm %s3813_s29, 1  ;;  %s3819_s11 = scalar_lea.hbm %s4108_s24, 1 }
  0xc8   : > { %p3815_p6 = scmp.ne.s32.totalorder %s3813_s29, %s3814_s19  ;;  %p3820_p10 = scmp.lt.s32.totalorder %s3813_s29, %s4108_s24 }
  0xc9   : > { %p3821_p11 = scmp.lt.s32.totalorder %s3819_s11, %s3814_s19 }
  0xca   : > { %p3817_p8 = pnand %p3815_p6, %p4156_p7 }
  0xcb   : > { %p3822_p12 = por %p3821_p11, %p3820_p10 }
  0xcc   : > { %p3818_p9 = pneg %p3817_p8 }
  0xce   : > { %p3823_p13 = pnand %p3822_p12, %p3818_p9 }
  0xd0   : > { %3826 = shalt.err (!%p3823_p13)
}
  0xd1   : > { %3370 = dma.hbm_to_vmem [thread:$0]  (!%p4145_p5), %s4282_s2, 16, %s956_s10, [#allocation18]  }
  0xd2   : > { %s3951_s7 = smov [#allocation20]   ;;  %s3842_s26 = sshra.s32 %s966_s22, 4  ;;  %s3843_s26 = int_to_ptr.hbm [resolvable:$true] %s3842_s26 }
  0xd3   : > { %s967_s1 = sshll.u32 %s3951_s7, 4  ;;  %s3844_s15 = scalar_lea.hbm %s3843_s26, 1  ;;  %s968_s1 = int_to_ptr.vmem [resolvable:$true] %s967_s1 }
  0xd4   : > { %p3845_p0 = scmp.ne.s32.totalorder %s3843_s26, %s3844_s15  ;;  %s3849_s16 = scalar_lea.hbm %s4113_s4, 1 }
  0xd5   : > { %p3850_p6 = scmp.lt.s32.totalorder %s3843_s26, %s4113_s4  ;;  %p3851_p8 = scmp.lt.s32.totalorder %s3849_s16, %s3844_s15 }
  0xd6   : > { %p3847_p1 = pnand %p3845_p0, %p4156_p7 }
  0xd7   : > { %p3852_p9 = por %p3851_p8, %p3850_p6 }
  0xd8   : > { %p3848_p4 = pneg %p3847_p1 }
  0xda   : > { %p3853_p10 = pnand %p3852_p9, %p3848_p4 }
  0xdc   : > { %3856 = shalt.err (!%p3853_p10)
}
  0xdd   : > { %3373 = dma.hbm_to_vmem [thread:$0]  (!%p4145_p5), %s966_s22, 16, %s968_s1, [#allocation21]  }
  0xde   : > { %1006 = sbr.rel (%p4132_p3) target bundleno = 3409 (0xd51), region = 140 }
  0xe3   : > { %3877 = dma.done.wait (%p3374_p2), [#allocation4], 1024  }
  0xe4   : > { %3879 = vsyncadd (%p3374_p2), [#allocation4], 4294966272 }
  0xe5   : > { %3881 = dma.done.wait (%p3374_p2), [#allocation6], 2048  }
  0xe6   : > { %3883 = vsyncadd (%p3374_p2), [#allocation6], 4294965248 }
  0xe7   : > { %3885 = dma.done.wait (%p3374_p2), [#allocation9], 2048  }
  0xe8   : > { %3887 = vsyncadd (%p3374_p2), [#allocation9], 4294965248 }
  0xe9   : > { %3889 = dma.done.wait (%p3374_p2), [#allocation12], 2048  }
  0xea   : > { %3891 = vsyncadd (%p3374_p2), [#allocation12], 4294965248 }
  0xeb   : > { %3893 = dma.done.wait (%p3374_p2), [#allocation15], 2048  }
  0xec   : > { %3895 = vsyncadd (%p3374_p2), [#allocation15], 4294965248 }
  0xed   : > { %3897 = dma.done.wait (%p3374_p2), [#allocation18], 1040  }
  0xee   : > { %3899 = vsyncadd (%p3374_p2), [#allocation18], 4294966256 }
  0xef   : > { %3901 = dma.done.wait (%p3374_p2), [#allocation21], 16  }
  0xf0   : > { %3903 = vsyncadd (%p3374_p2), [#allocation21], 4294967280  ;;  %v3216_v0 = vld [vmem:[#allocation3 + $0x38] sm:$0xff]  ;;  %v3215_v2 = vld [vmem:[#allocation3 + $0x30] sm:$0xff]  ;;  %p1148_p3 = scmp.lt.s32.totalorder %s4126_s0, 1  ;;  %vm1453_vm0 = vcmask 64512   ;;  %v1169_v51 = vlaneseq }
  0xf1   : > { %v3224_v1 = vld [vmem:[#allocation5 + $0x38] sm:$0xff]  ;;  %1307 = vmatpush.bf16.msra.mxu0 %v3216_v0  ;;  %v3223_v3 = vld [vmem:[#allocation5 + $0x30] sm:$0xff]  ;;  %v3214_v5 = vld [vmem:[#allocation3 + $0x28] sm:$0xff]  ;;  %s3952_s23 = smov 112   ;;  %s3953_s2 = smov 120   ;;  %vm1488_vm1 = vcmask 1043456  }
  0xf2   : > { %1372 = vmatpush.bf16.msra.mxu1 %v3224_v1  ;;  %v3232_v4 = vld [vmem:[#allocation7 + $0x38] sm:$0xff]  ;;  %v3222_v6 = vld [vmem:[#allocation5 + $0x28] sm:$0xff]  ;;  %v3231_v7 = vld [vmem:[#allocation7 + $0x30] sm:$0xff]  ;;  %s4519_s0 = smov (!%p1148_p3, %s4126_s0), 1  ;;  %s4504_s10 = sld [smem:[#allocation29_spill]]  ;;  %v1170_v55 = vshrl.u32 %v1169_v51, 7 }
  0xf3   : > { %1436 = vmatpush.bf16.msra.mxu2 %v3232_v4  ;;  %v3213_v8 = vld [vmem:[#allocation3 + $0x20] sm:$0xff]  ;;  %v3230_v10 = vld [vmem:[#allocation7 + $0x28] sm:$0xff]  ;;  %v3212_v11 = vld [vmem:[#allocation3 + $0x18] sm:$0xff]  ;;  %s4345_s18 = sshll.u32 %s4519_s0, 3  ;;  %s3954_s22 = smov 104   ;;  %v1172_v56 = vand.u32 127, %v1169_v51 }
  0xf4   : > { %v3221_v9 = vld [vmem:[#allocation5 + $0x20] sm:$0xff]  ;;  %v3220_v12 = vld [vmem:[#allocation5 + $0x18] sm:$0xff]  ;;  %v3211_v14 = vld [vmem:[#allocation3 + $0x10] sm:$0xff]  ;;  %s1151_s28 = scalar_lea.vmem %s3968_s5, %s4345_s18  ;;  %v3955_v59 = vmov -1e+09   ;;  %s3957_s19 = smov 8  }
  0xf5   : > { %1308 = vmatpush.bf16.msra.mxu0 %v3215_v2  ;;  %v3229_v13 = vld [vmem:[#allocation7 + $0x20] sm:$0xff]  ;;  %v3219_v15 = vld [vmem:[#allocation5 + $0x10] sm:$0xff]  ;;  %v3228_v16 = vld [vmem:[#allocation7 + $0x18] sm:$0xff]  ;;  %vm1176_vm2 = vcmp.le.s32.totalorder %v1172_v56, %v1170_v55  ;;  %s3958_s11 = smov 16   ;;  %s3959_s7 = smov 24   ;;  %vm1575_vm3 = vcmask 130112  }
  0xf6   : > { %1373 = vmatpush.bf16.msra.mxu1 %v3223_v3  ;;  %v3210_v17 = vld [vmem:[#allocation3 + $0x8] sm:$0xff]  ;;  %v3227_v19 = vld [vmem:[#allocation7 + $0x10] sm:$0xff]  ;;  %v3209_v20 = vld [vmem:[#allocation3] sm:$0xff]  ;;  %v1177_v60 = vsel %vm1176_vm2, 0.0, %v3955_v59  ;;  %vm1637_vm4 = vcmask 195712   ;;  %vm1699_vm5 = vcmask 261312  }
  0xf7   : > { %1437 = vmatpush.bf16.msra.mxu2 %v3231_v7  ;;  %v3218_v18 = vld [vmem:[#allocation5 + $0x8] sm:$0xff]  ;;  %v3217_v21 = vld [vmem:[#allocation5] sm:$0xff]  ;;  %v4349_v22 = vld [vmem:[%s1151_s28] sm:$0xff]  ;;  %s4505_s1 = sld [smem:[#allocation34_spill]] }
  0xf8   : > { %v3226_v23 = vld [vmem:[#allocation7 + $0x8] sm:$0xff]  ;;  %v1255_v24 = vpack.c.bf16 %v4349_v22, %v4349_v22  ;;  %v3225_v25 = vld [vmem:[#allocation7] sm:$0xff]  ;;  %v3458_v26 = vld [vmem:[%s3993_s25] ss:$0 sm:$0xff]  ;;  %s1154_s29 = scalar_lea.vmem %s4504_s10, %s4519_s0  ;;  %s4506_s26 = sld [smem:[#allocation30_spill]] }
  0xf9   : > { %1309 = vmatpush.bf16.msra.mxu0 %v3214_v5  ;;  %v3459_v27 = vld [vmem:[%s4003_s3] ss:$0 sm:$0xff]  ;;  %s4507_s16 = sld [smem:[#allocation35_spill]] }
  0xfa   : > { %1374 = vmatpush.bf16.msra.mxu1 %v3222_v6  ;;  %v3460_v43 = vld [vmem:[%s4013_s14] ss:$0 sm:$0xff]  ;;  %s4508_s28 = sld [smem:[#allocation36_spill]] }
  0xfb   : > { %1438 = vmatpush.bf16.msra.mxu2 %v3230_v10  ;;  %v1173_v50 = vld [vmem:[%s1154_s29] sm:$0x1]  ;;  %s4509_s10 = sld [smem:[#allocation38_spill]] }
  0xfc   : > { %v1174_v53 = vsub.f32 1.0, %v1173_v50  ;;  %s4510_s29 = sld [smem:[#allocation37_spill]] }
  0xfd   : > { %1310 = vmatpush.bf16.msra.mxu0 %v3213_v8 }
  0xfe   : > { %1375 = vmatpush.bf16.msra.mxu1 %v3221_v9  ;;  %v1175_v57 = vmul.f32 -1e+09, %v1174_v53  ;;  %s1158_s15 = scalar_lea.vmem %s4506_s26, %s4345_s18 }
  0xff   : > { %1439 = vmatpush.bf16.msra.mxu2 %v3229_v13  ;;  %v3956_v13 = vmov 0.0  }
 0x100   : > { %v1179_v58 = vperm.slane %v1175_v57, 0  ;;  %1452 = vst [vmem:[#allocation2] sm:$0xff] %v3956_v13 }
 0x101   : > { %1311 = vmatpush.bf16.msra.mxu0 %v3212_v11 }
 0x102   : > { %1376 = vmatpush.bf16.msra.mxu1 %v3220_v12  ;;  %v1181_v61 = vadd.f32 %v1179_v58, %v1177_v60 }
 0x103   : > { %1440 = vmatpush.bf16.msra.mxu2 %v3228_v16 }
 0x105   : > { %1312 = vmatpush.bf16.msra.mxu0 %v3211_v14 }
 0x106   : > { %1377 = vmatpush.bf16.msra.mxu1 %v3219_v15 }
 0x107   : > { %1441 = vmatpush.bf16.msra.mxu2 %v3227_v19 }
 0x109   : > { %1313 = vmatpush.bf16.msra.mxu0 %v3210_v17 }
 0x10a   : > { %1378 = vmatpush.bf16.msra.mxu1 %v3218_v18 }
 0x10b   : > { %1442 = vmatpush.bf16.msra.mxu2 %v3226_v23 }
 0x10d   : > { %1314 = vmatpush.bf16.msra.mxu0 %v3209_v20 }
 0x10e   : > { %1379 = vmatpush.bf16.msra.mxu1 %v3217_v21 }
 0x10f   : > { %1443 = vmatpush.bf16.msra.mxu2 %v3225_v25 }
 0x110   : > { %1315 = vmatmul.bf16.vlgmr.msra.gmra.mxu0 %v1255_v24 }
 0x111   : > { %1380 = vmatmul.bf16.vlgmr.msra.gmra.mxu1 %v1255_v24 }
 0x112   : > { %1444 = vmatmul.bf16.vlgmr.msra.gmra.mxu2 %v1255_v24 }
 0x18d   : > { %v1316_v28 = vpop.f32.mrf.mxu0 }
 0x18e   : > { %v1381_v29 = vpop.f32.mrf.mxu1  ;;  %v1317_v30 = vadd.f32 %v3458_v26, %v1316_v28 }
 0x18f   : > { %v1382_v31 = vadd.f32 %v3459_v27, %v1381_v29 }
 0x190   : > { %v1320_v32 = vmul.f32 0.35355338, %v1317_v30 }
 0x191   : > { %v1450_v33 = vpack.c.bf16 %v1382_v31, %v1382_v31 }
 0x192   : > { %v1449_v34 = vpack.c.bf16 %v1320_v32, %v1320_v32 }
 0x193   : > { %v1512_v35 = vunpack.c.l.b16 %v1450_v33  ;;  %v1458_v36 = vsel %vm1453_vm0, %v1450_v33, 0 }
 0x194   : > { %1467 = vmatpush.bf16.xpose.msrb.mxu0 %v1458_v36  ;;  %v1507_v40 = vunpack.c.l.b16 %v1449_v34 }
 0x195   : > { %v1513_v37 = vpack.c.b16 %v1512_v35, %v1512_v35  ;;  %v1318_v38 = vpop.f32.mrf.mxu0  ;;  %v1445_v42 = vpop.f32.mrf.mxu2 }
 0x196   : > { %v1383_v39 = vpop.f32.mrf.mxu1  ;;  %v1508_v41 = vpack.c.b16 %v1507_v40, %v1507_v40  ;;  %v1446_v44 = vadd.f32 %v3460_v43, %v1445_v42 }
 0x197   : > { %1579 = vrot.lane.b32.xlu2 %v1513_v37, %s3952_s23  ;;  %1514 = vrot.lane.b32.xlu1 %v1513_v37, %s3953_s2 }
 0x198   : > { %v4363_v46 = vpack.c.bf16 %v1446_v44, %v1446_v44 }
 0x19a   : > { %v1490_v47 = vsel %vm1488_vm1, %v4363_v46, 0  ;;  %v1548_v32 = vunpack.c.l.b16 %v4363_v46 }
 0x19b   : > { %2967 = vmatmul.msk.bf16.vlgmr.msrb.gmra.mxu0 %vm1453_vm0, %v1449_v34  ;;  %1499 = vmatpush.bf16.msra.mxu3 %v1490_v47 }
 0x19c   : > { %v1549_v33 = vpack.c.b16 %v1548_v32, %v1548_v32 }
 0x19d   : > { %v1447_v45 = vpop.f32.mrf.mxu2 }
 0x19f   : > { %1641 = vrot.lane.b32.xlu2 %v1513_v37, %s3954_s22  ;;  %1509 = vrot.lane.b32.xlu1 %v1508_v41, %s3953_s2 }
 0x1a7   : > { %1639 = vrot.lane.b32.xlu1 %v1508_v41, %s3954_s22 }
 0x1f1   : > { %v1580_v48 = vpop.permute.xlu2 %1579 }
 0x1f2   : > { %v1585_v49 = vsel %vm1453_vm0, %v1580_v48, 0 }
 0x1f3   : > { %1594 = vmatpush.bf16.xpose.msrb.mxu1 %v1585_v49 }
 0x1f9   : > { %v1642_v10 = vpop.permute.xlu2 %1641 }
 0x1fa   : > { %v1647_v12 = vsel %vm1453_vm0, %v1642_v10, 0  ;;  %v3239_v10 = vld [vmem:[#allocation8 + $0x30] sm:$0xff] }
 0x209   : > { %v1515_v52 = vpop.permute.xlu1 %1514 }
 0x20a   : > { %v1520_v54 = vsel %vm1453_vm0, %v1515_v52, 0 }
 0x20b   : > { %1529 = vmatpush.bf16.xpose.msrb.mxu3 %v1520_v54 }
 0x211   : > { %v1510_v15 = vpop.permute.xlu1 %1509 }
 0x218   : > { %v1469_v62 = vpop.f32.mrf.mxu0 }
 0x219   : > { %v1470_v63 = vadd.f32 %v1469_v62, %v1181_v61  ;;  %v1640_v16 = vpop.permute.xlu1 %1639 }
 0x21b   : > { %v1473_v0 = vsel %vm1453_vm0, %v1470_v63, -inf }
 0x21c   : > { %1474 = vmax.xlane.f32.xlu0 %v1473_v0 }
 0x220   : > { %v1471_v1 = vpop.f32.mrf.mxu0 }
 0x28f   : > { %v1475_v2 = vpop.xlane.xlu0 %1474 }
 0x290   : > { %v1476_v3 = vsub.f32 %v1470_v63, %v1475_v2 }
 0x292   : > { %v1477_v4 = vmul.f32 1.442695, %v1476_v3 }
 0x294   : > { %3474 = vpow2.f32 %v1477_v4 }
 0x29a   : > { %v3475_v5 = vpop.eup %3474 }
 0x29b   : > { %v1479_v6 = vsel %vm1453_vm0, %v3475_v5, 0.0 }
 0x29c   : > { %1480 = vadd.xlane.f32.xlu0 %v1479_v6 }
 0x2b0   : > { %1577 = vrot.lane.b32.xlu0 %v1508_v41, %s3952_s23 }
 0x30f   : > { %v1481_v7 = vpop.xlane.xlu0 %1480 }
 0x310   : > { %3476 = vrcp.f32 %v1481_v7 }
 0x316   : > { %v3477_v8 = vpop.eup %3476 }
 0x317   : > { %v1483_v9 = vmul.f32 %v3477_v8, %v3475_v5 }
 0x319   : > { %v1484_v11 = vpack.c.bf16 %v1483_v9, %v1483_v9  ;;  %v3240_v9 = vld [vmem:[#allocation8 + $0x38] sm:$0xff] }
 0x31a   : > { %1754 = vmatpush.bf16.msra.mxu1 %v3240_v9 }
 0x31b   : > { %2968 = vmatmul.msk.bf16.vlgmr.msra.gmra.mxu3 %vm1453_vm0, %v1484_v11  ;;  %v3238_v11 = vld [vmem:[#allocation8 + $0x28] sm:$0xff] }
 0x31c   : > { %1656 = vmatpush.bf16.xpose.msra.mxu3 %v1647_v12  ;;  %v3237_v12 = vld [vmem:[#allocation8 + $0x20] sm:$0xff] }
 0x31e   : > { %1755 = vmatpush.bf16.msra.mxu1 %v3239_v10 }
 0x322   : > { %v1578_v14 = vpop.permute.xlu0 %1577  ;;  %1756 = vmatpush.bf16.msra.mxu1 %v3238_v11  ;;  %v3465_v11 = vld [vmem:[%s4510_s29] ss:$0 sm:$0xff] }
 0x323   : > { %2971 = vmatmul.msk.bf16.vlgmr.msrb.gmra.mxu1 %vm1453_vm0, %v1578_v14  ;;  %v3236_v14 = vld [vmem:[#allocation8 + $0x18] sm:$0xff] }
 0x326   : > { %1757 = vmatpush.bf16.msra.mxu1 %v3237_v12 }
 0x32a   : > { %1758 = vmatpush.bf16.msra.mxu1 %v3236_v14 }
 0x32b   : > { %2969 = vmatmul.msk.bf16.vlgmr.msrb.gmra.mxu3 %vm1453_vm0, %v1510_v15  ;;  %v3235_v15 = vld [vmem:[#allocation8 + $0x10] sm:$0xff] }
 0x32e   : > { %1759 = vmatpush.bf16.msra.mxu1 %v3235_v15 }
 0x33b   : > { %2973 = vmatmul.msk.bf16.vlgmr.msra.gmra.mxu3 %vm1453_vm0, %v1640_v16 }
 0x39e   : > { %v1501_v17 = vpop.f32.mrf.mxu3 }
 0x39f   : > { %1505 = vst.msk [vmem:[#allocation2] sm:$0xff] %vm1453_vm0, %v1501_v17 }
 0x3a0   : > { %v1596_v18 = vpop.f32.mrf.mxu1 }
 0x3a1   : > { %v1597_v19 = vadd.f32 %v1596_v18, %v1181_v61  ;;  %v3234_v18 = vld [vmem:[#allocation8 + $0x8] sm:$0xff] }
 0x3a2   : > { %1760 = vmatpush.bf16.msra.mxu1 %v3234_v18 }
 0x3a3   : > { %v1600_v20 = vsel %vm1453_vm0, %v1597_v19, -inf }
 0x3a4   : > { %1601 = vmax.xlane.f32.xlu1 %v1600_v20 }
 0x3a6   : > { %v1503_v21 = vpop.f32.mrf.mxu3 }
 0x3a8   : > { %v1598_v23 = vpop.f32.mrf.mxu1 }
 0x3ae   : > { %v1531_v24 = vpop.f32.mrf.mxu3 }
 0x3af   : > { %v1532_v25 = vadd.f32 %v1531_v24, %v1181_v61  ;;  %v3256_v24 = vld [vmem:[#allocation11 + $0x38] sm:$0xff] }
 0x3b0   : > { %1986 = vmatpush.bf16.msrb.mxu3 %v3256_v24 }
 0x3b1   : > { %v1535_v26 = vsel %vm1453_vm0, %v1532_v25, -inf }
 0x3b2   : > { %1536 = vmax.xlane.f32.xlu2 %v1535_v26  ;;  %v3254_v26 = vld [vmem:[#allocation11 + $0x28] sm:$0xff] }
 0x3b6   : > { %v1533_v27 = vpop.f32.mrf.mxu3 }
 0x3b7   : > { %v3253_v27 = vld [vmem:[#allocation11 + $0x20] sm:$0xff] }
 0x3be   : > { %v1658_v28 = vpop.f32.mrf.mxu3 }
 0x3bf   : > { %v1659_v29 = vadd.f32 %v1658_v28, %v1181_v61  ;;  %v3252_v28 = vld [vmem:[#allocation11 + $0x18] sm:$0xff] }
 0x3c1   : > { %v1662_v30 = vsel %vm1453_vm0, %v1659_v29, -inf }
 0x3c2   : > { %1663 = vmax.xlane.f32.xlu0 %v1662_v30 }
 0x3c6   : > { %v1660_v31 = vpop.f32.mrf.mxu3 }
 0x3d6   : > { %1612 = vrot.lane.b32.xlu0 %v1549_v33, %s3952_s23 }
 0x417   : > { %v1602_v34 = vpop.xlane.xlu1 %1601 }
 0x418   : > { %v1603_v35 = vsub.f32 %v1597_v19, %v1602_v34  ;;  %v3233_v19 = vld [vmem:[#allocation8] sm:$0xff]  ;;  %v3251_v34 = vld [vmem:[#allocation11 + $0x10] sm:$0xff] }
 0x419   : > { %1761 = vmatpush.bf16.msra.mxu1 %v3233_v19 }
 0x41a   : > { %v1604_v36 = vmul.f32 1.442695, %v1603_v35  ;;  %v3248_v35 = vld [vmem:[#allocation10 + $0x38] sm:$0xff] }
 0x41c   : > { %3478 = vpow2.f32 %v1604_v36  ;;  %v3250_v36 = vld [vmem:[#allocation11 + $0x8] sm:$0xff] }
 0x422   : > { %v3479_v37 = vpop.eup %3478 }
 0x423   : > { %v1606_v38 = vsel %vm1453_vm0, %v3479_v37, 0.0 }
 0x424   : > { %1607 = vadd.xlane.f32.xlu1 %v1606_v38  ;;  %v3249_v38 = vld [vmem:[#allocation11] sm:$0xff] }
 0x425   : > { %v1537_v39 = vpop.xlane.xlu2 %1536 }
 0x426   : > { %v1538_v40 = vsub.f32 %v1532_v25, %v1537_v39  ;;  %v3255_v25 = vld [vmem:[#allocation11 + $0x30] sm:$0xff]  ;;  %v3246_v39 = vld [vmem:[#allocation10 + $0x28] sm:$0xff] }
 0x427   : > { %1987 = vmatpush.bf16.msrb.mxu3 %v3255_v25  ;;  %v3264_v25 = vld [vmem:[#allocation13 + $0x38] sm:$0xff] }
 0x428   : > { %v1539_v41 = vmul.f32 1.442695, %v1538_v40  ;;  %v1168_v40 = vld [vmem:[%s1158_s15] sm:$0xff] }
 0x42a   : > { %3480 = vpow2.f32 %v1539_v41  ;;  %v4408_v41 = vpack.c.bf16 %v1168_v40, %v1168_v40 }
 0x42b   : > { %1988 = vmatpush.bf16.msrb.mxu3 %v3254_v26  ;;  %v3263_v26 = vld [vmem:[#allocation13 + $0x30] sm:$0xff] }
 0x42f   : > { %1989 = vmatpush.bf16.msrb.mxu3 %v3253_v27  ;;  %v3262_v27 = vld [vmem:[#allocation13 + $0x28] sm:$0xff] }
 0x430   : > { %v3481_v42 = vpop.eup %3480 }
 0x431   : > { %v1541_v43 = vsel %vm1453_vm0, %v3481_v42, 0.0 }
 0x432   : > { %1542 = vadd.xlane.f32.xlu2 %v1541_v43  ;;  %v3243_v43 = vld [vmem:[#allocation10 + $0x10] sm:$0xff] }
 0x433   : > { %1990 = vmatpush.bf16.msrb.mxu3 %v3252_v28 }
 0x435   : > { %v1664_v44 = vpop.xlane.xlu0 %1663 }
 0x436   : > { %v1665_v45 = vsub.f32 %v1659_v29, %v1664_v44  ;;  %v3461_v29 = vld [vmem:[%s4505_s1] ss:$0 sm:$0xff]  ;;  %v3242_v44 = vld [vmem:[#allocation10 + $0x8] sm:$0xff]  ;;  %s4511_s1 = sld [smem:[#allocation31_spill]] }
 0x437   : > { %1991 = vmatpush.bf16.msrb.mxu3 %v3251_v34 }
 0x438   : > { %v1666_v46 = vmul.f32 1.442695, %v1665_v45  ;;  %v3241_v45 = vld [vmem:[#allocation10] sm:$0xff] }
 0x43a   : > { %3482 = vpow2.f32 %v1666_v46 }
 0x43b   : > { %1992 = vmatpush.bf16.msrb.mxu3 %v3250_v36  ;;  %v3258_v36 = vld [vmem:[#allocation13 + $0x8] sm:$0xff] }
 0x43c   : > { %s1161_s26 = scalar_lea.vmem %s4511_s1, %s4519_s0  ;;  %s4512_s0 = sld [smem:[#allocation39_spill]] }
 0x43d   : > { %v1182_v28 = vld [vmem:[%s1161_s26] sm:$0x1] }
 0x43f   : > { %1993 = vmatpush.bf16.msrb.mxu3 %v3249_v38 }
 0x440   : > { %v3483_v47 = vpop.eup %3482 }
 0x441   : > { %v1668_v48 = vsel %vm1453_vm0, %v3483_v47, 0.0 }
 0x442   : > { %1669 = vadd.xlane.f32.xlu1 %v1668_v48  ;;  %1994 = vmatmul.bf16.vlgmr.msrb.gmra.mxu3 %v4408_v41 }
 0x448   : > { %v1613_v49 = vpop.permute.xlu0 %1612 }
 0x449   : > { %v1618_v50 = vsel %vm1488_vm1, %v1613_v49, 0 }
 0x44a   : > { %1550 = vrot.lane.b32.xlu2 %v1549_v33, %s3953_s2  ;;  %1627 = vmatpush.bf16.msrb.mxu2 %v1618_v50 }
 0x44e   : > { %1921 = vmatpush.bf16.msra.mxu2 %v3248_v35 }
 0x45b   : > { %1674 = vrot.lane.b32.xlu1 %v1549_v33, %s3954_s22 }
 0x497   : > { %v1608_v51 = vpop.xlane.xlu1 %1607 }
 0x498   : > { %3484 = vrcp.f32 %v1608_v51 }
 0x49e   : > { %v3485_v52 = vpop.eup %3484 }
 0x49f   : > { %v1610_v53 = vmul.f32 %v3485_v52, %v3479_v37  ;;  %v3247_v37 = vld [vmem:[#allocation10 + $0x30] sm:$0xff] }
 0x4a0   : > { %1922 = vmatpush.bf16.msra.mxu2 %v3247_v37 }
 0x4a1   : > { %v1611_v54 = vpack.c.bf16 %v1610_v53, %v1610_v53 }
 0x4a3   : > { %2972 = vmatmul.msk.bf16.vlgmr.msrb.gmra.mxu2 %vm1453_vm0, %v1611_v54 }
 0x4a4   : > { %1923 = vmatpush.bf16.msra.mxu2 %v3246_v39 }
 0x4a5   : > { %v1543_v55 = vpop.xlane.xlu2 %1542 }
 0x4a6   : > { %3486 = vrcp.f32 %v1543_v55 }
 0x4ac   : > { %v3487_v56 = vpop.eup %3486 }
 0x4ad   : > { %v1545_v57 = vmul.f32 %v3487_v56, %v3481_v42  ;;  %v1551_v58 = vpop.permute.xlu2 %1550  ;;  %v3244_v42 = vld [vmem:[#allocation10 + $0x18] sm:$0xff] }
 0x4ae   : > { %v1556_v59 = vsel %vm1488_vm1, %v1551_v58, 0 }
 0x4af   : > { %v1546_v60 = vpack.c.bf16 %v1545_v57, %v1545_v57  ;;  %1565 = vmatpush.bf16.msra.mxu0 %v1556_v59 }
 0x4b2   : > { %2970 = vmatmul.msk.bf16.vlgmr.msra.gmra.mxu0 %vm1453_vm0, %v1546_v60  ;;  %v3462_v60 = vld [vmem:[%s4507_s16] ss:$0 sm:$0xff] }
 0x4b5   : > { %v1670_v61 = vpop.xlane.xlu1 %1669 }
 0x4b6   : > { %3488 = vrcp.f32 %v1670_v61 }
 0x4bc   : > { %v3489_v62 = vpop.eup %3488 }
 0x4bd   : > { %v1672_v63 = vmul.f32 %v3489_v62, %v3483_v47 }
 0x4bf   : > { %v1673_v2 = vpack.c.bf16 %v1672_v63, %v1672_v63  ;;  %v3463_v63 = vld [vmem:[%s4508_s28] ss:$0 sm:$0xff] }
 0x4cd   : > { %v1675_v0 = vpop.permute.xlu1 %1674 }
 0x4ce   : > { %v1680_v1 = vsel %vm1488_vm1, %v1675_v0, 0 }
 0x4cf   : > { %1689 = vmatpush.bf16.msrb.mxu0 %v1680_v1 }
 0x4d2   : > { %2974 = vmatmul.msk.bf16.vlgmr.msrb.gmra.mxu0 %vm1453_vm0, %v1673_v2 }
 0x4d3   : > { %2050 = vmatpush.bf16.msra.mxu0 %v3264_v25 }
 0x4d7   : > { %2051 = vmatpush.bf16.msra.mxu0 %v3263_v26 }
 0x4db   : > { %2052 = vmatpush.bf16.msra.mxu0 %v3262_v27 }
 0x526   : > { %v1629_v3 = vpop.f32.mrf.mxu2 }
 0x52e   : > { %v1631_v4 = vpop.f32.mrf.mxu2 }
 0x52f   : > { %v1567_v5 = vpop.f32.mrf.mxu0  ;;  %v1995_v4 = vpop.f32.mrf.mxu3 }
 0x530   : > { %1572 = vrot.lane.b32.xlu2 %v1567_v5, %s3957_s19 }
 0x537   : > { %v1569_v6 = vpop.f32.mrf.mxu0  ;;  %v1997_v10 = vpop.f32.mrf.mxu3 }
 0x538   : > { %1634 = vrot.lane.b32.xlu2 %v1629_v3, %s3958_s11  ;;  %v3464_v3 = vld [vmem:[%s4509_s10] ss:$0 sm:$0xff] }
 0x539   : > { %v1996_v5 = vadd.f32 %v3464_v3, %v1995_v4 }
 0x53b   : > { %v2064_v6 = vpack.c.bf16 %v1996_v5, %v1996_v5 }
 0x54f   : > { %v1691_v7 = vpop.f32.mrf.mxu0 }
 0x550   : > { %1696 = vrot.lane.b32.xlu0 %v1691_v7, %s3959_s7  ;;  %v2074_v7 = vsel %vm1453_vm0, %v2064_v6, 0 }
 0x551   : > { %2083 = vmatpush.bf16.xpose.msrb.mxu1 %v2074_v7 }
 0x557   : > { %v1693_v8 = vpop.f32.mrf.mxu0 }
 0x558   : > { %v2127_v8 = vunpack.c.l.b16 %v2064_v6 }
 0x55a   : > { %v2128_v9 = vpack.c.b16 %v2127_v8, %v2127_v8 }
 0x55c   : > { %2129 = vrot.lane.b32.xlu1 %v2128_v9, %s3953_s2 }
 0x564   : > { %2193 = vrot.lane.b32.xlu1 %v2128_v9, %s3952_s23 }
 0x58a   : > { %v1573_v16 = vpop.permute.xlu2 %1572 }
 0x58b   : > { %1576 = vst.msk [vmem:[#allocation2] sm:$0xff] %vm1575_vm3, %v1573_v16 }
 0x592   : > { %v1635_v17 = vpop.permute.xlu2 %1634 }
 0x593   : > { %1638 = vst.msk [vmem:[#allocation2] sm:$0xff] %vm1637_vm4, %v1635_v17 }
 0x5c2   : > { %v1697_v20 = vpop.permute.xlu0 %1696 }
 0x5c3   : > { %1700 = vst.msk [vmem:[#allocation2] sm:$0xff] %vm1699_vm5, %v1697_v20 }
 0x5ca   : > { %v1701_v21 = vld [vmem:[#allocation2] sm:$0xff] }
 0x5cb   : > { %v1702_v23 = vpack.c.bf16 %v1701_v21, %v1701_v21  ;;  %2066 = vst [vmem:[#allocation2] sm:$0xff] %v3956_v13 }
 0x5cd   : > { %1762 = vmatmul.bf16.vlgmr.msra.gmra.mxu1 %v1702_v23 }
 0x5ce   : > { %v2130_v20 = vpop.permute.xlu1 %2129 }
 0x5cf   : > { %v2135_v21 = vsel %vm1453_vm0, %v2130_v20, 0 }
 0x5d0   : > { %2144 = vmatpush.bf16.xpose.msra.mxu3 %v2135_v21 }
 0x5d6   : > { %v2194_v23 = vpop.permute.xlu1 %2193 }
 0x5d7   : > { %v2199_v24 = vsel %vm1453_vm0, %v2194_v23, 0 }
 0x5d8   : > { %2208 = vmatpush.bf16.xpose.msra.mxu1 %v2199_v24 }
 0x64a   : > { %v1763_v30 = vpop.f32.mrf.mxu1 }
 0x64b   : > { %v1764_v31 = vadd.f32 %v3461_v29, %v1763_v30  ;;  %v3261_v29 = vld [vmem:[#allocation13 + $0x20] sm:$0xff]  ;;  %v1183_v30 = vsub.f32 1.0, %v1182_v28 }
 0x64c   : > { %2053 = vmatpush.bf16.msra.mxu0 %v3261_v29 }
 0x64d   : > { %v1767_v32 = vadd.f32 %v1764_v31, %v4349_v22  ;;  %v3245_v22 = vld [vmem:[#allocation10 + $0x20] sm:$0xff]  ;;  %v3260_v31 = vld [vmem:[#allocation13 + $0x18] sm:$0xff] }
 0x64e   : > { %1924 = vmatpush.bf16.msra.mxu2 %v3245_v22  ;;  %v3257_v22 = vld [vmem:[#allocation13] sm:$0xff] }
 0x64f   : > { %1768 = vadd.xlane.f32.xlu2 %v1767_v32  ;;  %v1771_v13 = vmul.f32 %v1767_v32, %v1767_v32 }
 0x650   : > { %2054 = vmatpush.bf16.msra.mxu0 %v3260_v31 }
 0x651   : > { %1772 = vadd.xlane.f32.xlu0 %v1771_v13  ;;  %v1184_v13 = vmul.f32 -1e+09, %v1183_v30 }
 0x652   : > { %v1765_v33 = vpop.f32.mrf.mxu1  ;;  %1925 = vmatpush.bf16.msra.mxu2 %v3244_v42 }
 0x653   : > { %v3259_v33 = vld [vmem:[#allocation13 + $0x10] sm:$0xff]  ;;  %v2068_v34 = vperm.slane %v1184_v13, 0 }
 0x654   : > { %2055 = vmatpush.bf16.msra.mxu0 %v3259_v33 }
 0x656   : > { %1926 = vmatpush.bf16.msra.mxu2 %v3243_v43 }
 0x658   : > { %2056 = vmatpush.bf16.msra.mxu0 %v3258_v36 }
 0x65a   : > { %1927 = vmatpush.bf16.msra.mxu2 %v3242_v44 }
 0x65c   : > { %2057 = vmatpush.bf16.msra.mxu0 %v3257_v22 }
 0x65e   : > { %1928 = vmatpush.bf16.msra.mxu2 %v3241_v45 }
 0x65f   : > { %2058 = vmatmul.bf16.vlgmr.msra.gmra.mxu0 %v4408_v41 }
 0x6c2   : > { %v1769_v46 = vpop.xlane.xlu2 %1768 }
 0x6c3   : > { %v1770_v47 = vmul.f32 0.03125, %v1769_v46 }
 0x6c4   : > { %v1773_v48 = vpop.xlane.xlu0 %1772 }
 0x6c5   : > { %v1775_v49 = vmul.f32 %v1770_v47, %v1770_v47  ;;  %v1774_v50 = vmul.f32 0.03125, %v1773_v48  ;;  %v1777_v59 = vsub.f32 %v1767_v32, %v1770_v47 }
 0x6c7   : > { %v1776_v51 = vsub.f32 %v1774_v50, %v1775_v49 }
 0x6c9   : > { %v1778_v52 = vadd.f32 1e-05, %v1776_v51 }
 0x6cb   : > { %3490 = vrsqrt.f32 %v1778_v52  ;;  %vm1785_vm7 = vweird.f32 %v1778_v52 }
 0x6d1   : > { %v3491_v53 = vpop.eup %3490 }
 0x6d2   : > { %v1780_v54 = vmul.f32 %v3491_v53, %v1778_v52  ;;  %vm1786_vm6 = vweird.f32 %v3491_v53  ;;  %v3466_v52 = vld [vmem:[%s4512_s0] ss:$0 sm:$0xff] }
 0x6d3   : > { %vm1787_vm8 = vmor %vm1785_vm7, %vm1786_vm6 }
 0x6d4   : > { %v1781_v55 = vmul.f32 %v3491_v53, %v1780_v54 }
 0x6d6   : > { %v1782_v56 = vmul.f32 0.5, %v1781_v55 }
 0x6d8   : > { %v1783_v57 = vsub.f32 1.5, %v1782_v56 }
 0x6da   : > { %v1784_v58 = vmul.f32 %v3491_v53, %v1783_v57 }
 0x6dc   : > { %v1788_v61 = vsel %vm1787_vm8, %v3491_v53, %v1784_v58  ;;  %v2059_v55 = vpop.f32.mrf.mxu0 }
 0x6dd   : > { %v1789_v62 = vmul.f32 %v1788_v61, %v1777_v59  ;;  %v2060_v56 = vadd.f32 %v3466_v52, %v2059_v55  ;;  %v3272_v52 = vld [vmem:[#allocation14 + $0x38] sm:$0xff]  ;;  %v3269_v55 = vld [vmem:[#allocation14 + $0x20] sm:$0xff] }
 0x6df   : > { %v1793_v0 = vmul.f32 %v3462_v60, %v1789_v62  ;;  %v2065_v58 = vpack.c.bf16 %v2060_v56, %v2060_v56  ;;  %v3268_v56 = vld [vmem:[#allocation14 + $0x18] sm:$0xff] }
 0x6e1   : > { %v4413_v1 = vadd.f32 %v3463_v63, %v1793_v0  ;;  %v2105_v59 = vsel %vm1488_vm1, %v2065_v58, 0  ;;  %v2163_v4 = vunpack.c.l.b16 %v2065_v58  ;;  %v3266_v58 = vld [vmem:[#allocation14 + $0x8] sm:$0xff] }
 0x6e2   : > { %2114 = vmatpush.bf16.msrb.mxu2 %v2105_v59 }
 0x6e3   : > { %v1868_v2 = vpack.c.bf16 %v4413_v1, %v4413_v1  ;;  %v2164_v5 = vpack.c.b16 %v2163_v4, %v2163_v4 }
 0x6e4   : > { %v2061_v62 = vpop.f32.mrf.mxu0 }
 0x6e5   : > { %1929 = vmatmul.bf16.vlgmr.msra.gmra.mxu2 %v1868_v2 }
 0x768   : > { %v1930_v12 = vpop.f32.mrf.mxu2 }
 0x769   : > { %v1931_v14 = vadd.f32 %v3465_v11, %v1930_v12 }
 0x76b   : > { %v1934_v15 = vmul.f32 0.35355338, %v1931_v14 }
 0x76d   : > { %v2063_v16 = vpack.c.bf16 %v1934_v15, %v1934_v15 }
 0x76f   : > { %v2122_v17 = vunpack.c.l.b16 %v2063_v16  ;;  %3103 = vmatmul.msk.bf16.vlgmr.msrb.gmra.mxu1 %vm1453_vm0, %v2063_v16 }
 0x770   : > { %v1932_v18 = vpop.f32.mrf.mxu2  ;;  %2366 = vmatpush.bf16.msrb.mxu1 %v3272_v52 }
 0x771   : > { %v2123_v19 = vpack.c.b16 %v2122_v17, %v2122_v17 }
 0x773   : > { %2252 = vrot.lane.b32.xlu2 %v2123_v19, %s3954_s22  ;;  %2124 = vrot.lane.b32.xlu1 %v2123_v19, %s3953_s2 }
 0x77b   : > { %2254 = vrot.lane.b32.xlu1 %v2128_v9, %s3954_s22 }
 0x783   : > { %2191 = vrot.lane.b32.xlu1 %v2123_v19, %s3952_s23 }
 0x7cd   : > { %v2253_v43 = vpop.permute.xlu2 %2252 }
 0x7e5   : > { %v2125_v32 = vpop.permute.xlu1 %2124 }
 0x7e6   : > { %3105 = vmatmul.msk.bf16.vlgmr.msra.gmra.mxu3 %vm1453_vm0, %v2125_v32 }
 0x7ec   : > { %v2085_v35 = vpop.f32.mrf.mxu1 }
 0x7ed   : > { %v2086_v37 = vadd.f32 %v2085_v35, %v2068_v34  ;;  %v2255_v38 = vpop.permute.xlu1 %2254 }
 0x7ee   : > { %v2260_v39 = vsel %vm1453_vm0, %v2255_v38, 0 }
 0x7ef   : > { %2269 = vmatpush.bf16.xpose.msrb.mxu3 %v2260_v39  ;;  %v2089_v40 = vsel %vm1453_vm0, %v2086_v37, -inf }
 0x7f0   : > { %2090 = vmax.xlane.f32.xlu1 %v2089_v40 }
 0x7f4   : > { %v2087_v42 = vpop.f32.mrf.mxu1 }
 0x7f5   : > { %v2192_v44 = vpop.permute.xlu1 %2191 }
 0x7f6   : > { %3107 = vmatmul.msk.bf16.vlgmr.msra.gmra.mxu1 %vm1453_vm0, %v2192_v44  ;;  %3109 = vmatmul.msk.bf16.vlgmr.msrb.gmra.mxu3 %vm1453_vm0, %v2253_v43 }
 0x863   : > { %v2091_v45 = vpop.xlane.xlu1 %2090 }
 0x864   : > { %v2092_v46 = vsub.f32 %v2086_v37, %v2091_v45 }
 0x866   : > { %v2093_v47 = vmul.f32 1.442695, %v2092_v46 }
 0x868   : > { %3492 = vpow2.f32 %v2093_v47 }
 0x869   : > { %v2146_v48 = vpop.f32.mrf.mxu3 }
 0x86a   : > { %v2147_v60 = vadd.f32 %v2146_v48, %v2068_v34 }
 0x86c   : > { %v2150_v63 = vsel %vm1453_vm0, %v2147_v60, -inf }
 0x86e   : > { %v3493_v49 = vpop.eup %3492 }
 0x86f   : > { %v2095_v50 = vsel %vm1453_vm0, %v3493_v49, 0.0 }
 0x870   : > { %2096 = vadd.xlane.f32.xlu2 %v2095_v50 }
 0x871   : > { %v2148_v51 = vpop.f32.mrf.mxu3 }
 0x873   : > { %v2210_v53 = vpop.f32.mrf.mxu1 }
 0x874   : > { %v2211_v54 = vadd.f32 %v2210_v53, %v2068_v34  ;;  %v3271_v53 = vld [vmem:[#allocation14 + $0x30] sm:$0xff] }
 0x875   : > { %2367 = vmatpush.bf16.msrb.mxu1 %v3271_v53 }
 0x876   : > { %v2214_v57 = vsel %vm1453_vm0, %v2211_v54, -inf }
 0x877   : > { %2215 = vmax.xlane.f32.xlu0 %v2214_v57  ;;  %v3267_v57 = vld [vmem:[#allocation14 + $0x10] sm:$0xff] }
 0x879   : > { %v2271_v41 = vpop.f32.mrf.mxu3 }
 0x87a   : > { %v2272_v2 = vadd.f32 %v2271_v41, %v2068_v34  ;;  %v3265_v41 = vld [vmem:[#allocation14] sm:$0xff] }
 0x87b   : > { %v2212_v61 = vpop.f32.mrf.mxu1 }
 0x87c   : > { %v2275_v3 = vsel %vm1453_vm0, %v2272_v2, -inf }
 0x87f   : > { %2151 = vmax.xlane.f32.xlu0 %v2150_v63 }
 0x881   : > { %v2273_v0 = vpop.f32.mrf.mxu3 }
 0x887   : > { %2276 = vmax.xlane.f32.xlu0 %v2275_v3 }
 0x89b   : > { %2165 = vrot.lane.b32.xlu0 %v2164_v5, %s3953_s2  ;;  %s4514_s2 = sld [smem:[#allocation41_spill]] }
 0x8e3   : > { %v2097_v6 = vpop.xlane.xlu2 %2096 }
 0x8e4   : > { %3494 = vrcp.f32 %v2097_v6 }
 0x8ea   : > { %v3495_v7 = vpop.eup %3494  ;;  %v2216_v8 = vpop.xlane.xlu0 %2215 }
 0x8eb   : > { %v2099_v9 = vmul.f32 %v3495_v7, %v3493_v49  ;;  %v2217_v10 = vsub.f32 %v2211_v54, %v2216_v8  ;;  %v3270_v54 = vld [vmem:[#allocation14 + $0x28] sm:$0xff]  ;;  %v3280_v7 = vld [vmem:[#allocation16 + $0x38] sm:$0xff]  ;;  %v3279_v8 = vld [vmem:[#allocation16 + $0x30] sm:$0xff] }
 0x8ec   : > { %2368 = vmatpush.bf16.msrb.mxu1 %v3270_v54 }
 0x8ed   : > { %v2100_v11 = vpack.c.bf16 %v2099_v9, %v2099_v9  ;;  %v2218_v12 = vmul.f32 1.442695, %v2217_v10  ;;  %v3278_v9 = vld [vmem:[#allocation16 + $0x28] sm:$0xff]  ;;  %v3277_v10 = vld [vmem:[#allocation16 + $0x20] sm:$0xff] }
 0x8ef   : > { %3496 = vpow2.f32 %v2218_v12  ;;  %3104 = vmatmul.msk.bf16.vlgmr.msrb.gmra.mxu2 %vm1453_vm0, %v2100_v11  ;;  %v3276_v11 = vld [vmem:[#allocation16 + $0x18] sm:$0xff]  ;;  %v3275_v12 = vld [vmem:[#allocation16 + $0x10] sm:$0xff] }
 0x8f0   : > { %2369 = vmatpush.bf16.msrb.mxu1 %v3269_v55 }
 0x8f2   : > { %v2152_v14 = vpop.xlane.xlu0 %2151 }
 0x8f3   : > { %v2153_v15 = vsub.f32 %v2147_v60, %v2152_v14  ;;  %v3274_v14 = vld [vmem:[#allocation16 + $0x8] sm:$0xff] }
 0x8f4   : > { %2370 = vmatpush.bf16.msrb.mxu1 %v3268_v56 }
 0x8f5   : > { %v3497_v16 = vpop.eup %3496  ;;  %v2154_v17 = vmul.f32 1.442695, %v2153_v15  ;;  %v3273_v15 = vld [vmem:[#allocation16] sm:$0xff] }
 0x8f6   : > { %v2220_v18 = vsel %vm1453_vm0, %v3497_v16, 0.0 }
 0x8f7   : > { %3498 = vpow2.f32 %v2154_v17  ;;  %2221 = vadd.xlane.f32.xlu1 %v2220_v18 }
 0x8f8   : > { %2371 = vmatpush.bf16.msrb.mxu1 %v3267_v57 }
 0x8fa   : > { %v2277_v19 = vpop.xlane.xlu0 %2276 }
 0x8fb   : > { %v2278_v20 = vsub.f32 %v2272_v2, %v2277_v19 }
 0x8fc   : > { %2372 = vmatpush.bf16.msrb.mxu1 %v3266_v58 }
 0x8fd   : > { %v3499_v21 = vpop.eup %3498  ;;  %v2279_v23 = vmul.f32 1.442695, %v2278_v20  ;;  %v3288_v20 = vld [vmem:[#allocation17 + $0x38] sm:$0xff] }
 0x8fe   : > { %v2156_v24 = vsel %vm1453_vm0, %v3499_v21, 0.0  ;;  %2564 = vmatpush.bf16.msra.mxu3 %v3288_v20 }
 0x8ff   : > { %3500 = vpow2.f32 %v2279_v23  ;;  %2157 = vadd.xlane.f32.xlu0 %v2156_v24  ;;  %v3287_v23 = vld [vmem:[#allocation17 + $0x30] sm:$0xff] }
 0x900   : > { %2373 = vmatpush.bf16.msrb.mxu1 %v3265_v41 }
 0x902   : > { %2565 = vmatpush.bf16.msra.mxu3 %v3287_v23 }
 0x905   : > { %v3501_v25 = vpop.eup %3500 }
 0x906   : > { %v2281_v26 = vsel %vm1453_vm0, %v3501_v25, 0.0 }
 0x907   : > { %2282 = vadd.xlane.f32.xlu1 %v2281_v26  ;;  %v3285_v26 = vld [vmem:[#allocation17 + $0x20] sm:$0xff] }
 0x90d   : > { %v2166_v27 = vpop.permute.xlu0 %2165 }
 0x90e   : > { %v2171_v28 = vsel %vm1488_vm1, %v2166_v27, 0 }
 0x90f   : > { %2180 = vmatpush.bf16.msrb.mxu0 %v2171_v28 }
 0x913   : > { %2226 = vrot.lane.b32.xlu0 %v2164_v5, %s3952_s23  ;;  %s4513_s23 = sld [smem:[#allocation40_spill]] }
 0x919   : > { %v3467_v0 = vld [vmem:[%s4513_s23] ss:$0 sm:$0xff] }
 0x920   : > { %2287 = vrot.lane.b32.xlu1 %v2164_v5, %s3954_s22  ;;  %s4515_s22 = sld [smem:[#allocation42_spill]] }
 0x96a   : > { %v2222_v31 = vpop.xlane.xlu1 %2221 }
 0x972   : > { %v2158_v29 = vpop.xlane.xlu0 %2157  ;;  %v2116_v30 = vpop.f32.mrf.mxu2 }
 0x973   : > { %3502 = vrcp.f32 %v2158_v29  ;;  %2120 = vst.msk [vmem:[#allocation2] sm:$0xff] %vm1453_vm0, %v2116_v30  ;;  %v3284_v29 = vld [vmem:[#allocation17 + $0x18] sm:$0xff] }
 0x974   : > { %3504 = vrcp.f32 %v2222_v31 }
 0x979   : > { %v3503_v32 = vpop.eup %3502 }
 0x97a   : > { %v2160_v13 = vmul.f32 %v3503_v32, %v3499_v21  ;;  %v2118_v33 = vpop.f32.mrf.mxu2  ;;  %v3505_v35 = vpop.eup %3504  ;;  %v3283_v32 = vld [vmem:[#allocation17 + $0x10] sm:$0xff] }
 0x97b   : > { %v2224_v36 = vmul.f32 %v3505_v35, %v3497_v16  ;;  %v2283_v37 = vpop.xlane.xlu1 %2282  ;;  %v3468_v35 = vld [vmem:[%s4514_s2] ss:$0 sm:$0xff] }
 0x97c   : > { %v2161_v34 = vpack.c.bf16 %v2160_v13, %v2160_v13  ;;  %3506 = vrcp.f32 %v2283_v37 }
 0x97d   : > { %v2225_v40 = vpack.c.bf16 %v2224_v36, %v2224_v36 }
 0x97e   : > { %3106 = vmatmul.msk.bf16.vlgmr.msrb.gmra.mxu0 %vm1453_vm0, %v2161_v34 }
 0x982   : > { %v3507_v22 = vpop.eup %3506 }
 0x983   : > { %v2285_v42 = vmul.f32 %v3507_v22, %v3501_v25  ;;  %v3286_v25 = vld [vmem:[#allocation17 + $0x28] sm:$0xff] }
 0x984   : > { %2566 = vmatpush.bf16.msra.mxu3 %v3286_v25 }
 0x985   : > { %v2227_v38 = vpop.permute.xlu0 %2226  ;;  %v2286_v45 = vpack.c.bf16 %v2285_v42, %v2285_v42  ;;  %v3282_v42 = vld [vmem:[#allocation17 + $0x8] sm:$0xff] }
 0x986   : > { %v2232_v39 = vsel %vm1488_vm1, %v2227_v38, 0  ;;  %v3469_v38 = vld [vmem:[%s4515_s22] ss:$0 sm:$0xff] }
 0x987   : > { %2241 = vmatpush.bf16.msra.mxu2 %v2232_v39 }
 0x988   : > { %2567 = vmatpush.bf16.msra.mxu3 %v3285_v26 }
 0x98a   : > { %3108 = vmatmul.msk.bf16.vlgmr.msra.gmra.mxu2 %vm1453_vm0, %v2225_v40 }
 0x98b   : > { %2498 = vmatpush.bf16.msrb.mxu2 %v3280_v7 }
 0x98c   : > { %2568 = vmatpush.bf16.msra.mxu3 %v3284_v29 }
 0x98f   : > { %2499 = vmatpush.bf16.msrb.mxu2 %v3279_v8  ;;  %v3473_v8 = vld [vmem:[#allocation20] ss:$0 sm:$0xff] }
 0x990   : > { %2569 = vmatpush.bf16.msra.mxu3 %v3283_v32 }
 0x992   : > { %v2288_v43 = vpop.permute.xlu1 %2287 }
 0x993   : > { %v2293_v44 = vsel %vm1488_vm1, %v2288_v43, 0  ;;  %2500 = vmatpush.bf16.msrb.mxu2 %v3278_v9  ;;  %v3281_v43 = vld [vmem:[#allocation17] sm:$0xff] }
 0x994   : > { %2302 = vmatpush.bf16.msra.mxu0 %v2293_v44  ;;  %2570 = vmatpush.bf16.msra.mxu3 %v3282_v42 }
 0x997   : > { %3110 = vmatmul.msk.bf16.vlgmr.msra.gmra.mxu0 %vm1453_vm0, %v2286_v45  ;;  %2501 = vmatpush.bf16.msrb.mxu2 %v3277_v10 }
 0x998   : > { %2571 = vmatpush.bf16.msra.mxu3 %v3281_v43 }
 0x99b   : > { %2502 = vmatpush.bf16.msrb.mxu2 %v3276_v11 }
 0x99f   : > { %2503 = vmatpush.bf16.msrb.mxu2 %v3275_v12 }
 0x9a3   : > { %2504 = vmatpush.bf16.msrb.mxu2 %v3274_v14 }
 0x9a7   : > { %2505 = vmatpush.bf16.msrb.mxu2 %v3273_v15 }
 0x9fb   : > { %v2182_v46 = vpop.f32.mrf.mxu0 }
 0x9fc   : > { %2187 = vrot.lane.b32.xlu0 %v2182_v46, %s3957_s19  ;;  %s4516_s19 = sld [smem:[#allocation43_spill]] }
 0xa02   : > { %v3470_v44 = vld [vmem:[%s4516_s19] ss:$0 sm:$0xff] }
 0xa03   : > { %v2184_v47 = vpop.f32.mrf.mxu0 }
 0xa0d   : > { %v2243_v48 = vpop.f32.mrf.mxu2 }
 0xa0e   : > { %2248 = vrot.lane.b32.xlu2 %v2243_v48, %s3958_s11  ;;  %s1165_s11 = scalar_lea.vmem %s4118_s9, %s4345_s18 }
 0xa14   : > { %v2304_v49 = vpop.f32.mrf.mxu0 }
 0xa15   : > { %v2245_v50 = vpop.f32.mrf.mxu2  ;;  %2309 = vrot.lane.b32.xlu0 %v2304_v49, %s3959_s7 }
 0xa16   : > { %v3471_v50 = vld [vmem:[%s4103_s20] ss:$0 sm:$0xff] }
 0xa1c   : > { %v2306_v51 = vpop.f32.mrf.mxu0 }
 0xa68   : > { %v2249_v60 = vpop.permute.xlu2 %2248 }
 0xa6e   : > { %v2188_v59 = vpop.permute.xlu0 %2187 }
 0xa6f   : > { %2190 = vst.msk [vmem:[#allocation2] sm:$0xff] %vm1575_vm3, %v2188_v59 }
 0xa70   : > { %2251 = vst.msk [vmem:[#allocation2] sm:$0xff] %vm1637_vm4, %v2249_v60 }
 0xa87   : > { %v2310_v61 = vpop.permute.xlu0 %2309 }
 0xa88   : > { %2312 = vst.msk [vmem:[#allocation2] sm:$0xff] %vm1699_vm5, %v2310_v61 }
 0xa8f   : > { %v2313_v62 = vld [vmem:[#allocation2] sm:$0xff] }
 0xa90   : > { %v2314_v63 = vpack.c.bf16 %v2313_v62, %v2313_v62 }
 0xa92   : > { %2374 = vmatmul.bf16.vlgmr.msrb.gmra.mxu1 %v2314_v63 }
 0xb0f   : > { %v2375_v2 = vpop.f32.mrf.mxu1 }
 0xb10   : > { %v2376_v3 = vadd.f32 %v3467_v0, %v2375_v2 }
 0xb12   : > { %v2379_v4 = vadd.f32 %v2376_v3, %v4413_v1 }
 0xb14   : > { %2380 = vadd.xlane.f32.xlu0 %v2379_v4  ;;  %v2383_v5 = vmul.f32 %v2379_v4, %v2379_v4 }
 0xb16   : > { %2384 = vadd.xlane.f32.xlu1 %v2383_v5 }
 0xb17   : > { %v2377_v6 = vpop.f32.mrf.mxu1 }
 0xb18   : > { %v3472_v6 = vld [vmem:[#allocation19] ss:$0 sm:$0xff] }
 0xb87   : > { %v2381_v1 = vpop.xlane.xlu0 %2380 }
 0xb88   : > { %v2382_v16 = vmul.f32 0.03125, %v2381_v1 }
 0xb89   : > { %v2385_v17 = vpop.xlane.xlu1 %2384 }
 0xb8a   : > { %v2387_v18 = vmul.f32 %v2382_v16, %v2382_v16  ;;  %v2386_v19 = vmul.f32 0.03125, %v2385_v17  ;;  %v2389_v34 = vsub.f32 %v2379_v4, %v2382_v16 }
 0xb8c   : > { %v2388_v21 = vsub.f32 %v2386_v19, %v2387_v18 }
 0xb8e   : > { %v2390_v24 = vadd.f32 1e-05, %v2388_v21 }
 0xb90   : > { %3508 = vrsqrt.f32 %v2390_v24  ;;  %vm2397_vm10 = vweird.f32 %v2390_v24 }
 0xb96   : > { %v3509_v27 = vpop.eup %3508 }
 0xb97   : > { %v2392_v28 = vmul.f32 %v3509_v27, %v2390_v24  ;;  %vm2398_vm9 = vweird.f32 %v3509_v27 }
 0xb98   : > { %vm2399_vm11 = vmor %vm2397_vm10, %vm2398_vm9 }
 0xb99   : > { %v2393_v30 = vmul.f32 %v3509_v27, %v2392_v28 }
 0xb9b   : > { %v2394_v31 = vmul.f32 0.5, %v2393_v30 }
 0xb9d   : > { %v2395_v13 = vsub.f32 1.5, %v2394_v31 }
 0xb9f   : > { %v2396_v33 = vmul.f32 %v3509_v27, %v2395_v13 }
 0xba1   : > { %v2400_v36 = vsel %vm2399_vm11, %v3509_v27, %v2396_v33 }
 0xba2   : > { %v2401_v37 = vmul.f32 %v2400_v36, %v2389_v34 }
 0xba4   : > { %v2405_v39 = vmul.f32 %v3468_v35, %v2401_v37 }
 0xba6   : > { %v2409_v40 = vadd.f32 %v3469_v38, %v2405_v39 }
 0xba8   : > { %v2446_v22 = vpack.c.bf16 %v2409_v40, %v2409_v40 }
 0xbaa   : > { %2506 = vmatmul.bf16.vlgmr.msrb.gmra.mxu2 %v2446_v22 }
 0xc2d   : > { %v2507_v45 = vpop.f32.mrf.mxu2 }
 0xc2e   : > { %v2508_v46 = vadd.f32 %v3470_v44, %v2507_v45 }
 0xc30   : > { %v2511_v47 = vmax.f32 %v2508_v46, 0.0 }
 0xc32   : > { %v2512_v48 = vpack.c.bf16 %v2511_v47, %v2511_v47 }
 0xc34   : > { %2572 = vmatmul.bf16.vlgmr.msra.gmra.mxu3 %v2512_v48 }
 0xc35   : > { %v2509_v49 = vpop.f32.mrf.mxu2 }
 0xcb7   : > { %v2573_v51 = vpop.f32.mrf.mxu3 }
 0xcb8   : > { %v2574_v52 = vadd.f32 %v3471_v50, %v2573_v51 }
 0xcba   : > { %v2577_v53 = vadd.f32 %v2574_v52, %v2409_v40 }
 0xcbc   : > { %2578 = vadd.xlane.f32.xlu2 %v2577_v53  ;;  %v2581_v54 = vmul.f32 %v2577_v53, %v2577_v53 }
 0xcbe   : > { %2582 = vadd.xlane.f32.xlu0 %v2581_v54 }
 0xcbf   : > { %v2575_v55 = vpop.f32.mrf.mxu3 }
 0xd2f   : > { %v2579_v56 = vpop.xlane.xlu2 %2578 }
 0xd30   : > { %v2580_v57 = vmul.f32 0.03125, %v2579_v56 }
 0xd31   : > { %v2583_v58 = vpop.xlane.xlu0 %2582 }
 0xd32   : > { %v2585_v41 = vmul.f32 %v2580_v57, %v2580_v57  ;;  %v2584_v59 = vmul.f32 0.03125, %v2583_v58  ;;  %v2587_v5 = vsub.f32 %v2577_v53, %v2580_v57 }
 0xd34   : > { %v2586_v60 = vsub.f32 %v2584_v59, %v2585_v41 }
 0xd36   : > { %v2588_v61 = vadd.f32 1e-05, %v2586_v60 }
 0xd38   : > { %3510 = vrsqrt.f32 %v2588_v61  ;;  %vm2595_vm13 = vweird.f32 %v2588_v61 }
 0xd3e   : > { %v3511_v62 = vpop.eup %3510 }
 0xd3f   : > { %v2590_v63 = vmul.f32 %v3511_v62, %v2588_v61  ;;  %vm2596_vm12 = vweird.f32 %v3511_v62 }
 0xd40   : > { %vm2597_vm14 = vmor %vm2595_vm13, %vm2596_vm12 }
 0xd41   : > { %v2591_v0 = vmul.f32 %v3511_v62, %v2590_v63 }
 0xd43   : > { %v2592_v2 = vmul.f32 0.5, %v2591_v0 }
 0xd45   : > { %v2593_v3 = vsub.f32 1.5, %v2592_v2 }
 0xd47   : > { %v2594_v4 = vmul.f32 %v3511_v62, %v2593_v3 }
 0xd49   : > { %v2598_v7 = vsel %vm2597_vm14, %v3511_v62, %v2594_v4 }
 0xd4a   : > { %v2599_v9 = vmul.f32 %v2598_v7, %v2587_v5 }
 0xd4c   : > { %v2603_v10 = vmul.f32 %v3472_v6, %v2599_v9 }
 0xd4e   : > { %v2607_v11 = vadd.f32 %v3473_v8, %v2603_v10 }
 0xd50   : > { %2608 = vst [vmem:[%s1165_s11] sm:$0xff] %v2607_v11 }
 0xd51 PF: > { %s4517_s7 = sld [smem:[#allocation44_spill]] }
 0xd57   : > { %s78_s15 = sadd.s32 1, %s4517_s7  }
 0xd58   : > { %p75_p2 = scmp.ge.s32.totalorder %s78_s15, 4  }
 0xd5a   :  { %77 = sbr.rel (!%p75_p2) target bundleno = 56 (0x38), region = 258 }
 0xd5f   :  { %2628 = vsyncpa [#allocation4], 1 }
 0xd60   :  { %2630 = vsyncpa [#allocation4 + $0x1], 1 }
 0xd61   :  { %2631 = vsyncpa [#allocation6], 1 }
 0xd62   :  { %2632 = vsyncpa [#allocation9], 1 }
 0xd63   :  { %2633 = vsyncpa [#allocation12], 1 }
 0xd64   :  { %2634 = vsyncpa [#allocation15], 1 }
 0xd65   :  { %2635 = vsyncpa [#allocation18], 1 }
 0xd66   :  { %2636 = vsyncpa [#allocation21], 1 }

// kernel: transformer_forward.9
= control target key start
LH: loop header
LB: loop body
LE: loop exit
PB: predicated region body
PF: predicated region fallthrough
CT: control target
= control target key end

     0   :  { %8 = vsyncpa [#allocation3], 0  ;;  %s678_s0 = inlined_call_operand.vmem [shape: f32[16,128], index: 0, kind: input, shape index: {}]   ;;  %s679_s1 = inlined_call_operand.hbm [shape: bf16[128,128], index: 1, kind: input, shape index: {}]   ;;  %s680_s2 = inlined_call_operand.vmem [shape: f32[1,128], index: 2, kind: input, shape index: {}]   ;;  %s681_s3 = inlined_call_operand.hbm [shape: f32[16,128], index: 3, kind: output, shape index: {}]  }
   0x1   :  { %9 = vsyncpa [#allocation4], 0 }
   0x2   :  { %11 = vsyncpa [#allocation4 + $0x1], 0  ;;  %s580_s12 = smov 0   ;;  %s582_s13 = smov 0  }
   0x3   :  { %s584_s14 = smov 0   ;;  %s586_s15 = smov 0  }
   0x4 LB: > { %s601_s16 = sadd.s32 4294967295, %s555_s15   ;;  %s354_s17 = sadd.s32 4294967294, %s555_s15   ;;  %s555_s15 = sphi %s586_s15, %s687_s15   ;;  %s551_s14 = sphi %s584_s14, %s686_s14   ;;  %s547_s13 = sphi %s582_s13, %s685_s13   ;;  %s543_s12 = sphi %s580_s12, %s684_s12  }
   0x5   : > { %s605_s18 = sadd.s32 1, %s555_s15   ;;  %s92_s19 = sadd.s32 1, %s551_s14 }
   0x6   : > { %s89_s20 = ssub.s32 %s555_s15, %s605_s18  ;;  %p102_p0 = scmp.ne.s32.totalorder %s551_s14, %s547_s13 }
   0x7   : > { %p90_p1 = scmp.eq.s32.totalorder %s89_s20, 0  ;;  %p103_p2 = scmp.eq.s32.totalorder %s601_s16, 1 }
   0x8   : > { %p108_p3 = scmp.ne.s32.totalorder %s547_s13, %s543_s12  ;;  %p109_p4 = scmp.eq.s32.totalorder %s354_s17, 1 }
   0x9   : > { %s616_s21 = scalar_select %p90_p1, %s551_s14, %s92_s19  }
   0xa   : > { %p618_p5 = por %p103_p2, %p102_p0  ;;  %p622_p6 = por %p109_p4, %p108_p3 }
   0xb   : > { %p355_p7 = scmp.ge.s32.totalorder %s555_s15, 1  ;;  %p116_p8 = scmp.lt.s32.totalorder %s555_s15, 3 }
   0xc   : > { %p420_p9 = scmp.eq.s32.totalorder %s601_s16, 0  ;;  %s127_s26 = sshll.u32 %s679_s1, 4  ;;  %s128_s26 = int_to_ptr.hbm [resolvable:$true] %s127_s26 }
   0xd   : > { %p117_p10 = pnand %p355_p7, %p116_p8  ;;  %s557_s27 = smov [#allocation2]  }
   0xe   : > { %s129_s28 = sshll.u32 %s557_s27, 4  ;;  %s558_s29 = smov 64   ;;  %s130_s28 = int_to_ptr.vmem [resolvable:$true] %s129_s28 }
   0xf   : > { %p412_p11 = pneg %p117_p10  ;;  %s559_s30 = smov 4  }
  0x10   : > { %155 = sbr.rel (%p117_p10) target bundleno = 188 (0xbc), region = 32 }
  0x11   : > { %p413_p12 = pnand %p420_p9, %p412_p11 }
  0x13   : > { %415 = dma.hbm_to_vmem [thread:$0]  (!%p413_p12), %s128_s26, 1024, %s130_s28, [#allocation3], %s558_s29, %s558_s29, %s559_s30  }
  0x15   : > { %534 = dma.done.wait (%p420_p9), [#allocation3], 1024  }
  0x16   : > { %536 = vsyncadd (%p420_p9), [#allocation3], 4294966272  ;;  %v405_v0 = vld [vmem:[#allocation2 + $0x38] sm:$0xff]  ;;  %v404_v1 = vld [vmem:[#allocation2 + $0x30] sm:$0xff]  ;;  %p179_p13 = scmp.lt.s32.totalorder %s601_s16, 1  ;;  %s176_s9 = sand.u32 1, %s547_s13  }
  0x17   : > { %253 = vmatpush.bf16.msra.mxu0 %v405_v0  ;;  %v403_v2 = vld [vmem:[#allocation2 + $0x28] sm:$0xff]  ;;  %v402_v3 = vld [vmem:[#allocation2 + $0x20] sm:$0xff]  ;;  %v401_v4 = vld [vmem:[#allocation2 + $0x18] sm:$0xff]  ;;  %s395_s10 = sshll.u32 %s601_s16, 3  ;;  %s360_s11 = sshll.u32 %s176_s9, 3 }
  0x18   : > { %s180_s4 = scalar_select %p179_p13, %s601_s16, 1  ;;  %v400_v5 = vld [vmem:[#allocation2 + $0x10] sm:$0xff]  ;;  %v399_v6 = vld [vmem:[#allocation2 + $0x8] sm:$0xff]  ;;  %v398_v7 = vld [vmem:[#allocation2] sm:$0xff] }
  0x19   : > { %s278_s20 = scalar_lea.hbm %s681_s3, %s395_s10  ;;  %v458_v10 = vld [vmem:[%s680_s2] ss:$0 sm:$0xff]  ;;  %s178_s26 = scalar_lea.vmem [#allocation5], %s360_s11 }
  0x1a   : > { %s361_s5 = sshll.u32 %s180_s4, 3  ;;  %s280_s27 = sshll.u32 %s178_s26, 4  ;;  %s281_s27 = int_to_ptr.vmem [resolvable:$true] %s280_s27 }
  0x1b   : > { %254 = vmatpush.bf16.msra.mxu0 %v404_v1  ;;  %s182_s8 = scalar_lea.vmem %s678_s0, %s361_s5  ;;  %s282_s28 = sshll.u32 %s278_s20, 4  ;;  %s283_s28 = int_to_ptr.hbm [resolvable:$true] %s282_s28 }
  0x1c   : > { %v183_v8 = vld [vmem:[%s182_s8] sm:$0xff]  ;;  %s268_s29 = scalar_lea.sflag [#allocation4], %s176_s9  ;;  %s503_s16 = sshra.s32 %s283_s28, 4  ;;  %s504_s16 = int_to_ptr.hbm [resolvable:$true] %s503_s16 }
  0x1d   : > { %v184_v9 = vpack.c.bf16 %v183_v8, %v183_v8  ;;  %s505_s30 = scalar_lea.hbm %s504_s16, 8  ;;  %s509_s6 = scalar_lea.hbm %s681_s3, 16 }
  0x1e   : > { %p506_p0 = scmp.ne.s32.totalorder %s504_s16, %s505_s30  ;;  %p510_p3 = scmp.lt.s32.totalorder %s504_s16, %s681_s3 }
  0x1f   : > { %255 = vmatpush.bf16.msra.mxu0 %v403_v2  ;;  %p511_p4 = scmp.lt.s32.totalorder %s509_s6, %s505_s30 }
  0x20   : > { %p507_p1 = pnand %p506_p0, %p618_p5 }
  0x21   : > { %p512_p7 = por %p511_p4, %p510_p3 }
  0x22   : > { %p508_p2 = pneg %p507_p1 }
  0x23   : > { %256 = vmatpush.bf16.msra.mxu0 %v402_v3 }
  0x24   : > { %p513_p8 = pnand %p512_p7, %p508_p2 }
  0x27   : > { %257 = vmatpush.bf16.msra.mxu0 %v401_v4 }
  0x2b   : > { %258 = vmatpush.bf16.msra.mxu0 %v400_v5 }
  0x2f   : > { %259 = vmatpush.bf16.msra.mxu0 %v399_v6 }
  0x33   : > { %260 = vmatpush.bf16.msra.mxu0 %v398_v7 }
  0x36   : > { %261 = vmatmul.bf16.vlgmr.msra.gmra.mxu0 %v184_v9 }
  0xb3   : > { %v262_v11 = vpop.f32.mrf.mxu0 }
  0xb4   : > { %v263_v12 = vadd.f32 %v458_v10, %v262_v11 }
  0xb6   : > { %266 = vst [vmem:[%s178_s26] sm:$0xff] %v263_v12 }
  0xb7   : > { %516 = shalt.err (!%p513_p8)
}
  0xb8   : > { %410 = dma.vmem_to_hbm [thread:$0]  (%p618_p5), %s281_s27, 128, %s283_s28, %s268_s29  }
  0xbb   : > { %v264_v13 = vpop.f32.mrf.mxu0 }
  0xbc PF: > { %p422_p9 = scmp.ge.s32.totalorder %s555_s15, 2  ;;  %s294_s9 = sand.u32 1, %s543_s12  }
  0xbd   : > { %s295_s10 = scalar_lea.sflag [#allocation4], %s294_s9 }
  0xbe   : > { %p417_p10 = pnand %p422_p9, %p622_p6 }
  0xc0   : > { %p418_p11 = pneg %p417_p10 }
  0xc2   : > { %538 = dma.done.wait (%p418_p11), %s295_s10, 128  }
  0xc3   : > { %540 = vsyncadd (%p418_p11), %s295_s10, 4294967168  ;;  %p14_p12 = scmp.ge.s32.totalorder %s605_s18, 4   ;;  %s684_s12 = smov %s547_s13 }
  0xc4   : > { %s685_s13 = smov %s551_s14  ;;  %s686_s14 = smov %s616_s21 }
  0xc5   : > { %s687_s15 = smov %s605_s18  ;;  %16 = sbr.rel (!%p14_p12) target bundleno = 4 (0x4), region = 72 }
  0xca   :  { %301 = vsyncpa [#allocation3], 1 }
  0xcb   :  { %303 = vsyncpa [#allocation3 + $0x1], 1 }
  0xcc   :  { %304 = vsyncpa [#allocation4], 1 }
  0xcd   :  { %306 = vsyncpa [#allocation4 + $0x1], 1 }

</bundles_post_ra>
